<compile_context>
chip_gen: v7x
topology: tpu7x:2x2x1
jax: 0.10.0
libtpu: 0.0.40
codegen_flags: <defaults>
</compile_context>

<pallas_src>
import jax
import jax.numpy as jnp
from jax.experimental import pallas as pl
from jax.experimental.pallas import tpu as pltpu

D_IN, D_HID, D_OUT = 512, 2048, 10
N_PAD = 128  # lane-padded output width (dense 128-lane stores instead of vst.msk)


def _round_up(n, m):
    return (n + m - 1) // m * m


def _tensorcores_per_chip():
    """Best-effort: 2 on v7x (two TCs per chip), else 1."""
    try:
        kind = jax.devices()[0].device_kind.lower()
    except Exception:
        return 1
    return 2 if "v7" in kind else 1


def predictor_kernel(x_ref, w2_ref, b2_ref, w3_ref, b3_ref, out_ref):
    # (TB,512)bf16 @ (512,2048)bf16 -> f32 accumulate on the MXU.
    h = jnp.dot(x_ref[...], w2_ref[...], preferred_element_type=jnp.float32)
    # Eval-mode BN is pre-folded into w2/b2: single bias add + ReLU in f32 (VPU).
    h = jnp.maximum(h + b2_ref[...], 0.0)
    # (TB,2048)bf16 @ (2048,128)bf16 -> f32; lane-dense 128-wide output store.
    out = jnp.dot(h.astype(jnp.bfloat16), w3_ref[...],
                  preferred_element_type=jnp.float32)
    out_ref[...] = out + b3_ref[...]


def fold_and_pad(params):
    """One-time preprocessing (call at init, reuse across forwards):
    fold eval-mode BN into fc2, cast weights to bf16, lane-pad fc3 to 128."""
    eps = 1e-5
    inv_std = 1.0 / jnp.sqrt(params["bn_var"] + eps)
    scale = params["bn_gamma"] * inv_std                       # (2048,)
    shift = params["bn_beta"] - params["bn_mean"] * scale      # (2048,)
    w2p = (params["w2"] * scale[None, :]).astype(jnp.bfloat16)                 # (512,2048)
    b2p = (params["b2"] * scale[None, :] + shift[None, :]).astype(jnp.float32)  # (1,2048)
    w3p = jnp.zeros((D_HID, N_PAD), jnp.float32).at[:, :D_OUT].set(params["w3"])
    w3p = w3p.astype(jnp.bfloat16)                                              # (2048,128)
    b3p = jnp.zeros((1, N_PAD), jnp.float32).at[:, :D_OUT].set(params["b3"])    # (1,128)
    return (w2p, b2p, w3p, b3p)


def _const_spec(shape, single_buffer):
    """BlockSpec for a weight/bias whose block never changes across the grid."""
    if single_buffer:
        return pl.BlockSpec(shape, lambda i: (0, 0), pipeline_mode=pl.Buffered(1))
    return pl.BlockSpec(shape, lambda i: (0, 0))


def _call_kernel(x_p, w2p, b2p, w3p, b3p, *, TB, B_pad, single_buffer):
    return pl.pallas_call(
        predictor_kernel,
        out_shape=jax.ShapeDtypeStruct((B_pad, N_PAD), jnp.float32),
        grid=(B_pad // TB,),
        in_specs=[
            pl.BlockSpec((TB, D_IN), lambda i: (i, 0)),     # x tile (per batch step)
            _const_spec((D_IN, D_HID), single_buffer),      # W2' (BN folded, bf16)
            _const_spec((1, D_HID), single_buffer),         # b2' (folded BN bias, f32)
            _const_spec((D_HID, N_PAD), single_buffer),     # W3 (lane-padded, bf16)
            _const_spec((1, N_PAD), single_buffer),         # b3 (lane-padded, f32)
        ],
        out_specs=pl.BlockSpec((TB, N_PAD), lambda i: (i, 0)),
        compiler_params=pltpu.CompilerParams(
            dimension_semantics=("parallel",),   # independent batch tiles -> megacore
            vmem_limit_bytes=48 << 20,           # ~13 MiB resident at TB=512 (bf16)
        ),
    )(x_p, w2p, b2p, w3p, b3p)


def predictor_forward(x, folded, *, tb_max=512):
    """x: (B, 512) float32, folded = fold_and_pad(params). Returns (B, 10) f32."""
    w2p, b2p, w3p, b3p = folded
    B = x.shape[0]

    # Batch tile: multiple of 16 (bf16 sublane packing), capped at tb_max.
    TB = min(tb_max, _round_up(B, 16))
    # On v7x keep >= 2 grid steps so ("parallel",) shards across both TCs.
    ncores = _tensorcores_per_chip()
    if ncores > 1 and B > 16:
        TB = min(TB, _round_up(-(-B // ncores), 16))
    B_pad = _round_up(B, TB)

    # Cast once; pad only when needed (padded rows are sliced off below).
    x_b = x.astype(jnp.bfloat16)
    if B_pad != B:
        x_b = jnp.pad(x_b, ((0, B_pad - B), (0, 0)))

    try:
        out = _call_kernel(x_b, w2p, b2p, w3p, b3p,
                           TB=TB, B_pad=B_pad, single_buffer=True)
    except Exception:
        # Fallback for jax versions where Buffered(1) on a constant block is
        # rejected; identical semantics, just one extra weight buffer in VMEM.
        out = _call_kernel(x_b, w2p, b2p, w3p, b3p,
                           TB=TB, B_pad=B_pad, single_buffer=False)
    return out[:B, :D_OUT]


def init_params(key):
    """Deterministic synthetic parameters matching the module's shapes."""
    k1, k2, k3, k4, k5, k6, k7 = jax.random.split(key, 7)
    params = {
        # nn.Linear(512, 2048): weight (2048,512) -> stored transposed (512,2048)
        "w2": jax.random.normal(k1, (D_IN, D_HID), jnp.float32) * 0.02,
        "b2": jax.random.normal(k2, (1, D_HID), jnp.float32) * 0.01,
        # nn.BatchNorm1d(2048) running stats + affine params
        "bn_gamma": 1.0 + 0.1 * jax.random.normal(k3, (D_HID,), jnp.float32),
        "bn_beta": 0.1 * jax.random.normal(k4, (D_HID,), jnp.float32),
        "bn_mean": 0.05 * jax.random.normal(k5, (D_HID,), jnp.float32),
        "bn_var": jnp.abs(jax.random.normal(k6, (D_HID,), jnp.float32)) + 0.5,
        # nn.Linear(2048, 10): weight (10,2048) -> stored transposed (2048,10)
        "w3": jax.random.normal(k7, (D_HID, D_OUT), jnp.float32) * 0.02,
        "b3": jnp.linspace(-0.1, 0.1, D_OUT, dtype=jnp.float32).reshape(1, D_OUT),
    }
    return params


def reference_forward_f32(x, params):
    """Pure-JAX f32 reference (same eval-mode BN semantics, no bf16)."""
    eps = 1e-5
    hp = jax.lax.Precision.HIGHEST
    h = jnp.dot(x, params["w2"], precision=hp) + params["b2"]
    h = (h - params["bn_mean"]) / jnp.sqrt(params["bn_var"] + eps)
    h = h * params["bn_gamma"] + params["bn_beta"]
    h = jnp.maximum(h, 0.0)
    return jnp.dot(h, params["w3"], precision=hp) + params["b3"]


def reference_forward_bf16(x, w2p, b2p, w3p, b3p):
    """Reference mirroring the kernel's bf16 casts exactly (folded params)."""
    hp = jax.lax.Precision.HIGHEST
    f32 = jnp.float32
    xb = x.astype(jnp.bfloat16).astype(f32)
    h = jnp.dot(xb, w2p.astype(f32), precision=hp) + b2p
    h = jnp.maximum(h, 0.0)
    hb = h.astype(jnp.bfloat16).astype(f32)
    out = jnp.dot(hb, w3p.astype(f32), precision=hp) + b3p
    return out[:, :D_OUT]


if __name__ == "__main__":
    key = jax.random.PRNGKey(0)
    kx, kp = jax.random.split(key)
    params = init_params(kp)

    # One-time preprocessing: folded/cast/padded weights are cached and reused.
    folded = fold_and_pad(params)

    for B in (8, 40):  # single-tile path and the padded/ multi-core tiling path
        x = jax.random.normal(jax.random.fold_in(kx, B), (B, D_IN), jnp.float32)
        out = jax.block_until_ready(predictor_forward(x, folded))
        assert out.shape == (B, D_OUT), out.shape

        # Tight check against a reference with identical bf16 rounding.
        ref_b = reference_forward_bf16(x, *folded)
        assert jnp.allclose(out, ref_b, atol=1e-3, rtol=1e-3), (
            B, float(jnp.max(jnp.abs(out - ref_b))))

        # Loose semantic check against the full-f32 module math (bf16 weight error).
        ref_f = reference_forward_f32(x, params)
        assert jnp.allclose(out, ref_f, atol=3e-2, rtol=3e-2), (
            B, float(jnp.max(jnp.abs(out - ref_f))))

    print("KERNEL_OK")
</pallas_src>

<mosaic_0001>
module attributes {stable_mosaic.version = 11 : i64} {
  func.func @predictor_kernel(%arg0: i32, %arg1: memref<16x512xbf16, #tpu.memory_space<vmem>>, %arg2: memref<512x2048xbf16, #tpu.memory_space<vmem>>, %arg3: memref<1x2048xf32, #tpu.memory_space<vmem>>, %arg4: memref<2048x128xbf16, #tpu.memory_space<vmem>>, %arg5: memref<1x128xf32, #tpu.memory_space<vmem>>, %arg6: memref<16x128xf32, #tpu.memory_space<vmem>>) attributes {dimension_semantics = [#tpu.dimension_semantics<parallel>], iteration_bounds = array<i64: 1>, scalar_prefetch = 0 : i64, scratch_operands = 0 : i64, tpu.core_type = #tpu.core_type<tc>, window_params = [{transform_indices = @transform_0, window_bounds = array<i64: 16, 512>}, {pipeline_mode = #tpu.pipeline_mode<synchronous>, transform_indices = @transform_1, window_bounds = array<i64: 512, 2048>}, {pipeline_mode = #tpu.pipeline_mode<synchronous>, transform_indices = @transform_2, window_bounds = array<i64: 1, 2048>}, {pipeline_mode = #tpu.pipeline_mode<synchronous>, transform_indices = @transform_3, window_bounds = array<i64: 2048, 128>}, {pipeline_mode = #tpu.pipeline_mode<synchronous>, transform_indices = @transform_4, window_bounds = array<i64: 1, 128>}, {transform_indices = @transform_5, window_bounds = array<i64: 16, 128>}]} {
    %c0 = arith.constant 0 : index
    %c0_0 = arith.constant 0 : index
    %0 = vector.load %arg1[%c0, %c0_0] : memref<16x512xbf16, #tpu.memory_space<vmem>>, vector<16x512xbf16>
    %c0_1 = arith.constant 0 : index
    %c0_2 = arith.constant 0 : index
    %1 = vector.load %arg2[%c0_1, %c0_2] : memref<512x2048xbf16, #tpu.memory_space<vmem>>, vector<512x2048xbf16>
    %cst = arith.constant dense<0.000000e+00> : vector<16x2048xf32>
    %2 = tpu.matmul %0, %1, %cst {dimension_numbers = #tpu.dot_dimension_numbers<[1], [0], [0], [1], [0, 0, 1, 1], [], []>} : vector<16x512xbf16>, vector<512x2048xbf16>, vector<16x2048xf32> -> vector<16x2048xf32>
    %c0_3 = arith.constant 0 : index
    %c0_4 = arith.constant 0 : index
    %3 = vector.load %arg3[%c0_3, %c0_4] : memref<1x2048xf32, #tpu.memory_space<vmem>>, vector<1x2048xf32>
    %4 = vector.broadcast %3 : vector<1x2048xf32> to vector<16x2048xf32>
    %5 = arith.addf %2, %4 : vector<16x2048xf32>
    %cst_5 = arith.constant 0.000000e+00 : f32
    %6 = vector.broadcast %cst_5 : f32 to vector<16x2048xf32>
    %7 = arith.maximumf %5, %6 : vector<16x2048xf32>
    %8 = arith.truncf %7 : vector<16x2048xf32> to vector<16x2048xbf16>
    %c0_6 = arith.constant 0 : index
    %c0_7 = arith.constant 0 : index
    %9 = vector.load %arg4[%c0_6, %c0_7] : memref<2048x128xbf16, #tpu.memory_space<vmem>>, vector<2048x128xbf16>
    %cst_8 = arith.constant dense<0.000000e+00> : vector<16x128xf32>
    %10 = tpu.matmul %8, %9, %cst_8 {dimension_numbers = #tpu.dot_dimension_numbers<[1], [0], [0], [1], [0, 0, 1, 1], [], []>} : vector<16x2048xbf16>, vector<2048x128xbf16>, vector<16x128xf32> -> vector<16x128xf32>
    %c0_9 = arith.constant 0 : index
    %c0_10 = arith.constant 0 : index
    %11 = vector.load %arg5[%c0_9, %c0_10] : memref<1x128xf32, #tpu.memory_space<vmem>>, vector<1x128xf32>
    %12 = vector.broadcast %11 : vector<1x128xf32> to vector<16x128xf32>
    %13 = arith.addf %10, %12 : vector<16x128xf32>
    %c0_11 = arith.constant 0 : index
    %c0_12 = arith.constant 0 : index
    %14 = vector.load %arg6[%c0_11, %c0_12] : memref<16x128xf32, #tpu.memory_space<vmem>>, vector<16x128xf32>
    tpu.vector_store %arg6[%c0_11, %c0_12], %13 {strides = array<i32>} : memref<16x128xf32, #tpu.memory_space<vmem>>, vector<16x128xf32>,
    return
  }
  func.func @transform_0(%arg0: i32) -> (i32, i32) {
    %c0_i32 = arith.constant 0 : i32
    %c0_i32_0 = arith.constant 0 : i32
    return %arg0, %c0_i32 : i32, i32
  }
  func.func @transform_1(%arg0: i32) -> (i32, i32) {
    %c0_i32 = arith.constant 0 : i32
    %c0_i32_0 = arith.constant 0 : i32
    %c0_i32_1 = arith.constant 0 : i32
    return %c0_i32, %c0_i32_0 : i32, i32
  }
  func.func @transform_2(%arg0: i32) -> (i32, i32) {
    %c0_i32 = arith.constant 0 : i32
    %c0_i32_0 = arith.constant 0 : i32
    %c0_i32_1 = arith.constant 0 : i32
    return %c0_i32, %c0_i32_0 : i32, i32
  }
  func.func @transform_3(%arg0: i32) -> (i32, i32) {
    %c0_i32 = arith.constant 0 : i32
    %c0_i32_0 = arith.constant 0 : i32
    %c0_i32_1 = arith.constant 0 : i32
    return %c0_i32, %c0_i32_0 : i32, i32
  }
  func.func @transform_4(%arg0: i32) -> (i32, i32) {
    %c0_i32 = arith.constant 0 : i32
    %c0_i32_0 = arith.constant 0 : i32
    %c0_i32_1 = arith.constant 0 : i32
    return %c0_i32, %c0_i32_0 : i32, i32
  }
  func.func @transform_5(%arg0: i32) -> (i32, i32) {
    %c0_i32 = arith.constant 0 : i32
    %c0_i32_0 = arith.constant 0 : i32
    return %arg0, %c0_i32 : i32, i32
  }
}

module attributes {stable_mosaic.version = 11 : i64} {
  func.func @predictor_kernel(%arg0: i32, %arg1: memref<16x512xbf16, #tpu.memory_space<vmem>>, %arg2: memref<512x2048xbf16, #tpu.memory_space<vmem>>, %arg3: memref<1x2048xf32, #tpu.memory_space<vmem>>, %arg4: memref<2048x128xbf16, #tpu.memory_space<vmem>>, %arg5: memref<1x128xf32, #tpu.memory_space<vmem>>, %arg6: memref<16x128xf32, #tpu.memory_space<vmem>>) attributes {dimension_semantics = [#tpu.dimension_semantics<parallel>], iteration_bounds = array<i64: 1>, scalar_prefetch = 0 : i64, scratch_operands = 0 : i64, tpu.core_type = #tpu.core_type<tc>, window_params = [{transform_indices = @transform_0, window_bounds = array<i64: 16, 512>}, {pipeline_mode = #tpu.pipeline_mode<synchronous>, transform_indices = @transform_1, window_bounds = array<i64: 512, 2048>}, {pipeline_mode = #tpu.pipeline_mode<synchronous>, transform_indices = @transform_2, window_bounds = array<i64: 1, 2048>}, {pipeline_mode = #tpu.pipeline_mode<synchronous>, transform_indices = @transform_3, window_bounds = array<i64: 2048, 128>}, {pipeline_mode = #tpu.pipeline_mode<synchronous>, transform_indices = @transform_4, window_bounds = array<i64: 1, 128>}, {transform_indices = @transform_5, window_bounds = array<i64: 16, 128>}]} {
    %c0 = arith.constant 0 : index
    %c0_0 = arith.constant 0 : index
    %0 = vector.load %arg1[%c0, %c0_0] : memref<16x512xbf16, #tpu.memory_space<vmem>>, vector<16x512xbf16>
    %c0_1 = arith.constant 0 : index
    %c0_2 = arith.constant 0 : index
    %1 = vector.load %arg2[%c0_1, %c0_2] : memref<512x2048xbf16, #tpu.memory_space<vmem>>, vector<512x2048xbf16>
    %cst = arith.constant dense<0.000000e+00> : vector<16x2048xf32>
    %2 = tpu.matmul %0, %1, %cst {dimension_numbers = #tpu.dot_dimension_numbers<[1], [0], [0], [1], [0, 0, 1, 1], [], []>} : vector<16x512xbf16>, vector<512x2048xbf16>, vector<16x2048xf32> -> vector<16x2048xf32>
    %c0_3 = arith.constant 0 : index
    %c0_4 = arith.constant 0 : index
    %3 = vector.load %arg3[%c0_3, %c0_4] : memref<1x2048xf32, #tpu.memory_space<vmem>>, vector<1x2048xf32>
    %4 = vector.broadcast %3 : vector<1x2048xf32> to vector<16x2048xf32>
    %5 = arith.addf %2, %4 : vector<16x2048xf32>
    %cst_5 = arith.constant 0.000000e+00 : f32
    %6 = vector.broadcast %cst_5 : f32 to vector<16x2048xf32>
    %7 = arith.maximumf %5, %6 : vector<16x2048xf32>
    %8 = arith.truncf %7 : vector<16x2048xf32> to vector<16x2048xbf16>
    %c0_6 = arith.constant 0 : index
    %c0_7 = arith.constant 0 : index
    %9 = vector.load %arg4[%c0_6, %c0_7] : memref<2048x128xbf16, #tpu.memory_space<vmem>>, vector<2048x128xbf16>
    %cst_8 = arith.constant dense<0.000000e+00> : vector<16x128xf32>
    %10 = tpu.matmul %8, %9, %cst_8 {dimension_numbers = #tpu.dot_dimension_numbers<[1], [0], [0], [1], [0, 0, 1, 1], [], []>} : vector<16x2048xbf16>, vector<2048x128xbf16>, vector<16x128xf32> -> vector<16x128xf32>
    %c0_9 = arith.constant 0 : index
    %c0_10 = arith.constant 0 : index
    %11 = vector.load %arg5[%c0_9, %c0_10] : memref<1x128xf32, #tpu.memory_space<vmem>>, vector<1x128xf32>
    %12 = vector.broadcast %11 : vector<1x128xf32> to vector<16x128xf32>
    %13 = arith.addf %10, %12 : vector<16x128xf32>
    %c0_11 = arith.constant 0 : index
    %c0_12 = arith.constant 0 : index
    %14 = vector.load %arg6[%c0_11, %c0_12] : memref<16x128xf32, #tpu.memory_space<vmem>>, vector<16x128xf32>
    tpu.vector_store %arg6[%c0_11, %c0_12], %13 {strides = array<i32>} : memref<16x128xf32, #tpu.memory_space<vmem>>, vector<16x128xf32>,
    return
  }
  func.func @transform_0(%arg0: i32) -> (i32, i32) {
    %c0_i32 = arith.constant 0 : i32
    %c0_i32_0 = arith.constant 0 : i32
    return %arg0, %c0_i32 : i32, i32
  }
  func.func @transform_1(%arg0: i32) -> (i32, i32) {
    %c0_i32 = arith.constant 0 : i32
    %c0_i32_0 = arith.constant 0 : i32
    %c0_i32_1 = arith.constant 0 : i32
    return %c0_i32, %c0_i32_0 : i32, i32
  }
  func.func @transform_2(%arg0: i32) -> (i32, i32) {
    %c0_i32 = arith.constant 0 : i32
    %c0_i32_0 = arith.constant 0 : i32
    %c0_i32_1 = arith.constant 0 : i32
    return %c0_i32, %c0_i32_0 : i32, i32
  }
  func.func @transform_3(%arg0: i32) -> (i32, i32) {
    %c0_i32 = arith.constant 0 : i32
    %c0_i32_0 = arith.constant 0 : i32
    %c0_i32_1 = arith.constant 0 : i32
    return %c0_i32, %c0_i32_0 : i32, i32
  }
  func.func @transform_4(%arg0: i32) -> (i32, i32) {
    %c0_i32 = arith.constant 0 : i32
    %c0_i32_0 = arith.constant 0 : i32
    %c0_i32_1 = arith.constant 0 : i32
    return %c0_i32, %c0_i32_0 : i32, i32
  }
  func.func @transform_5(%arg0: i32) -> (i32, i32) {
    %c0_i32 = arith.constant 0 : i32
    %c0_i32_0 = arith.constant 0 : i32
    return %arg0, %c0_i32 : i32, i32
  }
}

</mosaic_0001>

<bundles_post_ra>
// kernel: tpu_custom_call.1
= control target key start
LH: loop header
LB: loop body
LE: loop exit
PB: predicated region body
PF: predicated region fallthrough
CT: control target
= control target key end

     0   :  { %10 = vsyncpa [#allocation3], 0  ;;  %s6792_s0 = inlined_call_operand.hbm [shape: bf16[16,512], index: 0, kind: input, shape index: {}]   ;;  %s6793_s1 = inlined_call_operand.hbm [shape: bf16[512,2048], index: 1, kind: input, shape index: {}]   ;;  %s6794_s2 = inlined_call_operand.hbm [shape: f32[1,2048], index: 2, kind: input, shape index: {}]   ;;  %s6795_s3 = inlined_call_operand.hbm [shape: bf16[2048,128], index: 3, kind: input, shape index: {}]   ;;  %s6796_s4 = inlined_call_operand.hbm [shape: f32[1,128], index: 4, kind: input, shape index: {}]   ;;  %s6797_s5 = inlined_call_operand.hbm [shape: f32[16,128], index: 5, kind: output, shape index: {}]  }
   0x1   :  { %11 = vsyncpa [#allocation6], 0 }
   0x2   :  { %12 = vsyncpa [#allocation9], 0 }
   0x3   :  { %13 = vsyncpa [#allocation4], 0  ;;  %s6561_s18 = smov [#allocation5]   ;;  %s6421_s22 = scalar_lea.hbm %s6793_s1, 65536 }
   0x4   :  { %s31_s19 = sshll.u32 %s6561_s18, 4  ;;  %p6422_p0 = scmp.ne.s32.totalorder %s6793_s1, %s6421_s22  ;;  %s32_s19 = int_to_ptr.vmem [resolvable:$true] %s31_s19 }
   0x5   :  { %p6425_p1 = scmp.lt.u32.totalorder %s6421_s22, %s6793_s1 }
   0x7   :  { %p6427_p2 = pnand %p6425_p1, %p6422_p0 }
   0x9   :  { %6430 = shalt.err (!%p6427_p2)
}
   0xa   :  { %s6431_s27 = scalar_lea.vmem %s32_s19, 65536  ;;  %p6436_p4 = scmp.lt.s32.totalorder %s32_s19, %s32_s19 }
   0xb   :  { %p6432_p3 = scmp.ne.s32.totalorder %s32_s19, %s6431_s27  ;;  %p6437_p5 = scmp.lt.s32.totalorder %s6431_s27, %s6431_s27 }
   0xd   :  { %p6438_p6 = por %p6437_p5, %p6436_p4 }
   0xf   :  { %p6439_p7 = pnand %p6438_p6, %p6432_p3 }
  0x11   :  { %6442 = shalt.err (!%p6439_p7)
}
  0x12   :  { %s6562_s28 = smov 1024   ;;  %s6563_s29 = smov 64  }
  0x13   :  { %37 = dma.hbm_to_vmem [thread:$0]  %s6793_s1, 65536, %s32_s19, [#allocation6], %s6562_s28, %s6562_s28, %s6563_s29  }
  0x14   :  { %s6564_s7 = smov [#allocation8]   ;;  %s6443_s11 = scalar_lea.hbm %s6795_s3, 16384 }
  0x15   :  { %s53_s8 = sshll.u32 %s6564_s7, 4  ;;  %p6444_p8 = scmp.ne.s32.totalorder %s6795_s3, %s6443_s11  ;;  %s54_s8 = int_to_ptr.vmem [resolvable:$true] %s53_s8 }
  0x16   :  { %p6447_p9 = scmp.lt.u32.totalorder %s6443_s11, %s6795_s3 }
  0x18   :  { %p6449_p10 = pnand %p6447_p9, %p6444_p8 }
  0x1a   :  { %6452 = shalt.err (!%p6449_p10)
}
  0x1b   :  { %s6453_s16 = scalar_lea.vmem %s54_s8, 16384  ;;  %p6458_p12 = scmp.lt.s32.totalorder %s54_s8, %s54_s8 }
  0x1c   :  { %p6454_p11 = scmp.ne.s32.totalorder %s54_s8, %s6453_s16  ;;  %p6459_p13 = scmp.lt.s32.totalorder %s6453_s16, %s6453_s16 }
  0x1e   :  { %p6460_p0 = por %p6459_p13, %p6458_p12 }
  0x20   :  { %p6461_p1 = pnand %p6460_p0, %p6454_p11 }
  0x22   :  { %6464 = shalt.err (!%p6461_p1)
}
  0x23   :  { %s6565_s1 = smov 4   ;;  %s6566_s19 = smov [#allocation2]  }
  0x24   :  { %59 = dma.hbm_to_vmem [thread:$0]  %s6795_s3, 16384, %s54_s8, [#allocation9], %s6563_s29, %s6563_s29, %s6565_s1  }
  0x25   :  { %s19_s20 = sshll.u32 %s6566_s19, 4  ;;  %s6465_s23 = scalar_lea.hbm %s6792_s0, 512  ;;  %s20_s20 = int_to_ptr.vmem [resolvable:$true] %s19_s20 }
  0x26   :  { %p6466_p2 = scmp.ne.s32.totalorder %s6792_s0, %s6465_s23  ;;  %p6469_p3 = scmp.lt.u32.totalorder %s6465_s23, %s6792_s0 }
  0x28   :  { %p6471_p4 = pnand %p6469_p3, %p6466_p2 }
  0x2a   :  { %6474 = shalt.err (!%p6471_p4)
}
  0x2b   :  { %s6475_s28 = scalar_lea.vmem %s20_s20, 512  ;;  %p6480_p6 = scmp.lt.s32.totalorder %s20_s20, %s20_s20 }
  0x2c   :  { %p6476_p5 = scmp.ne.s32.totalorder %s20_s20, %s6475_s28  ;;  %p6481_p7 = scmp.lt.s32.totalorder %s6475_s28, %s6475_s28 }
  0x2e   :  { %p6482_p8 = por %p6481_p7, %p6480_p6 }
  0x30   :  { %p6483_p9 = pnand %p6482_p8, %p6476_p5 }
  0x32   :  { %6486 = shalt.err (!%p6483_p9)
}
  0x33   :  { %s6567_s3 = smov 256   ;;  %s6568_s29 = smov 16  }
  0x34   :  { %25 = dma.hbm_to_vmem [thread:$0]  %s6792_s0, 512, %s20_s20, [#allocation3], %s6567_s3, %s6567_s3, %s6568_s29  }
  0x35   :  { %s6569_s7 = smov [#allocation7]   ;;  %s6570_s9 = smov [#allocation10]  }
  0x36   :  { %s44_s8 = sshll.u32 %s6569_s7, 4  ;;  %s66_s10 = sshll.u32 %s6570_s9, 4  ;;  %s45_s8 = int_to_ptr.vmem [resolvable:$true] %s44_s8  ;;  %s67_s10 = int_to_ptr.vmem [resolvable:$true] %s66_s10 }
  0x37   :  { %s6487_s13 = scalar_lea.hbm %s6794_s2, 256 }
  0x38   :  { %p6488_p10 = scmp.ne.s32.totalorder %s6794_s2, %s6487_s13  ;;  %p6491_p11 = scmp.lt.u32.totalorder %s6487_s13, %s6794_s2 }
  0x3a   :  { %p6493_p12 = pnand %p6491_p11, %p6488_p10 }
  0x3c   :  { %6496 = shalt.err (!%p6493_p12)
}
  0x3d   :  { %s6497_s0 = scalar_lea.vmem %s45_s8, 256  ;;  %p6502_p0 = scmp.lt.s32.totalorder %s45_s8, %s45_s8 }
  0x3e   :  { %p6498_p13 = scmp.ne.s32.totalorder %s45_s8, %s6497_s0  ;;  %p6503_p1 = scmp.lt.s32.totalorder %s6497_s0, %s6497_s0 }
  0x40   :  { %p6504_p2 = por %p6503_p1, %p6502_p0 }
  0x42   :  { %p6505_p3 = pnand %p6504_p2, %p6498_p13 }
  0x44   :  { %6508 = shalt.err (!%p6505_p3)
}
  0x45   :  { %47 = dma.hbm_to_vmem [thread:$0]  %s6794_s2, 256, %s45_s8, [#allocation6]  }
  0x46   :  { %s6509_s21 = scalar_lea.hbm %s6796_s4, 16 }
  0x47   :  { %p6510_p4 = scmp.ne.s32.totalorder %s6796_s4, %s6509_s21  ;;  %p6513_p5 = scmp.lt.u32.totalorder %s6509_s21, %s6796_s4 }
  0x49   :  { %p6515_p6 = pnand %p6513_p5, %p6510_p4 }
  0x4b   :  { %6518 = shalt.err (!%p6515_p6)
}
  0x4c   :  { %s6519_s26 = scalar_lea.vmem %s67_s10, 16  ;;  %s6523_s27 = scalar_lea.vmem %s67_s10, 32 }
  0x4d   :  { %p6520_p7 = scmp.ne.s32.totalorder %s67_s10, %s6519_s26  ;;  %p6524_p8 = scmp.lt.s32.totalorder %s67_s10, %s67_s10 }
  0x4e   :  { %p6525_p9 = scmp.lt.s32.totalorder %s6523_s27, %s6519_s26 }
  0x50   :  { %p6526_p10 = por %p6525_p9, %p6524_p8 }
  0x52   :  { %p6527_p11 = pnand %p6526_p10, %p6520_p7 }
  0x54   :  { %6530 = shalt.err (!%p6527_p11)
}
  0x55   :  { %69 = dma.hbm_to_vmem [thread:$0]  %s6796_s4, 16, %s67_s10, [#allocation9]  }
  0x56   :  { %6553 = dma.done.wait [#allocation3], 512  }
  0x57   :  { %6554 = vsyncadd [#allocation3], 4294966784 }
  0x58   :  { %6555 = dma.done.wait [#allocation6], 65792  }
  0x59   :  { %6556 = vsyncadd [#allocation6], 4294901504 }
  0x5a   :  { %6557 = dma.done.wait [#allocation9], 16400  }
  0x5b   :  { %6558 = vsyncadd [#allocation9], 4294950896  ;;  %v90_v0 = vld [vmem:[#allocation5] sm:$0xff]  ;;  %v91_v2 = vld [vmem:[#allocation5 + $0x8] sm:$0xff]  ;;  %s6571_s4 = smov [#allocation11]  }
  0x5c   :  { %v98_v1 = vld [vmem:[#allocation5 + $0x40] sm:$0xff]  ;;  %v99_v4 = vld [vmem:[#allocation5 + $0x48] sm:$0xff]  ;;  %s5368_s3 = sshll.u32 %s6571_s4, 4  ;;  %s5369_s3 = int_to_ptr.vmem [resolvable:$true] %s5368_s3 }
  0x5d   :  { %v5387_v3 = vcombine.high %v90_v0, %v98_v1  ;;  %v5386_v5 = vcombine.low %v90_v0, %v98_v1  ;;  %v106_v6 = vld [vmem:[#allocation5 + $0x80] sm:$0xff]  ;;  %v5389_v8 = vcombine.high %v91_v2, %v99_v4  ;;  %v5388_v9 = vcombine.low %v91_v2, %v99_v4  ;;  %v107_v11 = vld [vmem:[#allocation5 + $0x88] sm:$0xff]  ;;  %s6531_s29 = scalar_lea.vmem %s5369_s3, 256  ;;  %p6536_p13 = scmp.lt.s32.totalorder %s5369_s3, %s5369_s3 }
  0x5e   :  { %v114_v7 = vld [vmem:[#allocation5 + $0xc0] sm:$0xff]  ;;  %v115_v12 = vld [vmem:[#allocation5 + $0xc8] sm:$0xff]  ;;  %p6532_p12 = scmp.ne.s32.totalorder %s5369_s3, %s6531_s29  ;;  %p6537_p0 = scmp.lt.s32.totalorder %s6531_s29, %s6531_s29 }
  0x5f   :  { %v5403_v10 = vcombine.high %v106_v6, %v114_v7  ;;  %v122_v13 = vld [vmem:[#allocation5 + $0x100] sm:$0xff]  ;;  %3266 = vmatprep.subr.bf16.mxu0 %v5387_v3  ;;  %v5405_v14 = vcombine.high %v107_v11, %v115_v12  ;;  %v123_v16 = vld [vmem:[#allocation5 + $0x108] sm:$0xff]  ;;  %3352 = vmatprep.subr.bf16.mxu1 %v5389_v8  ;;  %v5402_v18 = vcombine.low %v106_v6, %v114_v7 }
  0x60   :  { %v130_v15 = vld [vmem:[#allocation5 + $0x140] sm:$0xff]  ;;  %v131_v17 = vld [vmem:[#allocation5 + $0x148] sm:$0xff]  ;;  %3267 = vmatpush1.bf16.msra.mxu0 %v5386_v5  ;;  %3353 = vmatpush1.bf16.msra.mxu1 %v5388_v9  ;;  %v5404_v19 = vcombine.low %v107_v11, %v115_v12  ;;  %p6538_p1 = por %p6537_p0, %p6536_p13 }
  0x61   :  { %3268 = vmatprep.subr.bf16.mxu0 %v5403_v10  ;;  %v5419_v20 = vcombine.high %v122_v13, %v130_v15  ;;  %3354 = vmatprep.subr.bf16.mxu1 %v5405_v14  ;;  %v5421_v21 = vcombine.high %v123_v16, %v131_v17  ;;  %v138_v22 = vld [vmem:[#allocation5 + $0x180] sm:$0xff]  ;;  %v139_v24 = vld [vmem:[#allocation5 + $0x188] sm:$0xff]  ;;  %v5418_v26 = vcombine.low %v122_v13, %v130_v15 }
  0x62   :  { %v146_v23 = vld [vmem:[#allocation5 + $0x1c0] sm:$0xff]  ;;  %v147_v25 = vld [vmem:[#allocation5 + $0x1c8] sm:$0xff]  ;;  %v5420_v27 = vcombine.low %v123_v16, %v131_v17  ;;  %p6539_p2 = pnand %p6538_p1, %p6532_p12 }
  0x63   :  { %v5435_v28 = vcombine.high %v138_v22, %v146_v23  ;;  %v5437_v29 = vcombine.high %v139_v24, %v147_v25  ;;  %v154_v30 = vld [vmem:[#allocation5 + $0x200] sm:$0xff]  ;;  %v155_v32 = vld [vmem:[#allocation5 + $0x208] sm:$0xff]  ;;  %v5434_v34 = vcombine.low %v138_v22, %v146_v23  ;;  %v5436_v35 = vcombine.low %v139_v24, %v147_v25 }
  0x64   :  { %3269 = vmatpush1.bf16.msra.mxu0 %v5402_v18  ;;  %3355 = vmatpush1.bf16.msra.mxu1 %v5404_v19  ;;  %v162_v31 = vld [vmem:[#allocation5 + $0x240] sm:$0xff]  ;;  %v163_v33 = vld [vmem:[#allocation5 + $0x248] sm:$0xff] }
  0x65   :  { %3270 = vmatprep.subr.bf16.mxu0 %v5419_v20  ;;  %3356 = vmatprep.subr.bf16.mxu1 %v5421_v21  ;;  %v5451_v36 = vcombine.high %v154_v30, %v162_v31  ;;  %v5453_v37 = vcombine.high %v155_v32, %v163_v33  ;;  %v170_v38 = vld [vmem:[#allocation5 + $0x280] sm:$0xff]  ;;  %v171_v40 = vld [vmem:[#allocation5 + $0x288] sm:$0xff]  ;;  %v5450_v42 = vcombine.low %v154_v30, %v162_v31 }
  0x66   :  { %v178_v39 = vld [vmem:[#allocation5 + $0x2c0] sm:$0xff]  ;;  %v179_v41 = vld [vmem:[#allocation5 + $0x2c8] sm:$0xff]  ;;  %v5452_v43 = vcombine.low %v155_v32, %v163_v33 }
  0x67   :  { %v5467_v44 = vcombine.high %v170_v38, %v178_v39  ;;  %v5469_v45 = vcombine.high %v171_v40, %v179_v41  ;;  %v186_v46 = vld [vmem:[#allocation5 + $0x300] sm:$0xff]  ;;  %v187_v48 = vld [vmem:[#allocation5 + $0x308] sm:$0xff]  ;;  %v5466_v50 = vcombine.low %v170_v38, %v178_v39  ;;  %v5468_v51 = vcombine.low %v171_v40, %v179_v41 }
  0x68   :  { %3271 = vmatpush1.bf16.msra.mxu0 %v5418_v26  ;;  %3357 = vmatpush1.bf16.msra.mxu1 %v5420_v27  ;;  %v194_v47 = vld [vmem:[#allocation5 + $0x340] sm:$0xff]  ;;  %v195_v49 = vld [vmem:[#allocation5 + $0x348] sm:$0xff] }
  0x69   :  { %3272 = vmatprep.subr.bf16.mxu0 %v5435_v28  ;;  %3358 = vmatprep.subr.bf16.mxu1 %v5437_v29  ;;  %v5483_v52 = vcombine.high %v186_v46, %v194_v47  ;;  %v5485_v53 = vcombine.high %v187_v48, %v195_v49  ;;  %v202_v54 = vld [vmem:[#allocation5 + $0x380] sm:$0xff]  ;;  %v203_v57 = vld [vmem:[#allocation5 + $0x388] sm:$0xff]  ;;  %v5482_v59 = vcombine.low %v186_v46, %v194_v47 }
  0x6a   :  { %v210_v55 = vld [vmem:[#allocation5 + $0x3c0] sm:$0xff]  ;;  %v211_v58 = vld [vmem:[#allocation5 + $0x3c8] sm:$0xff]  ;;  %v5484_v60 = vcombine.low %v187_v48, %v195_v49 }
  0x6b   :  { %v6664_v56 = vld [vmem:[#allocation2 + $0x4] ss:$16 sps:$4 sm:$0xff]   ;;  %v5499_v61 = vcombine.high %v202_v54, %v210_v55  ;;  %v5501_v62 = vcombine.high %v203_v57, %v211_v58  ;;  %v219_v1 = vld [vmem:[#allocation5 + $0x408] sm:$0xff]  ;;  %v5498_v3 = vcombine.low %v202_v54, %v210_v55  ;;  %v5500_v4 = vcombine.low %v203_v57, %v211_v58 }
  0x6c   :  { %3273 = vmatpush1.bf16.msra.mxu0 %v5434_v34  ;;  %3359 = vmatpush1.bf16.msra.mxu1 %v5436_v35  ;;  %v218_v63 = vld [vmem:[#allocation5 + $0x400] sm:$0xff]  ;;  %v227_v2 = vld [vmem:[#allocation5 + $0x448] sm:$0xff] }
  0x6d   :  { %3274 = vmatprep.subr.bf16.mxu0 %v5451_v36  ;;  %3360 = vmatprep.subr.bf16.mxu1 %v5453_v37  ;;  %v226_v0 = vld [vmem:[#allocation5 + $0x440] sm:$0xff]  ;;  %v5517_v6 = vcombine.high %v219_v1, %v227_v2  ;;  %v235_v9 = vld [vmem:[#allocation5 + $0x488] sm:$0xff]  ;;  %v5516_v12 = vcombine.low %v219_v1, %v227_v2 }
  0x6e   :  { %3298 = vmatprep.mubr.bf16.mxu0 %v6664_v56  ;;  %3384 = vmatprep.mubr.bf16.mxu1 %v6664_v56  ;;  %v5515_v5 = vcombine.high %v218_v63, %v226_v0  ;;  %v234_v7 = vld [vmem:[#allocation5 + $0x480] sm:$0xff]  ;;  %v243_v10 = vld [vmem:[#allocation5 + $0x4c8] sm:$0xff]  ;;  %v5514_v11 = vcombine.low %v218_v63, %v226_v0 }
  0x6f   :  { %v242_v8 = vld [vmem:[#allocation5 + $0x4c0] sm:$0xff]  ;;  %v5533_v14 = vcombine.high %v235_v9, %v243_v10  ;;  %v251_v17 = vld [vmem:[#allocation5 + $0x508] sm:$0xff]  ;;  %v5532_v20 = vcombine.low %v235_v9, %v243_v10 }
  0x70   :  { %3275 = vmatpush1.bf16.msra.mxu0 %v5450_v42  ;;  %3361 = vmatpush1.bf16.msra.mxu1 %v5452_v43  ;;  %v5531_v13 = vcombine.high %v234_v7, %v242_v8  ;;  %v250_v15 = vld [vmem:[#allocation5 + $0x500] sm:$0xff]  ;;  %v259_v18 = vld [vmem:[#allocation5 + $0x548] sm:$0xff]  ;;  %v5530_v19 = vcombine.low %v234_v7, %v242_v8 }
  0x71   :  { %3276 = vmatprep.subr.bf16.mxu0 %v5467_v44  ;;  %3362 = vmatprep.subr.bf16.mxu1 %v5469_v45  ;;  %v258_v16 = vld [vmem:[#allocation5 + $0x540] sm:$0xff]  ;;  %v5549_v22 = vcombine.high %v251_v17, %v259_v18  ;;  %v267_v25 = vld [vmem:[#allocation5 + $0x588] sm:$0xff]  ;;  %v5548_v28 = vcombine.low %v251_v17, %v259_v18 }
  0x72   :  { %v5547_v21 = vcombine.high %v250_v15, %v258_v16  ;;  %v266_v23 = vld [vmem:[#allocation5 + $0x580] sm:$0xff]  ;;  %v275_v26 = vld [vmem:[#allocation5 + $0x5c8] sm:$0xff]  ;;  %v5546_v27 = vcombine.low %v250_v15, %v258_v16 }
  0x73   :  { %v274_v24 = vld [vmem:[#allocation5 + $0x5c0] sm:$0xff]  ;;  %v5565_v30 = vcombine.high %v267_v25, %v275_v26  ;;  %v283_v33 = vld [vmem:[#allocation5 + $0x608] sm:$0xff]  ;;  %v5564_v36 = vcombine.low %v267_v25, %v275_v26 }
  0x74   :  { %3277 = vmatpush1.bf16.msra.mxu0 %v5466_v50  ;;  %3363 = vmatpush1.bf16.msra.mxu1 %v5468_v51  ;;  %v5563_v29 = vcombine.high %v266_v23, %v274_v24  ;;  %v282_v31 = vld [vmem:[#allocation5 + $0x600] sm:$0xff]  ;;  %v291_v34 = vld [vmem:[#allocation5 + $0x648] sm:$0xff]  ;;  %v5562_v35 = vcombine.low %v266_v23, %v274_v24 }
  0x75   :  { %3278 = vmatprep.subr.bf16.mxu0 %v5483_v52  ;;  %3364 = vmatprep.subr.bf16.mxu1 %v5485_v53  ;;  %v290_v32 = vld [vmem:[#allocation5 + $0x640] sm:$0xff]  ;;  %v5581_v38 = vcombine.high %v283_v33, %v291_v34  ;;  %v299_v41 = vld [vmem:[#allocation5 + $0x688] sm:$0xff]  ;;  %v5580_v44 = vcombine.low %v283_v33, %v291_v34 }
  0x76   :  { %v5579_v37 = vcombine.high %v282_v31, %v290_v32  ;;  %v298_v39 = vld [vmem:[#allocation5 + $0x680] sm:$0xff]  ;;  %v307_v42 = vld [vmem:[#allocation5 + $0x6c8] sm:$0xff]  ;;  %v5578_v43 = vcombine.low %v282_v31, %v290_v32 }
  0x77   :  { %v306_v40 = vld [vmem:[#allocation5 + $0x6c0] sm:$0xff]  ;;  %v5597_v46 = vcombine.high %v299_v41, %v307_v42  ;;  %v315_v49 = vld [vmem:[#allocation5 + $0x708] sm:$0xff]  ;;  %v5596_v52 = vcombine.low %v299_v41, %v307_v42 }
  0x78   :  { %3279 = vmatpush1.bf16.msra.mxu0 %v5482_v59  ;;  %3365 = vmatpush1.bf16.msra.mxu1 %v5484_v60  ;;  %v5595_v45 = vcombine.high %v298_v39, %v306_v40  ;;  %v314_v47 = vld [vmem:[#allocation5 + $0x700] sm:$0xff]  ;;  %v323_v50 = vld [vmem:[#allocation5 + $0x748] sm:$0xff]  ;;  %v5594_v51 = vcombine.low %v298_v39, %v306_v40 }
  0x79   :  { %3280 = vmatprep.subr.bf16.mxu0 %v5499_v61  ;;  %3366 = vmatprep.subr.bf16.mxu1 %v5501_v62  ;;  %v322_v48 = vld [vmem:[#allocation5 + $0x740] sm:$0xff]  ;;  %v5613_v54 = vcombine.high %v315_v49, %v323_v50  ;;  %v331_v58 = vld [vmem:[#allocation5 + $0x788] sm:$0xff]  ;;  %v5612_v61 = vcombine.low %v315_v49, %v323_v50 }
  0x7a   :  { %v5611_v53 = vcombine.high %v314_v47, %v322_v48  ;;  %v330_v55 = vld [vmem:[#allocation5 + $0x780] sm:$0xff]  ;;  %v339_v59 = vld [vmem:[#allocation5 + $0x7c8] sm:$0xff]  ;;  %v5610_v60 = vcombine.low %v314_v47, %v322_v48 }
  0x7b   :  { %v338_v57 = vld [vmem:[#allocation5 + $0x7c0] sm:$0xff]  ;;  %v5629_v63 = vcombine.high %v331_v58, %v339_v59  ;;  %v347_v2 = vld [vmem:[#allocation5 + $0x808] sm:$0xff] }
  0x7c   :  { %3281 = vmatpush1.bf16.msra.mxu0 %v5498_v3  ;;  %3367 = vmatpush1.bf16.msra.mxu1 %v5500_v4  ;;  %v5627_v62 = vcombine.high %v330_v55, %v338_v57  ;;  %v346_v0 = vld [vmem:[#allocation5 + $0x800] sm:$0xff]  ;;  %v355_v3 = vld [vmem:[#allocation5 + $0x848] sm:$0xff]  ;;  %v5626_v4 = vcombine.low %v330_v55, %v338_v57 }
  0x7d   :  { %3282 = vmatprep.subr.bf16.mxu0 %v5515_v5  ;;  %3368 = vmatprep.subr.bf16.mxu1 %v5517_v6  ;;  %v354_v1 = vld [vmem:[#allocation5 + $0x840] sm:$0xff]  ;;  %v5628_v5 = vcombine.low %v331_v58, %v339_v59  ;;  %v5645_v7 = vcombine.high %v347_v2, %v355_v3 }
  0x7e   :  { %v5643_v6 = vcombine.high %v346_v0, %v354_v1  ;;  %v362_v8 = vld [vmem:[#allocation5 + $0x880] sm:$0xff] }
  0x7f   :  { %v370_v9 = vld [vmem:[#allocation5 + $0x8c0] sm:$0xff] }
  0x80   :  { %3283 = vmatpush1.bf16.msra.mxu0 %v5514_v11  ;;  %3369 = vmatpush1.bf16.msra.mxu1 %v5516_v12  ;;  %v6282_v10 = vld [vmem:[#allocation2] ss:$16 sps:$4 sm:$0xff]   ;;  %v363_v11 = vld [vmem:[#allocation5 + $0x888] sm:$0xff]  ;;  %v5659_v15 = vcombine.high %v362_v8, %v370_v9 }
  0x81   :  { %3284 = vmatprep.subr.bf16.mxu0 %v5531_v13  ;;  %3370 = vmatprep.subr.bf16.mxu1 %v5533_v14  ;;  %v371_v12 = vld [vmem:[#allocation5 + $0x8c8] sm:$0xff]  ;;  %v5642_v13 = vcombine.low %v346_v0, %v354_v1  ;;  %v5644_v14 = vcombine.low %v347_v2, %v355_v3  ;;  %v378_v17 = vld [vmem:[#allocation5 + $0x900] sm:$0xff] }
  0x82   :  { %v5661_v16 = vcombine.high %v363_v11, %v371_v12  ;;  %v386_v18 = vld [vmem:[#allocation5 + $0x940] sm:$0xff]  ;;  %v5660_v23 = vcombine.low %v363_v11, %v371_v12  ;;  %v491_v12 = vld [vmem:[#allocation5 + $0xc88] sm:$0xff] }
  0x83   :  { %v5675_v24 = vcombine.high %v378_v17, %v386_v18  ;;  %v394_v25 = vld [vmem:[#allocation5 + $0x980] sm:$0xff] }
  0x84   :  { %3285 = vmatpush1.bf16.msra.mxu0 %v5530_v19  ;;  %3371 = vmatpush1.bf16.msra.mxu1 %v5532_v20  ;;  %v6283_v19 = vld [vmem:[#allocation2 + $0xc] ss:$16 sps:$4 sm:$0xff]   ;;  %v402_v26 = vld [vmem:[#allocation5 + $0x9c0] sm:$0xff] }
  0x85   :  { %3286 = vmatprep.subr.bf16.mxu0 %v5547_v21  ;;  %3372 = vmatprep.subr.bf16.mxu1 %v5549_v22  ;;  %v379_v20 = vld [vmem:[#allocation5 + $0x908] sm:$0xff]  ;;  %v5658_v22 = vcombine.low %v362_v8, %v370_v9  ;;  %v5691_v32 = vcombine.high %v394_v25, %v402_v26  ;;  %v410_v33 = vld [vmem:[#allocation5 + $0xa00] sm:$0xff] }
  0x86   :  { %v387_v21 = vld [vmem:[#allocation5 + $0x948] sm:$0xff]  ;;  %v418_v34 = vld [vmem:[#allocation5 + $0xa40] sm:$0xff] }
  0x87   :  { %v5676_v31 = vcombine.low %v379_v20, %v387_v21  ;;  %v5707_v40 = vcombine.high %v410_v33, %v418_v34  ;;  %v426_v41 = vld [vmem:[#allocation5 + $0xa80] sm:$0xff] }
  0x88   :  { %3287 = vmatpush1.bf16.msra.mxu0 %v5546_v27  ;;  %3373 = vmatpush1.bf16.msra.mxu1 %v5548_v28  ;;  %v395_v27 = vld [vmem:[#allocation5 + $0x988] sm:$0xff]  ;;  %v5677_v28 = vcombine.high %v379_v20, %v387_v21  ;;  %v434_v42 = vld [vmem:[#allocation5 + $0xac0] sm:$0xff] }
  0x89   :  { %3288 = vmatprep.subr.bf16.mxu0 %v5563_v29  ;;  %3374 = vmatprep.subr.bf16.mxu1 %v5565_v30  ;;  %v403_v29 = vld [vmem:[#allocation5 + $0x9c8] sm:$0xff]  ;;  %v5674_v30 = vcombine.low %v378_v17, %v386_v18  ;;  %v5723_v48 = vcombine.high %v426_v41, %v434_v42  ;;  %v442_v49 = vld [vmem:[#allocation5 + $0xb00] sm:$0xff] }
  0x8a   :  { %v5692_v39 = vcombine.low %v395_v27, %v403_v29  ;;  %v450_v50 = vld [vmem:[#allocation5 + $0xb40] sm:$0xff]  ;;  %v507_v20 = vld [vmem:[#allocation5 + $0xd08] sm:$0xff] }
  0x8b   :  { %v5739_v57 = vcombine.high %v442_v49, %v450_v50  ;;  %v458_v58 = vld [vmem:[#allocation5 + $0xb80] sm:$0xff] }
  0x8c   :  { %3289 = vmatpush1.bf16.msra.mxu0 %v5562_v35  ;;  %3375 = vmatpush1.bf16.msra.mxu1 %v5564_v36  ;;  %v411_v35 = vld [vmem:[#allocation5 + $0xa08] sm:$0xff]  ;;  %v5693_v36 = vcombine.high %v395_v27, %v403_v29  ;;  %v466_v59 = vld [vmem:[#allocation5 + $0xbc0] sm:$0xff] }
  0x8d   :  { %3290 = vmatprep.subr.bf16.mxu0 %v5579_v37  ;;  %3376 = vmatprep.subr.bf16.mxu1 %v5581_v38  ;;  %v419_v37 = vld [vmem:[#allocation5 + $0xa48] sm:$0xff]  ;;  %v5690_v38 = vcombine.low %v394_v25, %v402_v26  ;;  %v5755_v1 = vcombine.high %v458_v58, %v466_v59  ;;  %v474_v2 = vld [vmem:[#allocation5 + $0xc00] sm:$0xff] }
  0x8e   :  { %v5708_v47 = vcombine.low %v411_v35, %v419_v37  ;;  %v482_v3 = vld [vmem:[#allocation5 + $0xc40] sm:$0xff] }
  0x8f   :  { %v5771_v9 = vcombine.high %v474_v2, %v482_v3  ;;  %v498_v11 = vld [vmem:[#allocation5 + $0xcc0] sm:$0xff] }
  0x90   :  { %3291 = vmatpush1.bf16.msra.mxu0 %v5578_v43  ;;  %3377 = vmatpush1.bf16.msra.mxu1 %v5580_v44  ;;  %v427_v43 = vld [vmem:[#allocation5 + $0xa88] sm:$0xff]  ;;  %v5709_v44 = vcombine.high %v411_v35, %v419_v37  ;;  %v506_v18 = vld [vmem:[#allocation5 + $0xd00] sm:$0xff] }
  0x91   :  { %3292 = vmatprep.subr.bf16.mxu0 %v5595_v45  ;;  %3378 = vmatprep.subr.bf16.mxu1 %v5597_v46  ;;  %v435_v45 = vld [vmem:[#allocation5 + $0xac8] sm:$0xff]  ;;  %v5706_v46 = vcombine.low %v410_v33, %v418_v34  ;;  %v522_v26 = vld [vmem:[#allocation5 + $0xd80] sm:$0xff] }
  0x92   :  { %v5724_v55 = vcombine.low %v427_v43, %v435_v45  ;;  %v530_v27 = vld [vmem:[#allocation5 + $0xdc0] sm:$0xff] }
  0x93   :  { %v5819_v33 = vcombine.high %v522_v26, %v530_v27  ;;  %v538_v34 = vld [vmem:[#allocation5 + $0xe00] sm:$0xff] }
  0x94   :  { %3293 = vmatpush1.bf16.msra.mxu0 %v5594_v51  ;;  %3379 = vmatpush1.bf16.msra.mxu1 %v5596_v52  ;;  %v443_v51 = vld [vmem:[#allocation5 + $0xb08] sm:$0xff]  ;;  %v5725_v52 = vcombine.high %v427_v43, %v435_v45  ;;  %v546_v35 = vld [vmem:[#allocation5 + $0xe40] sm:$0xff] }
  0x95   :  { %3294 = vmatprep.subr.bf16.mxu0 %v5611_v53  ;;  %3380 = vmatprep.subr.bf16.mxu1 %v5613_v54  ;;  %v451_v53 = vld [vmem:[#allocation5 + $0xb48] sm:$0xff]  ;;  %v5722_v54 = vcombine.low %v426_v41, %v434_v42  ;;  %v5835_v41 = vcombine.high %v538_v34, %v546_v35  ;;  %v554_v42 = vld [vmem:[#allocation5 + $0xe80] sm:$0xff] }
  0x96   :  { %v5740_v0 = vcombine.low %v443_v51, %v451_v53  ;;  %v562_v43 = vld [vmem:[#allocation5 + $0xec0] sm:$0xff] }
  0x98   :  { %3295 = vmatpush1.bf16.msra.mxu0 %v5610_v60  ;;  %3381 = vmatpush1.bf16.msra.mxu1 %v5612_v61  ;;  %v459_v60 = vld [vmem:[#allocation5 + $0xb88] sm:$0xff]  ;;  %v5741_v61 = vcombine.high %v443_v51, %v451_v53  ;;  %v578_v51 = vld [vmem:[#allocation5 + $0xf40] sm:$0xff] }
  0x99   :  { %3296 = vmatprep.subr.bf16.mxu0 %v5627_v62  ;;  %3382 = vmatprep.subr.bf16.mxu1 %v5629_v63  ;;  %v467_v62 = vld [vmem:[#allocation5 + $0xbc8] sm:$0xff]  ;;  %v5738_v63 = vcombine.low %v442_v49, %v450_v50  ;;  %v5851_v49 = vcombine.high %v554_v42, %v562_v43  ;;  %v570_v50 = vld [vmem:[#allocation5 + $0xf00] sm:$0xff] }
  0x9a   :  { %v5756_v8 = vcombine.low %v459_v60, %v467_v62 }
  0x9c   :  { %3297 = vmatpush1.bf16.msra.mxu0 %v5626_v4  ;;  %3383 = vmatpush1.bf16.msra.mxu1 %v5628_v5  ;;  %v475_v4 = vld [vmem:[#allocation5 + $0xc08] sm:$0xff]  ;;  %v5757_v5 = vcombine.high %v459_v60, %v467_v62  ;;  %v594_v60 = vld [vmem:[#allocation5 + $0xfc0] sm:$0xff] }
  0x9d   :  { %3309 = vmatprep.subr.bf16.mxu0 %v5643_v6  ;;  %3395 = vmatprep.subr.bf16.mxu1 %v5645_v7  ;;  %v483_v6 = vld [vmem:[#allocation5 + $0xc48] sm:$0xff]  ;;  %v5754_v7 = vcombine.low %v458_v58, %v466_v59  ;;  %v5867_v58 = vcombine.high %v570_v50, %v578_v51  ;;  %v586_v59 = vld [vmem:[#allocation5 + $0xf80] sm:$0xff] }
  0x9f   :  { %3299 = vmatmul.mubr.bf16.vlgmr.msra.gmra.mrb[0].mxu0 %v6282_v10  ;;  %3385 = vmatmul.mubr.bf16.vlgmr.msra.gmra.mrb[0].mxu1 %v6282_v10  ;;  %v490_v10 = vld [vmem:[#allocation5 + $0xc80] sm:$0xff] }
  0xa0   :  { %3310 = vmatpush1.bf16.msra.mxu0 %v5642_v13  ;;  %3396 = vmatpush1.bf16.msra.mxu1 %v5644_v14  ;;  %v5773_v13 = vcombine.high %v475_v4, %v483_v6  ;;  %v499_v14 = vld [vmem:[#allocation5 + $0xcc8] sm:$0xff]  ;;  %v5787_v17 = vcombine.high %v490_v10, %v498_v11 }
  0xa1   :  { %3311 = vmatprep.subr.bf16.mxu0 %v5659_v15  ;;  %3397 = vmatprep.subr.bf16.mxu1 %v5661_v16  ;;  %v5770_v15 = vcombine.low %v474_v2, %v482_v3  ;;  %v5772_v16 = vcombine.low %v475_v4, %v483_v6  ;;  %v5789_v21 = vcombine.high %v491_v12, %v499_v14  ;;  %v92_v3 = vld [vmem:[#allocation5 + $0x10] sm:$0xff] }
  0xa2   :  { %3341 = vmatprep.mubr.bf16.mxu0 %v6283_v19  ;;  %3427 = vmatprep.mubr.bf16.mxu1 %v6283_v19  ;;  %v514_v19 = vld [vmem:[#allocation5 + $0xd40] sm:$0xff]  ;;  %v5883_v2 = vcombine.high %v586_v59, %v594_v60  ;;  %v100_v4 = vld [vmem:[#allocation5 + $0x50] sm:$0xff] }
  0xa3   :  { %v5803_v25 = vcombine.high %v506_v18, %v514_v19 }
  0xa4   :  { %3312 = vmatpush1.bf16.msra.mxu0 %v5658_v22  ;;  %3398 = vmatpush1.bf16.msra.mxu1 %v5660_v23  ;;  %v515_v22 = vld [vmem:[#allocation5 + $0xd48] sm:$0xff]  ;;  %v5786_v23 = vcombine.low %v490_v10, %v498_v11  ;;  %v5391_v11 = vcombine.high %v92_v3, %v100_v4 }
  0xa5   :  { %3313 = vmatprep.subr.bf16.mxu0 %v5675_v24  ;;  %3399 = vmatprep.subr.bf16.mxu1 %v5677_v28  ;;  %v5788_v24 = vcombine.low %v491_v12, %v499_v14  ;;  %v523_v28 = vld [vmem:[#allocation5 + $0xd88] sm:$0xff]  ;;  %v5805_v29 = vcombine.high %v507_v20, %v515_v22  ;;  %v108_v12 = vld [vmem:[#allocation5 + $0x90] sm:$0xff]  ;;  %v109_v14 = vld [vmem:[#allocation5 + $0x98] sm:$0xff] }
  0xa6   :  { %v6285_v10 = vld [vmem:[#allocation2 + $0x8] ss:$16 sps:$4 sm:$0xff]  }
  0xa8   :  { %3314 = vmatpush1.bf16.msra.mxu0 %v5674_v30  ;;  %3400 = vmatpush1.bf16.msra.mxu1 %v5676_v31  ;;  %v531_v30 = vld [vmem:[#allocation5 + $0xdc8] sm:$0xff]  ;;  %v5802_v31 = vcombine.low %v506_v18, %v514_v19 }
  0xa9   :  { %3315 = vmatprep.subr.bf16.mxu0 %v5691_v32  ;;  %3401 = vmatprep.subr.bf16.mxu1 %v5693_v36  ;;  %v5804_v32 = vcombine.low %v507_v20, %v515_v22  ;;  %v539_v36 = vld [vmem:[#allocation5 + $0xe08] sm:$0xff]  ;;  %v5821_v37 = vcombine.high %v523_v28, %v531_v30  ;;  %v124_v20 = vld [vmem:[#allocation5 + $0x110] sm:$0xff]  ;;  %v125_v22 = vld [vmem:[#allocation5 + $0x118] sm:$0xff] }
  0xac   :  { %3316 = vmatpush1.bf16.msra.mxu0 %v5690_v38  ;;  %3402 = vmatpush1.bf16.msra.mxu1 %v5692_v39  ;;  %v547_v38 = vld [vmem:[#allocation5 + $0xe48] sm:$0xff]  ;;  %v5818_v39 = vcombine.low %v522_v26, %v530_v27 }
  0xad   :  { %3317 = vmatprep.subr.bf16.mxu0 %v5707_v40  ;;  %3403 = vmatprep.subr.bf16.mxu1 %v5709_v44  ;;  %v5820_v40 = vcombine.low %v523_v28, %v531_v30  ;;  %v555_v44 = vld [vmem:[#allocation5 + $0xe88] sm:$0xff]  ;;  %v5837_v45 = vcombine.high %v539_v36, %v547_v38  ;;  %v140_v28 = vld [vmem:[#allocation5 + $0x190] sm:$0xff]  ;;  %v141_v30 = vld [vmem:[#allocation5 + $0x198] sm:$0xff] }
  0xb0   :  { %3318 = vmatpush1.bf16.msra.mxu0 %v5706_v46  ;;  %3404 = vmatpush1.bf16.msra.mxu1 %v5708_v47  ;;  %v563_v46 = vld [vmem:[#allocation5 + $0xec8] sm:$0xff]  ;;  %v5834_v47 = vcombine.low %v538_v34, %v546_v35 }
  0xb1   :  { %3319 = vmatprep.subr.bf16.mxu0 %v5723_v48  ;;  %3405 = vmatprep.subr.bf16.mxu1 %v5725_v52  ;;  %v5836_v48 = vcombine.low %v539_v36, %v547_v38  ;;  %v571_v52 = vld [vmem:[#allocation5 + $0xf08] sm:$0xff]  ;;  %v5853_v53 = vcombine.high %v555_v44, %v563_v46  ;;  %v156_v36 = vld [vmem:[#allocation5 + $0x210] sm:$0xff]  ;;  %v157_v38 = vld [vmem:[#allocation5 + $0x218] sm:$0xff] }
  0xb4   :  { %3320 = vmatpush1.bf16.msra.mxu0 %v5722_v54  ;;  %3406 = vmatpush1.bf16.msra.mxu1 %v5724_v55  ;;  %v579_v54 = vld [vmem:[#allocation5 + $0xf48] sm:$0xff]  ;;  %v5850_v55 = vcombine.low %v554_v42, %v562_v43 }
  0xb5   :  { %3321 = vmatprep.subr.bf16.mxu0 %v5739_v57  ;;  %3407 = vmatprep.subr.bf16.mxu1 %v5741_v61  ;;  %v5852_v57 = vcombine.low %v555_v44, %v563_v46  ;;  %v587_v61 = vld [vmem:[#allocation5 + $0xf88] sm:$0xff]  ;;  %v5869_v62 = vcombine.high %v571_v52, %v579_v54  ;;  %v172_v44 = vld [vmem:[#allocation5 + $0x290] sm:$0xff] }
  0xb8   :  { %3322 = vmatpush1.bf16.msra.mxu0 %v5738_v63  ;;  %3408 = vmatpush1.bf16.msra.mxu1 %v5740_v0  ;;  %v595_v63 = vld [vmem:[#allocation5 + $0xfc8] sm:$0xff]  ;;  %v5866_v0 = vcombine.low %v570_v50, %v578_v51  ;;  %v188_v51 = vld [vmem:[#allocation5 + $0x310] sm:$0xff] }
  0xb9   :  { %3323 = vmatprep.subr.bf16.mxu0 %v5755_v1  ;;  %3409 = vmatprep.subr.bf16.mxu1 %v5757_v5  ;;  %v5868_v1 = vcombine.low %v571_v52, %v579_v54  ;;  %v93_v5 = vld [vmem:[#allocation5 + $0x18] sm:$0xff]  ;;  %v5885_v6 = vcombine.high %v587_v61, %v595_v63  ;;  %v196_v52 = vld [vmem:[#allocation5 + $0x350] sm:$0xff] }
  0xbc   :  { %3324 = vmatpush1.bf16.msra.mxu0 %v5754_v7  ;;  %3410 = vmatpush1.bf16.msra.mxu1 %v5756_v8  ;;  %v101_v7 = vld [vmem:[#allocation5 + $0x58] sm:$0xff]  ;;  %v5882_v8 = vcombine.low %v586_v59, %v594_v60  ;;  %v5487_v59 = vcombine.high %v188_v51, %v196_v52  ;;  %v204_v60 = vld [vmem:[#allocation5 + $0x390] sm:$0xff] }
  0xbd   :  { %3325 = vmatprep.subr.bf16.mxu0 %v5771_v9  ;;  %3411 = vmatprep.subr.bf16.mxu1 %v5773_v13  ;;  %v5884_v9 = vcombine.low %v587_v61, %v595_v63  ;;  %v116_v13 = vld [vmem:[#allocation5 + $0xd0] sm:$0xff]  ;;  %v5392_v18 = vcombine.low %v93_v5, %v101_v7 }
  0xbe   :  { %v5407_v19 = vcombine.high %v108_v12, %v116_v13  ;;  %v212_v61 = vld [vmem:[#allocation5 + $0x3d0] sm:$0xff] }
  0xc0   :  { %3326 = vmatpush1.bf16.msra.mxu0 %v5770_v15  ;;  %3412 = vmatpush1.bf16.msra.mxu1 %v5772_v16  ;;  %v5393_v15 = vcombine.high %v93_v5, %v101_v7  ;;  %v117_v16 = vld [vmem:[#allocation5 + $0xd8] sm:$0xff]  ;;  %v228_v5 = vld [vmem:[#allocation5 + $0x450] sm:$0xff] }
  0xc1   :  { %3327 = vmatprep.subr.bf16.mxu0 %v5787_v17  ;;  %3413 = vmatprep.subr.bf16.mxu1 %v5789_v21  ;;  %v5390_v17 = vcombine.low %v92_v3, %v100_v4  ;;  %v132_v21 = vld [vmem:[#allocation5 + $0x150] sm:$0xff]  ;;  %v5408_v26 = vcombine.low %v109_v14, %v117_v16  ;;  %v5503_v3 = vcombine.high %v204_v60, %v212_v61 }
  0xc2   :  { %v5423_v27 = vcombine.high %v124_v20, %v132_v21  ;;  %v220_v4 = vld [vmem:[#allocation5 + $0x410] sm:$0xff] }
  0xc4   :  { %3328 = vmatpush1.bf16.msra.mxu0 %v5786_v23  ;;  %3414 = vmatpush1.bf16.msra.mxu1 %v5788_v24  ;;  %v5409_v23 = vcombine.high %v109_v14, %v117_v16  ;;  %v133_v24 = vld [vmem:[#allocation5 + $0x158] sm:$0xff] }
  0xc5   :  { %3329 = vmatprep.subr.bf16.mxu0 %v5803_v25  ;;  %3415 = vmatprep.subr.bf16.mxu1 %v5805_v29  ;;  %v5406_v25 = vcombine.low %v108_v12, %v116_v13  ;;  %v148_v29 = vld [vmem:[#allocation5 + $0x1d0] sm:$0xff]  ;;  %v5424_v34 = vcombine.low %v125_v22, %v133_v24  ;;  %v237_v14 = vld [vmem:[#allocation5 + $0x498] sm:$0xff] }
  0xc6   :  { %v5439_v35 = vcombine.high %v140_v28, %v148_v29  ;;  %v236_v12 = vld [vmem:[#allocation5 + $0x490] sm:$0xff]  ;;  %v245_v16 = vld [vmem:[#allocation5 + $0x4d8] sm:$0xff] }
  0xc7   :  { %v244_v13 = vld [vmem:[#allocation5 + $0x4d0] sm:$0xff] }
  0xc8   :  { %3330 = vmatpush1.bf16.msra.mxu0 %v5802_v31  ;;  %3416 = vmatpush1.bf16.msra.mxu1 %v5804_v32  ;;  %v5425_v31 = vcombine.high %v125_v22, %v133_v24  ;;  %v149_v32 = vld [vmem:[#allocation5 + $0x1d8] sm:$0xff] }
  0xc9   :  { %3331 = vmatprep.subr.bf16.mxu0 %v5819_v33  ;;  %3417 = vmatprep.subr.bf16.mxu1 %v5821_v37  ;;  %v5422_v33 = vcombine.low %v124_v20, %v132_v21  ;;  %v164_v37 = vld [vmem:[#allocation5 + $0x250] sm:$0xff]  ;;  %v5440_v42 = vcombine.low %v141_v30, %v149_v32  ;;  %v253_v22 = vld [vmem:[#allocation5 + $0x518] sm:$0xff] }
  0xca   :  { %v5455_v43 = vcombine.high %v156_v36, %v164_v37  ;;  %v252_v20 = vld [vmem:[#allocation5 + $0x510] sm:$0xff]  ;;  %v261_v24 = vld [vmem:[#allocation5 + $0x558] sm:$0xff] }
  0xcb   :  { %v260_v21 = vld [vmem:[#allocation5 + $0x550] sm:$0xff] }
  0xcc   :  { %3332 = vmatpush1.bf16.msra.mxu0 %v5818_v39  ;;  %3418 = vmatpush1.bf16.msra.mxu1 %v5820_v40  ;;  %v5441_v39 = vcombine.high %v141_v30, %v149_v32  ;;  %v165_v40 = vld [vmem:[#allocation5 + $0x258] sm:$0xff] }
  0xcd   :  { %3333 = vmatprep.subr.bf16.mxu0 %v5835_v41  ;;  %3419 = vmatprep.subr.bf16.mxu1 %v5837_v45  ;;  %v5438_v41 = vcombine.low %v140_v28, %v148_v29  ;;  %v173_v45 = vld [vmem:[#allocation5 + $0x298] sm:$0xff]  ;;  %v5457_v46 = vcombine.high %v157_v38, %v165_v40  ;;  %v268_v28 = vld [vmem:[#allocation5 + $0x590] sm:$0xff] }
  0xce   :  { %v276_v29 = vld [vmem:[#allocation5 + $0x5d0] sm:$0xff]  ;;  %v269_v30 = vld [vmem:[#allocation5 + $0x598] sm:$0xff] }
  0xcf   :  { %v277_v32 = vld [vmem:[#allocation5 + $0x5d8] sm:$0xff] }
  0xd0   :  { %3334 = vmatpush1.bf16.msra.mxu0 %v5834_v47  ;;  %3420 = vmatpush1.bf16.msra.mxu1 %v5836_v48  ;;  %v181_v47 = vld [vmem:[#allocation5 + $0x2d8] sm:$0xff]  ;;  %v5454_v48 = vcombine.low %v156_v36, %v164_v37  ;;  %v284_v36 = vld [vmem:[#allocation5 + $0x610] sm:$0xff] }
  0xd1   :  { %3335 = vmatprep.subr.bf16.mxu0 %v5851_v49  ;;  %3421 = vmatprep.subr.bf16.mxu1 %v5853_v53  ;;  %v5456_v49 = vcombine.low %v157_v38, %v165_v40  ;;  %v189_v53 = vld [vmem:[#allocation5 + $0x318] sm:$0xff]  ;;  %v5473_v54 = vcombine.high %v173_v45, %v181_v47  ;;  %v292_v37 = vld [vmem:[#allocation5 + $0x650] sm:$0xff] }
  0xd2   :  { %v285_v38 = vld [vmem:[#allocation5 + $0x618] sm:$0xff] }
  0xd3   :  { %v293_v40 = vld [vmem:[#allocation5 + $0x658] sm:$0xff] }
  0xd4   :  { %3336 = vmatpush1.bf16.msra.mxu0 %v5850_v55  ;;  %3422 = vmatpush1.bf16.msra.mxu1 %v5852_v57  ;;  %v197_v55 = vld [vmem:[#allocation5 + $0x358] sm:$0xff] }
  0xd5   :  { %3337 = vmatprep.subr.bf16.mxu0 %v5867_v58  ;;  %3423 = vmatprep.subr.bf16.mxu1 %v5869_v62  ;;  %v5472_v58 = vcombine.low %v173_v45, %v181_v47  ;;  %v205_v62 = vld [vmem:[#allocation5 + $0x398] sm:$0xff]  ;;  %v5489_v63 = vcombine.high %v189_v53, %v197_v55 }
  0xd6   :  { %v301_v45 = vld [vmem:[#allocation5 + $0x698] sm:$0xff] }
  0xd7   :  { %v309_v47 = vld [vmem:[#allocation5 + $0x6d8] sm:$0xff] }
  0xd8   :  { %3338 = vmatpush1.bf16.msra.mxu0 %v5866_v0  ;;  %3424 = vmatpush1.bf16.msra.mxu1 %v5868_v1  ;;  %v213_v0 = vld [vmem:[#allocation5 + $0x3d8] sm:$0xff]  ;;  %v5486_v1 = vcombine.low %v188_v51, %v196_v52  ;;  %v316_v51 = vld [vmem:[#allocation5 + $0x710] sm:$0xff] }
  0xd9   :  { %3339 = vmatprep.subr.bf16.mxu0 %v5883_v2  ;;  %3425 = vmatprep.subr.bf16.mxu1 %v5885_v6  ;;  %v5488_v2 = vcombine.low %v189_v53, %v197_v55  ;;  %v221_v6 = vld [vmem:[#allocation5 + $0x418] sm:$0xff]  ;;  %v5505_v7 = vcombine.high %v205_v62, %v213_v0  ;;  %v324_v52 = vld [vmem:[#allocation5 + $0x750] sm:$0xff] }
  0xda   :  { %v317_v53 = vld [vmem:[#allocation5 + $0x718] sm:$0xff] }
  0xdb   :  { %v325_v55 = vld [vmem:[#allocation5 + $0x758] sm:$0xff] }
  0xdc   :  { %3340 = vmatpush1.bf16.msra.mxu0 %v5882_v8  ;;  %3426 = vmatpush1.bf16.msra.mxu1 %v5884_v9  ;;  %v229_v8 = vld [vmem:[#allocation5 + $0x458] sm:$0xff]  ;;  %v5502_v9 = vcombine.low %v204_v60, %v212_v61  ;;  %v332_v60 = vld [vmem:[#allocation5 + $0x790] sm:$0xff] }
  0xdd   :  { %3438 = vmatprep.subr.bf16.mxu0 %v5391_v11  ;;  %3524 = vmatprep.subr.bf16.mxu1 %v5393_v15  ;;  %v5519_v11 = vcombine.high %v220_v4, %v228_v5  ;;  %v5521_v15 = vcombine.high %v221_v6, %v229_v8  ;;  %v340_v61 = vld [vmem:[#allocation5 + $0x7d0] sm:$0xff] }
  0xdf   :  { %3342 = vmatmul.mubr.bf16.vlgmr.msra.gmra.mrb[0].mxu0 %v6285_v10  ;;  %3428 = vmatmul.mubr.bf16.vlgmr.msra.gmra.mrb[0].mxu1 %v6285_v10  ;;  %v5504_v10 = vcombine.low %v205_v62, %v213_v0  ;;  %v333_v62 = vld [vmem:[#allocation5 + $0x798] sm:$0xff] }
  0xe0   :  { %3439 = vmatpush1.bf16.msra.mxu0 %v5390_v17  ;;  %3525 = vmatpush1.bf16.msra.mxu1 %v5392_v18  ;;  %v5518_v17 = vcombine.low %v220_v4, %v228_v5  ;;  %v5520_v18 = vcombine.low %v221_v6, %v229_v8  ;;  %v341_v0 = vld [vmem:[#allocation5 + $0x7d8] sm:$0xff]  ;;  %v348_v4 = vld [vmem:[#allocation5 + $0x810] sm:$0xff] }
  0xe1   :  { %3440 = vmatprep.subr.bf16.mxu0 %v5407_v19  ;;  %3526 = vmatprep.subr.bf16.mxu1 %v5409_v23  ;;  %v5535_v19 = vcombine.high %v236_v12, %v244_v13  ;;  %v5537_v23 = vcombine.high %v237_v14, %v245_v16  ;;  %v356_v5 = vld [vmem:[#allocation5 + $0x850] sm:$0xff]  ;;  %v349_v6 = vld [vmem:[#allocation5 + $0x818] sm:$0xff] }
  0xe2   :  { %3470 = vmatprep.mubr.bf16.mxu0 %v6664_v56  ;;  %3556 = vmatprep.mubr.bf16.mxu1 %v6664_v56  ;;  %v180_v56 = vld [vmem:[#allocation5 + $0x2d0] sm:$0xff]  ;;  %v357_v8 = vld [vmem:[#allocation5 + $0x858] sm:$0xff] }
  0xe3   :  { %v5471_v50 = vcombine.high %v172_v44, %v180_v56  ;;  %v5470_v57 = vcombine.low %v172_v44, %v180_v56  ;;  %v300_v44 = vld [vmem:[#allocation5 + $0x690] sm:$0xff] }
  0xe4   :  { %3441 = vmatpush1.bf16.msra.mxu0 %v5406_v25  ;;  %3527 = vmatpush1.bf16.msra.mxu1 %v5408_v26  ;;  %v5534_v25 = vcombine.low %v236_v12, %v244_v13  ;;  %v5536_v26 = vcombine.low %v237_v14, %v245_v16  ;;  %v308_v56 = vld [vmem:[#allocation5 + $0x6d0] sm:$0xff]  ;;  %v365_v14 = vld [vmem:[#allocation5 + $0x898] sm:$0xff] }
  0xe5   :  { %3442 = vmatprep.subr.bf16.mxu0 %v5423_v27  ;;  %3528 = vmatprep.subr.bf16.mxu1 %v5425_v31  ;;  %v5551_v27 = vcombine.high %v252_v20, %v260_v21  ;;  %v5553_v31 = vcombine.high %v253_v22, %v261_v24  ;;  %v364_v12 = vld [vmem:[#allocation5 + $0x890] sm:$0xff]  ;;  %v373_v16 = vld [vmem:[#allocation5 + $0x8d8] sm:$0xff] }
  0xe6   :  { %v372_v13 = vld [vmem:[#allocation5 + $0x8d0] sm:$0xff] }
  0xe8   :  { %3443 = vmatpush1.bf16.msra.mxu0 %v5422_v33  ;;  %3529 = vmatpush1.bf16.msra.mxu1 %v5424_v34  ;;  %v5550_v33 = vcombine.low %v252_v20, %v260_v21  ;;  %v5552_v34 = vcombine.low %v253_v22, %v261_v24  ;;  %v380_v20 = vld [vmem:[#allocation5 + $0x910] sm:$0xff]  ;;  %v381_v22 = vld [vmem:[#allocation5 + $0x918] sm:$0xff] }
  0xe9   :  { %3444 = vmatprep.subr.bf16.mxu0 %v5439_v35  ;;  %3530 = vmatprep.subr.bf16.mxu1 %v5441_v39  ;;  %v5567_v35 = vcombine.high %v268_v28, %v276_v29  ;;  %v5569_v39 = vcombine.high %v269_v30, %v277_v32  ;;  %v388_v21 = vld [vmem:[#allocation5 + $0x950] sm:$0xff]  ;;  %v389_v24 = vld [vmem:[#allocation5 + $0x958] sm:$0xff] }
  0xec   :  { %3445 = vmatpush1.bf16.msra.mxu0 %v5438_v41  ;;  %3531 = vmatpush1.bf16.msra.mxu1 %v5440_v42  ;;  %v5566_v41 = vcombine.low %v268_v28, %v276_v29  ;;  %v5568_v42 = vcombine.low %v269_v30, %v277_v32  ;;  %v5679_v28 = vcombine.high %v380_v20, %v388_v21  ;;  %v396_v30 = vld [vmem:[#allocation5 + $0x990] sm:$0xff]  ;;  %v6674_v32 = vld [vmem:[#allocation2 + $0xc] ss:$16 sps:$4 sm:$0xff]  }
  0xed   :  { %3446 = vmatprep.subr.bf16.mxu0 %v5455_v43  ;;  %3532 = vmatprep.subr.bf16.mxu1 %v5457_v46  ;;  %v5583_v43 = vcombine.high %v284_v36, %v292_v37  ;;  %v5585_v46 = vcombine.high %v285_v38, %v293_v40  ;;  %v5681_v29 = vcombine.high %v381_v22, %v389_v24 }
  0xf0   :  { %3447 = vmatpush1.bf16.msra.mxu0 %v5454_v48  ;;  %3533 = vmatpush1.bf16.msra.mxu1 %v5456_v49  ;;  %v5582_v48 = vcombine.low %v284_v36, %v292_v37  ;;  %v5584_v49 = vcombine.low %v285_v38, %v293_v40  ;;  %v5680_v36 = vcombine.low %v381_v22, %v389_v24  ;;  %v420_v40 = vld [vmem:[#allocation5 + $0xa50] sm:$0xff] }
  0xf1   :  { %3448 = vmatprep.subr.bf16.mxu0 %v5471_v50  ;;  %3534 = vmatprep.subr.bf16.mxu1 %v5473_v54  ;;  %v5599_v50 = vcombine.high %v300_v44, %v308_v56  ;;  %v5601_v54 = vcombine.high %v301_v45, %v309_v47  ;;  %v516_v24 = vld [vmem:[#allocation5 + $0xd50] sm:$0xff] }
  0xf4   :  { %3449 = vmatpush1.bf16.msra.mxu0 %v5470_v57  ;;  %3535 = vmatpush1.bf16.msra.mxu1 %v5472_v58  ;;  %v5598_v57 = vcombine.low %v300_v44, %v308_v56  ;;  %v5600_v58 = vcombine.low %v301_v45, %v309_v47  ;;  %v436_v47 = vld [vmem:[#allocation5 + $0xad0] sm:$0xff] }
  0xf5   :  { %3450 = vmatprep.subr.bf16.mxu0 %v5487_v59  ;;  %3536 = vmatprep.subr.bf16.mxu1 %v5489_v63  ;;  %v5615_v59 = vcombine.high %v316_v51, %v324_v52  ;;  %v5617_v63 = vcombine.high %v317_v53, %v325_v55 }
  0xf8   :  { %3451 = vmatpush1.bf16.msra.mxu0 %v5486_v1  ;;  %3537 = vmatpush1.bf16.msra.mxu1 %v5488_v2  ;;  %v5614_v1 = vcombine.low %v316_v51, %v324_v52  ;;  %v5616_v2 = vcombine.low %v317_v53, %v325_v55  ;;  %v452_v55 = vld [vmem:[#allocation5 + $0xb50] sm:$0xff] }
  0xf9   :  { %3452 = vmatprep.subr.bf16.mxu0 %v5503_v3  ;;  %3538 = vmatprep.subr.bf16.mxu1 %v5505_v7  ;;  %v5631_v3 = vcombine.high %v332_v60, %v340_v61  ;;  %v5633_v7 = vcombine.high %v333_v62, %v341_v0 }
  0xfc   :  { %3453 = vmatpush1.bf16.msra.mxu0 %v5502_v9  ;;  %3539 = vmatpush1.bf16.msra.mxu1 %v5504_v10  ;;  %v5630_v9 = vcombine.low %v332_v60, %v340_v61  ;;  %v5632_v10 = vcombine.low %v333_v62, %v341_v0  ;;  %v468_v0 = vld [vmem:[#allocation5 + $0xbd0] sm:$0xff] }
  0xfd   :  { %3454 = vmatprep.subr.bf16.mxu0 %v5519_v11  ;;  %3540 = vmatprep.subr.bf16.mxu1 %v5521_v15  ;;  %v5647_v11 = vcombine.high %v348_v4, %v356_v5  ;;  %v5649_v15 = vcombine.high %v349_v6, %v357_v8 }
 0x100   :  { %3455 = vmatpush1.bf16.msra.mxu0 %v5518_v17  ;;  %3541 = vmatpush1.bf16.msra.mxu1 %v5520_v18  ;;  %v5646_v17 = vcombine.low %v348_v4, %v356_v5  ;;  %v5648_v18 = vcombine.low %v349_v6, %v357_v8  ;;  %v484_v8 = vld [vmem:[#allocation5 + $0xc50] sm:$0xff] }
 0x101   :  { %3456 = vmatprep.subr.bf16.mxu0 %v5535_v19  ;;  %3542 = vmatprep.subr.bf16.mxu1 %v5537_v23  ;;  %v5663_v19 = vcombine.high %v364_v12, %v372_v13  ;;  %v5665_v23 = vcombine.high %v365_v14, %v373_v16 }
 0x104   :  { %3457 = vmatpush1.bf16.msra.mxu0 %v5534_v25  ;;  %3543 = vmatpush1.bf16.msra.mxu1 %v5536_v26  ;;  %v6670_v25 = vld [vmem:[#allocation2] ss:$16 sps:$4 sm:$0xff]   ;;  %v5662_v26 = vcombine.low %v364_v12, %v372_v13 }
 0x105   :  { %3458 = vmatprep.subr.bf16.mxu0 %v5551_v27  ;;  %3544 = vmatprep.subr.bf16.mxu1 %v5553_v31  ;;  %v5664_v27 = vcombine.low %v365_v14, %v373_v16  ;;  %v404_v31 = vld [vmem:[#allocation5 + $0x9d0] sm:$0xff] }
 0x106   :  { %v5695_v37 = vcombine.high %v396_v30, %v404_v31  ;;  %v500_v16 = vld [vmem:[#allocation5 + $0xcd0] sm:$0xff] }
 0x108   :  { %3459 = vmatpush1.bf16.msra.mxu0 %v5550_v33  ;;  %3545 = vmatpush1.bf16.msra.mxu1 %v5552_v34  ;;  %v397_v33 = vld [vmem:[#allocation5 + $0x998] sm:$0xff] }
 0x109   :  { %3460 = vmatprep.subr.bf16.mxu0 %v5567_v35  ;;  %3546 = vmatprep.subr.bf16.mxu1 %v5569_v39  ;;  %v405_v34 = vld [vmem:[#allocation5 + $0x9d8] sm:$0xff]  ;;  %v5678_v35 = vcombine.low %v380_v20, %v388_v21  ;;  %v412_v39 = vld [vmem:[#allocation5 + $0xa10] sm:$0xff] }
 0x10a   :  { %v5697_v38 = vcombine.high %v397_v33, %v405_v34  ;;  %v5696_v44 = vcombine.low %v397_v33, %v405_v34  ;;  %v5711_v56 = vcombine.high %v412_v39, %v420_v40  ;;  %v524_v33 = vld [vmem:[#allocation5 + $0xd90] sm:$0xff] }
 0x10b   :  { %v532_v34 = vld [vmem:[#allocation5 + $0xdd0] sm:$0xff] }
 0x10c   :  { %3461 = vmatpush1.bf16.msra.mxu0 %v5566_v41  ;;  %3547 = vmatpush1.bf16.msra.mxu1 %v5568_v42  ;;  %v413_v41 = vld [vmem:[#allocation5 + $0xa18] sm:$0xff] }
 0x10d   :  { %3462 = vmatprep.subr.bf16.mxu0 %v5583_v43  ;;  %3548 = vmatprep.subr.bf16.mxu1 %v5585_v46  ;;  %v421_v42 = vld [vmem:[#allocation5 + $0xa58] sm:$0xff]  ;;  %v5694_v43 = vcombine.low %v396_v30, %v404_v31  ;;  %v428_v46 = vld [vmem:[#allocation5 + $0xa90] sm:$0xff] }
 0x10e   :  { %v5713_v45 = vcombine.high %v413_v41, %v421_v42  ;;  %v5712_v51 = vcombine.low %v413_v41, %v421_v42  ;;  %v5727_v52 = vcombine.high %v428_v46, %v436_v47  ;;  %v540_v41 = vld [vmem:[#allocation5 + $0xe10] sm:$0xff] }
 0x10f   :  { %v548_v42 = vld [vmem:[#allocation5 + $0xe50] sm:$0xff] }
 0x110   :  { %3463 = vmatpush1.bf16.msra.mxu0 %v5582_v48  ;;  %3549 = vmatpush1.bf16.msra.mxu1 %v5584_v49  ;;  %v429_v48 = vld [vmem:[#allocation5 + $0xa98] sm:$0xff] }
 0x111   :  { %3464 = vmatprep.subr.bf16.mxu0 %v5599_v50  ;;  %3550 = vmatprep.subr.bf16.mxu1 %v5601_v54  ;;  %v437_v49 = vld [vmem:[#allocation5 + $0xad8] sm:$0xff]  ;;  %v5710_v50 = vcombine.low %v412_v39, %v420_v40  ;;  %v444_v54 = vld [vmem:[#allocation5 + $0xb10] sm:$0xff]  ;;  %v5823_v39 = vcombine.high %v524_v33, %v532_v34 }
 0x112   :  { %v5729_v53 = vcombine.high %v429_v48, %v437_v49  ;;  %v5728_v60 = vcombine.low %v429_v48, %v437_v49  ;;  %v5743_v61 = vcombine.high %v444_v54, %v452_v55  ;;  %v556_v48 = vld [vmem:[#allocation5 + $0xe90] sm:$0xff] }
 0x113   :  { %v564_v49 = vld [vmem:[#allocation5 + $0xed0] sm:$0xff] }
 0x114   :  { %3465 = vmatpush1.bf16.msra.mxu0 %v5598_v57  ;;  %3551 = vmatpush1.bf16.msra.mxu1 %v5600_v58  ;;  %v445_v57 = vld [vmem:[#allocation5 + $0xb18] sm:$0xff] }
 0x115   :  { %3466 = vmatprep.subr.bf16.mxu0 %v5615_v59  ;;  %3552 = vmatprep.subr.bf16.mxu1 %v5617_v63  ;;  %v453_v58 = vld [vmem:[#allocation5 + $0xb58] sm:$0xff]  ;;  %v5726_v59 = vcombine.low %v428_v46, %v436_v47  ;;  %v460_v63 = vld [vmem:[#allocation5 + $0xb90] sm:$0xff]  ;;  %v5839_v46 = vcombine.high %v540_v41, %v548_v42 }
 0x116   :  { %v5745_v62 = vcombine.high %v445_v57, %v453_v58  ;;  %v5744_v4 = vcombine.low %v445_v57, %v453_v58  ;;  %v5759_v5 = vcombine.high %v460_v63, %v468_v0  ;;  %v572_v57 = vld [vmem:[#allocation5 + $0xf10] sm:$0xff] }
 0x117   :  { %v580_v58 = vld [vmem:[#allocation5 + $0xf50] sm:$0xff] }
 0x118   :  { %3467 = vmatpush1.bf16.msra.mxu0 %v5614_v1  ;;  %3553 = vmatpush1.bf16.msra.mxu1 %v5616_v2  ;;  %v461_v1 = vld [vmem:[#allocation5 + $0xb98] sm:$0xff] }
 0x119   :  { %3468 = vmatprep.subr.bf16.mxu0 %v5631_v3  ;;  %3554 = vmatprep.subr.bf16.mxu1 %v5633_v7  ;;  %v469_v2 = vld [vmem:[#allocation5 + $0xbd8] sm:$0xff]  ;;  %v5742_v3 = vcombine.low %v444_v54, %v452_v55  ;;  %v476_v7 = vld [vmem:[#allocation5 + $0xc10] sm:$0xff]  ;;  %v5855_v54 = vcombine.high %v556_v48, %v564_v49 }
 0x11a   :  { %v5761_v6 = vcombine.high %v461_v1, %v469_v2  ;;  %v5760_v12 = vcombine.low %v461_v1, %v469_v2  ;;  %v5775_v13 = vcombine.high %v476_v7, %v484_v8  ;;  %v588_v1 = vld [vmem:[#allocation5 + $0xf90] sm:$0xff] }
 0x11b   :  { %v596_v2 = vld [vmem:[#allocation5 + $0xfd0] sm:$0xff] }
 0x11c   :  { %3469 = vmatpush1.bf16.msra.mxu0 %v5630_v9  ;;  %3555 = vmatpush1.bf16.msra.mxu1 %v5632_v10  ;;  %v477_v9 = vld [vmem:[#allocation5 + $0xc18] sm:$0xff] }
 0x11d   :  { %3481 = vmatprep.subr.bf16.mxu0 %v5647_v11  ;;  %3567 = vmatprep.subr.bf16.mxu1 %v5649_v15  ;;  %v485_v10 = vld [vmem:[#allocation5 + $0xc58] sm:$0xff]  ;;  %v5758_v11 = vcombine.low %v460_v63, %v468_v0  ;;  %v492_v15 = vld [vmem:[#allocation5 + $0xc90] sm:$0xff]  ;;  %v5871_v63 = vcombine.high %v572_v57, %v580_v58 }
 0x11e   :  { %v5777_v14 = vcombine.high %v477_v9, %v485_v10  ;;  %v5776_v20 = vcombine.low %v477_v9, %v485_v10  ;;  %v5791_v21 = vcombine.high %v492_v15, %v500_v16  ;;  %v94_v9 = vld [vmem:[#allocation5 + $0x20] sm:$0xff] }
 0x11f   :  { %3471 = vmatmul.mubr.bf16.vlgmr.msra.gmra.mrb[4].mxu0 %v6670_v25  ;;  %3557 = vmatmul.mubr.bf16.vlgmr.msra.gmra.mrb[4].mxu1 %v6670_v25  ;;  %v102_v10 = vld [vmem:[#allocation5 + $0x60] sm:$0xff] }
 0x120   :  { %3482 = vmatpush1.bf16.msra.mxu0 %v5646_v17  ;;  %3568 = vmatpush1.bf16.msra.mxu1 %v5648_v18  ;;  %v493_v17 = vld [vmem:[#allocation5 + $0xc98] sm:$0xff] }
 0x121   :  { %3483 = vmatprep.subr.bf16.mxu0 %v5663_v19  ;;  %3569 = vmatprep.subr.bf16.mxu1 %v5665_v23  ;;  %v501_v18 = vld [vmem:[#allocation5 + $0xcd8] sm:$0xff]  ;;  %v5774_v19 = vcombine.low %v476_v7, %v484_v8  ;;  %v508_v23 = vld [vmem:[#allocation5 + $0xd10] sm:$0xff]  ;;  %v5887_v7 = vcombine.high %v588_v1, %v596_v2 }
 0x122   :  { %3513 = vmatprep.mubr.bf16.mxu0 %v6674_v32  ;;  %3599 = vmatprep.mubr.bf16.mxu1 %v6674_v32  ;;  %v5793_v22 = vcombine.high %v493_v17, %v501_v18  ;;  %v5807_v30 = vcombine.high %v508_v23, %v516_v24 }
 0x124   :  { %3484 = vmatpush1.bf16.msra.mxu0 %v5662_v26  ;;  %3570 = vmatpush1.bf16.msra.mxu1 %v5664_v27  ;;  %v509_v26 = vld [vmem:[#allocation5 + $0xd18] sm:$0xff] }
 0x125   :  { %3485 = vmatprep.subr.bf16.mxu0 %v5679_v28  ;;  %3571 = vmatprep.subr.bf16.mxu1 %v5681_v29  ;;  %v517_v27 = vld [vmem:[#allocation5 + $0xd58] sm:$0xff]  ;;  %v5790_v28 = vcombine.low %v492_v15, %v500_v16  ;;  %v5792_v29 = vcombine.low %v493_v17, %v501_v18  ;;  %v5395_v15 = vcombine.high %v94_v9, %v102_v10  ;;  %v110_v17 = vld [vmem:[#allocation5 + $0xa0] sm:$0xff] }
 0x126   :  { %v5809_v31 = vcombine.high %v509_v26, %v517_v27  ;;  %v118_v18 = vld [vmem:[#allocation5 + $0xe0] sm:$0xff] }
 0x128   :  { %3486 = vmatpush1.bf16.msra.mxu0 %v5678_v35  ;;  %3572 = vmatpush1.bf16.msra.mxu1 %v5680_v36  ;;  %v525_v35 = vld [vmem:[#allocation5 + $0xd98] sm:$0xff] }
 0x129   :  { %3487 = vmatprep.subr.bf16.mxu0 %v5695_v37  ;;  %3573 = vmatprep.subr.bf16.mxu1 %v5697_v38  ;;  %v533_v36 = vld [vmem:[#allocation5 + $0xdd8] sm:$0xff]  ;;  %v5806_v37 = vcombine.low %v508_v23, %v516_v24  ;;  %v5808_v38 = vcombine.low %v509_v26, %v517_v27  ;;  %v5411_v23 = vcombine.high %v110_v17, %v118_v18  ;;  %v126_v26 = vld [vmem:[#allocation5 + $0x120] sm:$0xff] }
 0x12a   :  { %v5825_v40 = vcombine.high %v525_v35, %v533_v36  ;;  %v134_v27 = vld [vmem:[#allocation5 + $0x160] sm:$0xff] }
 0x12c   :  { %3488 = vmatpush1.bf16.msra.mxu0 %v5694_v43  ;;  %3574 = vmatpush1.bf16.msra.mxu1 %v5696_v44  ;;  %v541_v43 = vld [vmem:[#allocation5 + $0xe18] sm:$0xff] }
 0x12d   :  { %3489 = vmatprep.subr.bf16.mxu0 %v5711_v56  ;;  %3575 = vmatprep.subr.bf16.mxu1 %v5713_v45  ;;  %v549_v44 = vld [vmem:[#allocation5 + $0xe58] sm:$0xff]  ;;  %v5822_v56 = vcombine.low %v524_v33, %v532_v34  ;;  %v5824_v45 = vcombine.low %v525_v35, %v533_v36  ;;  %v5427_v34 = vcombine.high %v126_v26, %v134_v27  ;;  %v142_v36 = vld [vmem:[#allocation5 + $0x1a0] sm:$0xff] }
 0x12e   :  { %v5841_v47 = vcombine.high %v541_v43, %v549_v44 }
 0x130   :  { %3490 = vmatpush1.bf16.msra.mxu0 %v5710_v50  ;;  %3576 = vmatpush1.bf16.msra.mxu1 %v5712_v51  ;;  %v557_v50 = vld [vmem:[#allocation5 + $0xe98] sm:$0xff] }
 0x131   :  { %3491 = vmatprep.subr.bf16.mxu0 %v5727_v52  ;;  %3577 = vmatprep.subr.bf16.mxu1 %v5729_v53  ;;  %v565_v51 = vld [vmem:[#allocation5 + $0xed8] sm:$0xff]  ;;  %v5838_v52 = vcombine.low %v540_v41, %v548_v42  ;;  %v5840_v53 = vcombine.low %v541_v43, %v549_v44  ;;  %v5426_v41 = vcombine.low %v126_v26, %v134_v27 }
 0x132   :  { %v5857_v55 = vcombine.high %v557_v50, %v565_v51 }
 0x134   :  { %3492 = vmatpush1.bf16.msra.mxu0 %v5726_v59  ;;  %3578 = vmatpush1.bf16.msra.mxu1 %v5728_v60  ;;  %v573_v59 = vld [vmem:[#allocation5 + $0xf18] sm:$0xff] }
 0x135   :  { %3493 = vmatprep.subr.bf16.mxu0 %v5743_v61  ;;  %3579 = vmatprep.subr.bf16.mxu1 %v5745_v62  ;;  %v581_v60 = vld [vmem:[#allocation5 + $0xf58] sm:$0xff]  ;;  %v5854_v61 = vcombine.low %v556_v48, %v564_v49  ;;  %v5856_v62 = vcombine.low %v557_v50, %v565_v51 }
 0x136   :  { %v5873_v0 = vcombine.high %v573_v59, %v581_v60 }
 0x138   :  { %3494 = vmatpush1.bf16.msra.mxu0 %v5742_v3  ;;  %3580 = vmatpush1.bf16.msra.mxu1 %v5744_v4  ;;  %v589_v3 = vld [vmem:[#allocation5 + $0xf98] sm:$0xff] }
 0x139   :  { %3495 = vmatprep.subr.bf16.mxu0 %v5759_v5  ;;  %3581 = vmatprep.subr.bf16.mxu1 %v5761_v6  ;;  %v597_v4 = vld [vmem:[#allocation5 + $0xfd8] sm:$0xff]  ;;  %v5870_v5 = vcombine.low %v572_v57, %v580_v58  ;;  %v5872_v6 = vcombine.low %v573_v59, %v581_v60 }
 0x13a   :  { %v5889_v8 = vcombine.high %v589_v3, %v597_v4 }
 0x13c   :  { %3496 = vmatpush1.bf16.msra.mxu0 %v5758_v11  ;;  %3582 = vmatpush1.bf16.msra.mxu1 %v5760_v12  ;;  %v95_v11 = vld [vmem:[#allocation5 + $0x28] sm:$0xff] }
 0x13d   :  { %3497 = vmatprep.subr.bf16.mxu0 %v5775_v13  ;;  %3583 = vmatprep.subr.bf16.mxu1 %v5777_v14  ;;  %v103_v12 = vld [vmem:[#allocation5 + $0x68] sm:$0xff]  ;;  %v5886_v13 = vcombine.low %v588_v1, %v596_v2  ;;  %v5888_v14 = vcombine.low %v589_v3, %v597_v4 }
 0x13e   :  { %v5397_v16 = vcombine.high %v95_v11, %v103_v12 }
 0x140   :  { %3498 = vmatpush1.bf16.msra.mxu0 %v5774_v19  ;;  %3584 = vmatpush1.bf16.msra.mxu1 %v5776_v20  ;;  %v111_v19 = vld [vmem:[#allocation5 + $0xa8] sm:$0xff] }
 0x141   :  { %3499 = vmatprep.subr.bf16.mxu0 %v5791_v21  ;;  %3585 = vmatprep.subr.bf16.mxu1 %v5793_v22  ;;  %v119_v20 = vld [vmem:[#allocation5 + $0xe8] sm:$0xff]  ;;  %v5394_v21 = vcombine.low %v94_v9, %v102_v10  ;;  %v5396_v22 = vcombine.low %v95_v11, %v103_v12 }
 0x142   :  { %v5413_v24 = vcombine.high %v111_v19, %v119_v20  ;;  %v5412_v33 = vcombine.low %v111_v19, %v119_v20 }
 0x144   :  { %3500 = vmatpush1.bf16.msra.mxu0 %v5790_v28  ;;  %3586 = vmatpush1.bf16.msra.mxu1 %v5792_v29  ;;  %v6678_v28 = vld [vmem:[#allocation2 + $0x8] ss:$16 sps:$4 sm:$0xff]  }
 0x145   :  { %3501 = vmatprep.subr.bf16.mxu0 %v5807_v30  ;;  %3587 = vmatprep.subr.bf16.mxu1 %v5809_v31  ;;  %v127_v29 = vld [vmem:[#allocation5 + $0x128] sm:$0xff]  ;;  %v5410_v31 = vcombine.low %v110_v17, %v118_v18 }
 0x146   :  { %v135_v30 = vld [vmem:[#allocation5 + $0x168] sm:$0xff] }
 0x147   :  { %v5429_v35 = vcombine.high %v127_v29, %v135_v30  ;;  %v5428_v42 = vcombine.low %v127_v29, %v135_v30 }
 0x148   :  { %3502 = vmatpush1.bf16.msra.mxu0 %v5806_v37  ;;  %3588 = vmatpush1.bf16.msra.mxu1 %v5808_v38  ;;  %v150_v37 = vld [vmem:[#allocation5 + $0x1e0] sm:$0xff] }
 0x149   :  { %3503 = vmatprep.subr.bf16.mxu0 %v5823_v39  ;;  %3589 = vmatprep.subr.bf16.mxu1 %v5825_v40  ;;  %v6682_v38 = vld [vmem:[#allocation2 + $0x4] ss:$16 sps:$4 sm:$0xff]   ;;  %v143_v39 = vld [vmem:[#allocation5 + $0x1a8] sm:$0xff]  ;;  %v5443_v43 = vcombine.high %v142_v36, %v150_v37  ;;  %v5442_v48 = vcombine.low %v142_v36, %v150_v37 }
 0x14a   :  { %v151_v40 = vld [vmem:[#allocation5 + $0x1e8] sm:$0xff] }
 0x14b   :  { %v5445_v44 = vcombine.high %v143_v39, %v151_v40  ;;  %v5444_v49 = vcombine.low %v143_v39, %v151_v40 }
 0x14c   :  { %3504 = vmatpush1.bf16.msra.mxu0 %v5822_v56  ;;  %3590 = vmatpush1.bf16.msra.mxu1 %v5824_v45  ;;  %v158_v56 = vld [vmem:[#allocation5 + $0x220] sm:$0xff] }
 0x14d   :  { %3505 = vmatprep.subr.bf16.mxu0 %v5839_v46  ;;  %3591 = vmatprep.subr.bf16.mxu1 %v5841_v47  ;;  %v166_v45 = vld [vmem:[#allocation5 + $0x260] sm:$0xff]  ;;  %v159_v46 = vld [vmem:[#allocation5 + $0x228] sm:$0xff] }
 0x14e   :  { %v167_v47 = vld [vmem:[#allocation5 + $0x268] sm:$0xff]  ;;  %v5459_v50 = vcombine.high %v158_v56, %v166_v45  ;;  %v5458_v57 = vcombine.low %v158_v56, %v166_v45 }
 0x14f   :  { %v5461_v51 = vcombine.high %v159_v46, %v167_v47  ;;  %v5460_v58 = vcombine.low %v159_v46, %v167_v47 }
 0x150   :  { %3506 = vmatpush1.bf16.msra.mxu0 %v5838_v52  ;;  %3592 = vmatpush1.bf16.msra.mxu1 %v5840_v53  ;;  %v174_v52 = vld [vmem:[#allocation5 + $0x2a0] sm:$0xff] }
 0x151   :  { %3507 = vmatprep.subr.bf16.mxu0 %v5855_v54  ;;  %3593 = vmatprep.subr.bf16.mxu1 %v5857_v55  ;;  %v182_v53 = vld [vmem:[#allocation5 + $0x2e0] sm:$0xff]  ;;  %v175_v54 = vld [vmem:[#allocation5 + $0x2a8] sm:$0xff] }
 0x152   :  { %v183_v55 = vld [vmem:[#allocation5 + $0x2e8] sm:$0xff]  ;;  %v5475_v59 = vcombine.high %v174_v52, %v182_v53  ;;  %v5474_v1 = vcombine.low %v174_v52, %v182_v53 }
 0x153   :  { %v5477_v60 = vcombine.high %v175_v54, %v183_v55  ;;  %v5476_v2 = vcombine.low %v175_v54, %v183_v55 }
 0x154   :  { %3508 = vmatpush1.bf16.msra.mxu0 %v5854_v61  ;;  %3594 = vmatpush1.bf16.msra.mxu1 %v5856_v62  ;;  %v190_v61 = vld [vmem:[#allocation5 + $0x320] sm:$0xff] }
 0x155   :  { %3509 = vmatprep.subr.bf16.mxu0 %v5871_v63  ;;  %3595 = vmatprep.subr.bf16.mxu1 %v5873_v0  ;;  %v198_v62 = vld [vmem:[#allocation5 + $0x360] sm:$0xff]  ;;  %v191_v63 = vld [vmem:[#allocation5 + $0x328] sm:$0xff] }
 0x156   :  { %v199_v0 = vld [vmem:[#allocation5 + $0x368] sm:$0xff]  ;;  %v5491_v3 = vcombine.high %v190_v61, %v198_v62  ;;  %v5490_v9 = vcombine.low %v190_v61, %v198_v62 }
 0x157   :  { %v5493_v4 = vcombine.high %v191_v63, %v199_v0  ;;  %v5492_v10 = vcombine.low %v191_v63, %v199_v0 }
 0x158   :  { %3510 = vmatpush1.bf16.msra.mxu0 %v5870_v5  ;;  %3596 = vmatpush1.bf16.msra.mxu1 %v5872_v6  ;;  %v206_v5 = vld [vmem:[#allocation5 + $0x3a0] sm:$0xff] }
 0x159   :  { %3511 = vmatprep.subr.bf16.mxu0 %v5887_v7  ;;  %3597 = vmatprep.subr.bf16.mxu1 %v5889_v8  ;;  %v214_v6 = vld [vmem:[#allocation5 + $0x3e0] sm:$0xff]  ;;  %v207_v7 = vld [vmem:[#allocation5 + $0x3a8] sm:$0xff] }
 0x15a   :  { %v215_v8 = vld [vmem:[#allocation5 + $0x3e8] sm:$0xff]  ;;  %v5507_v11 = vcombine.high %v206_v5, %v214_v6  ;;  %v5506_v17 = vcombine.low %v206_v5, %v214_v6 }
 0x15b   :  { %v5509_v12 = vcombine.high %v207_v7, %v215_v8  ;;  %v5508_v18 = vcombine.low %v207_v7, %v215_v8 }
 0x15c   :  { %3512 = vmatpush1.bf16.msra.mxu0 %v5886_v13  ;;  %3598 = vmatpush1.bf16.msra.mxu1 %v5888_v14  ;;  %v222_v13 = vld [vmem:[#allocation5 + $0x420] sm:$0xff] }
 0x15d   :  { %3610 = vmatprep.subr.bf16.mxu0 %v5395_v15  ;;  %3696 = vmatprep.subr.bf16.mxu1 %v5397_v16  ;;  %v230_v14 = vld [vmem:[#allocation5 + $0x460] sm:$0xff]  ;;  %v223_v15 = vld [vmem:[#allocation5 + $0x428] sm:$0xff] }
 0x15e   :  { %v231_v16 = vld [vmem:[#allocation5 + $0x468] sm:$0xff]  ;;  %v5523_v19 = vcombine.high %v222_v13, %v230_v14  ;;  %v5522_v26 = vcombine.low %v222_v13, %v230_v14 }
 0x15f   :  { %3514 = vmatmul.mubr.bf16.vlgmr.msra.gmra.mrb[4].mxu0 %v6678_v28  ;;  %3600 = vmatmul.mubr.bf16.vlgmr.msra.gmra.mrb[4].mxu1 %v6678_v28  ;;  %v5525_v20 = vcombine.high %v223_v15, %v231_v16  ;;  %v5524_v27 = vcombine.low %v223_v15, %v231_v16 }
 0x160   :  { %3611 = vmatpush1.bf16.msra.mxu0 %v5394_v21  ;;  %3697 = vmatpush1.bf16.msra.mxu1 %v5396_v22  ;;  %v238_v21 = vld [vmem:[#allocation5 + $0x4a0] sm:$0xff] }
 0x161   :  { %3612 = vmatprep.subr.bf16.mxu0 %v5411_v23  ;;  %3698 = vmatprep.subr.bf16.mxu1 %v5413_v24  ;;  %v246_v22 = vld [vmem:[#allocation5 + $0x4e0] sm:$0xff]  ;;  %v239_v23 = vld [vmem:[#allocation5 + $0x4a8] sm:$0xff] }
 0x162   :  { %3642 = vmatprep.mubr.bf16.mxu0 %v6682_v38  ;;  %3728 = vmatprep.mubr.bf16.mxu1 %v6682_v38  ;;  %v247_v24 = vld [vmem:[#allocation5 + $0x4e8] sm:$0xff]  ;;  %v5539_v29 = vcombine.high %v238_v21, %v246_v22  ;;  %v5538_v36 = vcombine.low %v238_v21, %v246_v22 }
 0x163   :  { %v5541_v30 = vcombine.high %v239_v23, %v247_v24  ;;  %v5540_v37 = vcombine.low %v239_v23, %v247_v24 }
 0x164   :  { %3613 = vmatpush1.bf16.msra.mxu0 %v5410_v31  ;;  %3699 = vmatpush1.bf16.msra.mxu1 %v5412_v33  ;;  %v254_v31 = vld [vmem:[#allocation5 + $0x520] sm:$0xff] }
 0x165   :  { %3614 = vmatprep.subr.bf16.mxu0 %v5427_v34  ;;  %3700 = vmatprep.subr.bf16.mxu1 %v5429_v35  ;;  %v262_v33 = vld [vmem:[#allocation5 + $0x560] sm:$0xff]  ;;  %v255_v34 = vld [vmem:[#allocation5 + $0x528] sm:$0xff] }
 0x166   :  { %v263_v35 = vld [vmem:[#allocation5 + $0x568] sm:$0xff]  ;;  %v5555_v39 = vcombine.high %v254_v31, %v262_v33  ;;  %v5554_v56 = vcombine.low %v254_v31, %v262_v33 }
 0x167   :  { %v5557_v40 = vcombine.high %v255_v34, %v263_v35  ;;  %v5556_v45 = vcombine.low %v255_v34, %v263_v35 }
 0x168   :  { %3615 = vmatpush1.bf16.msra.mxu0 %v5426_v41  ;;  %3701 = vmatpush1.bf16.msra.mxu1 %v5428_v42  ;;  %v270_v41 = vld [vmem:[#allocation5 + $0x5a0] sm:$0xff] }
 0x169   :  { %3616 = vmatprep.subr.bf16.mxu0 %v5443_v43  ;;  %3702 = vmatprep.subr.bf16.mxu1 %v5445_v44  ;;  %v278_v42 = vld [vmem:[#allocation5 + $0x5e0] sm:$0xff]  ;;  %v271_v43 = vld [vmem:[#allocation5 + $0x5a8] sm:$0xff] }
 0x16a   :  { %v279_v44 = vld [vmem:[#allocation5 + $0x5e8] sm:$0xff]  ;;  %v5571_v46 = vcombine.high %v270_v41, %v278_v42  ;;  %v5570_v52 = vcombine.low %v270_v41, %v278_v42 }
 0x16b   :  { %v5573_v47 = vcombine.high %v271_v43, %v279_v44  ;;  %v5572_v53 = vcombine.low %v271_v43, %v279_v44 }
 0x16c   :  { %3617 = vmatpush1.bf16.msra.mxu0 %v5442_v48  ;;  %3703 = vmatpush1.bf16.msra.mxu1 %v5444_v49  ;;  %v286_v48 = vld [vmem:[#allocation5 + $0x620] sm:$0xff] }
 0x16d   :  { %3618 = vmatprep.subr.bf16.mxu0 %v5459_v50  ;;  %3704 = vmatprep.subr.bf16.mxu1 %v5461_v51  ;;  %v294_v49 = vld [vmem:[#allocation5 + $0x660] sm:$0xff]  ;;  %v287_v50 = vld [vmem:[#allocation5 + $0x628] sm:$0xff] }
 0x16e   :  { %v295_v51 = vld [vmem:[#allocation5 + $0x668] sm:$0xff]  ;;  %v5587_v54 = vcombine.high %v286_v48, %v294_v49  ;;  %v5586_v61 = vcombine.low %v286_v48, %v294_v49  ;;  %v606_v48 = vlaneseq }
 0x16f   :  { %v5589_v55 = vcombine.high %v287_v50, %v295_v51  ;;  %v5588_v62 = vcombine.low %v287_v50, %v295_v51 }
 0x170   :  { %3619 = vmatpush1.bf16.msra.mxu0 %v5458_v57  ;;  %3705 = vmatpush1.bf16.msra.mxu1 %v5460_v58  ;;  %v302_v57 = vld [vmem:[#allocation5 + $0x6a0] sm:$0xff] }
 0x171   :  { %3620 = vmatprep.subr.bf16.mxu0 %v5475_v59  ;;  %3706 = vmatprep.subr.bf16.mxu1 %v5477_v60  ;;  %v310_v58 = vld [vmem:[#allocation5 + $0x6e0] sm:$0xff]  ;;  %v303_v59 = vld [vmem:[#allocation5 + $0x6a8] sm:$0xff] }
 0x172   :  { %v311_v60 = vld [vmem:[#allocation5 + $0x6e8] sm:$0xff]  ;;  %v5603_v63 = vcombine.high %v302_v57, %v310_v58  ;;  %v5602_v5 = vcombine.low %v302_v57, %v310_v58  ;;  %v6690_v57 = vshrl.u32 %v606_v48, 7 }
 0x173   :  { %v5605_v0 = vcombine.high %v303_v59, %v311_v60  ;;  %v5604_v6 = vcombine.low %v303_v59, %v311_v60 }
 0x174   :  { %3621 = vmatpush1.bf16.msra.mxu0 %v5474_v1  ;;  %3707 = vmatpush1.bf16.msra.mxu1 %v5476_v2  ;;  %v318_v1 = vld [vmem:[#allocation5 + $0x720] sm:$0xff] }
 0x175   :  { %3622 = vmatprep.subr.bf16.mxu0 %v5491_v3  ;;  %3708 = vmatprep.subr.bf16.mxu1 %v5493_v4  ;;  %v326_v2 = vld [vmem:[#allocation5 + $0x760] sm:$0xff]  ;;  %v319_v3 = vld [vmem:[#allocation5 + $0x728] sm:$0xff] }
 0x176   :  { %v327_v4 = vld [vmem:[#allocation5 + $0x768] sm:$0xff]  ;;  %v5619_v7 = vcombine.high %v318_v1, %v326_v2  ;;  %v5618_v13 = vcombine.low %v318_v1, %v326_v2 }
 0x177   :  { %v5621_v8 = vcombine.high %v319_v3, %v327_v4  ;;  %v5620_v14 = vcombine.low %v319_v3, %v327_v4  ;;  %v439_v1 = vld [vmem:[#allocation5 + $0xae8] sm:$0xff]  ;;  %v6693_v3 = vld [vmem:[#allocation7] sm:$0xff]  ;;  %v616_v4 = vsub.s32 2, %v6690_v57 }
 0x178   :  { %3623 = vmatpush1.bf16.msra.mxu0 %v5490_v9  ;;  %3709 = vmatpush1.bf16.msra.mxu1 %v5492_v10  ;;  %v334_v9 = vld [vmem:[#allocation5 + $0x7a0] sm:$0xff] }
 0x179   :  { %3624 = vmatprep.subr.bf16.mxu0 %v5507_v11  ;;  %3710 = vmatprep.subr.bf16.mxu1 %v5509_v12  ;;  %v342_v10 = vld [vmem:[#allocation5 + $0x7e0] sm:$0xff]  ;;  %v335_v11 = vld [vmem:[#allocation5 + $0x7a8] sm:$0xff] }
 0x17a   :  { %v343_v12 = vld [vmem:[#allocation5 + $0x7e8] sm:$0xff]  ;;  %v5635_v15 = vcombine.high %v334_v9, %v342_v10  ;;  %v5634_v21 = vcombine.low %v334_v9, %v342_v10  ;;  %v446_v10 = vld [vmem:[#allocation5 + $0xb20] sm:$0xff] }
 0x17b   :  { %v5637_v16 = vcombine.high %v335_v11, %v343_v12  ;;  %v5636_v22 = vcombine.low %v335_v11, %v343_v12  ;;  %v454_v11 = vld [vmem:[#allocation5 + $0xb60] sm:$0xff] }
 0x17c   :  { %3625 = vmatpush1.bf16.msra.mxu0 %v5506_v17  ;;  %3711 = vmatpush1.bf16.msra.mxu1 %v5508_v18  ;;  %v350_v17 = vld [vmem:[#allocation5 + $0x820] sm:$0xff] }
 0x17d   :  { %3626 = vmatprep.subr.bf16.mxu0 %v5523_v19  ;;  %3712 = vmatprep.subr.bf16.mxu1 %v5525_v20  ;;  %v358_v18 = vld [vmem:[#allocation5 + $0x860] sm:$0xff]  ;;  %v351_v19 = vld [vmem:[#allocation5 + $0x828] sm:$0xff] }
 0x17e   :  { %v359_v20 = vld [vmem:[#allocation5 + $0x868] sm:$0xff]  ;;  %v5651_v23 = vcombine.high %v350_v17, %v358_v18  ;;  %v5650_v31 = vcombine.low %v350_v17, %v358_v18 }
 0x17f   :  { %v5653_v24 = vcombine.high %v351_v19, %v359_v20  ;;  %v5652_v33 = vcombine.low %v351_v19, %v359_v20  ;;  %v5747_v20 = vcombine.high %v446_v10, %v454_v11 }
 0x180   :  { %3627 = vmatpush1.bf16.msra.mxu0 %v5522_v26  ;;  %3713 = vmatpush1.bf16.msra.mxu1 %v5524_v27  ;;  %v366_v26 = vld [vmem:[#allocation5 + $0x8a0] sm:$0xff] }
 0x181   :  { %3628 = vmatprep.subr.bf16.mxu0 %v5539_v29  ;;  %3714 = vmatprep.subr.bf16.mxu1 %v5541_v30  ;;  %v374_v27 = vld [vmem:[#allocation5 + $0x8e0] sm:$0xff]  ;;  %v367_v29 = vld [vmem:[#allocation5 + $0x8a8] sm:$0xff] }
 0x182   :  { %v375_v30 = vld [vmem:[#allocation5 + $0x8e8] sm:$0xff]  ;;  %v5667_v34 = vcombine.high %v366_v26, %v374_v27  ;;  %v5666_v41 = vcombine.low %v366_v26, %v374_v27 }
 0x183   :  { %v5669_v35 = vcombine.high %v367_v29, %v375_v30  ;;  %v5668_v42 = vcombine.low %v367_v29, %v375_v30  ;;  %v463_v30 = vld [vmem:[#allocation5 + $0xba8] sm:$0xff] }
 0x184   :  { %3629 = vmatpush1.bf16.msra.mxu0 %v5538_v36  ;;  %3715 = vmatpush1.bf16.msra.mxu1 %v5540_v37  ;;  %v382_v36 = vld [vmem:[#allocation5 + $0x920] sm:$0xff] }
 0x185   :  { %3630 = vmatprep.subr.bf16.mxu0 %v5555_v39  ;;  %3716 = vmatprep.subr.bf16.mxu1 %v5557_v40  ;;  %v390_v37 = vld [vmem:[#allocation5 + $0x960] sm:$0xff]  ;;  %v383_v39 = vld [vmem:[#allocation5 + $0x928] sm:$0xff] }
 0x186   :  { %v391_v40 = vld [vmem:[#allocation5 + $0x968] sm:$0xff]  ;;  %v5683_v43 = vcombine.high %v382_v36, %v390_v37  ;;  %v5682_v49 = vcombine.low %v382_v36, %v390_v37  ;;  %v5746_v37 = vcombine.low %v446_v10, %v454_v11  ;;  %v502_v10 = vld [vmem:[#allocation5 + $0xce0] sm:$0xff] }
 0x187   :  { %v5685_v44 = vcombine.high %v383_v39, %v391_v40 }
 0x188   :  { %3631 = vmatpush1.bf16.msra.mxu0 %v5554_v56  ;;  %3717 = vmatpush1.bf16.msra.mxu1 %v5556_v45  ;;  %v398_v56 = vld [vmem:[#allocation5 + $0x9a0] sm:$0xff] }
 0x189   :  { %3632 = vmatprep.subr.bf16.mxu0 %v5571_v46  ;;  %3718 = vmatprep.subr.bf16.mxu1 %v5573_v47  ;;  %v406_v45 = vld [vmem:[#allocation5 + $0x9e0] sm:$0xff]  ;;  %v399_v46 = vld [vmem:[#allocation5 + $0x9a8] sm:$0xff] }
 0x18a   :  { %v407_v47 = vld [vmem:[#allocation5 + $0x9e8] sm:$0xff]  ;;  %v5699_v50 = vcombine.high %v398_v56, %v406_v45  ;;  %v5698_v58 = vcombine.low %v398_v56, %v406_v45 }
 0x18b   :  { %v5701_v51 = vcombine.high %v399_v46, %v407_v47  ;;  %v5700_v59 = vcombine.low %v399_v46, %v407_v47 }
 0x18c   :  { %3633 = vmatpush1.bf16.msra.mxu0 %v5570_v52  ;;  %3719 = vmatpush1.bf16.msra.mxu1 %v5572_v53  ;;  %v414_v52 = vld [vmem:[#allocation5 + $0xa20] sm:$0xff] }
 0x18d   :  { %3634 = vmatprep.subr.bf16.mxu0 %v5587_v54  ;;  %3720 = vmatprep.subr.bf16.mxu1 %v5589_v55  ;;  %v422_v53 = vld [vmem:[#allocation5 + $0xa60] sm:$0xff]  ;;  %v415_v54 = vld [vmem:[#allocation5 + $0xa28] sm:$0xff] }
 0x18e   :  { %v423_v55 = vld [vmem:[#allocation5 + $0xa68] sm:$0xff]  ;;  %v5714_v2 = vcombine.low %v414_v52, %v422_v53 }
 0x18f   :  { %v5717_v60 = vcombine.high %v415_v54, %v423_v55 }
 0x190   :  { %3635 = vmatpush1.bf16.msra.mxu0 %v5586_v61  ;;  %3721 = vmatpush1.bf16.msra.mxu1 %v5588_v62  ;;  %v430_v61 = vld [vmem:[#allocation5 + $0xaa0] sm:$0xff] }
 0x191   :  { %3636 = vmatprep.subr.bf16.mxu0 %v5603_v63  ;;  %3722 = vmatprep.subr.bf16.mxu1 %v5605_v0  ;;  %v438_v62 = vld [vmem:[#allocation5 + $0xae0] sm:$0xff]  ;;  %v608_v63 = vsub.s32 0, %v6690_v57  ;;  %v431_v0 = vld [vmem:[#allocation5 + $0xaa8] sm:$0xff] }
 0x192   :  { %v5733_v9 = vcombine.high %v431_v0, %v439_v1  ;;  %v5730_v17 = vcombine.low %v430_v61, %v438_v62  ;;  %v5732_v19 = vcombine.low %v431_v0, %v439_v1 }
 0x193   :  { %v609_v12 = vrot.slane %v6693_v3, %v608_v63 }
 0x194   :  { %3637 = vmatpush1.bf16.msra.mxu0 %v5602_v5  ;;  %3723 = vmatpush1.bf16.msra.mxu1 %v5604_v6  ;;  %v612_v5 = vsub.s32 1, %v6690_v57  ;;  %v5716_v6 = vcombine.low %v415_v54, %v423_v55  ;;  %v479_v54 = vld [vmem:[#allocation5 + $0xc28] sm:$0xff] }
 0x195   :  { %3638 = vmatprep.subr.bf16.mxu0 %v5619_v7  ;;  %3724 = vmatprep.subr.bf16.mxu1 %v5621_v8  ;;  %v620_v7 = vsub.s32 3, %v6690_v57  ;;  %v5731_v8 = vcombine.high %v430_v61, %v438_v62  ;;  %v487_v55 = vld [vmem:[#allocation5 + $0xc68] sm:$0xff] }
 0x197   :  { %v621_v18 = vrot.slane %v6693_v3, %v620_v7 }
 0x198   :  { %3639 = vmatpush1.bf16.msra.mxu0 %v5618_v13  ;;  %3725 = vmatpush1.bf16.msra.mxu1 %v5620_v14  ;;  %v447_v13 = vld [vmem:[#allocation5 + $0xb28] sm:$0xff] }
 0x199   :  { %3640 = vmatprep.subr.bf16.mxu0 %v5635_v15  ;;  %3726 = vmatprep.subr.bf16.mxu1 %v5637_v16  ;;  %v455_v14 = vld [vmem:[#allocation5 + $0xb68] sm:$0xff]  ;;  %v617_v15 = vrot.slane %v6693_v3, %v616_v4  ;;  %v613_v16 = vrot.slane %v6693_v3, %v612_v5 }
 0x19c   :  { %3641 = vmatpush1.bf16.msra.mxu0 %v5634_v21  ;;  %3727 = vmatpush1.bf16.msra.mxu1 %v5636_v22  ;;  %v5749_v22 = vcombine.high %v447_v13, %v455_v14 }
 0x19d   :  { %3653 = vmatprep.subr.bf16.mxu0 %v5651_v23  ;;  %3739 = vmatprep.subr.bf16.mxu1 %v5653_v24  ;;  %v462_v23 = vld [vmem:[#allocation5 + $0xba0] sm:$0xff] }
 0x19e   :  { %v470_v24 = vld [vmem:[#allocation5 + $0xbe0] sm:$0xff] }
 0x19f   :  { %3643 = vmatmul.mubr.bf16.vlgmr.msra.gmra.mrb[8].mxu0 %v6670_v25  ;;  %3729 = vmatmul.mubr.bf16.vlgmr.msra.gmra.mrb[8].mxu1 %v6670_v25  ;;  %v5684_v25 = vcombine.low %v383_v39, %v391_v40  ;;  %v5748_v39 = vcombine.low %v447_v13, %v455_v14  ;;  %v5762_v47 = vcombine.low %v462_v23, %v470_v24  ;;  %v503_v13 = vld [vmem:[#allocation5 + $0xce8] sm:$0xff] }
 0x1a0   :  { %3654 = vmatpush1.bf16.msra.mxu0 %v5650_v31  ;;  %3740 = vmatpush1.bf16.msra.mxu1 %v5652_v33  ;;  %v471_v31 = vld [vmem:[#allocation5 + $0xbe8] sm:$0xff] }
 0x1a1   :  { %3655 = vmatprep.subr.bf16.mxu0 %v5667_v34  ;;  %3741 = vmatprep.subr.bf16.mxu1 %v5669_v35  ;;  %v5765_v48 = vcombine.high %v463_v30, %v471_v31 }
 0x1a2   :  { %3685 = vmatprep.mubr.bf16.mxu0 %v6674_v32  ;;  %3771 = vmatprep.mubr.bf16.mxu1 %v6674_v32  ;;  %v5715_v32 = vcombine.high %v414_v52, %v422_v53  ;;  %v5764_v53 = vcombine.low %v463_v30, %v471_v31  ;;  %v527_v30 = vld [vmem:[#allocation5 + $0xda8] sm:$0xff] }
 0x1a3   :  { %v535_v31 = vld [vmem:[#allocation5 + $0xde8] sm:$0xff] }
 0x1a4   :  { %3656 = vmatpush1.bf16.msra.mxu0 %v5666_v41  ;;  %3742 = vmatpush1.bf16.msra.mxu1 %v5668_v42 }
 0x1a5   :  { %3657 = vmatprep.subr.bf16.mxu0 %v5683_v43  ;;  %3743 = vmatprep.subr.bf16.mxu1 %v5685_v44  ;;  %v5763_v44 = vcombine.high %v462_v23, %v470_v24 }
 0x1a8   :  { %3658 = vmatpush1.bf16.msra.mxu0 %v5682_v49  ;;  %3744 = vmatpush1.bf16.msra.mxu1 %v5684_v25  ;;  %v478_v49 = vld [vmem:[#allocation5 + $0xc20] sm:$0xff] }
 0x1a9   :  { %3659 = vmatprep.subr.bf16.mxu0 %v5699_v50  ;;  %3745 = vmatprep.subr.bf16.mxu1 %v5701_v51  ;;  %v486_v25 = vld [vmem:[#allocation5 + $0xc60] sm:$0xff] }
 0x1aa   :  { %v5779_v1 = vcombine.high %v478_v49, %v486_v25  ;;  %v5778_v14 = vcombine.low %v478_v49, %v486_v25 }
 0x1ac   :  { %3660 = vmatpush1.bf16.msra.mxu0 %v5698_v58  ;;  %3746 = vmatpush1.bf16.msra.mxu1 %v5700_v59 }
 0x1ad   :  { %3661 = vmatprep.subr.bf16.mxu0 %v5715_v32  ;;  %3747 = vmatprep.subr.bf16.mxu1 %v5717_v60 }
 0x1b0   :  { %3662 = vmatpush1.bf16.msra.mxu0 %v5714_v2  ;;  %3748 = vmatpush1.bf16.msra.mxu1 %v5716_v6 }
 0x1b1   :  { %3663 = vmatprep.subr.bf16.mxu0 %v5731_v8  ;;  %3749 = vmatprep.subr.bf16.mxu1 %v5733_v9  ;;  %v5781_v8 = vcombine.high %v479_v54, %v487_v55  ;;  %v494_v9 = vld [vmem:[#allocation5 + $0xca0] sm:$0xff] }
 0x1b2   :  { %v3343_v21 = vpop.f32.mrb[0].mxu0  ;;  %v3429_v27 = vpop.f32.mrb[0].mxu1 }
 0x1b3   :  { %v6203_v26 = vadd.f32 %v3343_v21, %v609_v12  ;;  %v3345_v29 = vpop.f32.mrb[1].mxu0  ;;  %v6207_v33 = vadd.f32 %v3429_v27, %v617_v15  ;;  %v3431_v35 = vpop.f32.mrb[1].mxu1  ;;  %v519_v21 = vld [vmem:[#allocation5 + $0xd68] sm:$0xff]  ;;  %v526_v27 = vld [vmem:[#allocation5 + $0xda0] sm:$0xff] }
 0x1b4   :  { %v6204_v34 = vadd.f32 %v3345_v29, %v613_v16  ;;  %v3347_v36 = vpop.f32.mrb[2].mxu0  ;;  %3664 = vmatpush1.bf16.msra.mxu0 %v5730_v17  ;;  %v6208_v40 = vadd.f32 %v3431_v35, %v621_v18  ;;  %v3433_v42 = vpop.f32.mrb[2].mxu1  ;;  %3750 = vmatpush1.bf16.msra.mxu1 %v5732_v19  ;;  %v518_v19 = vld [vmem:[#allocation5 + $0xd60] sm:$0xff] }
 0x1b5   :  { %v6205_v41 = vadd.f32 %v3347_v36, %v609_v12  ;;  %v3349_v43 = vpop.f32.mrb[3].mxu0  ;;  %3665 = vmatprep.subr.bf16.mxu0 %v5747_v20  ;;  %v6209_v56 = vadd.f32 %v3433_v42, %v617_v15  ;;  %v3435_v46 = vpop.f32.mrb[3].mxu1  ;;  %3751 = vmatprep.subr.bf16.mxu1 %v5749_v22  ;;  %v3954_v50 = vmax.f32 %v6203_v26, 0.0  ;;  %v3956_v58 = vmax.f32 %v6207_v33, 0.0  ;;  %v495_v12 = vld [vmem:[#allocation5 + $0xca8] sm:$0xff]  ;;  %v534_v29 = vld [vmem:[#allocation5 + $0xde0] sm:$0xff] }
 0x1b6   :  { %v6206_v45 = vadd.f32 %v3349_v43, %v613_v16  ;;  %v6210_v52 = vadd.f32 %v3435_v46, %v621_v18  ;;  %v3955_v59 = vmax.f32 %v6204_v34, 0.0  ;;  %v3957_v61 = vmax.f32 %v6208_v40, 0.0  ;;  %v510_v18 = vld [vmem:[#allocation5 + $0xd20] sm:$0xff]  ;;  %v511_v20 = vld [vmem:[#allocation5 + $0xd28] sm:$0xff] }
 0x1b7   :  { %v3970_v51 = vmax.f32 %v6205_v41, 0.0  ;;  %v3972_v32 = vmax.f32 %v6209_v56, 0.0  ;;  %v5780_v15 = vcombine.low %v479_v54, %v487_v55  ;;  %v5795_v16 = vcombine.high %v494_v9, %v502_v10  ;;  %v543_v40 = vld [vmem:[#allocation5 + $0xe28] sm:$0xff]  ;;  %v566_v46 = vld [vmem:[#allocation5 + $0xee0] sm:$0xff] }
 0x1b8   :  { %v3971_v60 = vmax.f32 %v6206_v45, 0.0  ;;  %3666 = vmatpush1.bf16.msra.mxu0 %v5746_v37  ;;  %v3973_v0 = vmax.f32 %v6210_v52, 0.0  ;;  %3752 = vmatpush1.bf16.msra.mxu1 %v5748_v39  ;;  %v5797_v17 = vcombine.high %v495_v12, %v503_v13  ;;  %v5794_v22 = vcombine.low %v494_v9, %v502_v10  ;;  %v542_v37 = vld [vmem:[#allocation5 + $0xe20] sm:$0xff]  ;;  %v551_v41 = vld [vmem:[#allocation5 + $0xe68] sm:$0xff] }
 0x1b9   :  { %v6710_v62 = vpack.c.bf16 %v3970_v51, %v3954_v50  ;;  %3667 = vmatprep.subr.bf16.mxu0 %v5763_v44  ;;  %v6712_v2 = vpack.c.bf16 %v3972_v32, %v3956_v58  ;;  %3753 = vmatprep.subr.bf16.mxu1 %v5765_v48  ;;  %v5796_v23 = vcombine.low %v495_v12, %v503_v13  ;;  %v550_v39 = vld [vmem:[#allocation5 + $0xe60] sm:$0xff]  ;;  %v567_v48 = vld [vmem:[#allocation5 + $0xee8] sm:$0xff] }
 0x1ba   :  { %v6714_v6 = vpack.c.bf16 %v3971_v60, %v3955_v59  ;;  %v6716_v11 = vpack.c.bf16 %v3973_v0, %v3957_v61  ;;  %v5811_v24 = vcombine.high %v510_v18, %v518_v19  ;;  %v5813_v26 = vcombine.high %v511_v20, %v519_v21  ;;  %v558_v45 = vld [vmem:[#allocation5 + $0xea0] sm:$0xff]  ;;  %v575_v54 = vld [vmem:[#allocation5 + $0xf28] sm:$0xff] }
 0x1bb   :  { %v5810_v33 = vcombine.low %v510_v18, %v518_v19  ;;  %v5812_v34 = vcombine.low %v511_v20, %v519_v21  ;;  %v5827_v35 = vcombine.high %v526_v27, %v534_v29  ;;  %v5829_v36 = vcombine.high %v527_v30, %v535_v31  ;;  %v574_v52 = vld [vmem:[#allocation5 + $0xf20] sm:$0xff]  ;;  %v583_v55 = vld [vmem:[#allocation5 + $0xf68] sm:$0xff] }
 0x1bc   :  { %3668 = vmatpush1.bf16.msra.mxu0 %v5762_v47  ;;  %3754 = vmatpush1.bf16.msra.mxu1 %v5764_v53  ;;  %v5826_v42 = vcombine.low %v526_v27, %v534_v29  ;;  %v5828_v43 = vcombine.low %v527_v30, %v535_v31  ;;  %v5843_v44 = vcombine.high %v542_v37, %v550_v39  ;;  %v559_v47 = vld [vmem:[#allocation5 + $0xea8] sm:$0xff]  ;;  %v582_v53 = vld [vmem:[#allocation5 + $0xf60] sm:$0xff] }
 0x1bd   :  { %3669 = vmatprep.subr.bf16.mxu0 %v5779_v1  ;;  %3755 = vmatprep.subr.bf16.mxu1 %v5781_v8  ;;  %v5845_v56 = vcombine.high %v543_v40, %v551_v41  ;;  %v5842_v49 = vcombine.low %v542_v37, %v550_v39  ;;  %v5844_v25 = vcombine.low %v543_v40, %v551_v41  ;;  %v590_v61 = vld [vmem:[#allocation5 + $0xfa0] sm:$0xff]  ;;  %v591_v1 = vld [vmem:[#allocation5 + $0xfa8] sm:$0xff] }
 0x1be   :  { %v5859_v50 = vcombine.high %v558_v45, %v566_v46  ;;  %v5861_v51 = vcombine.high %v559_v47, %v567_v48  ;;  %v5858_v58 = vcombine.low %v558_v45, %v566_v46  ;;  %v5860_v59 = vcombine.low %v559_v47, %v567_v48  ;;  %v598_v0 = vld [vmem:[#allocation5 + $0xfe0] sm:$0xff]  ;;  %v599_v8 = vld [vmem:[#allocation5 + $0xfe8] sm:$0xff]  ;;  %v160_v48 = vld [vmem:[#allocation5 + $0x230] sm:$0xff] }
 0x1bf   :  { %v5875_v32 = vcombine.high %v574_v52, %v582_v53  ;;  %v5877_v60 = vcombine.high %v575_v54, %v583_v55  ;;  %v5874_v9 = vcombine.low %v574_v52, %v582_v53  ;;  %v5876_v10 = vcombine.low %v575_v54, %v583_v55  ;;  %v176_v54 = vld [vmem:[#allocation5 + $0x2b0] sm:$0xff] }
 0x1c0   :  { %3670 = vmatpush1.bf16.msra.mxu0 %v5778_v14  ;;  %3756 = vmatpush1.bf16.msra.mxu1 %v5780_v15  ;;  %v5891_v12 = vcombine.high %v590_v61, %v598_v0  ;;  %v5893_v13 = vcombine.high %v591_v1, %v599_v8  ;;  %v96_v14 = vld [vmem:[#allocation5 + $0x30] sm:$0xff]  ;;  %v5890_v18 = vcombine.low %v590_v61, %v598_v0 }
 0x1c1   :  { %3671 = vmatprep.subr.bf16.mxu0 %v5795_v16  ;;  %3757 = vmatprep.subr.bf16.mxu1 %v5797_v17  ;;  %v104_v15 = vld [vmem:[#allocation5 + $0x70] sm:$0xff]  ;;  %v97_v16 = vld [vmem:[#allocation5 + $0x38] sm:$0xff]  ;;  %v5892_v19 = vcombine.low %v591_v1, %v599_v8 }
 0x1c2   :  { %v105_v17 = vld [vmem:[#allocation5 + $0x78] sm:$0xff]  ;;  %v5399_v20 = vcombine.high %v96_v14, %v104_v15  ;;  %v5398_v27 = vcombine.low %v96_v14, %v104_v15  ;;  %v184_v55 = vld [vmem:[#allocation5 + $0x2f0] sm:$0xff] }
 0x1c3   :  { %v5401_v21 = vcombine.high %v97_v16, %v105_v17  ;;  %v5400_v29 = vcombine.low %v97_v16, %v105_v17  ;;  %v5479_v61 = vcombine.high %v176_v54, %v184_v55  ;;  %v192_v1 = vld [vmem:[#allocation5 + $0x330] sm:$0xff] }
 0x1c4   :  { %3672 = vmatpush1.bf16.msra.mxu0 %v5794_v22  ;;  %3758 = vmatpush1.bf16.msra.mxu1 %v5796_v23  ;;  %v112_v22 = vld [vmem:[#allocation5 + $0xb0] sm:$0xff] }
 0x1c5   :  { %3673 = vmatprep.subr.bf16.mxu0 %v5811_v24  ;;  %3759 = vmatprep.subr.bf16.mxu1 %v5813_v26  ;;  %v120_v23 = vld [vmem:[#allocation5 + $0xf0] sm:$0xff]  ;;  %v113_v24 = vld [vmem:[#allocation5 + $0xb8] sm:$0xff] }
 0x1c6   :  { %v121_v26 = vld [vmem:[#allocation5 + $0xf8] sm:$0xff]  ;;  %v5415_v30 = vcombine.high %v112_v22, %v120_v23  ;;  %v5414_v37 = vcombine.low %v112_v22, %v120_v23  ;;  %v200_v8 = vld [vmem:[#allocation5 + $0x370] sm:$0xff] }
 0x1c7   :  { %v5417_v31 = vcombine.high %v113_v24, %v121_v26  ;;  %v5416_v39 = vcombine.low %v113_v24, %v121_v26  ;;  %v5495_v14 = vcombine.high %v192_v1, %v200_v8  ;;  %v208_v16 = vld [vmem:[#allocation5 + $0x3b0] sm:$0xff] }
 0x1c8   :  { %3674 = vmatpush1.bf16.msra.mxu0 %v5810_v33  ;;  %3760 = vmatpush1.bf16.msra.mxu1 %v5812_v34  ;;  %v128_v33 = vld [vmem:[#allocation5 + $0x130] sm:$0xff] }
 0x1c9   :  { %3675 = vmatprep.subr.bf16.mxu0 %v5827_v35  ;;  %3761 = vmatprep.subr.bf16.mxu1 %v5829_v36  ;;  %v136_v34 = vld [vmem:[#allocation5 + $0x170] sm:$0xff]  ;;  %v129_v35 = vld [vmem:[#allocation5 + $0x138] sm:$0xff] }
 0x1ca   :  { %v137_v36 = vld [vmem:[#allocation5 + $0x178] sm:$0xff]  ;;  %v5431_v40 = vcombine.high %v128_v33, %v136_v34  ;;  %v5430_v45 = vcombine.low %v128_v33, %v136_v34  ;;  %v216_v17 = vld [vmem:[#allocation5 + $0x3f0] sm:$0xff] }
 0x1cb   :  { %v5433_v41 = vcombine.high %v129_v35, %v137_v36  ;;  %v5511_v22 = vcombine.high %v208_v16, %v216_v17  ;;  %v224_v24 = vld [vmem:[#allocation5 + $0x430] sm:$0xff] }
 0x1cc   :  { %3676 = vmatpush1.bf16.msra.mxu0 %v5826_v42  ;;  %3762 = vmatpush1.bf16.msra.mxu1 %v5828_v43  ;;  %v144_v42 = vld [vmem:[#allocation5 + $0x1b0] sm:$0xff] }
 0x1cd   :  { %3677 = vmatprep.subr.bf16.mxu0 %v5843_v44  ;;  %3763 = vmatprep.subr.bf16.mxu1 %v5845_v56  ;;  %v152_v43 = vld [vmem:[#allocation5 + $0x1f0] sm:$0xff]  ;;  %v145_v44 = vld [vmem:[#allocation5 + $0x1b8] sm:$0xff] }
 0x1ce   :  { %v153_v56 = vld [vmem:[#allocation5 + $0x1f8] sm:$0xff]  ;;  %v5447_v46 = vcombine.high %v144_v42, %v152_v43  ;;  %v232_v26 = vld [vmem:[#allocation5 + $0x470] sm:$0xff] }
 0x1cf   :  { %v5449_v47 = vcombine.high %v145_v44, %v153_v56  ;;  %v5448_v52 = vcombine.low %v145_v44, %v153_v56  ;;  %v5527_v33 = vcombine.high %v224_v24, %v232_v26  ;;  %v256_v44 = vld [vmem:[#allocation5 + $0x530] sm:$0xff] }
 0x1d0   :  { %3678 = vmatpush1.bf16.msra.mxu0 %v5842_v49  ;;  %3764 = vmatpush1.bf16.msra.mxu1 %v5844_v25  ;;  %v168_v49 = vld [vmem:[#allocation5 + $0x270] sm:$0xff]  ;;  %v161_v25 = vld [vmem:[#allocation5 + $0x238] sm:$0xff] }
 0x1d1   :  { %3679 = vmatprep.subr.bf16.mxu0 %v5859_v50  ;;  %3765 = vmatprep.subr.bf16.mxu1 %v5861_v51  ;;  %v169_v50 = vld [vmem:[#allocation5 + $0x278] sm:$0xff]  ;;  %v5446_v51 = vcombine.low %v144_v42, %v152_v43  ;;  %v5463_v53 = vcombine.high %v160_v48, %v168_v49  ;;  %v264_v56 = vld [vmem:[#allocation5 + $0x570] sm:$0xff] }
 0x1d4   :  { %3680 = vmatpush1.bf16.msra.mxu0 %v5858_v58  ;;  %3766 = vmatpush1.bf16.msra.mxu1 %v5860_v59  ;;  %v177_v58 = vld [vmem:[#allocation5 + $0x2b8] sm:$0xff] }
 0x1d5   :  { %3681 = vmatprep.subr.bf16.mxu0 %v5875_v32  ;;  %3767 = vmatprep.subr.bf16.mxu1 %v5877_v60  ;;  %v185_v59 = vld [vmem:[#allocation5 + $0x2f8] sm:$0xff]  ;;  %v5462_v32 = vcombine.low %v160_v48, %v168_v49  ;;  %v5464_v60 = vcombine.low %v161_v25, %v169_v50  ;;  %v5559_v48 = vcombine.high %v256_v44, %v264_v56 }
 0x1d6   :  { %v5481_v0 = vcombine.high %v177_v58, %v185_v59 }
 0x1d8   :  { %3682 = vmatpush1.bf16.msra.mxu0 %v5874_v9  ;;  %3768 = vmatpush1.bf16.msra.mxu1 %v5876_v10  ;;  %v193_v9 = vld [vmem:[#allocation5 + $0x338] sm:$0xff] }
 0x1d9   :  { %3683 = vmatprep.subr.bf16.mxu0 %v5891_v12  ;;  %3769 = vmatprep.subr.bf16.mxu1 %v5893_v13  ;;  %v201_v10 = vld [vmem:[#allocation5 + $0x378] sm:$0xff]  ;;  %v5478_v12 = vcombine.low %v176_v54, %v184_v55  ;;  %v5480_v13 = vcombine.low %v177_v58, %v185_v59  ;;  %v288_v58 = vld [vmem:[#allocation5 + $0x630] sm:$0xff] }
 0x1da   :  { %v5497_v15 = vcombine.high %v193_v9, %v201_v10  ;;  %v296_v59 = vld [vmem:[#allocation5 + $0x670] sm:$0xff] }
 0x1dc   :  { %3684 = vmatpush1.bf16.msra.mxu0 %v5890_v18  ;;  %3770 = vmatpush1.bf16.msra.mxu1 %v5892_v19  ;;  %v209_v18 = vld [vmem:[#allocation5 + $0x3b8] sm:$0xff] }
 0x1dd   :  { %3782 = vmatprep.subr.bf16.mxu0 %v5399_v20  ;;  %3868 = vmatprep.subr.bf16.mxu1 %v5401_v21  ;;  %v217_v19 = vld [vmem:[#allocation5 + $0x3f8] sm:$0xff]  ;;  %v5494_v20 = vcombine.low %v192_v1, %v200_v8  ;;  %v5496_v21 = vcombine.low %v193_v9, %v201_v10  ;;  %v5591_v1 = vcombine.high %v288_v58, %v296_v59  ;;  %v304_v9 = vld [vmem:[#allocation5 + $0x6b0] sm:$0xff] }
 0x1de   :  { %v5513_v23 = vcombine.high %v209_v18, %v217_v19  ;;  %v312_v10 = vld [vmem:[#allocation5 + $0x6f0] sm:$0xff] }
 0x1df   :  { %3686 = vmatmul.mubr.bf16.vlgmr.msra.gmra.mrb[8].mxu0 %v6678_v28  ;;  %3772 = vmatmul.mubr.bf16.vlgmr.msra.gmra.mrb[8].mxu1 %v6678_v28  ;;  %v5432_v28 = vcombine.low %v129_v35, %v137_v36  ;;  %v240_v35 = vld [vmem:[#allocation5 + $0x4b0] sm:$0xff] }
 0x1e0   :  { %3783 = vmatpush1.bf16.msra.mxu0 %v5398_v27  ;;  %3869 = vmatpush1.bf16.msra.mxu1 %v5400_v29  ;;  %v225_v27 = vld [vmem:[#allocation5 + $0x438] sm:$0xff]  ;;  %v248_v36 = vld [vmem:[#allocation5 + $0x4f0] sm:$0xff] }
 0x1e1   :  { %3784 = vmatprep.subr.bf16.mxu0 %v5415_v30  ;;  %3870 = vmatprep.subr.bf16.mxu1 %v5417_v31  ;;  %v233_v29 = vld [vmem:[#allocation5 + $0x478] sm:$0xff]  ;;  %v5510_v30 = vcombine.low %v208_v16, %v216_v17  ;;  %v5512_v31 = vcombine.low %v209_v18, %v217_v19  ;;  %v5543_v42 = vcombine.high %v240_v35, %v248_v36  ;;  %v320_v18 = vld [vmem:[#allocation5 + $0x730] sm:$0xff] }
 0x1e2   :  { %3814 = vmatprep.mubr.bf16.mxu0 %v6682_v38  ;;  %3900 = vmatprep.mubr.bf16.mxu1 %v6682_v38  ;;  %v5465_v38 = vcombine.high %v161_v25, %v169_v50  ;;  %v5529_v34 = vcombine.high %v225_v27, %v233_v29  ;;  %v272_v25 = vld [vmem:[#allocation5 + $0x5b0] sm:$0xff]  ;;  %v5607_v16 = vcombine.high %v304_v9, %v312_v10 }
 0x1e3   :  { %v280_v50 = vld [vmem:[#allocation5 + $0x5f0] sm:$0xff] }
 0x1e4   :  { %3785 = vmatpush1.bf16.msra.mxu0 %v5414_v37  ;;  %3871 = vmatpush1.bf16.msra.mxu1 %v5416_v39  ;;  %v241_v37 = vld [vmem:[#allocation5 + $0x4b8] sm:$0xff]  ;;  %v5575_v54 = vcombine.high %v272_v25, %v280_v50  ;;  %v328_v19 = vld [vmem:[#allocation5 + $0x770] sm:$0xff] }
 0x1e5   :  { %3786 = vmatprep.subr.bf16.mxu0 %v5431_v40  ;;  %3872 = vmatprep.subr.bf16.mxu1 %v5433_v41  ;;  %v249_v39 = vld [vmem:[#allocation5 + $0x4f8] sm:$0xff]  ;;  %v5526_v40 = vcombine.low %v224_v24, %v232_v26  ;;  %v5528_v41 = vcombine.low %v225_v27, %v233_v29  ;;  %v5623_v24 = vcombine.high %v320_v18, %v328_v19  ;;  %v336_v27 = vld [vmem:[#allocation5 + $0x7b0] sm:$0xff] }
 0x1e6   :  { %v5545_v43 = vcombine.high %v241_v37, %v249_v39  ;;  %v344_v29 = vld [vmem:[#allocation5 + $0x7f0] sm:$0xff] }
 0x1e8   :  { %3787 = vmatpush1.bf16.msra.mxu0 %v5430_v45  ;;  %3873 = vmatpush1.bf16.msra.mxu1 %v5432_v28  ;;  %v257_v45 = vld [vmem:[#allocation5 + $0x538] sm:$0xff] }
 0x1e9   :  { %3788 = vmatprep.subr.bf16.mxu0 %v5447_v46  ;;  %3874 = vmatprep.subr.bf16.mxu1 %v5449_v47  ;;  %v265_v28 = vld [vmem:[#allocation5 + $0x578] sm:$0xff]  ;;  %v5542_v46 = vcombine.low %v240_v35, %v248_v36  ;;  %v5544_v47 = vcombine.low %v241_v37, %v249_v39  ;;  %v5639_v35 = vcombine.high %v336_v27, %v344_v29  ;;  %v352_v37 = vld [vmem:[#allocation5 + $0x830] sm:$0xff] }
 0x1ea   :  { %v5561_v49 = vcombine.high %v257_v45, %v265_v28  ;;  %v360_v39 = vld [vmem:[#allocation5 + $0x870] sm:$0xff] }
 0x1ec   :  { %3789 = vmatpush1.bf16.msra.mxu0 %v5446_v51  ;;  %3875 = vmatpush1.bf16.msra.mxu1 %v5448_v52  ;;  %v273_v51 = vld [vmem:[#allocation5 + $0x5b8] sm:$0xff] }
 0x1ed   :  { %3790 = vmatprep.subr.bf16.mxu0 %v5463_v53  ;;  %3876 = vmatprep.subr.bf16.mxu1 %v5465_v38  ;;  %v281_v52 = vld [vmem:[#allocation5 + $0x5f8] sm:$0xff]  ;;  %v5558_v53 = vcombine.low %v256_v44, %v264_v56  ;;  %v5560_v38 = vcombine.low %v257_v45, %v265_v28  ;;  %v5655_v44 = vcombine.high %v352_v37, %v360_v39  ;;  %v368_v45 = vld [vmem:[#allocation5 + $0x8b0] sm:$0xff] }
 0x1ee   :  { %v5577_v55 = vcombine.high %v273_v51, %v281_v52  ;;  %v376_v28 = vld [vmem:[#allocation5 + $0x8f0] sm:$0xff] }
 0x1f0   :  { %3791 = vmatpush1.bf16.msra.mxu0 %v5462_v32  ;;  %3877 = vmatpush1.bf16.msra.mxu1 %v5464_v60  ;;  %v289_v32 = vld [vmem:[#allocation5 + $0x638] sm:$0xff] }
 0x1f1   :  { %3792 = vmatprep.subr.bf16.mxu0 %v5479_v61  ;;  %3878 = vmatprep.subr.bf16.mxu1 %v5481_v0  ;;  %v297_v60 = vld [vmem:[#allocation5 + $0x678] sm:$0xff]  ;;  %v5574_v61 = vcombine.low %v272_v25, %v280_v50  ;;  %v5576_v0 = vcombine.low %v273_v51, %v281_v52  ;;  %v5671_v25 = vcombine.high %v368_v45, %v376_v28  ;;  %v384_v51 = vld [vmem:[#allocation5 + $0x930] sm:$0xff] }
 0x1f2   :  { %v5593_v8 = vcombine.high %v289_v32, %v297_v60  ;;  %v392_v52 = vld [vmem:[#allocation5 + $0x970] sm:$0xff] }
 0x1f4   :  { %3793 = vmatpush1.bf16.msra.mxu0 %v5478_v12  ;;  %3879 = vmatpush1.bf16.msra.mxu1 %v5480_v13  ;;  %v305_v12 = vld [vmem:[#allocation5 + $0x6b8] sm:$0xff] }
 0x1f5   :  { %3794 = vmatprep.subr.bf16.mxu0 %v5495_v14  ;;  %3880 = vmatprep.subr.bf16.mxu1 %v5497_v15  ;;  %v313_v13 = vld [vmem:[#allocation5 + $0x6f8] sm:$0xff]  ;;  %v5590_v14 = vcombine.low %v288_v58, %v296_v59  ;;  %v5592_v15 = vcombine.low %v289_v32, %v297_v60  ;;  %v5687_v59 = vcombine.high %v384_v51, %v392_v52  ;;  %v400_v60 = vld [vmem:[#allocation5 + $0x9b0] sm:$0xff] }
 0x1f6   :  { %v5609_v17 = vcombine.high %v305_v12, %v313_v13 }
 0x1f8   :  { %3795 = vmatpush1.bf16.msra.mxu0 %v5494_v20  ;;  %3881 = vmatpush1.bf16.msra.mxu1 %v5496_v21  ;;  %v321_v20 = vld [vmem:[#allocation5 + $0x738] sm:$0xff] }
 0x1f9   :  { %3796 = vmatprep.subr.bf16.mxu0 %v5511_v22  ;;  %3882 = vmatprep.subr.bf16.mxu1 %v5513_v23  ;;  %v329_v21 = vld [vmem:[#allocation5 + $0x778] sm:$0xff]  ;;  %v5606_v22 = vcombine.low %v304_v9, %v312_v10  ;;  %v5608_v23 = vcombine.low %v305_v12, %v313_v13  ;;  %v5686_v9 = vcombine.low %v384_v51, %v392_v52 }
 0x1fa   :  { %v5625_v26 = vcombine.high %v321_v20, %v329_v21 }
 0x1fc   :  { %3797 = vmatpush1.bf16.msra.mxu0 %v5510_v30  ;;  %3883 = vmatpush1.bf16.msra.mxu1 %v5512_v31  ;;  %v337_v30 = vld [vmem:[#allocation5 + $0x7b8] sm:$0xff] }
 0x1fd   :  { %3798 = vmatprep.subr.bf16.mxu0 %v5527_v33  ;;  %3884 = vmatprep.subr.bf16.mxu1 %v5529_v34  ;;  %v345_v31 = vld [vmem:[#allocation5 + $0x7f8] sm:$0xff]  ;;  %v5622_v33 = vcombine.low %v320_v18, %v328_v19  ;;  %v5624_v34 = vcombine.low %v321_v20, %v329_v21 }
 0x1fe   :  { %v5641_v36 = vcombine.high %v337_v30, %v345_v31 }
 0x200   :  { %3799 = vmatpush1.bf16.msra.mxu0 %v5526_v40  ;;  %3885 = vmatpush1.bf16.msra.mxu1 %v5528_v41  ;;  %v353_v40 = vld [vmem:[#allocation5 + $0x838] sm:$0xff] }
 0x201   :  { %3800 = vmatprep.subr.bf16.mxu0 %v5543_v42  ;;  %3886 = vmatprep.subr.bf16.mxu1 %v5545_v43  ;;  %v361_v41 = vld [vmem:[#allocation5 + $0x878] sm:$0xff]  ;;  %v5638_v42 = vcombine.low %v336_v27, %v344_v29  ;;  %v5640_v43 = vcombine.low %v337_v30, %v345_v31  ;;  %v632_v30 = vsub.s32 6, %v6690_v57  ;;  %v628_v31 = vsub.s32 5, %v6690_v57 }
 0x202   :  { %v5657_v56 = vcombine.high %v353_v40, %v361_v41  ;;  %v441_v27 = vld [vmem:[#allocation5 + $0xaf8] sm:$0xff] }
 0x204   :  { %3801 = vmatpush1.bf16.msra.mxu0 %v5542_v46  ;;  %3887 = vmatpush1.bf16.msra.mxu1 %v5544_v47  ;;  %v369_v46 = vld [vmem:[#allocation5 + $0x8b8] sm:$0xff] }
 0x205   :  { %3802 = vmatprep.subr.bf16.mxu0 %v5559_v48  ;;  %3888 = vmatprep.subr.bf16.mxu1 %v5561_v49  ;;  %v377_v47 = vld [vmem:[#allocation5 + $0x8f8] sm:$0xff]  ;;  %v5654_v48 = vcombine.low %v352_v37, %v360_v39  ;;  %v5656_v49 = vcombine.low %v353_v40, %v361_v41  ;;  %v448_v37 = vld [vmem:[#allocation5 + $0xb30] sm:$0xff] }
 0x206   :  { %v5673_v50 = vcombine.high %v369_v46, %v377_v47  ;;  %v5672_v58 = vcombine.low %v369_v46, %v377_v47  ;;  %v456_v39 = vld [vmem:[#allocation5 + $0xb70] sm:$0xff]  ;;  %v449_v41 = vld [vmem:[#allocation5 + $0xb38] sm:$0xff] }
 0x207   :  { %v5751_v46 = vcombine.high %v448_v37, %v456_v39 }
 0x208   :  { %3803 = vmatpush1.bf16.msra.mxu0 %v5558_v53  ;;  %3889 = vmatpush1.bf16.msra.mxu1 %v5560_v38  ;;  %v6418_v53 = vld [vmem:[#allocation2] ss:$16 sps:$4 sm:$0xff]   ;;  %v385_v38 = vld [vmem:[#allocation5 + $0x938] sm:$0xff] }
 0x209   :  { %3804 = vmatprep.subr.bf16.mxu0 %v5575_v54  ;;  %3890 = vmatprep.subr.bf16.mxu1 %v5577_v55  ;;  %v393_v54 = vld [vmem:[#allocation5 + $0x978] sm:$0xff]  ;;  %v5670_v55 = vcombine.low %v368_v45, %v376_v28 }
 0x20a   :  { %v5689_v32 = vcombine.high %v385_v38, %v393_v54  ;;  %v5688_v10 = vcombine.low %v385_v38, %v393_v54  ;;  %v473_v38 = vld [vmem:[#allocation5 + $0xbf8] sm:$0xff] }
 0x20c   :  { %3805 = vmatpush1.bf16.msra.mxu0 %v5574_v61  ;;  %3891 = vmatpush1.bf16.msra.mxu1 %v5576_v0  ;;  %v408_v61 = vld [vmem:[#allocation5 + $0x9f0] sm:$0xff]  ;;  %v6419_v0 = vld [vmem:[#allocation2 + $0xc] ss:$16 sps:$4 sm:$0xff]  }
 0x20d   :  { %3806 = vmatprep.subr.bf16.mxu0 %v5591_v1  ;;  %3892 = vmatprep.subr.bf16.mxu1 %v5593_v8  ;;  %v401_v1 = vld [vmem:[#allocation5 + $0x9b8] sm:$0xff]  ;;  %v5703_v12 = vcombine.high %v400_v60, %v408_v61  ;;  %v5702_v18 = vcombine.low %v400_v60, %v408_v61 }
 0x20e   :  { %v409_v8 = vld [vmem:[#allocation5 + $0x9f8] sm:$0xff] }
 0x20f   :  { %v5705_v13 = vcombine.high %v401_v1, %v409_v8  ;;  %v5704_v19 = vcombine.low %v401_v1, %v409_v8 }
 0x210   :  { %3807 = vmatpush1.bf16.msra.mxu0 %v5590_v14  ;;  %3893 = vmatpush1.bf16.msra.mxu1 %v5592_v15  ;;  %v416_v14 = vld [vmem:[#allocation5 + $0xa30] sm:$0xff] }
 0x211   :  { %3808 = vmatprep.subr.bf16.mxu0 %v5607_v16  ;;  %3894 = vmatprep.subr.bf16.mxu1 %v5609_v17  ;;  %v424_v15 = vld [vmem:[#allocation5 + $0xa70] sm:$0xff]  ;;  %v417_v16 = vld [vmem:[#allocation5 + $0xa38] sm:$0xff] }
 0x212   :  { %v425_v17 = vld [vmem:[#allocation5 + $0xa78] sm:$0xff]  ;;  %v5719_v20 = vcombine.high %v416_v14, %v424_v15  ;;  %v5718_v29 = vcombine.low %v416_v14, %v424_v15  ;;  %v480_v15 = vld [vmem:[#allocation5 + $0xc30] sm:$0xff] }
 0x213   :  { %v5721_v21 = vcombine.high %v417_v16, %v425_v17 }
 0x214   :  { %3809 = vmatpush1.bf16.msra.mxu0 %v5606_v22  ;;  %3895 = vmatpush1.bf16.msra.mxu1 %v5608_v23  ;;  %v432_v22 = vld [vmem:[#allocation5 + $0xab0] sm:$0xff] }
 0x215   :  { %3810 = vmatprep.subr.bf16.mxu0 %v5623_v24  ;;  %3896 = vmatprep.subr.bf16.mxu1 %v5625_v26  ;;  %v440_v23 = vld [vmem:[#allocation5 + $0xaf0] sm:$0xff]  ;;  %v624_v24 = vsub.s32 4, %v6690_v57  ;;  %v433_v26 = vld [vmem:[#allocation5 + $0xab8] sm:$0xff] }
 0x216   :  { %v5736_v28 = vcombine.low %v433_v26, %v441_v27 }
 0x217   :  { %v625_v40 = vrot.slane %v6693_v3, %v624_v24 }
 0x218   :  { %3811 = vmatpush1.bf16.msra.mxu0 %v5622_v33  ;;  %3897 = vmatpush1.bf16.msra.mxu1 %v5624_v34  ;;  %v5720_v33 = vcombine.low %v417_v16, %v425_v17  ;;  %v636_v34 = vsub.s32 7, %v6690_v57  ;;  %v488_v16 = vld [vmem:[#allocation5 + $0xc70] sm:$0xff] }
 0x219   :  { %3812 = vmatprep.subr.bf16.mxu0 %v5639_v35  ;;  %3898 = vmatprep.subr.bf16.mxu1 %v5641_v36  ;;  %v5735_v35 = vcombine.high %v432_v22, %v440_v23  ;;  %v5737_v36 = vcombine.high %v433_v26, %v441_v27 }
 0x21a   :  { %v637_v45 = vrot.slane %v6693_v3, %v636_v34 }
 0x21c   :  { %3813 = vmatpush1.bf16.msra.mxu0 %v5638_v42  ;;  %3899 = vmatpush1.bf16.msra.mxu1 %v5640_v43  ;;  %v457_v42 = vld [vmem:[#allocation5 + $0xb78] sm:$0xff]  ;;  %v633_v43 = vrot.slane %v6693_v3, %v632_v30 }
 0x21d   :  { %3825 = vmatprep.subr.bf16.mxu0 %v5655_v44  ;;  %3911 = vmatprep.subr.bf16.mxu1 %v5657_v56  ;;  %v629_v44 = vrot.slane %v6693_v3, %v628_v31  ;;  %v5734_v56 = vcombine.low %v432_v22, %v440_v23  ;;  %v5752_v3 = vcombine.low %v449_v41, %v457_v42  ;;  %v489_v22 = vld [vmem:[#allocation5 + $0xc78] sm:$0xff] }
 0x21f   :  { %3815 = vmatmul.mubr.bf16.vlgmr.msra.gmra.mrb[12].mxu0 %v6418_v53  ;;  %3901 = vmatmul.mubr.bf16.vlgmr.msra.gmra.mrb[12].mxu1 %v6418_v53  ;;  %v465_v53 = vld [vmem:[#allocation5 + $0xbb8] sm:$0xff] }
 0x220   :  { %3826 = vmatpush1.bf16.msra.mxu0 %v5654_v48  ;;  %3912 = vmatpush1.bf16.msra.mxu1 %v5656_v49  ;;  %v5753_v48 = vcombine.high %v449_v41, %v457_v42  ;;  %v464_v49 = vld [vmem:[#allocation5 + $0xbb0] sm:$0xff]  ;;  %v5769_v14 = vcombine.high %v465_v53, %v473_v38 }
 0x221   :  { %3827 = vmatprep.subr.bf16.mxu0 %v5671_v25  ;;  %3913 = vmatprep.subr.bf16.mxu1 %v5673_v50  ;;  %v472_v25 = vld [vmem:[#allocation5 + $0xbf0] sm:$0xff] }
 0x222   :  { %3857 = vmatprep.mubr.bf16.mxu0 %v6419_v0  ;;  %3943 = vmatprep.mubr.bf16.mxu1 %v6419_v0  ;;  %v5767_v8 = vcombine.high %v464_v49, %v472_v25  ;;  %v496_v42 = vld [vmem:[#allocation5 + $0xcb0] sm:$0xff] }
 0x224   :  { %3828 = vmatpush1.bf16.msra.mxu0 %v5670_v55  ;;  %3914 = vmatpush1.bf16.msra.mxu1 %v5672_v58 }
 0x225   :  { %3829 = vmatprep.subr.bf16.mxu0 %v5687_v59  ;;  %3915 = vmatprep.subr.bf16.mxu1 %v5689_v32  ;;  %v5750_v32 = vcombine.low %v448_v37, %v456_v39  ;;  %v5783_v37 = vcombine.high %v480_v15, %v488_v16 }
 0x228   :  { %3830 = vmatpush1.bf16.msra.mxu0 %v5686_v9  ;;  %3916 = vmatpush1.bf16.msra.mxu1 %v5688_v10 }
 0x229   :  { %3831 = vmatprep.subr.bf16.mxu0 %v5703_v12  ;;  %3917 = vmatprep.subr.bf16.mxu1 %v5705_v13  ;;  %v5766_v13 = vcombine.low %v464_v49, %v472_v25  ;;  %v512_v49 = vld [vmem:[#allocation5 + $0xd30] sm:$0xff] }
 0x22a   :  { %v520_v25 = vld [vmem:[#allocation5 + $0xd70] sm:$0xff] }
 0x22c   :  { %3832 = vmatpush1.bf16.msra.mxu0 %v5702_v18  ;;  %3918 = vmatpush1.bf16.msra.mxu1 %v5704_v19 }
 0x22d   :  { %3833 = vmatprep.subr.bf16.mxu0 %v5719_v20  ;;  %3919 = vmatprep.subr.bf16.mxu1 %v5721_v21  ;;  %v5768_v20 = vcombine.low %v465_v53, %v473_v38  ;;  %v481_v21 = vld [vmem:[#allocation5 + $0xc38] sm:$0xff]  ;;  %v5815_v38 = vcombine.high %v512_v49, %v520_v25 }
 0x22e   :  { %v5785_v41 = vcombine.high %v481_v21, %v489_v22 }
 0x230   :  { %3834 = vmatpush1.bf16.msra.mxu0 %v5718_v29  ;;  %3920 = vmatpush1.bf16.msra.mxu1 %v5720_v33 }
 0x231   :  { %3835 = vmatprep.subr.bf16.mxu0 %v5735_v35  ;;  %3921 = vmatprep.subr.bf16.mxu1 %v5737_v36 }
 0x232   :  { %v3515_v47 = vpop.f32.mrb[4].mxu0  ;;  %v3601_v51 = vpop.f32.mrb[4].mxu1 }
 0x233   :  { %v6211_v50 = vadd.f32 %v3515_v47, %v625_v40  ;;  %v3517_v52 = vpop.f32.mrb[5].mxu0  ;;  %v6215_v54 = vadd.f32 %v3601_v51, %v633_v43  ;;  %v3603_v58 = vpop.f32.mrb[5].mxu1  ;;  %v521_v51 = vld [vmem:[#allocation5 + $0xd78] sm:$0xff] }
 0x234   :  { %v6212_v55 = vadd.f32 %v3517_v52, %v629_v44  ;;  %v3519_v59 = vpop.f32.mrb[6].mxu0  ;;  %3836 = vmatpush1.bf16.msra.mxu0 %v5734_v56  ;;  %v6216_v60 = vadd.f32 %v3603_v58, %v637_v45  ;;  %v3605_v0 = vpop.f32.mrb[6].mxu1  ;;  %3922 = vmatpush1.bf16.msra.mxu1 %v5736_v28  ;;  %v497_v56 = vld [vmem:[#allocation5 + $0xcb8] sm:$0xff]  ;;  %v5782_v28 = vcombine.low %v480_v15, %v488_v16  ;;  %v536_v58 = vld [vmem:[#allocation5 + $0xdf0] sm:$0xff] }
 0x235   :  { %v6213_v61 = vadd.f32 %v3519_v59, %v625_v40  ;;  %v3521_v1 = vpop.f32.mrb[7].mxu0  ;;  %3837 = vmatprep.subr.bf16.mxu0 %v5751_v46  ;;  %v6217_v9 = vadd.f32 %v3605_v0, %v633_v43  ;;  %v3607_v12 = vpop.f32.mrb[7].mxu1  ;;  %3923 = vmatprep.subr.bf16.mxu1 %v5753_v48  ;;  %v3958_v17 = vmax.f32 %v6211_v50, 0.0  ;;  %v3960_v23 = vmax.f32 %v6215_v54, 0.0  ;;  %v504_v43 = vld [vmem:[#allocation5 + $0xcf0] sm:$0xff]  ;;  %v513_v50 = vld [vmem:[#allocation5 + $0xd38] sm:$0xff] }
 0x236   :  { %v6214_v10 = vadd.f32 %v3521_v1, %v629_v44  ;;  %v6218_v19 = vadd.f32 %v3607_v12, %v637_v45  ;;  %v3959_v26 = vmax.f32 %v6212_v55, 0.0  ;;  %v3961_v33 = vmax.f32 %v6216_v60, 0.0  ;;  %v505_v45 = vld [vmem:[#allocation5 + $0xcf8] sm:$0xff]  ;;  %v528_v55 = vld [vmem:[#allocation5 + $0xdb0] sm:$0xff] }
 0x237   :  { %v3974_v18 = vmax.f32 %v6213_v61, 0.0  ;;  %v3976_v27 = vmax.f32 %v6217_v9, 0.0  ;;  %v5784_v46 = vcombine.low %v481_v21, %v489_v22  ;;  %v5799_v47 = vcombine.high %v496_v42, %v504_v43  ;;  %v529_v59 = vld [vmem:[#allocation5 + $0xdb8] sm:$0xff]  ;;  %v544_v1 = vld [vmem:[#allocation5 + $0xe30] sm:$0xff] }
 0x238   :  { %v3975_v29 = vmax.f32 %v6214_v10, 0.0  ;;  %3838 = vmatpush1.bf16.msra.mxu0 %v5750_v32  ;;  %v3977_v36 = vmax.f32 %v6218_v19, 0.0  ;;  %3924 = vmatpush1.bf16.msra.mxu1 %v5752_v3  ;;  %v5801_v48 = vcombine.high %v497_v56, %v505_v45  ;;  %v5798_v52 = vcombine.low %v496_v42, %v504_v43  ;;  %v537_v32 = vld [vmem:[#allocation5 + $0xdf8] sm:$0xff]  ;;  %v560_v16 = vld [vmem:[#allocation5 + $0xeb0] sm:$0xff] }
 0x239   :  { %v6738_v35 = vpack.c.bf16 %v3974_v18, %v3958_v17  ;;  %3839 = vmatprep.subr.bf16.mxu0 %v5767_v8  ;;  %v6740_v39 = vpack.c.bf16 %v3976_v27, %v3960_v23  ;;  %3925 = vmatprep.subr.bf16.mxu1 %v5769_v14  ;;  %v5800_v53 = vcombine.low %v497_v56, %v505_v45  ;;  %v552_v8 = vld [vmem:[#allocation5 + $0xe70] sm:$0xff]  ;;  %v545_v9 = vld [vmem:[#allocation5 + $0xe38] sm:$0xff] }
 0x23a   :  { %v6742_v40 = vpack.c.bf16 %v3975_v29, %v3959_v26  ;;  %v6744_v44 = vpack.c.bf16 %v3977_v36, %v3961_v33  ;;  %v5817_v54 = vcombine.high %v513_v50, %v521_v51  ;;  %v5814_v3 = vcombine.low %v512_v49, %v520_v25  ;;  %v553_v10 = vld [vmem:[#allocation5 + $0xe78] sm:$0xff]  ;;  %v568_v17 = vld [vmem:[#allocation5 + $0xef0] sm:$0xff] }
 0x23b   :  { %v5816_v60 = vcombine.low %v513_v50, %v521_v51  ;;  %v5831_v61 = vcombine.high %v528_v55, %v536_v58  ;;  %v5833_v0 = vcombine.high %v529_v59, %v537_v32  ;;  %v5830_v12 = vcombine.low %v528_v55, %v536_v58  ;;  %v561_v18 = vld [vmem:[#allocation5 + $0xeb8] sm:$0xff]  ;;  %v576_v26 = vld [vmem:[#allocation5 + $0xf30] sm:$0xff] }
 0x23c   :  { %3840 = vmatpush1.bf16.msra.mxu0 %v5766_v13  ;;  %3926 = vmatpush1.bf16.msra.mxu1 %v5768_v20  ;;  %v5832_v13 = vcombine.low %v529_v59, %v537_v32  ;;  %v5847_v14 = vcombine.high %v544_v1, %v552_v8  ;;  %v5849_v15 = vcombine.high %v545_v9, %v553_v10  ;;  %v569_v19 = vld [vmem:[#allocation5 + $0xef8] sm:$0xff]  ;;  %v584_v27 = vld [vmem:[#allocation5 + $0xf70] sm:$0xff] }
 0x23d   :  { %3841 = vmatprep.subr.bf16.mxu0 %v5783_v37  ;;  %3927 = vmatprep.subr.bf16.mxu1 %v5785_v41  ;;  %v5846_v20 = vcombine.low %v544_v1, %v552_v8  ;;  %v5848_v21 = vcombine.low %v545_v9, %v553_v10  ;;  %v5863_v22 = vcombine.high %v560_v16, %v568_v17  ;;  %v577_v29 = vld [vmem:[#allocation5 + $0xf38] sm:$0xff]  ;;  %v592_v43 = vld [vmem:[#allocation5 + $0xfb0] sm:$0xff]  ;;  %v6298_v1 = vld [vmem:[#allocation8 + $0x58] sm:$0xff]  }
 0x23e   :  { %v5865_v23 = vcombine.high %v561_v18, %v569_v19  ;;  %v585_v33 = vld [vmem:[#allocation5 + $0xf78] sm:$0xff]  ;;  %v5862_v36 = vcombine.low %v560_v16, %v568_v17  ;;  %v5864_v37 = vcombine.low %v561_v18, %v569_v19  ;;  %v5879_v41 = vcombine.high %v576_v26, %v584_v27  ;;  %v600_v56 = vld [vmem:[#allocation5 + $0xff0] sm:$0xff]  ;;  %v6299_v8 = vld [vmem:[#allocation8 + $0xd8] sm:$0xff]  }
 0x23f   :  { %v5881_v42 = vcombine.high %v577_v29, %v585_v33  ;;  %v593_v45 = vld [vmem:[#allocation5 + $0xfb8] sm:$0xff]  ;;  %v5894_v25 = vcombine.low %v592_v43, %v600_v56  ;;  %v6286_v51 = vld [vmem:[#allocation8 + $0x40] sm:$0xff]   ;;  %v6300_v9 = vld [vmem:[#allocation8 + $0x18] sm:$0xff]  }
 0x240   :  { %3842 = vmatpush1.bf16.msra.mxu0 %v5782_v28  ;;  %3928 = vmatpush1.bf16.msra.mxu1 %v5784_v46  ;;  %v601_v28 = vld [vmem:[#allocation5 + $0xff8] sm:$0xff]  ;;  %v5878_v46 = vcombine.low %v576_v26, %v584_v27  ;;  %v6302_v10 = vld [vmem:[#allocation8 + $0x60] sm:$0xff]   ;;  %v6310_v18 = vld [vmem:[#allocation8 + $0x70] sm:$0xff]  }
 0x241   :  { %3843 = vmatprep.subr.bf16.mxu0 %v5799_v47  ;;  %3929 = vmatprep.subr.bf16.mxu1 %v5801_v48  ;;  %v5880_v47 = vcombine.low %v577_v29, %v585_v33  ;;  %v5895_v48 = vcombine.high %v592_v43, %v600_v56  ;;  %v5897_v49 = vcombine.high %v593_v45, %v601_v28  ;;  %v6420_v55 = vld [vmem:[#allocation2 + $0x8] ss:$16 sps:$4 sm:$0xff]   ;;  %v6311_v19 = vld [vmem:[#allocation8 + $0xf0] sm:$0xff]   ;;  %v6318_v29 = vld [vmem:[#allocation8 + $0x140] sm:$0xff]  }
 0x242   :  { %v5896_v50 = vcombine.low %v593_v45, %v601_v28  ;;  %v6291_v58 = vld [vmem:[#allocation8 + $0xc8] sm:$0xff]   ;;  %v6316_v26 = vld [vmem:[#allocation8 + $0x38] sm:$0xff]   ;;  %v6319_v33 = vld [vmem:[#allocation8 + $0x1c0] sm:$0xff]  }
 0x243   :  { %v6292_v59 = vld [vmem:[#allocation8 + $0x8] sm:$0xff]   ;;  %v6317_v27 = vld [vmem:[#allocation8 + $0xb8] sm:$0xff]   ;;  %v6326_v45 = vld [vmem:[#allocation8 + $0x150] sm:$0xff]  }
 0x244   :  { %3844 = vmatpush1.bf16.msra.mxu0 %v5798_v52  ;;  %3930 = vmatpush1.bf16.msra.mxu1 %v5800_v53  ;;  %v6287_v52 = vld [vmem:[#allocation8 + $0xc0] sm:$0xff]   ;;  %v6293_v32 = vld [vmem:[#allocation8 + $0x88] sm:$0xff]   ;;  %v6327_v28 = vld [vmem:[#allocation8 + $0x1d0] sm:$0xff]  }
 0x245   :  { %3845 = vmatprep.subr.bf16.mxu0 %v5815_v38  ;;  %3931 = vmatprep.subr.bf16.mxu1 %v5817_v54  ;;  %v6288_v53 = vld [vmem:[#allocation8] sm:$0xff]   ;;  %v6290_v54 = vld [vmem:[#allocation8 + $0x48] sm:$0xff]  }
 0x246   :  { %v6289_v38 = vld [vmem:[#allocation8 + $0x80] sm:$0xff]   ;;  %v6308_v16 = vld [vmem:[#allocation8 + $0x28] sm:$0xff]  }
 0x247   :  { %v6309_v17 = vld [vmem:[#allocation8 + $0xa8] sm:$0xff]  }
 0x248   :  { %3846 = vmatpush1.bf16.msra.mxu0 %v5814_v3  ;;  %3932 = vmatpush1.bf16.msra.mxu1 %v5816_v60  ;;  %v6294_v3 = vld [vmem:[#allocation8 + $0x50] sm:$0xff]   ;;  %v6324_v43 = vld [vmem:[#allocation8 + $0x108] sm:$0xff]  }
 0x249   :  { %3847 = vmatprep.subr.bf16.mxu0 %v5831_v61  ;;  %3933 = vmatprep.subr.bf16.mxu1 %v5833_v0  ;;  %v6295_v60 = vld [vmem:[#allocation8 + $0xd0] sm:$0xff]   ;;  %v6325_v56 = vld [vmem:[#allocation8 + $0x188] sm:$0xff]  }
 0x24a   :  { %v6296_v61 = vld [vmem:[#allocation8 + $0x10] sm:$0xff]  }
 0x24b   :  { %v6297_v0 = vld [vmem:[#allocation8 + $0x90] sm:$0xff]  }
 0x24c   :  { %3848 = vmatpush1.bf16.msra.mxu0 %v5830_v12  ;;  %3934 = vmatpush1.bf16.msra.mxu1 %v5832_v13  ;;  %v6303_v12 = vld [vmem:[#allocation8 + $0xe0] sm:$0xff]  }
 0x24d   :  { %3849 = vmatprep.subr.bf16.mxu0 %v5847_v14  ;;  %3935 = vmatprep.subr.bf16.mxu1 %v5849_v15  ;;  %v6305_v13 = vld [vmem:[#allocation8 + $0xa0] sm:$0xff]   ;;  %v6306_v14 = vld [vmem:[#allocation8 + $0x68] sm:$0xff]  }
 0x24e   :  { %v6307_v15 = vld [vmem:[#allocation8 + $0xe8] sm:$0xff]  }
 0x250   :  { %3850 = vmatpush1.bf16.msra.mxu0 %v5846_v20  ;;  %3936 = vmatpush1.bf16.msra.mxu1 %v5848_v21  ;;  %v6312_v20 = vld [vmem:[#allocation8 + $0x30] sm:$0xff]  }
 0x251   :  { %3851 = vmatprep.subr.bf16.mxu0 %v5863_v22  ;;  %3937 = vmatprep.subr.bf16.mxu1 %v5865_v23  ;;  %v6313_v21 = vld [vmem:[#allocation8 + $0xb0] sm:$0xff]   ;;  %v6314_v22 = vld [vmem:[#allocation8 + $0x78] sm:$0xff]  }
 0x252   :  { %v6315_v23 = vld [vmem:[#allocation8 + $0xf8] sm:$0xff]  }
 0x254   :  { %3852 = vmatpush1.bf16.msra.mxu0 %v5862_v36  ;;  %3938 = vmatpush1.bf16.msra.mxu1 %v5864_v37  ;;  %v6320_v36 = vld [vmem:[#allocation8 + $0x100] sm:$0xff]  }
 0x255   :  { %3853 = vmatprep.subr.bf16.mxu0 %v5879_v41  ;;  %3939 = vmatprep.subr.bf16.mxu1 %v5881_v42  ;;  %v6321_v37 = vld [vmem:[#allocation8 + $0x180] sm:$0xff]   ;;  %v6322_v41 = vld [vmem:[#allocation8 + $0x148] sm:$0xff]  }
 0x256   :  { %v6323_v42 = vld [vmem:[#allocation8 + $0x1c8] sm:$0xff]  }
 0x258   :  { %3854 = vmatpush1.bf16.msra.mxu0 %v5878_v46  ;;  %3940 = vmatpush1.bf16.msra.mxu1 %v5880_v47  ;;  %v6328_v46 = vld [vmem:[#allocation8 + $0x110] sm:$0xff]   ;;  %v6330_v47 = vld [vmem:[#allocation8 + $0x158] sm:$0xff]  }
 0x259   :  { %3855 = vmatprep.subr.bf16.mxu0 %v5895_v48  ;;  %3941 = vmatprep.subr.bf16.mxu1 %v5897_v49  ;;  %v6332_v48 = vld [vmem:[#allocation8 + $0x118] sm:$0xff]   ;;  %v6334_v49 = vld [vmem:[#allocation8 + $0x160] sm:$0xff]  }
 0x25c   :  { %3856 = vmatpush1.bf16.msra.mxu0 %v5894_v25  ;;  %3942 = vmatpush1.bf16.msra.mxu1 %v5896_v50  ;;  %v6335_v25 = vld [vmem:[#allocation8 + $0x1e0] sm:$0xff]  }
 0x25d   :  { %6027 = vmatprep.subr.bf16.mxu0 %v6286_v51  ;;  %6049 = vmatprep.subr.bf16.mxu1 %v6287_v52  ;;  %v6337_v50 = vld [vmem:[#allocation8 + $0x1a0] sm:$0xff]   ;;  %v6338_v51 = vld [vmem:[#allocation8 + $0x168] sm:$0xff]  }
 0x25e   :  { %v6339_v52 = vld [vmem:[#allocation8 + $0x1e8] sm:$0xff]  }
 0x25f   :  { %3858 = vmatmul.mubr.bf16.vlgmr.msra.gmra.mrb[12].mxu0 %v6420_v55  ;;  %3944 = vmatmul.mubr.bf16.vlgmr.msra.gmra.mrb[12].mxu1 %v6420_v55  ;;  %v6343_v55 = vld [vmem:[#allocation8 + $0x1f0] sm:$0xff]  }
 0x260   :  { %6028 = vmatpush3.bf16.msra.mxu0 %v6288_v53  ;;  %5065 = vmatprep.mubr.bf16.mxu0 %v6714_v6  ;;  %v6301_v6 = vld [vmem:[#allocation8 + $0x98] sm:$0xff]   ;;  %v6340_v53 = vld [vmem:[#allocation8 + $0x128] sm:$0xff]  }
 0x261   :  { %6050 = vmatpush3.bf16.msra.mxu1 %v6289_v38  ;;  %5106 = vmatprep.mubr.bf16.mxu1 %v6716_v11  ;;  %v6304_v11 = vld [vmem:[#allocation8 + $0x20] sm:$0xff]   ;;  %v6341_v38 = vld [vmem:[#allocation8 + $0x1a8] sm:$0xff]  }
 0x262   :  { %6029 = vmatprep.subr.bf16.mxu0 %v6290_v54  ;;  %6051 = vmatprep.subr.bf16.mxu1 %v6291_v58  ;;  %v6342_v54 = vld [vmem:[#allocation8 + $0x170] sm:$0xff]  }
 0x263   :  { %v6344_v58 = vld [vmem:[#allocation8 + $0x130] sm:$0xff]  }
 0x264   :  { %6030 = vmatpush3.bf16.msra.mxu0 %v6292_v59  ;;  %v6345_v59 = vld [vmem:[#allocation8 + $0x1b0] sm:$0xff]  }
 0x265   :  { %6052 = vmatpush3.bf16.msra.mxu1 %v6293_v32  ;;  %6031 = vmatprep.subr.bf16.mxu0 %v6294_v3  ;;  %v6346_v32 = vld [vmem:[#allocation8 + $0x178] sm:$0xff]  }
 0x266   :  { %6053 = vmatprep.subr.bf16.mxu1 %v6295_v60  ;;  %v6347_v3 = vld [vmem:[#allocation8 + $0x1f8] sm:$0xff]  }
 0x267   :  { %v6348_v60 = vld [vmem:[#allocation8 + $0x138] sm:$0xff]  }
 0x268   :  { %6032 = vmatpush3.bf16.msra.mxu0 %v6296_v61  ;;  %v6349_v61 = vld [vmem:[#allocation8 + $0x1b8] sm:$0xff]  }
 0x269   :  { %6054 = vmatpush3.bf16.msra.mxu1 %v6297_v0  ;;  %6033 = vmatprep.subr.bf16.mxu0 %v6298_v1  ;;  %v6350_v0 = vld [vmem:[#allocation8 + $0x240] sm:$0xff]  }
 0x26a   :  { %6055 = vmatprep.subr.bf16.mxu1 %v6299_v8  ;;  %v6351_v1 = vld [vmem:[#allocation8 + $0x2c0] sm:$0xff]  }
 0x26b   :  { %v6352_v8 = vld [vmem:[#allocation8 + $0x200] sm:$0xff]  }
 0x26c   :  { %6034 = vmatpush3.bf16.msra.mxu0 %v6300_v9  ;;  %v6353_v9 = vld [vmem:[#allocation8 + $0x280] sm:$0xff]  }
 0x26d   :  { %6056 = vmatpush3.bf16.msra.mxu1 %v6301_v6  ;;  %6035 = vmatprep.subr.bf16.mxu0 %v6302_v10  ;;  %v6354_v6 = vld [vmem:[#allocation8 + $0x248] sm:$0xff]  }
 0x26e   :  { %6057 = vmatprep.subr.bf16.mxu1 %v6303_v12  ;;  %v6355_v10 = vld [vmem:[#allocation8 + $0x2c8] sm:$0xff]  }
 0x26f   :  { %v6356_v12 = vld [vmem:[#allocation8 + $0x208] sm:$0xff]  }
 0x270   :  { %6036 = vmatpush3.bf16.msra.mxu0 %v6304_v11  ;;  %v6357_v11 = vld [vmem:[#allocation8 + $0x288] sm:$0xff]  }
 0x271   :  { %6058 = vmatpush3.bf16.msra.mxu1 %v6305_v13  ;;  %6037 = vmatprep.subr.bf16.mxu0 %v6306_v14  ;;  %v6358_v13 = vld [vmem:[#allocation8 + $0x250] sm:$0xff]  }
 0x272   :  { %6059 = vmatprep.subr.bf16.mxu1 %v6307_v15  ;;  %v6359_v14 = vld [vmem:[#allocation8 + $0x2d0] sm:$0xff]  }
 0x273   :  { %v6360_v15 = vld [vmem:[#allocation8 + $0x210] sm:$0xff]  }
 0x274   :  { %6038 = vmatpush3.bf16.msra.mxu0 %v6308_v16  ;;  %v6361_v16 = vld [vmem:[#allocation8 + $0x290] sm:$0xff]  }
 0x275   :  { %6060 = vmatpush3.bf16.msra.mxu1 %v6309_v17  ;;  %6039 = vmatprep.subr.bf16.mxu0 %v6310_v18  ;;  %v6362_v17 = vld [vmem:[#allocation8 + $0x258] sm:$0xff]  }
 0x276   :  { %6061 = vmatprep.subr.bf16.mxu1 %v6311_v19  ;;  %v6363_v18 = vld [vmem:[#allocation8 + $0x2d8] sm:$0xff]   ;;  %v6366_v19 = vld [vmem:[#allocation8 + $0x260] sm:$0xff]  }
 0x278   :  { %6040 = vmatpush3.bf16.msra.mxu0 %v6312_v20  ;;  %v6367_v20 = vld [vmem:[#allocation8 + $0x2e0] sm:$0xff]  }
 0x279   :  { %6062 = vmatpush3.bf16.msra.mxu1 %v6313_v21  ;;  %6041 = vmatprep.subr.bf16.mxu0 %v6314_v22  ;;  %v6368_v21 = vld [vmem:[#allocation8 + $0x220] sm:$0xff]   ;;  %v6754_v22 = vld [vmem:[#allocation7 + $0x8] sm:$0xff] }
 0x27a   :  { %6063 = vmatprep.subr.bf16.mxu1 %v6315_v23  ;;  %v6369_v23 = vld [vmem:[#allocation8 + $0x2a0] sm:$0xff]  }
 0x27c   :  { %6042 = vmatpush3.bf16.msra.mxu0 %v6316_v26  ;;  %v6370_v26 = vld [vmem:[#allocation8 + $0x268] sm:$0xff]  }
 0x27d   :  { %6064 = vmatpush3.bf16.msra.mxu1 %v6317_v27  ;;  %6071 = vmatprep.subr.bf16.mxu0 %v6318_v29  ;;  %v6371_v27 = vld [vmem:[#allocation8 + $0x2e8] sm:$0xff]   ;;  %v641_v29 = vrot.slane %v6754_v22, %v608_v63  ;;  %v6375_v63 = vld [vmem:[#allocation8 + $0x2f0] sm:$0xff]  }
 0x27e   :  { %6093 = vmatprep.subr.bf16.mxu1 %v6319_v33  ;;  %v649_v33 = vrot.slane %v6754_v22, %v616_v4 }
 0x27f   :  { %5066 = vmatmul.mubr.bf16.vlgmr.msra.gmra.mrb[16].mxu0 %v6710_v62  ;;  %v6329_v62 = vld [vmem:[#allocation8 + $0x190] sm:$0xff]  }
 0x280   :  { %5107 = vmatmul.mubr.bf16.vlgmr.msra.gmra.mrb[16].mxu1 %v6712_v2  ;;  %6072 = vmatpush3.bf16.msra.mxu0 %v6320_v36  ;;  %v6331_v2 = vld [vmem:[#allocation8 + $0x1d8] sm:$0xff]   ;;  %v645_v36 = vrot.slane %v6754_v22, %v612_v5  ;;  %v6376_v5 = vld [vmem:[#allocation8 + $0x230] sm:$0xff]  }
 0x281   :  { %5147 = vmatprep.mubr.bf16.mxu0 %v6742_v40  ;;  %6094 = vmatpush3.bf16.msra.mxu1 %v6321_v37  ;;  %v6333_v40 = vld [vmem:[#allocation8 + $0x198] sm:$0xff]   ;;  %v6372_v37 = vld [vmem:[#allocation8 + $0x228] sm:$0xff]  }
 0x282   :  { %5188 = vmatprep.mubr.bf16.mxu1 %v6744_v44  ;;  %6073 = vmatprep.subr.bf16.mxu0 %v6322_v41  ;;  %v6336_v44 = vld [vmem:[#allocation8 + $0x120] sm:$0xff]   ;;  %v653_v41 = vrot.slane %v6754_v22, %v620_v7 }
 0x283   :  { %6095 = vmatprep.subr.bf16.mxu1 %v6323_v42  ;;  %v6373_v42 = vld [vmem:[#allocation8 + $0x2a8] sm:$0xff]  }
 0x284   :  { %6074 = vmatpush3.bf16.msra.mxu0 %v6324_v43  ;;  %v6374_v43 = vld [vmem:[#allocation8 + $0x270] sm:$0xff]  }
 0x285   :  { %6096 = vmatpush3.bf16.msra.mxu1 %v6325_v56  ;;  %6075 = vmatprep.subr.bf16.mxu0 %v6326_v45 }
 0x286   :  { %6097 = vmatprep.subr.bf16.mxu1 %v6327_v28 }
 0x288   :  { %6076 = vmatpush3.bf16.msra.mxu0 %v6328_v46 }
 0x289   :  { %6098 = vmatpush3.bf16.msra.mxu1 %v6329_v62  ;;  %6077 = vmatprep.subr.bf16.mxu0 %v6330_v47 }
 0x28a   :  { %6099 = vmatprep.subr.bf16.mxu1 %v6331_v2 }
 0x28c   :  { %6078 = vmatpush3.bf16.msra.mxu0 %v6332_v48 }
 0x28d   :  { %6100 = vmatpush3.bf16.msra.mxu1 %v6333_v40  ;;  %6079 = vmatprep.subr.bf16.mxu0 %v6334_v49 }
 0x28e   :  { %6101 = vmatprep.subr.bf16.mxu1 %v6335_v25  ;;  %v6377_v25 = vld [vmem:[#allocation8 + $0x2b0] sm:$0xff]  }
 0x290   :  { %6080 = vmatpush3.bf16.msra.mxu0 %v6336_v44  ;;  %v6378_v44 = vld [vmem:[#allocation8 + $0x278] sm:$0xff]  }
 0x291   :  { %6102 = vmatpush3.bf16.msra.mxu1 %v6337_v50  ;;  %6081 = vmatprep.subr.bf16.mxu0 %v6338_v51 }
 0x292   :  { %6103 = vmatprep.subr.bf16.mxu1 %v6339_v52 }
 0x294   :  { %6082 = vmatpush3.bf16.msra.mxu0 %v6340_v53  ;;  %v6379_v53 = vld [vmem:[#allocation8 + $0x2f8] sm:$0xff]  }
 0x295   :  { %6104 = vmatpush3.bf16.msra.mxu1 %v6341_v38  ;;  %6083 = vmatprep.subr.bf16.mxu0 %v6342_v54 }
 0x296   :  { %6105 = vmatprep.subr.bf16.mxu1 %v6343_v55 }
 0x298   :  { %6084 = vmatpush3.bf16.msra.mxu0 %v6344_v58 }
 0x299   :  { %6106 = vmatpush3.bf16.msra.mxu1 %v6345_v59  ;;  %6085 = vmatprep.subr.bf16.mxu0 %v6346_v32 }
 0x29a   :  { %6107 = vmatprep.subr.bf16.mxu1 %v6347_v3 }
 0x29c   :  { %6086 = vmatpush3.bf16.msra.mxu0 %v6348_v60  ;;  %v6380_v60 = vld [vmem:[#allocation8 + $0x238] sm:$0xff]  }
 0x29d   :  { %6108 = vmatpush3.bf16.msra.mxu1 %v6349_v61  ;;  %6115 = vmatprep.subr.bf16.mxu0 %v6350_v0 }
 0x29e   :  { %6137 = vmatprep.subr.bf16.mxu1 %v6351_v1 }
 0x29f   :  { %5148 = vmatmul.mubr.bf16.vlgmr.msra.gmra.mrb[20].mxu0 %v6738_v35  ;;  %v6364_v35 = vld [vmem:[#allocation8 + $0x218] sm:$0xff]  }
 0x2a0   :  { %5189 = vmatmul.mubr.bf16.vlgmr.msra.gmra.mrb[20].mxu1 %v6740_v39  ;;  %6116 = vmatpush3.bf16.msra.mxu0 %v6352_v8  ;;  %v6365_v39 = vld [vmem:[#allocation8 + $0x298] sm:$0xff]  }
 0x2a1   :  { %6138 = vmatpush3.bf16.msra.mxu1 %v6353_v9  ;;  %6117 = vmatprep.subr.bf16.mxu0 %v6354_v6  ;;  %v6381_v8 = vld [vmem:[#allocation8 + $0x2b8] sm:$0xff]  }
 0x2a2   :  { %6139 = vmatprep.subr.bf16.mxu1 %v6355_v10  ;;  %v6382_v10 = vld [vmem:[#allocation8 + $0x340] sm:$0xff]  }
 0x2a4   :  { %6118 = vmatpush3.bf16.msra.mxu0 %v6356_v12  ;;  %v6383_v12 = vld [vmem:[#allocation8 + $0x3c0] sm:$0xff]  }
 0x2a5   :  { %6140 = vmatpush3.bf16.msra.mxu1 %v6357_v11  ;;  %6119 = vmatprep.subr.bf16.mxu0 %v6358_v13  ;;  %v6384_v13 = vld [vmem:[#allocation8 + $0x300] sm:$0xff]  }
 0x2a6   :  { %6141 = vmatprep.subr.bf16.mxu1 %v6359_v14  ;;  %v6385_v14 = vld [vmem:[#allocation8 + $0x380] sm:$0xff]  }
 0x2a8   :  { %6120 = vmatpush3.bf16.msra.mxu0 %v6360_v15  ;;  %v6386_v15 = vld [vmem:[#allocation8 + $0x348] sm:$0xff]  }
 0x2a9   :  { %6142 = vmatpush3.bf16.msra.mxu1 %v6361_v16  ;;  %6121 = vmatprep.subr.bf16.mxu0 %v6362_v17  ;;  %v6387_v16 = vld [vmem:[#allocation8 + $0x3c8] sm:$0xff]  }
 0x2aa   :  { %6143 = vmatprep.subr.bf16.mxu1 %v6363_v18  ;;  %v6388_v17 = vld [vmem:[#allocation8 + $0x308] sm:$0xff]  }
 0x2ab   :  { %v6389_v18 = vld [vmem:[#allocation8 + $0x388] sm:$0xff]  }
 0x2ac   :  { %6122 = vmatpush3.bf16.msra.mxu0 %v6364_v35  ;;  %v6390_v35 = vld [vmem:[#allocation8 + $0x350] sm:$0xff]  }
 0x2ad   :  { %6144 = vmatpush3.bf16.msra.mxu1 %v6365_v39  ;;  %6123 = vmatprep.subr.bf16.mxu0 %v6366_v19  ;;  %v6391_v39 = vld [vmem:[#allocation8 + $0x3d0] sm:$0xff]  }
 0x2ae   :  { %6145 = vmatprep.subr.bf16.mxu1 %v6367_v20  ;;  %v6392_v19 = vld [vmem:[#allocation8 + $0x310] sm:$0xff]  }
 0x2af   :  { %v6393_v20 = vld [vmem:[#allocation8 + $0x390] sm:$0xff]  }
 0x2b0   :  { %6124 = vmatpush3.bf16.msra.mxu0 %v6368_v21  ;;  %v6394_v21 = vld [vmem:[#allocation8 + $0x358] sm:$0xff]  }
 0x2b1   :  { %6146 = vmatpush3.bf16.msra.mxu1 %v6369_v23  ;;  %6125 = vmatprep.subr.bf16.mxu0 %v6370_v26  ;;  %v6395_v23 = vld [vmem:[#allocation8 + $0x3d8] sm:$0xff]  }
 0x2b2   :  { %v3687_v56 = vpop.f32.mrb[8].mxu0  ;;  %6147 = vmatprep.subr.bf16.mxu1 %v6371_v27  ;;  %v3773_v28 = vpop.f32.mrb[8].mxu1  ;;  %v6396_v26 = vld [vmem:[#allocation8 + $0x318] sm:$0xff]  }
 0x2b3   :  { %v6219_v45 = vadd.f32 %v3687_v56, %v641_v29  ;;  %v3689_v46 = vpop.f32.mrb[9].mxu0  ;;  %v6223_v4 = vadd.f32 %v3773_v28, %v649_v33  ;;  %v3775_v47 = vpop.f32.mrb[9].mxu1  ;;  %v6397_v27 = vld [vmem:[#allocation8 + $0x398] sm:$0xff]   ;;  %v6405_v56 = vld [vmem:[#allocation8 + $0x3a8] sm:$0xff]   ;;  %v6408_v28 = vld [vmem:[#allocation8 + $0x330] sm:$0xff]  }
 0x2b4   :  { %v6220_v62 = vadd.f32 %v3689_v46, %v645_v36  ;;  %v3691_v2 = vpop.f32.mrb[10].mxu0  ;;  %6126 = vmatpush3.bf16.msra.mxu0 %v6372_v37  ;;  %v6224_v48 = vadd.f32 %v3775_v47, %v653_v41  ;;  %v3777_v49 = vpop.f32.mrb[10].mxu1  ;;  %v6401_v37 = vld [vmem:[#allocation8 + $0x3a0] sm:$0xff]   ;;  %v6409_v46 = vld [vmem:[#allocation8 + $0x3b0] sm:$0xff]   ;;  %v6412_v47 = vld [vmem:[#allocation8 + $0x338] sm:$0xff]  }
 0x2b5   :  { %v6221_v40 = vadd.f32 %v3691_v2, %v641_v29  ;;  %6148 = vmatpush3.bf16.msra.mxu1 %v6373_v42  ;;  %v3693_v7 = vpop.f32.mrb[11].mxu0  ;;  %6127 = vmatprep.subr.bf16.mxu0 %v6374_v43  ;;  %v6225_v50 = vadd.f32 %v3777_v49, %v649_v33  ;;  %v3779_v52 = vpop.f32.mrb[11].mxu1  ;;  %v3962_v38 = vmax.f32 %v6219_v45, 0.0  ;;  %v3964_v58 = vmax.f32 %v6223_v4, 0.0  ;;  %v6398_v29 = vld [vmem:[#allocation8 + $0x360] sm:$0xff]   ;;  %v6403_v42 = vld [vmem:[#allocation8 + $0x3e8] sm:$0xff]  }
 0x2b6   :  { %v6222_v51 = vadd.f32 %v3693_v7, %v645_v36  ;;  %6149 = vmatprep.subr.bf16.mxu1 %v6375_v63  ;;  %v6226_v55 = vadd.f32 %v3779_v52, %v653_v41  ;;  %v3963_v59 = vmax.f32 %v6220_v62, 0.0  ;;  %v3965_v61 = vmax.f32 %v6224_v48, 0.0  ;;  %v6399_v33 = vld [vmem:[#allocation8 + $0x3e0] sm:$0xff]   ;;  %v6402_v41 = vld [vmem:[#allocation8 + $0x368] sm:$0xff]   ;;  %v6406_v63 = vld [vmem:[#allocation8 + $0x370] sm:$0xff]  }
 0x2b7   :  { %v3978_v54 = vmax.f32 %v6221_v40, 0.0  ;;  %v3980_v32 = vmax.f32 %v6225_v50, 0.0  ;;  %v6400_v36 = vld [vmem:[#allocation8 + $0x320] sm:$0xff]   ;;  %v6404_v43 = vld [vmem:[#allocation8 + $0x328] sm:$0xff]   ;;  %v6407_v45 = vld [vmem:[#allocation8 + $0x3f0] sm:$0xff]   ;;  %v665_v48 = vrot.slane %v6754_v22, %v632_v30  ;;  %v661_v40 = vrot.slane %v6754_v22, %v628_v31 }
 0x2b8   :  { %v3979_v3 = vmax.f32 %v6222_v51, 0.0  ;;  %6128 = vmatpush3.bf16.msra.mxu0 %v6376_v5  ;;  %v3981_v1 = vmax.f32 %v6226_v55, 0.0  ;;  %v6410_v4 = vld [vmem:[#allocation8 + $0x378] sm:$0xff]   ;;  %v657_v5 = vrot.slane %v6754_v22, %v624_v24  ;;  %v669_v49 = vrot.slane %v6754_v22, %v636_v34 }
 0x2b9   :  { %v3994_v0 = vpack.c.bf16 %v3978_v54, %v3962_v38  ;;  %6150 = vmatpush3.bf16.msra.mxu1 %v6377_v25  ;;  %6129 = vmatprep.subr.bf16.mxu0 %v6378_v44  ;;  %v3996_v9 = vpack.c.bf16 %v3980_v32, %v3964_v58  ;;  %v6411_v62 = vld [vmem:[#allocation8 + $0x3f8] sm:$0xff]  }
 0x2ba   :  { %v3995_v6 = vpack.c.bf16 %v3979_v3, %v3963_v59  ;;  %6151 = vmatprep.subr.bf16.mxu1 %v6379_v53  ;;  %v3997_v11 = vpack.c.bf16 %v3981_v1, %v3965_v61  ;;  %v6413_v2 = vld [vmem:[#allocation8 + $0x3b8] sm:$0xff]  }
 0x2bc   :  { %6130 = vmatpush3.bf16.msra.mxu0 %v6380_v60  ;;  %5229 = vmatprep.mubr.bf16.mxu0 %v3995_v6 }
 0x2bd   :  { %6152 = vmatpush3.bf16.msra.mxu1 %v6381_v8  ;;  %5270 = vmatprep.mubr.bf16.mxu1 %v3997_v11 }
 0x2be   :  { %6159 = vmatprep.subr.bf16.mxu0 %v6382_v10  ;;  %6181 = vmatprep.subr.bf16.mxu1 %v6383_v12 }
 0x2bf   :  { %5230 = vmatmul.mubr.bf16.vlgmr.msra.gmra.mrb[24].mxu0 %v3994_v0 }
 0x2c0   :  { %5271 = vmatmul.mubr.bf16.vlgmr.msra.gmra.mrb[24].mxu1 %v3996_v9  ;;  %6160 = vmatpush3.bf16.msra.mxu0 %v6384_v13  ;;  %v5898_v13 = vld [vmem:[#allocation10] ss:$0 sm:$0xff] }
 0x2c1   :  { %6182 = vmatpush3.bf16.msra.mxu1 %v6385_v14  ;;  %6161 = vmatprep.subr.bf16.mxu0 %v6386_v15 }
 0x2c2   :  { %6183 = vmatprep.subr.bf16.mxu1 %v6387_v16 }
 0x2c4   :  { %6162 = vmatpush3.bf16.msra.mxu0 %v6388_v17 }
 0x2c5   :  { %6184 = vmatpush3.bf16.msra.mxu1 %v6389_v18  ;;  %6163 = vmatprep.subr.bf16.mxu0 %v6390_v35 }
 0x2c6   :  { %6185 = vmatprep.subr.bf16.mxu1 %v6391_v39 }
 0x2c8   :  { %6164 = vmatpush3.bf16.msra.mxu0 %v6392_v19 }
 0x2c9   :  { %6186 = vmatpush3.bf16.msra.mxu1 %v6393_v20  ;;  %6165 = vmatprep.subr.bf16.mxu0 %v6394_v21 }
 0x2ca   :  { %6187 = vmatprep.subr.bf16.mxu1 %v6395_v23 }
 0x2cc   :  { %6166 = vmatpush3.bf16.msra.mxu0 %v6396_v26 }
 0x2cd   :  { %6188 = vmatpush3.bf16.msra.mxu1 %v6397_v27  ;;  %6167 = vmatprep.subr.bf16.mxu0 %v6398_v29 }
 0x2ce   :  { %6189 = vmatprep.subr.bf16.mxu1 %v6399_v33 }
 0x2d0   :  { %6168 = vmatpush3.bf16.msra.mxu0 %v6400_v36 }
 0x2d1   :  { %6190 = vmatpush3.bf16.msra.mxu1 %v6401_v37  ;;  %6169 = vmatprep.subr.bf16.mxu0 %v6402_v41 }
 0x2d2   :  { %6191 = vmatprep.subr.bf16.mxu1 %v6403_v42 }
 0x2d4   :  { %6170 = vmatpush3.bf16.msra.mxu0 %v6404_v43 }
 0x2d5   :  { %6192 = vmatpush3.bf16.msra.mxu1 %v6405_v56  ;;  %6171 = vmatprep.subr.bf16.mxu0 %v6406_v63 }
 0x2d6   :  { %6193 = vmatprep.subr.bf16.mxu1 %v6407_v45 }
 0x2d8   :  { %6172 = vmatpush3.bf16.msra.mxu0 %v6408_v28 }
 0x2d9   :  { %6194 = vmatpush3.bf16.msra.mxu1 %v6409_v46  ;;  %6173 = vmatprep.subr.bf16.mxu0 %v6410_v4 }
 0x2da   :  { %6195 = vmatprep.subr.bf16.mxu1 %v6411_v62 }
 0x2dc   :  { %6174 = vmatpush3.bf16.msra.mxu0 %v6412_v47 }
 0x2dd   :  { %6196 = vmatpush3.bf16.msra.mxu1 %v6413_v2 }
 0x332   :  { %v3859_v7 = vpop.f32.mrb[12].mxu0  ;;  %v3945_v44 = vpop.f32.mrb[12].mxu1 }
 0x333   :  { %v6227_v25 = vadd.f32 %v3859_v7, %v657_v5  ;;  %v3861_v50 = vpop.f32.mrb[13].mxu0  ;;  %v6231_v51 = vadd.f32 %v3945_v44, %v665_v48  ;;  %v3947_v53 = vpop.f32.mrb[13].mxu1 }
 0x334   :  { %v6228_v52 = vadd.f32 %v3861_v50, %v661_v40  ;;  %v3863_v24 = vpop.f32.mrb[14].mxu0  ;;  %v6232_v38 = vadd.f32 %v3947_v53, %v669_v49  ;;  %v3949_v55 = vpop.f32.mrb[14].mxu1 }
 0x335   :  { %v6229_v54 = vadd.f32 %v3863_v24, %v657_v5  ;;  %v3865_v30 = vpop.f32.mrb[15].mxu0  ;;  %v6233_v58 = vadd.f32 %v3949_v55, %v665_v48  ;;  %v3951_v32 = vpop.f32.mrb[15].mxu1  ;;  %v3966_v31 = vmax.f32 %v6227_v25, 0.0  ;;  %v3968_v60 = vmax.f32 %v6231_v51, 0.0 }
 0x336   :  { %v6230_v59 = vadd.f32 %v3865_v30, %v661_v40  ;;  %v6234_v57 = vadd.f32 %v3951_v32, %v669_v49  ;;  %v3967_v34 = vmax.f32 %v6228_v52, 0.0  ;;  %v3969_v0 = vmax.f32 %v6232_v38, 0.0 }
 0x337   :  { %v3982_v3 = vmax.f32 %v6229_v54, 0.0  ;;  %v3984_v22 = vmax.f32 %v6233_v58, 0.0 }
 0x338   :  { %v3983_v61 = vmax.f32 %v6230_v59, 0.0  ;;  %v3985_v8 = vmax.f32 %v6234_v57, 0.0 }
 0x339   :  { %v3998_v1 = vpack.c.bf16 %v3982_v3, %v3966_v31  ;;  %v4000_v9 = vpack.c.bf16 %v3984_v22, %v3968_v60 }
 0x33a   :  { %v3999_v6 = vpack.c.bf16 %v3983_v61, %v3967_v34  ;;  %v4001_v10 = vpack.c.bf16 %v3985_v8, %v3969_v0 }
 0x33c   :  { %5311 = vmatprep.mubr.bf16.mxu0 %v3999_v6  ;;  %5352 = vmatprep.mubr.bf16.mxu1 %v4001_v10 }
 0x33d   :  { %5312 = vmatmul.mubr.bf16.vlgmr.msra.gmra.mrb[28].mxu0 %v3998_v1  ;;  %5353 = vmatmul.mubr.bf16.vlgmr.msra.gmra.mrb[28].mxu1 %v4000_v9 }
 0x352   :  { %v6043_v12 = vpop.f32.mrb[16].mxu0 }
 0x353   :  { %v6065_v11 = vpop.f32.mrb[16].mxu1  ;;  %v6044_v14 = vpop.f32.mrb[17].mxu0 }
 0x354   :  { %v6045_v15 = vadd.f32 %v6044_v14, %v6043_v12  ;;  %v6066_v16 = vpop.f32.mrb[17].mxu1  ;;  %v6046_v17 = vpop.f32.mrb[18].mxu0 }
 0x355   :  { %v6067_v18 = vadd.f32 %v6066_v16, %v6065_v11  ;;  %v6068_v35 = vpop.f32.mrb[18].mxu1  ;;  %v6047_v39 = vpop.f32.mrb[19].mxu0 }
 0x356   :  { %v5068_v19 = vadd.f32 %v6045_v15, %v5898_v13  ;;  %v6048_v20 = vadd.f32 %v6047_v39, %v6046_v17  ;;  %v6069_v21 = vpop.f32.mrb[19].mxu1 }
 0x357   :  { %v6070_v23 = vadd.f32 %v6069_v21, %v6068_v35 }
 0x358   :  { %v5109_v26 = vadd.f32 %v6067_v18, %v5068_v19  ;;  %v5071_v27 = vadd.f32 %v6048_v20, %v5898_v13 }
 0x35a   :  { %v5112_v29 = vadd.f32 %v6070_v23, %v5071_v27 }
 0x372   :  { %v6087_v33 = vpop.f32.mrb[20].mxu0 }
 0x373   :  { %v6109_v36 = vpop.f32.mrb[20].mxu1  ;;  %v6088_v37 = vpop.f32.mrb[21].mxu0 }
 0x374   :  { %v6089_v41 = vadd.f32 %v6088_v37, %v6087_v33  ;;  %v6110_v42 = vpop.f32.mrb[21].mxu1  ;;  %v6090_v43 = vpop.f32.mrb[22].mxu0 }
 0x375   :  { %v6111_v56 = vadd.f32 %v6110_v42, %v6109_v36  ;;  %v6112_v63 = vpop.f32.mrb[22].mxu1  ;;  %v6091_v45 = vpop.f32.mrb[23].mxu0 }
 0x376   :  { %v5150_v28 = vadd.f32 %v6089_v41, %v5109_v26  ;;  %v6092_v46 = vadd.f32 %v6091_v45, %v6090_v43  ;;  %v6113_v4 = vpop.f32.mrb[23].mxu1 }
 0x377   :  { %v6114_v62 = vadd.f32 %v6113_v4, %v6112_v63 }
 0x378   :  { %v5191_v47 = vadd.f32 %v6111_v56, %v5150_v28  ;;  %v5153_v2 = vadd.f32 %v6092_v46, %v5112_v29 }
 0x37a   :  { %v5194_v5 = vadd.f32 %v6114_v62, %v5153_v2 }
 0x392   :  { %v6131_v48 = vpop.f32.mrb[24].mxu0 }
 0x393   :  { %v6153_v40 = vpop.f32.mrb[24].mxu1  ;;  %v6132_v49 = vpop.f32.mrb[25].mxu0 }
 0x394   :  { %v6133_v7 = vadd.f32 %v6132_v49, %v6131_v48  ;;  %v6154_v25 = vpop.f32.mrb[25].mxu1  ;;  %v6134_v44 = vpop.f32.mrb[26].mxu0 }
 0x395   :  { %v6155_v50 = vadd.f32 %v6154_v25, %v6153_v40  ;;  %v6156_v51 = vpop.f32.mrb[26].mxu1  ;;  %v6135_v52 = vpop.f32.mrb[27].mxu0 }
 0x396   :  { %v5232_v53 = vadd.f32 %v6133_v7, %v5191_v47  ;;  %v6136_v24 = vadd.f32 %v6135_v52, %v6134_v44  ;;  %v6157_v38 = vpop.f32.mrb[27].mxu1 }
 0x397   :  { %v6158_v54 = vadd.f32 %v6157_v38, %v6156_v51 }
 0x398   :  { %v5273_v55 = vadd.f32 %v6155_v50, %v5232_v53  ;;  %v5235_v30 = vadd.f32 %v6136_v24, %v5194_v5 }
 0x39a   :  { %v5276_v58 = vadd.f32 %v6158_v54, %v5235_v30 }
 0x410   :  { %v6175_v59 = vpop.f32.mrb[28].mxu0  ;;  %v6197_v32 = vpop.f32.mrb[28].mxu1 }
 0x411   :  { %v6176_v31 = vpop.f32.mrb[29].mxu0  ;;  %v6198_v57 = vpop.f32.mrb[29].mxu1 }
 0x412   :  { %v6177_v3 = vadd.f32 %v6176_v31, %v6175_v59  ;;  %v6178_v60 = vpop.f32.mrb[30].mxu0  ;;  %v6199_v34 = vadd.f32 %v6198_v57, %v6197_v32  ;;  %v6200_v22 = vpop.f32.mrb[30].mxu1 }
 0x413   :  { %v6179_v61 = vpop.f32.mrb[31].mxu0  ;;  %v6201_v8 = vpop.f32.mrb[31].mxu1 }
 0x414   :  { %v5314_v0 = vadd.f32 %v6177_v3, %v5273_v55  ;;  %v6180_v1 = vadd.f32 %v6179_v61, %v6178_v60  ;;  %v6202_v9 = vadd.f32 %v6201_v8, %v6200_v22 }
 0x416   :  { %v5355_v6 = vadd.f32 %v6199_v34, %v5314_v0  ;;  %v5317_v10 = vadd.f32 %v6180_v1, %v5276_v58 }
 0x418   :  { %5361 = vst [vmem:[#allocation11] sm:$0xff] %v5355_v6  ;;  %v5358_v12 = vadd.f32 %v6202_v9, %v5317_v10 }
 0x41a   :  { %5362 = vst [vmem:[#allocation11 + $0x8] sm:$0xff] %v5358_v12 }
 0x41b   :  { %6542 = shalt.err (!%p6539_p2)
}
 0x41c   :  { %s6543_s7 = scalar_lea.hbm %s6797_s5, 256 }
 0x41d   :  { %p6544_p3 = scmp.ne.s32.totalorder %s6797_s5, %s6543_s7  ;;  %p6547_p4 = scmp.lt.u32.totalorder %s6543_s7, %s6797_s5 }
 0x41f   :  { %p6549_p5 = pnand %p6547_p4, %p6544_p3 }
 0x421   :  { %6552 = shalt.err (!%p6549_p5)
}
 0x422   :  { %s6572_s12 = smov 128   ;;  %s6573_s13 = smov 8  }
 0x423   :  { %5374 = dma.vmem_to_hbm [thread:$0]  %s5369_s3, 256, %s6797_s5, [#allocation4], %s6572_s12, %s6572_s12, %s6573_s13  }
 0x424   :  { %6559 = dma.done.wait [#allocation4], 256  }
 0x425   :  { %6560 = vsyncadd [#allocation4], 4294967040 }
 0x426   :  { %5378 = vsyncpa [#allocation3], 1 }
 0x427   :  { %5379 = vsyncpa [#allocation6], 1 }
 0x428   :  { %5380 = vsyncpa [#allocation9], 1 }
 0x429   :  { %5381 = vsyncpa [#allocation4], 1 }

// kernel: tpu_custom_call.1
= control target key start
LH: loop header
LB: loop body
LE: loop exit
PB: predicated region body
PF: predicated region fallthrough
CT: control target
= control target key end

     0   :  { %10 = vsyncpa [#allocation3], 0  ;;  %s6792_s0 = inlined_call_operand.hbm [shape: bf16[16,512], index: 0, kind: input, shape index: {}]   ;;  %s6793_s1 = inlined_call_operand.hbm [shape: bf16[512,2048], index: 1, kind: input, shape index: {}]   ;;  %s6794_s2 = inlined_call_operand.hbm [shape: f32[1,2048], index: 2, kind: input, shape index: {}]   ;;  %s6795_s3 = inlined_call_operand.hbm [shape: bf16[2048,128], index: 3, kind: input, shape index: {}]   ;;  %s6796_s4 = inlined_call_operand.hbm [shape: f32[1,128], index: 4, kind: input, shape index: {}]   ;;  %s6797_s5 = inlined_call_operand.hbm [shape: f32[16,128], index: 5, kind: output, shape index: {}]  }
   0x1   :  { %11 = vsyncpa [#allocation6], 0 }
   0x2   :  { %12 = vsyncpa [#allocation9], 0 }
   0x3   :  { %13 = vsyncpa [#allocation4], 0  ;;  %s6561_s18 = smov [#allocation5]   ;;  %s6421_s22 = scalar_lea.hbm %s6793_s1, 65536 }
   0x4   :  { %s31_s19 = sshll.u32 %s6561_s18, 4  ;;  %p6422_p0 = scmp.ne.s32.totalorder %s6793_s1, %s6421_s22  ;;  %s32_s19 = int_to_ptr.vmem [resolvable:$true] %s31_s19 }
   0x5   :  { %p6425_p1 = scmp.lt.u32.totalorder %s6421_s22, %s6793_s1 }
   0x7   :  { %p6427_p2 = pnand %p6425_p1, %p6422_p0 }
   0x9   :  { %6430 = shalt.err (!%p6427_p2)
}
   0xa   :  { %s6431_s27 = scalar_lea.vmem %s32_s19, 65536  ;;  %p6436_p4 = scmp.lt.s32.totalorder %s32_s19, %s32_s19 }
   0xb   :  { %p6432_p3 = scmp.ne.s32.totalorder %s32_s19, %s6431_s27  ;;  %p6437_p5 = scmp.lt.s32.totalorder %s6431_s27, %s6431_s27 }
   0xd   :  { %p6438_p6 = por %p6437_p5, %p6436_p4 }
   0xf   :  { %p6439_p7 = pnand %p6438_p6, %p6432_p3 }
  0x11   :  { %6442 = shalt.err (!%p6439_p7)
}
  0x12   :  { %s6562_s28 = smov 1024   ;;  %s6563_s29 = smov 64  }
  0x13   :  { %37 = dma.hbm_to_vmem [thread:$0]  %s6793_s1, 65536, %s32_s19, [#allocation6], %s6562_s28, %s6562_s28, %s6563_s29  }
  0x14   :  { %s6564_s7 = smov [#allocation8]   ;;  %s6443_s11 = scalar_lea.hbm %s6795_s3, 16384 }
  0x15   :  { %s53_s8 = sshll.u32 %s6564_s7, 4  ;;  %p6444_p8 = scmp.ne.s32.totalorder %s6795_s3, %s6443_s11  ;;  %s54_s8 = int_to_ptr.vmem [resolvable:$true] %s53_s8 }
  0x16   :  { %p6447_p9 = scmp.lt.u32.totalorder %s6443_s11, %s6795_s3 }
  0x18   :  { %p6449_p10 = pnand %p6447_p9, %p6444_p8 }
  0x1a   :  { %6452 = shalt.err (!%p6449_p10)
}
  0x1b   :  { %s6453_s16 = scalar_lea.vmem %s54_s8, 16384  ;;  %p6458_p12 = scmp.lt.s32.totalorder %s54_s8, %s54_s8 }
  0x1c   :  { %p6454_p11 = scmp.ne.s32.totalorder %s54_s8, %s6453_s16  ;;  %p6459_p13 = scmp.lt.s32.totalorder %s6453_s16, %s6453_s16 }
  0x1e   :  { %p6460_p0 = por %p6459_p13, %p6458_p12 }
  0x20   :  { %p6461_p1 = pnand %p6460_p0, %p6454_p11 }
  0x22   :  { %6464 = shalt.err (!%p6461_p1)
}
  0x23   :  { %s6565_s1 = smov 4   ;;  %s6566_s19 = smov [#allocation2]  }
  0x24   :  { %59 = dma.hbm_to_vmem [thread:$0]  %s6795_s3, 16384, %s54_s8, [#allocation9], %s6563_s29, %s6563_s29, %s6565_s1  }
  0x25   :  { %s19_s20 = sshll.u32 %s6566_s19, 4  ;;  %s6465_s23 = scalar_lea.hbm %s6792_s0, 512  ;;  %s20_s20 = int_to_ptr.vmem [resolvable:$true] %s19_s20 }
  0x26   :  { %p6466_p2 = scmp.ne.s32.totalorder %s6792_s0, %s6465_s23  ;;  %p6469_p3 = scmp.lt.u32.totalorder %s6465_s23, %s6792_s0 }
  0x28   :  { %p6471_p4 = pnand %p6469_p3, %p6466_p2 }
  0x2a   :  { %6474 = shalt.err (!%p6471_p4)
}
  0x2b   :  { %s6475_s28 = scalar_lea.vmem %s20_s20, 512  ;;  %p6480_p6 = scmp.lt.s32.totalorder %s20_s20, %s20_s20 }
  0x2c   :  { %p6476_p5 = scmp.ne.s32.totalorder %s20_s20, %s6475_s28  ;;  %p6481_p7 = scmp.lt.s32.totalorder %s6475_s28, %s6475_s28 }
  0x2e   :  { %p6482_p8 = por %p6481_p7, %p6480_p6 }
  0x30   :  { %p6483_p9 = pnand %p6482_p8, %p6476_p5 }
  0x32   :  { %6486 = shalt.err (!%p6483_p9)
}
  0x33   :  { %s6567_s3 = smov 256   ;;  %s6568_s29 = smov 16  }
  0x34   :  { %25 = dma.hbm_to_vmem [thread:$0]  %s6792_s0, 512, %s20_s20, [#allocation3], %s6567_s3, %s6567_s3, %s6568_s29  }
  0x35   :  { %s6569_s7 = smov [#allocation7]   ;;  %s6570_s9 = smov [#allocation10]  }
  0x36   :  { %s44_s8 = sshll.u32 %s6569_s7, 4  ;;  %s66_s10 = sshll.u32 %s6570_s9, 4  ;;  %s45_s8 = int_to_ptr.vmem [resolvable:$true] %s44_s8  ;;  %s67_s10 = int_to_ptr.vmem [resolvable:$true] %s66_s10 }
  0x37   :  { %s6487_s13 = scalar_lea.hbm %s6794_s2, 256 }
  0x38   :  { %p6488_p10 = scmp.ne.s32.totalorder %s6794_s2, %s6487_s13  ;;  %p6491_p11 = scmp.lt.u32.totalorder %s6487_s13, %s6794_s2 }
  0x3a   :  { %p6493_p12 = pnand %p6491_p11, %p6488_p10 }
  0x3c   :  { %6496 = shalt.err (!%p6493_p12)
}
  0x3d   :  { %s6497_s0 = scalar_lea.vmem %s45_s8, 256  ;;  %p6502_p0 = scmp.lt.s32.totalorder %s45_s8, %s45_s8 }
  0x3e   :  { %p6498_p13 = scmp.ne.s32.totalorder %s45_s8, %s6497_s0  ;;  %p6503_p1 = scmp.lt.s32.totalorder %s6497_s0, %s6497_s0 }
  0x40   :  { %p6504_p2 = por %p6503_p1, %p6502_p0 }
  0x42   :  { %p6505_p3 = pnand %p6504_p2, %p6498_p13 }
  0x44   :  { %6508 = shalt.err (!%p6505_p3)
}
  0x45   :  { %47 = dma.hbm_to_vmem [thread:$0]  %s6794_s2, 256, %s45_s8, [#allocation6]  }
  0x46   :  { %s6509_s21 = scalar_lea.hbm %s6796_s4, 16 }
  0x47   :  { %p6510_p4 = scmp.ne.s32.totalorder %s6796_s4, %s6509_s21  ;;  %p6513_p5 = scmp.lt.u32.totalorder %s6509_s21, %s6796_s4 }
  0x49   :  { %p6515_p6 = pnand %p6513_p5, %p6510_p4 }
  0x4b   :  { %6518 = shalt.err (!%p6515_p6)
}
  0x4c   :  { %s6519_s26 = scalar_lea.vmem %s67_s10, 16  ;;  %s6523_s27 = scalar_lea.vmem %s67_s10, 32 }
  0x4d   :  { %p6520_p7 = scmp.ne.s32.totalorder %s67_s10, %s6519_s26  ;;  %p6524_p8 = scmp.lt.s32.totalorder %s67_s10, %s67_s10 }
  0x4e   :  { %p6525_p9 = scmp.lt.s32.totalorder %s6523_s27, %s6519_s26 }
  0x50   :  { %p6526_p10 = por %p6525_p9, %p6524_p8 }
  0x52   :  { %p6527_p11 = pnand %p6526_p10, %p6520_p7 }
  0x54   :  { %6530 = shalt.err (!%p6527_p11)
}
  0x55   :  { %69 = dma.hbm_to_vmem [thread:$0]  %s6796_s4, 16, %s67_s10, [#allocation9]  }
  0x56   :  { %6553 = dma.done.wait [#allocation3], 512  }
  0x57   :  { %6554 = vsyncadd [#allocation3], 4294966784 }
  0x58   :  { %6555 = dma.done.wait [#allocation6], 65792  }
  0x59   :  { %6556 = vsyncadd [#allocation6], 4294901504 }
  0x5a   :  { %6557 = dma.done.wait [#allocation9], 16400  }
  0x5b   :  { %6558 = vsyncadd [#allocation9], 4294950896  ;;  %v90_v0 = vld [vmem:[#allocation5] sm:$0xff]  ;;  %v91_v2 = vld [vmem:[#allocation5 + $0x8] sm:$0xff]  ;;  %s6571_s4 = smov [#allocation11]  }
  0x5c   :  { %v98_v1 = vld [vmem:[#allocation5 + $0x40] sm:$0xff]  ;;  %v99_v4 = vld [vmem:[#allocation5 + $0x48] sm:$0xff]  ;;  %s5368_s3 = sshll.u32 %s6571_s4, 4  ;;  %s5369_s3 = int_to_ptr.vmem [resolvable:$true] %s5368_s3 }
  0x5d   :  { %v5387_v3 = vcombine.high %v90_v0, %v98_v1  ;;  %v5386_v5 = vcombine.low %v90_v0, %v98_v1  ;;  %v106_v6 = vld [vmem:[#allocation5 + $0x80] sm:$0xff]  ;;  %v5389_v8 = vcombine.high %v91_v2, %v99_v4  ;;  %v5388_v9 = vcombine.low %v91_v2, %v99_v4  ;;  %v107_v11 = vld [vmem:[#allocation5 + $0x88] sm:$0xff]  ;;  %s6531_s29 = scalar_lea.vmem %s5369_s3, 256  ;;  %p6536_p13 = scmp.lt.s32.totalorder %s5369_s3, %s5369_s3 }
  0x5e   :  { %v114_v7 = vld [vmem:[#allocation5 + $0xc0] sm:$0xff]  ;;  %v115_v12 = vld [vmem:[#allocation5 + $0xc8] sm:$0xff]  ;;  %p6532_p12 = scmp.ne.s32.totalorder %s5369_s3, %s6531_s29  ;;  %p6537_p0 = scmp.lt.s32.totalorder %s6531_s29, %s6531_s29 }
  0x5f   :  { %v5403_v10 = vcombine.high %v106_v6, %v114_v7  ;;  %v122_v13 = vld [vmem:[#allocation5 + $0x100] sm:$0xff]  ;;  %3266 = vmatprep.subr.bf16.mxu0 %v5387_v3  ;;  %v5405_v14 = vcombine.high %v107_v11, %v115_v12  ;;  %v123_v16 = vld [vmem:[#allocation5 + $0x108] sm:$0xff]  ;;  %3352 = vmatprep.subr.bf16.mxu1 %v5389_v8  ;;  %v5402_v18 = vcombine.low %v106_v6, %v114_v7 }
  0x60   :  { %v130_v15 = vld [vmem:[#allocation5 + $0x140] sm:$0xff]  ;;  %v131_v17 = vld [vmem:[#allocation5 + $0x148] sm:$0xff]  ;;  %3267 = vmatpush1.bf16.msra.mxu0 %v5386_v5  ;;  %3353 = vmatpush1.bf16.msra.mxu1 %v5388_v9  ;;  %v5404_v19 = vcombine.low %v107_v11, %v115_v12  ;;  %p6538_p1 = por %p6537_p0, %p6536_p13 }
  0x61   :  { %3268 = vmatprep.subr.bf16.mxu0 %v5403_v10  ;;  %v5419_v20 = vcombine.high %v122_v13, %v130_v15  ;;  %3354 = vmatprep.subr.bf16.mxu1 %v5405_v14  ;;  %v5421_v21 = vcombine.high %v123_v16, %v131_v17  ;;  %v138_v22 = vld [vmem:[#allocation5 + $0x180] sm:$0xff]  ;;  %v139_v24 = vld [vmem:[#allocation5 + $0x188] sm:$0xff]  ;;  %v5418_v26 = vcombine.low %v122_v13, %v130_v15 }
  0x62   :  { %v146_v23 = vld [vmem:[#allocation5 + $0x1c0] sm:$0xff]  ;;  %v147_v25 = vld [vmem:[#allocation5 + $0x1c8] sm:$0xff]  ;;  %v5420_v27 = vcombine.low %v123_v16, %v131_v17  ;;  %p6539_p2 = pnand %p6538_p1, %p6532_p12 }
  0x63   :  { %v5435_v28 = vcombine.high %v138_v22, %v146_v23  ;;  %v5437_v29 = vcombine.high %v139_v24, %v147_v25  ;;  %v154_v30 = vld [vmem:[#allocation5 + $0x200] sm:$0xff]  ;;  %v155_v32 = vld [vmem:[#allocation5 + $0x208] sm:$0xff]  ;;  %v5434_v34 = vcombine.low %v138_v22, %v146_v23  ;;  %v5436_v35 = vcombine.low %v139_v24, %v147_v25 }
  0x64   :  { %3269 = vmatpush1.bf16.msra.mxu0 %v5402_v18  ;;  %3355 = vmatpush1.bf16.msra.mxu1 %v5404_v19  ;;  %v162_v31 = vld [vmem:[#allocation5 + $0x240] sm:$0xff]  ;;  %v163_v33 = vld [vmem:[#allocation5 + $0x248] sm:$0xff] }
  0x65   :  { %3270 = vmatprep.subr.bf16.mxu0 %v5419_v20  ;;  %3356 = vmatprep.subr.bf16.mxu1 %v5421_v21  ;;  %v5451_v36 = vcombine.high %v154_v30, %v162_v31  ;;  %v5453_v37 = vcombine.high %v155_v32, %v163_v33  ;;  %v170_v38 = vld [vmem:[#allocation5 + $0x280] sm:$0xff]  ;;  %v171_v40 = vld [vmem:[#allocation5 + $0x288] sm:$0xff]  ;;  %v5450_v42 = vcombine.low %v154_v30, %v162_v31 }
  0x66   :  { %v178_v39 = vld [vmem:[#allocation5 + $0x2c0] sm:$0xff]  ;;  %v179_v41 = vld [vmem:[#allocation5 + $0x2c8] sm:$0xff]  ;;  %v5452_v43 = vcombine.low %v155_v32, %v163_v33 }
  0x67   :  { %v5467_v44 = vcombine.high %v170_v38, %v178_v39  ;;  %v5469_v45 = vcombine.high %v171_v40, %v179_v41  ;;  %v186_v46 = vld [vmem:[#allocation5 + $0x300] sm:$0xff]  ;;  %v187_v48 = vld [vmem:[#allocation5 + $0x308] sm:$0xff]  ;;  %v5466_v50 = vcombine.low %v170_v38, %v178_v39  ;;  %v5468_v51 = vcombine.low %v171_v40, %v179_v41 }
  0x68   :  { %3271 = vmatpush1.bf16.msra.mxu0 %v5418_v26  ;;  %3357 = vmatpush1.bf16.msra.mxu1 %v5420_v27  ;;  %v194_v47 = vld [vmem:[#allocation5 + $0x340] sm:$0xff]  ;;  %v195_v49 = vld [vmem:[#allocation5 + $0x348] sm:$0xff] }
  0x69   :  { %3272 = vmatprep.subr.bf16.mxu0 %v5435_v28  ;;  %3358 = vmatprep.subr.bf16.mxu1 %v5437_v29  ;;  %v5483_v52 = vcombine.high %v186_v46, %v194_v47  ;;  %v5485_v53 = vcombine.high %v187_v48, %v195_v49  ;;  %v202_v54 = vld [vmem:[#allocation5 + $0x380] sm:$0xff]  ;;  %v203_v57 = vld [vmem:[#allocation5 + $0x388] sm:$0xff]  ;;  %v5482_v59 = vcombine.low %v186_v46, %v194_v47 }
  0x6a   :  { %v210_v55 = vld [vmem:[#allocation5 + $0x3c0] sm:$0xff]  ;;  %v211_v58 = vld [vmem:[#allocation5 + $0x3c8] sm:$0xff]  ;;  %v5484_v60 = vcombine.low %v187_v48, %v195_v49 }
  0x6b   :  { %v6664_v56 = vld [vmem:[#allocation2 + $0x4] ss:$16 sps:$4 sm:$0xff]   ;;  %v5499_v61 = vcombine.high %v202_v54, %v210_v55  ;;  %v5501_v62 = vcombine.high %v203_v57, %v211_v58  ;;  %v219_v1 = vld [vmem:[#allocation5 + $0x408] sm:$0xff]  ;;  %v5498_v3 = vcombine.low %v202_v54, %v210_v55  ;;  %v5500_v4 = vcombine.low %v203_v57, %v211_v58 }
  0x6c   :  { %3273 = vmatpush1.bf16.msra.mxu0 %v5434_v34  ;;  %3359 = vmatpush1.bf16.msra.mxu1 %v5436_v35  ;;  %v218_v63 = vld [vmem:[#allocation5 + $0x400] sm:$0xff]  ;;  %v227_v2 = vld [vmem:[#allocation5 + $0x448] sm:$0xff] }
  0x6d   :  { %3274 = vmatprep.subr.bf16.mxu0 %v5451_v36  ;;  %3360 = vmatprep.subr.bf16.mxu1 %v5453_v37  ;;  %v226_v0 = vld [vmem:[#allocation5 + $0x440] sm:$0xff]  ;;  %v5517_v6 = vcombine.high %v219_v1, %v227_v2  ;;  %v235_v9 = vld [vmem:[#allocation5 + $0x488] sm:$0xff]  ;;  %v5516_v12 = vcombine.low %v219_v1, %v227_v2 }
  0x6e   :  { %3298 = vmatprep.mubr.bf16.mxu0 %v6664_v56  ;;  %3384 = vmatprep.mubr.bf16.mxu1 %v6664_v56  ;;  %v5515_v5 = vcombine.high %v218_v63, %v226_v0  ;;  %v234_v7 = vld [vmem:[#allocation5 + $0x480] sm:$0xff]  ;;  %v243_v10 = vld [vmem:[#allocation5 + $0x4c8] sm:$0xff]  ;;  %v5514_v11 = vcombine.low %v218_v63, %v226_v0 }
  0x6f   :  { %v242_v8 = vld [vmem:[#allocation5 + $0x4c0] sm:$0xff]  ;;  %v5533_v14 = vcombine.high %v235_v9, %v243_v10  ;;  %v251_v17 = vld [vmem:[#allocation5 + $0x508] sm:$0xff]  ;;  %v5532_v20 = vcombine.low %v235_v9, %v243_v10 }
  0x70   :  { %3275 = vmatpush1.bf16.msra.mxu0 %v5450_v42  ;;  %3361 = vmatpush1.bf16.msra.mxu1 %v5452_v43  ;;  %v5531_v13 = vcombine.high %v234_v7, %v242_v8  ;;  %v250_v15 = vld [vmem:[#allocation5 + $0x500] sm:$0xff]  ;;  %v259_v18 = vld [vmem:[#allocation5 + $0x548] sm:$0xff]  ;;  %v5530_v19 = vcombine.low %v234_v7, %v242_v8 }
  0x71   :  { %3276 = vmatprep.subr.bf16.mxu0 %v5467_v44  ;;  %3362 = vmatprep.subr.bf16.mxu1 %v5469_v45  ;;  %v258_v16 = vld [vmem:[#allocation5 + $0x540] sm:$0xff]  ;;  %v5549_v22 = vcombine.high %v251_v17, %v259_v18  ;;  %v267_v25 = vld [vmem:[#allocation5 + $0x588] sm:$0xff]  ;;  %v5548_v28 = vcombine.low %v251_v17, %v259_v18 }
  0x72   :  { %v5547_v21 = vcombine.high %v250_v15, %v258_v16  ;;  %v266_v23 = vld [vmem:[#allocation5 + $0x580] sm:$0xff]  ;;  %v275_v26 = vld [vmem:[#allocation5 + $0x5c8] sm:$0xff]  ;;  %v5546_v27 = vcombine.low %v250_v15, %v258_v16 }
  0x73   :  { %v274_v24 = vld [vmem:[#allocation5 + $0x5c0] sm:$0xff]  ;;  %v5565_v30 = vcombine.high %v267_v25, %v275_v26  ;;  %v283_v33 = vld [vmem:[#allocation5 + $0x608] sm:$0xff]  ;;  %v5564_v36 = vcombine.low %v267_v25, %v275_v26 }
  0x74   :  { %3277 = vmatpush1.bf16.msra.mxu0 %v5466_v50  ;;  %3363 = vmatpush1.bf16.msra.mxu1 %v5468_v51  ;;  %v5563_v29 = vcombine.high %v266_v23, %v274_v24  ;;  %v282_v31 = vld [vmem:[#allocation5 + $0x600] sm:$0xff]  ;;  %v291_v34 = vld [vmem:[#allocation5 + $0x648] sm:$0xff]  ;;  %v5562_v35 = vcombine.low %v266_v23, %v274_v24 }
  0x75   :  { %3278 = vmatprep.subr.bf16.mxu0 %v5483_v52  ;;  %3364 = vmatprep.subr.bf16.mxu1 %v5485_v53  ;;  %v290_v32 = vld [vmem:[#allocation5 + $0x640] sm:$0xff]  ;;  %v5581_v38 = vcombine.high %v283_v33, %v291_v34  ;;  %v299_v41 = vld [vmem:[#allocation5 + $0x688] sm:$0xff]  ;;  %v5580_v44 = vcombine.low %v283_v33, %v291_v34 }
  0x76   :  { %v5579_v37 = vcombine.high %v282_v31, %v290_v32  ;;  %v298_v39 = vld [vmem:[#allocation5 + $0x680] sm:$0xff]  ;;  %v307_v42 = vld [vmem:[#allocation5 + $0x6c8] sm:$0xff]  ;;  %v5578_v43 = vcombine.low %v282_v31, %v290_v32 }
  0x77   :  { %v306_v40 = vld [vmem:[#allocation5 + $0x6c0] sm:$0xff]  ;;  %v5597_v46 = vcombine.high %v299_v41, %v307_v42  ;;  %v315_v49 = vld [vmem:[#allocation5 + $0x708] sm:$0xff]  ;;  %v5596_v52 = vcombine.low %v299_v41, %v307_v42 }
  0x78   :  { %3279 = vmatpush1.bf16.msra.mxu0 %v5482_v59  ;;  %3365 = vmatpush1.bf16.msra.mxu1 %v5484_v60  ;;  %v5595_v45 = vcombine.high %v298_v39, %v306_v40  ;;  %v314_v47 = vld [vmem:[#allocation5 + $0x700] sm:$0xff]  ;;  %v323_v50 = vld [vmem:[#allocation5 + $0x748] sm:$0xff]  ;;  %v5594_v51 = vcombine.low %v298_v39, %v306_v40 }
  0x79   :  { %3280 = vmatprep.subr.bf16.mxu0 %v5499_v61  ;;  %3366 = vmatprep.subr.bf16.mxu1 %v5501_v62  ;;  %v322_v48 = vld [vmem:[#allocation5 + $0x740] sm:$0xff]  ;;  %v5613_v54 = vcombine.high %v315_v49, %v323_v50  ;;  %v331_v58 = vld [vmem:[#allocation5 + $0x788] sm:$0xff]  ;;  %v5612_v61 = vcombine.low %v315_v49, %v323_v50 }
  0x7a   :  { %v5611_v53 = vcombine.high %v314_v47, %v322_v48  ;;  %v330_v55 = vld [vmem:[#allocation5 + $0x780] sm:$0xff]  ;;  %v339_v59 = vld [vmem:[#allocation5 + $0x7c8] sm:$0xff]  ;;  %v5610_v60 = vcombine.low %v314_v47, %v322_v48 }
  0x7b   :  { %v338_v57 = vld [vmem:[#allocation5 + $0x7c0] sm:$0xff]  ;;  %v5629_v63 = vcombine.high %v331_v58, %v339_v59  ;;  %v347_v2 = vld [vmem:[#allocation5 + $0x808] sm:$0xff] }
  0x7c   :  { %3281 = vmatpush1.bf16.msra.mxu0 %v5498_v3  ;;  %3367 = vmatpush1.bf16.msra.mxu1 %v5500_v4  ;;  %v5627_v62 = vcombine.high %v330_v55, %v338_v57  ;;  %v346_v0 = vld [vmem:[#allocation5 + $0x800] sm:$0xff]  ;;  %v355_v3 = vld [vmem:[#allocation5 + $0x848] sm:$0xff]  ;;  %v5626_v4 = vcombine.low %v330_v55, %v338_v57 }
  0x7d   :  { %3282 = vmatprep.subr.bf16.mxu0 %v5515_v5  ;;  %3368 = vmatprep.subr.bf16.mxu1 %v5517_v6  ;;  %v354_v1 = vld [vmem:[#allocation5 + $0x840] sm:$0xff]  ;;  %v5628_v5 = vcombine.low %v331_v58, %v339_v59  ;;  %v5645_v7 = vcombine.high %v347_v2, %v355_v3 }
  0x7e   :  { %v5643_v6 = vcombine.high %v346_v0, %v354_v1  ;;  %v362_v8 = vld [vmem:[#allocation5 + $0x880] sm:$0xff] }
  0x7f   :  { %v370_v9 = vld [vmem:[#allocation5 + $0x8c0] sm:$0xff] }
  0x80   :  { %3283 = vmatpush1.bf16.msra.mxu0 %v5514_v11  ;;  %3369 = vmatpush1.bf16.msra.mxu1 %v5516_v12  ;;  %v6282_v10 = vld [vmem:[#allocation2] ss:$16 sps:$4 sm:$0xff]   ;;  %v363_v11 = vld [vmem:[#allocation5 + $0x888] sm:$0xff]  ;;  %v5659_v15 = vcombine.high %v362_v8, %v370_v9 }
  0x81   :  { %3284 = vmatprep.subr.bf16.mxu0 %v5531_v13  ;;  %3370 = vmatprep.subr.bf16.mxu1 %v5533_v14  ;;  %v371_v12 = vld [vmem:[#allocation5 + $0x8c8] sm:$0xff]  ;;  %v5642_v13 = vcombine.low %v346_v0, %v354_v1  ;;  %v5644_v14 = vcombine.low %v347_v2, %v355_v3  ;;  %v378_v17 = vld [vmem:[#allocation5 + $0x900] sm:$0xff] }
  0x82   :  { %v5661_v16 = vcombine.high %v363_v11, %v371_v12  ;;  %v386_v18 = vld [vmem:[#allocation5 + $0x940] sm:$0xff]  ;;  %v5660_v23 = vcombine.low %v363_v11, %v371_v12  ;;  %v491_v12 = vld [vmem:[#allocation5 + $0xc88] sm:$0xff] }
  0x83   :  { %v5675_v24 = vcombine.high %v378_v17, %v386_v18  ;;  %v394_v25 = vld [vmem:[#allocation5 + $0x980] sm:$0xff] }
  0x84   :  { %3285 = vmatpush1.bf16.msra.mxu0 %v5530_v19  ;;  %3371 = vmatpush1.bf16.msra.mxu1 %v5532_v20  ;;  %v6283_v19 = vld [vmem:[#allocation2 + $0xc] ss:$16 sps:$4 sm:$0xff]   ;;  %v402_v26 = vld [vmem:[#allocation5 + $0x9c0] sm:$0xff] }
  0x85   :  { %3286 = vmatprep.subr.bf16.mxu0 %v5547_v21  ;;  %3372 = vmatprep.subr.bf16.mxu1 %v5549_v22  ;;  %v379_v20 = vld [vmem:[#allocation5 + $0x908] sm:$0xff]  ;;  %v5658_v22 = vcombine.low %v362_v8, %v370_v9  ;;  %v5691_v32 = vcombine.high %v394_v25, %v402_v26  ;;  %v410_v33 = vld [vmem:[#allocation5 + $0xa00] sm:$0xff] }
  0x86   :  { %v387_v21 = vld [vmem:[#allocation5 + $0x948] sm:$0xff]  ;;  %v418_v34 = vld [vmem:[#allocation5 + $0xa40] sm:$0xff] }
  0x87   :  { %v5676_v31 = vcombine.low %v379_v20, %v387_v21  ;;  %v5707_v40 = vcombine.high %v410_v33, %v418_v34  ;;  %v426_v41 = vld [vmem:[#allocation5 + $0xa80] sm:$0xff] }
  0x88   :  { %3287 = vmatpush1.bf16.msra.mxu0 %v5546_v27  ;;  %3373 = vmatpush1.bf16.msra.mxu1 %v5548_v28  ;;  %v395_v27 = vld [vmem:[#allocation5 + $0x988] sm:$0xff]  ;;  %v5677_v28 = vcombine.high %v379_v20, %v387_v21  ;;  %v434_v42 = vld [vmem:[#allocation5 + $0xac0] sm:$0xff] }
  0x89   :  { %3288 = vmatprep.subr.bf16.mxu0 %v5563_v29  ;;  %3374 = vmatprep.subr.bf16.mxu1 %v5565_v30  ;;  %v403_v29 = vld [vmem:[#allocation5 + $0x9c8] sm:$0xff]  ;;  %v5674_v30 = vcombine.low %v378_v17, %v386_v18  ;;  %v5723_v48 = vcombine.high %v426_v41, %v434_v42  ;;  %v442_v49 = vld [vmem:[#allocation5 + $0xb00] sm:$0xff] }
  0x8a   :  { %v5692_v39 = vcombine.low %v395_v27, %v403_v29  ;;  %v450_v50 = vld [vmem:[#allocation5 + $0xb40] sm:$0xff]  ;;  %v507_v20 = vld [vmem:[#allocation5 + $0xd08] sm:$0xff] }
  0x8b   :  { %v5739_v57 = vcombine.high %v442_v49, %v450_v50  ;;  %v458_v58 = vld [vmem:[#allocation5 + $0xb80] sm:$0xff] }
  0x8c   :  { %3289 = vmatpush1.bf16.msra.mxu0 %v5562_v35  ;;  %3375 = vmatpush1.bf16.msra.mxu1 %v5564_v36  ;;  %v411_v35 = vld [vmem:[#allocation5 + $0xa08] sm:$0xff]  ;;  %v5693_v36 = vcombine.high %v395_v27, %v403_v29  ;;  %v466_v59 = vld [vmem:[#allocation5 + $0xbc0] sm:$0xff] }
  0x8d   :  { %3290 = vmatprep.subr.bf16.mxu0 %v5579_v37  ;;  %3376 = vmatprep.subr.bf16.mxu1 %v5581_v38  ;;  %v419_v37 = vld [vmem:[#allocation5 + $0xa48] sm:$0xff]  ;;  %v5690_v38 = vcombine.low %v394_v25, %v402_v26  ;;  %v5755_v1 = vcombine.high %v458_v58, %v466_v59  ;;  %v474_v2 = vld [vmem:[#allocation5 + $0xc00] sm:$0xff] }
  0x8e   :  { %v5708_v47 = vcombine.low %v411_v35, %v419_v37  ;;  %v482_v3 = vld [vmem:[#allocation5 + $0xc40] sm:$0xff] }
  0x8f   :  { %v5771_v9 = vcombine.high %v474_v2, %v482_v3  ;;  %v498_v11 = vld [vmem:[#allocation5 + $0xcc0] sm:$0xff] }
  0x90   :  { %3291 = vmatpush1.bf16.msra.mxu0 %v5578_v43  ;;  %3377 = vmatpush1.bf16.msra.mxu1 %v5580_v44  ;;  %v427_v43 = vld [vmem:[#allocation5 + $0xa88] sm:$0xff]  ;;  %v5709_v44 = vcombine.high %v411_v35, %v419_v37  ;;  %v506_v18 = vld [vmem:[#allocation5 + $0xd00] sm:$0xff] }
  0x91   :  { %3292 = vmatprep.subr.bf16.mxu0 %v5595_v45  ;;  %3378 = vmatprep.subr.bf16.mxu1 %v5597_v46  ;;  %v435_v45 = vld [vmem:[#allocation5 + $0xac8] sm:$0xff]  ;;  %v5706_v46 = vcombine.low %v410_v33, %v418_v34  ;;  %v522_v26 = vld [vmem:[#allocation5 + $0xd80] sm:$0xff] }
  0x92   :  { %v5724_v55 = vcombine.low %v427_v43, %v435_v45  ;;  %v530_v27 = vld [vmem:[#allocation5 + $0xdc0] sm:$0xff] }
  0x93   :  { %v5819_v33 = vcombine.high %v522_v26, %v530_v27  ;;  %v538_v34 = vld [vmem:[#allocation5 + $0xe00] sm:$0xff] }
  0x94   :  { %3293 = vmatpush1.bf16.msra.mxu0 %v5594_v51  ;;  %3379 = vmatpush1.bf16.msra.mxu1 %v5596_v52  ;;  %v443_v51 = vld [vmem:[#allocation5 + $0xb08] sm:$0xff]  ;;  %v5725_v52 = vcombine.high %v427_v43, %v435_v45  ;;  %v546_v35 = vld [vmem:[#allocation5 + $0xe40] sm:$0xff] }
  0x95   :  { %3294 = vmatprep.subr.bf16.mxu0 %v5611_v53  ;;  %3380 = vmatprep.subr.bf16.mxu1 %v5613_v54  ;;  %v451_v53 = vld [vmem:[#allocation5 + $0xb48] sm:$0xff]  ;;  %v5722_v54 = vcombine.low %v426_v41, %v434_v42  ;;  %v5835_v41 = vcombine.high %v538_v34, %v546_v35  ;;  %v554_v42 = vld [vmem:[#allocation5 + $0xe80] sm:$0xff] }
  0x96   :  { %v5740_v0 = vcombine.low %v443_v51, %v451_v53  ;;  %v562_v43 = vld [vmem:[#allocation5 + $0xec0] sm:$0xff] }
  0x98   :  { %3295 = vmatpush1.bf16.msra.mxu0 %v5610_v60  ;;  %3381 = vmatpush1.bf16.msra.mxu1 %v5612_v61  ;;  %v459_v60 = vld [vmem:[#allocation5 + $0xb88] sm:$0xff]  ;;  %v5741_v61 = vcombine.high %v443_v51, %v451_v53  ;;  %v578_v51 = vld [vmem:[#allocation5 + $0xf40] sm:$0xff] }
  0x99   :  { %3296 = vmatprep.subr.bf16.mxu0 %v5627_v62  ;;  %3382 = vmatprep.subr.bf16.mxu1 %v5629_v63  ;;  %v467_v62 = vld [vmem:[#allocation5 + $0xbc8] sm:$0xff]  ;;  %v5738_v63 = vcombine.low %v442_v49, %v450_v50  ;;  %v5851_v49 = vcombine.high %v554_v42, %v562_v43  ;;  %v570_v50 = vld [vmem:[#allocation5 + $0xf00] sm:$0xff] }
  0x9a   :  { %v5756_v8 = vcombine.low %v459_v60, %v467_v62 }
  0x9c   :  { %3297 = vmatpush1.bf16.msra.mxu0 %v5626_v4  ;;  %3383 = vmatpush1.bf16.msra.mxu1 %v5628_v5  ;;  %v475_v4 = vld [vmem:[#allocation5 + $0xc08] sm:$0xff]  ;;  %v5757_v5 = vcombine.high %v459_v60, %v467_v62  ;;  %v594_v60 = vld [vmem:[#allocation5 + $0xfc0] sm:$0xff] }
  0x9d   :  { %3309 = vmatprep.subr.bf16.mxu0 %v5643_v6  ;;  %3395 = vmatprep.subr.bf16.mxu1 %v5645_v7  ;;  %v483_v6 = vld [vmem:[#allocation5 + $0xc48] sm:$0xff]  ;;  %v5754_v7 = vcombine.low %v458_v58, %v466_v59  ;;  %v5867_v58 = vcombine.high %v570_v50, %v578_v51  ;;  %v586_v59 = vld [vmem:[#allocation5 + $0xf80] sm:$0xff] }
  0x9f   :  { %3299 = vmatmul.mubr.bf16.vlgmr.msra.gmra.mrb[0].mxu0 %v6282_v10  ;;  %3385 = vmatmul.mubr.bf16.vlgmr.msra.gmra.mrb[0].mxu1 %v6282_v10  ;;  %v490_v10 = vld [vmem:[#allocation5 + $0xc80] sm:$0xff] }
  0xa0   :  { %3310 = vmatpush1.bf16.msra.mxu0 %v5642_v13  ;;  %3396 = vmatpush1.bf16.msra.mxu1 %v5644_v14  ;;  %v5773_v13 = vcombine.high %v475_v4, %v483_v6  ;;  %v499_v14 = vld [vmem:[#allocation5 + $0xcc8] sm:$0xff]  ;;  %v5787_v17 = vcombine.high %v490_v10, %v498_v11 }
  0xa1   :  { %3311 = vmatprep.subr.bf16.mxu0 %v5659_v15  ;;  %3397 = vmatprep.subr.bf16.mxu1 %v5661_v16  ;;  %v5770_v15 = vcombine.low %v474_v2, %v482_v3  ;;  %v5772_v16 = vcombine.low %v475_v4, %v483_v6  ;;  %v5789_v21 = vcombine.high %v491_v12, %v499_v14  ;;  %v92_v3 = vld [vmem:[#allocation5 + $0x10] sm:$0xff] }
  0xa2   :  { %3341 = vmatprep.mubr.bf16.mxu0 %v6283_v19  ;;  %3427 = vmatprep.mubr.bf16.mxu1 %v6283_v19  ;;  %v514_v19 = vld [vmem:[#allocation5 + $0xd40] sm:$0xff]  ;;  %v5883_v2 = vcombine.high %v586_v59, %v594_v60  ;;  %v100_v4 = vld [vmem:[#allocation5 + $0x50] sm:$0xff] }
  0xa3   :  { %v5803_v25 = vcombine.high %v506_v18, %v514_v19 }
  0xa4   :  { %3312 = vmatpush1.bf16.msra.mxu0 %v5658_v22  ;;  %3398 = vmatpush1.bf16.msra.mxu1 %v5660_v23  ;;  %v515_v22 = vld [vmem:[#allocation5 + $0xd48] sm:$0xff]  ;;  %v5786_v23 = vcombine.low %v490_v10, %v498_v11  ;;  %v5391_v11 = vcombine.high %v92_v3, %v100_v4 }
  0xa5   :  { %3313 = vmatprep.subr.bf16.mxu0 %v5675_v24  ;;  %3399 = vmatprep.subr.bf16.mxu1 %v5677_v28  ;;  %v5788_v24 = vcombine.low %v491_v12, %v499_v14  ;;  %v523_v28 = vld [vmem:[#allocation5 + $0xd88] sm:$0xff]  ;;  %v5805_v29 = vcombine.high %v507_v20, %v515_v22  ;;  %v108_v12 = vld [vmem:[#allocation5 + $0x90] sm:$0xff]  ;;  %v109_v14 = vld [vmem:[#allocation5 + $0x98] sm:$0xff] }
  0xa6   :  { %v6285_v10 = vld [vmem:[#allocation2 + $0x8] ss:$16 sps:$4 sm:$0xff]  }
  0xa8   :  { %3314 = vmatpush1.bf16.msra.mxu0 %v5674_v30  ;;  %3400 = vmatpush1.bf16.msra.mxu1 %v5676_v31  ;;  %v531_v30 = vld [vmem:[#allocation5 + $0xdc8] sm:$0xff]  ;;  %v5802_v31 = vcombine.low %v506_v18, %v514_v19 }
  0xa9   :  { %3315 = vmatprep.subr.bf16.mxu0 %v5691_v32  ;;  %3401 = vmatprep.subr.bf16.mxu1 %v5693_v36  ;;  %v5804_v32 = vcombine.low %v507_v20, %v515_v22  ;;  %v539_v36 = vld [vmem:[#allocation5 + $0xe08] sm:$0xff]  ;;  %v5821_v37 = vcombine.high %v523_v28, %v531_v30  ;;  %v124_v20 = vld [vmem:[#allocation5 + $0x110] sm:$0xff]  ;;  %v125_v22 = vld [vmem:[#allocation5 + $0x118] sm:$0xff] }
  0xac   :  { %3316 = vmatpush1.bf16.msra.mxu0 %v5690_v38  ;;  %3402 = vmatpush1.bf16.msra.mxu1 %v5692_v39  ;;  %v547_v38 = vld [vmem:[#allocation5 + $0xe48] sm:$0xff]  ;;  %v5818_v39 = vcombine.low %v522_v26, %v530_v27 }
  0xad   :  { %3317 = vmatprep.subr.bf16.mxu0 %v5707_v40  ;;  %3403 = vmatprep.subr.bf16.mxu1 %v5709_v44  ;;  %v5820_v40 = vcombine.low %v523_v28, %v531_v30  ;;  %v555_v44 = vld [vmem:[#allocation5 + $0xe88] sm:$0xff]  ;;  %v5837_v45 = vcombine.high %v539_v36, %v547_v38  ;;  %v140_v28 = vld [vmem:[#allocation5 + $0x190] sm:$0xff]  ;;  %v141_v30 = vld [vmem:[#allocation5 + $0x198] sm:$0xff] }
  0xb0   :  { %3318 = vmatpush1.bf16.msra.mxu0 %v5706_v46  ;;  %3404 = vmatpush1.bf16.msra.mxu1 %v5708_v47  ;;  %v563_v46 = vld [vmem:[#allocation5 + $0xec8] sm:$0xff]  ;;  %v5834_v47 = vcombine.low %v538_v34, %v546_v35 }
  0xb1   :  { %3319 = vmatprep.subr.bf16.mxu0 %v5723_v48  ;;  %3405 = vmatprep.subr.bf16.mxu1 %v5725_v52  ;;  %v5836_v48 = vcombine.low %v539_v36, %v547_v38  ;;  %v571_v52 = vld [vmem:[#allocation5 + $0xf08] sm:$0xff]  ;;  %v5853_v53 = vcombine.high %v555_v44, %v563_v46  ;;  %v156_v36 = vld [vmem:[#allocation5 + $0x210] sm:$0xff]  ;;  %v157_v38 = vld [vmem:[#allocation5 + $0x218] sm:$0xff] }
  0xb4   :  { %3320 = vmatpush1.bf16.msra.mxu0 %v5722_v54  ;;  %3406 = vmatpush1.bf16.msra.mxu1 %v5724_v55  ;;  %v579_v54 = vld [vmem:[#allocation5 + $0xf48] sm:$0xff]  ;;  %v5850_v55 = vcombine.low %v554_v42, %v562_v43 }
  0xb5   :  { %3321 = vmatprep.subr.bf16.mxu0 %v5739_v57  ;;  %3407 = vmatprep.subr.bf16.mxu1 %v5741_v61  ;;  %v5852_v57 = vcombine.low %v555_v44, %v563_v46  ;;  %v587_v61 = vld [vmem:[#allocation5 + $0xf88] sm:$0xff]  ;;  %v5869_v62 = vcombine.high %v571_v52, %v579_v54  ;;  %v172_v44 = vld [vmem:[#allocation5 + $0x290] sm:$0xff] }
  0xb8   :  { %3322 = vmatpush1.bf16.msra.mxu0 %v5738_v63  ;;  %3408 = vmatpush1.bf16.msra.mxu1 %v5740_v0  ;;  %v595_v63 = vld [vmem:[#allocation5 + $0xfc8] sm:$0xff]  ;;  %v5866_v0 = vcombine.low %v570_v50, %v578_v51  ;;  %v188_v51 = vld [vmem:[#allocation5 + $0x310] sm:$0xff] }
  0xb9   :  { %3323 = vmatprep.subr.bf16.mxu0 %v5755_v1  ;;  %3409 = vmatprep.subr.bf16.mxu1 %v5757_v5  ;;  %v5868_v1 = vcombine.low %v571_v52, %v579_v54  ;;  %v93_v5 = vld [vmem:[#allocation5 + $0x18] sm:$0xff]  ;;  %v5885_v6 = vcombine.high %v587_v61, %v595_v63  ;;  %v196_v52 = vld [vmem:[#allocation5 + $0x350] sm:$0xff] }
  0xbc   :  { %3324 = vmatpush1.bf16.msra.mxu0 %v5754_v7  ;;  %3410 = vmatpush1.bf16.msra.mxu1 %v5756_v8  ;;  %v101_v7 = vld [vmem:[#allocation5 + $0x58] sm:$0xff]  ;;  %v5882_v8 = vcombine.low %v586_v59, %v594_v60  ;;  %v5487_v59 = vcombine.high %v188_v51, %v196_v52  ;;  %v204_v60 = vld [vmem:[#allocation5 + $0x390] sm:$0xff] }
  0xbd   :  { %3325 = vmatprep.subr.bf16.mxu0 %v5771_v9  ;;  %3411 = vmatprep.subr.bf16.mxu1 %v5773_v13  ;;  %v5884_v9 = vcombine.low %v587_v61, %v595_v63  ;;  %v116_v13 = vld [vmem:[#allocation5 + $0xd0] sm:$0xff]  ;;  %v5392_v18 = vcombine.low %v93_v5, %v101_v7 }
  0xbe   :  { %v5407_v19 = vcombine.high %v108_v12, %v116_v13  ;;  %v212_v61 = vld [vmem:[#allocation5 + $0x3d0] sm:$0xff] }
  0xc0   :  { %3326 = vmatpush1.bf16.msra.mxu0 %v5770_v15  ;;  %3412 = vmatpush1.bf16.msra.mxu1 %v5772_v16  ;;  %v5393_v15 = vcombine.high %v93_v5, %v101_v7  ;;  %v117_v16 = vld [vmem:[#allocation5 + $0xd8] sm:$0xff]  ;;  %v228_v5 = vld [vmem:[#allocation5 + $0x450] sm:$0xff] }
  0xc1   :  { %3327 = vmatprep.subr.bf16.mxu0 %v5787_v17  ;;  %3413 = vmatprep.subr.bf16.mxu1 %v5789_v21  ;;  %v5390_v17 = vcombine.low %v92_v3, %v100_v4  ;;  %v132_v21 = vld [vmem:[#allocation5 + $0x150] sm:$0xff]  ;;  %v5408_v26 = vcombine.low %v109_v14, %v117_v16  ;;  %v5503_v3 = vcombine.high %v204_v60, %v212_v61 }
  0xc2   :  { %v5423_v27 = vcombine.high %v124_v20, %v132_v21  ;;  %v220_v4 = vld [vmem:[#allocation5 + $0x410] sm:$0xff] }
  0xc4   :  { %3328 = vmatpush1.bf16.msra.mxu0 %v5786_v23  ;;  %3414 = vmatpush1.bf16.msra.mxu1 %v5788_v24  ;;  %v5409_v23 = vcombine.high %v109_v14, %v117_v16  ;;  %v133_v24 = vld [vmem:[#allocation5 + $0x158] sm:$0xff] }
  0xc5   :  { %3329 = vmatprep.subr.bf16.mxu0 %v5803_v25  ;;  %3415 = vmatprep.subr.bf16.mxu1 %v5805_v29  ;;  %v5406_v25 = vcombine.low %v108_v12, %v116_v13  ;;  %v148_v29 = vld [vmem:[#allocation5 + $0x1d0] sm:$0xff]  ;;  %v5424_v34 = vcombine.low %v125_v22, %v133_v24  ;;  %v237_v14 = vld [vmem:[#allocation5 + $0x498] sm:$0xff] }
  0xc6   :  { %v5439_v35 = vcombine.high %v140_v28, %v148_v29  ;;  %v236_v12 = vld [vmem:[#allocation5 + $0x490] sm:$0xff]  ;;  %v245_v16 = vld [vmem:[#allocation5 + $0x4d8] sm:$0xff] }
  0xc7   :  { %v244_v13 = vld [vmem:[#allocation5 + $0x4d0] sm:$0xff] }
  0xc8   :  { %3330 = vmatpush1.bf16.msra.mxu0 %v5802_v31  ;;  %3416 = vmatpush1.bf16.msra.mxu1 %v5804_v32  ;;  %v5425_v31 = vcombine.high %v125_v22, %v133_v24  ;;  %v149_v32 = vld [vmem:[#allocation5 + $0x1d8] sm:$0xff] }
  0xc9   :  { %3331 = vmatprep.subr.bf16.mxu0 %v5819_v33  ;;  %3417 = vmatprep.subr.bf16.mxu1 %v5821_v37  ;;  %v5422_v33 = vcombine.low %v124_v20, %v132_v21  ;;  %v164_v37 = vld [vmem:[#allocation5 + $0x250] sm:$0xff]  ;;  %v5440_v42 = vcombine.low %v141_v30, %v149_v32  ;;  %v253_v22 = vld [vmem:[#allocation5 + $0x518] sm:$0xff] }
  0xca   :  { %v5455_v43 = vcombine.high %v156_v36, %v164_v37  ;;  %v252_v20 = vld [vmem:[#allocation5 + $0x510] sm:$0xff]  ;;  %v261_v24 = vld [vmem:[#allocation5 + $0x558] sm:$0xff] }
  0xcb   :  { %v260_v21 = vld [vmem:[#allocation5 + $0x550] sm:$0xff] }
  0xcc   :  { %3332 = vmatpush1.bf16.msra.mxu0 %v5818_v39  ;;  %3418 = vmatpush1.bf16.msra.mxu1 %v5820_v40  ;;  %v5441_v39 = vcombine.high %v141_v30, %v149_v32  ;;  %v165_v40 = vld [vmem:[#allocation5 + $0x258] sm:$0xff] }
  0xcd   :  { %3333 = vmatprep.subr.bf16.mxu0 %v5835_v41  ;;  %3419 = vmatprep.subr.bf16.mxu1 %v5837_v45  ;;  %v5438_v41 = vcombine.low %v140_v28, %v148_v29  ;;  %v173_v45 = vld [vmem:[#allocation5 + $0x298] sm:$0xff]  ;;  %v5457_v46 = vcombine.high %v157_v38, %v165_v40  ;;  %v268_v28 = vld [vmem:[#allocation5 + $0x590] sm:$0xff] }
  0xce   :  { %v276_v29 = vld [vmem:[#allocation5 + $0x5d0] sm:$0xff]  ;;  %v269_v30 = vld [vmem:[#allocation5 + $0x598] sm:$0xff] }
  0xcf   :  { %v277_v32 = vld [vmem:[#allocation5 + $0x5d8] sm:$0xff] }
  0xd0   :  { %3334 = vmatpush1.bf16.msra.mxu0 %v5834_v47  ;;  %3420 = vmatpush1.bf16.msra.mxu1 %v5836_v48  ;;  %v181_v47 = vld [vmem:[#allocation5 + $0x2d8] sm:$0xff]  ;;  %v5454_v48 = vcombine.low %v156_v36, %v164_v37  ;;  %v284_v36 = vld [vmem:[#allocation5 + $0x610] sm:$0xff] }
  0xd1   :  { %3335 = vmatprep.subr.bf16.mxu0 %v5851_v49  ;;  %3421 = vmatprep.subr.bf16.mxu1 %v5853_v53  ;;  %v5456_v49 = vcombine.low %v157_v38, %v165_v40  ;;  %v189_v53 = vld [vmem:[#allocation5 + $0x318] sm:$0xff]  ;;  %v5473_v54 = vcombine.high %v173_v45, %v181_v47  ;;  %v292_v37 = vld [vmem:[#allocation5 + $0x650] sm:$0xff] }
  0xd2   :  { %v285_v38 = vld [vmem:[#allocation5 + $0x618] sm:$0xff] }
  0xd3   :  { %v293_v40 = vld [vmem:[#allocation5 + $0x658] sm:$0xff] }
  0xd4   :  { %3336 = vmatpush1.bf16.msra.mxu0 %v5850_v55  ;;  %3422 = vmatpush1.bf16.msra.mxu1 %v5852_v57  ;;  %v197_v55 = vld [vmem:[#allocation5 + $0x358] sm:$0xff] }
  0xd5   :  { %3337 = vmatprep.subr.bf16.mxu0 %v5867_v58  ;;  %3423 = vmatprep.subr.bf16.mxu1 %v5869_v62  ;;  %v5472_v58 = vcombine.low %v173_v45, %v181_v47  ;;  %v205_v62 = vld [vmem:[#allocation5 + $0x398] sm:$0xff]  ;;  %v5489_v63 = vcombine.high %v189_v53, %v197_v55 }
  0xd6   :  { %v301_v45 = vld [vmem:[#allocation5 + $0x698] sm:$0xff] }
  0xd7   :  { %v309_v47 = vld [vmem:[#allocation5 + $0x6d8] sm:$0xff] }
  0xd8   :  { %3338 = vmatpush1.bf16.msra.mxu0 %v5866_v0  ;;  %3424 = vmatpush1.bf16.msra.mxu1 %v5868_v1  ;;  %v213_v0 = vld [vmem:[#allocation5 + $0x3d8] sm:$0xff]  ;;  %v5486_v1 = vcombine.low %v188_v51, %v196_v52  ;;  %v316_v51 = vld [vmem:[#allocation5 + $0x710] sm:$0xff] }
  0xd9   :  { %3339 = vmatprep.subr.bf16.mxu0 %v5883_v2  ;;  %3425 = vmatprep.subr.bf16.mxu1 %v5885_v6  ;;  %v5488_v2 = vcombine.low %v189_v53, %v197_v55  ;;  %v221_v6 = vld [vmem:[#allocation5 + $0x418] sm:$0xff]  ;;  %v5505_v7 = vcombine.high %v205_v62, %v213_v0  ;;  %v324_v52 = vld [vmem:[#allocation5 + $0x750] sm:$0xff] }
  0xda   :  { %v317_v53 = vld [vmem:[#allocation5 + $0x718] sm:$0xff] }
  0xdb   :  { %v325_v55 = vld [vmem:[#allocation5 + $0x758] sm:$0xff] }
  0xdc   :  { %3340 = vmatpush1.bf16.msra.mxu0 %v5882_v8  ;;  %3426 = vmatpush1.bf16.msra.mxu1 %v5884_v9  ;;  %v229_v8 = vld [vmem:[#allocation5 + $0x458] sm:$0xff]  ;;  %v5502_v9 = vcombine.low %v204_v60, %v212_v61  ;;  %v332_v60 = vld [vmem:[#allocation5 + $0x790] sm:$0xff] }
  0xdd   :  { %3438 = vmatprep.subr.bf16.mxu0 %v5391_v11  ;;  %3524 = vmatprep.subr.bf16.mxu1 %v5393_v15  ;;  %v5519_v11 = vcombine.high %v220_v4, %v228_v5  ;;  %v5521_v15 = vcombine.high %v221_v6, %v229_v8  ;;  %v340_v61 = vld [vmem:[#allocation5 + $0x7d0] sm:$0xff] }
  0xdf   :  { %3342 = vmatmul.mubr.bf16.vlgmr.msra.gmra.mrb[0].mxu0 %v6285_v10  ;;  %3428 = vmatmul.mubr.bf16.vlgmr.msra.gmra.mrb[0].mxu1 %v6285_v10  ;;  %v5504_v10 = vcombine.low %v205_v62, %v213_v0  ;;  %v333_v62 = vld [vmem:[#allocation5 + $0x798] sm:$0xff] }
  0xe0   :  { %3439 = vmatpush1.bf16.msra.mxu0 %v5390_v17  ;;  %3525 = vmatpush1.bf16.msra.mxu1 %v5392_v18  ;;  %v5518_v17 = vcombine.low %v220_v4, %v228_v5  ;;  %v5520_v18 = vcombine.low %v221_v6, %v229_v8  ;;  %v341_v0 = vld [vmem:[#allocation5 + $0x7d8] sm:$0xff]  ;;  %v348_v4 = vld [vmem:[#allocation5 + $0x810] sm:$0xff] }
  0xe1   :  { %3440 = vmatprep.subr.bf16.mxu0 %v5407_v19  ;;  %3526 = vmatprep.subr.bf16.mxu1 %v5409_v23  ;;  %v5535_v19 = vcombine.high %v236_v12, %v244_v13  ;;  %v5537_v23 = vcombine.high %v237_v14, %v245_v16  ;;  %v356_v5 = vld [vmem:[#allocation5 + $0x850] sm:$0xff]  ;;  %v349_v6 = vld [vmem:[#allocation5 + $0x818] sm:$0xff] }
  0xe2   :  { %3470 = vmatprep.mubr.bf16.mxu0 %v6664_v56  ;;  %3556 = vmatprep.mubr.bf16.mxu1 %v6664_v56  ;;  %v180_v56 = vld [vmem:[#allocation5 + $0x2d0] sm:$0xff]  ;;  %v357_v8 = vld [vmem:[#allocation5 + $0x858] sm:$0xff] }
  0xe3   :  { %v5471_v50 = vcombine.high %v172_v44, %v180_v56  ;;  %v5470_v57 = vcombine.low %v172_v44, %v180_v56  ;;  %v300_v44 = vld [vmem:[#allocation5 + $0x690] sm:$0xff] }
  0xe4   :  { %3441 = vmatpush1.bf16.msra.mxu0 %v5406_v25  ;;  %3527 = vmatpush1.bf16.msra.mxu1 %v5408_v26  ;;  %v5534_v25 = vcombine.low %v236_v12, %v244_v13  ;;  %v5536_v26 = vcombine.low %v237_v14, %v245_v16  ;;  %v308_v56 = vld [vmem:[#allocation5 + $0x6d0] sm:$0xff]  ;;  %v365_v14 = vld [vmem:[#allocation5 + $0x898] sm:$0xff] }
  0xe5   :  { %3442 = vmatprep.subr.bf16.mxu0 %v5423_v27  ;;  %3528 = vmatprep.subr.bf16.mxu1 %v5425_v31  ;;  %v5551_v27 = vcombine.high %v252_v20, %v260_v21  ;;  %v5553_v31 = vcombine.high %v253_v22, %v261_v24  ;;  %v364_v12 = vld [vmem:[#allocation5 + $0x890] sm:$0xff]  ;;  %v373_v16 = vld [vmem:[#allocation5 + $0x8d8] sm:$0xff] }
  0xe6   :  { %v372_v13 = vld [vmem:[#allocation5 + $0x8d0] sm:$0xff] }
  0xe8   :  { %3443 = vmatpush1.bf16.msra.mxu0 %v5422_v33  ;;  %3529 = vmatpush1.bf16.msra.mxu1 %v5424_v34  ;;  %v5550_v33 = vcombine.low %v252_v20, %v260_v21  ;;  %v5552_v34 = vcombine.low %v253_v22, %v261_v24  ;;  %v380_v20 = vld [vmem:[#allocation5 + $0x910] sm:$0xff]  ;;  %v381_v22 = vld [vmem:[#allocation5 + $0x918] sm:$0xff] }
  0xe9   :  { %3444 = vmatprep.subr.bf16.mxu0 %v5439_v35  ;;  %3530 = vmatprep.subr.bf16.mxu1 %v5441_v39  ;;  %v5567_v35 = vcombine.high %v268_v28, %v276_v29  ;;  %v5569_v39 = vcombine.high %v269_v30, %v277_v32  ;;  %v388_v21 = vld [vmem:[#allocation5 + $0x950] sm:$0xff]  ;;  %v389_v24 = vld [vmem:[#allocation5 + $0x958] sm:$0xff] }
  0xec   :  { %3445 = vmatpush1.bf16.msra.mxu0 %v5438_v41  ;;  %3531 = vmatpush1.bf16.msra.mxu1 %v5440_v42  ;;  %v5566_v41 = vcombine.low %v268_v28, %v276_v29  ;;  %v5568_v42 = vcombine.low %v269_v30, %v277_v32  ;;  %v5679_v28 = vcombine.high %v380_v20, %v388_v21  ;;  %v396_v30 = vld [vmem:[#allocation5 + $0x990] sm:$0xff]  ;;  %v6674_v32 = vld [vmem:[#allocation2 + $0xc] ss:$16 sps:$4 sm:$0xff]  }
  0xed   :  { %3446 = vmatprep.subr.bf16.mxu0 %v5455_v43  ;;  %3532 = vmatprep.subr.bf16.mxu1 %v5457_v46  ;;  %v5583_v43 = vcombine.high %v284_v36, %v292_v37  ;;  %v5585_v46 = vcombine.high %v285_v38, %v293_v40  ;;  %v5681_v29 = vcombine.high %v381_v22, %v389_v24 }
  0xf0   :  { %3447 = vmatpush1.bf16.msra.mxu0 %v5454_v48  ;;  %3533 = vmatpush1.bf16.msra.mxu1 %v5456_v49  ;;  %v5582_v48 = vcombine.low %v284_v36, %v292_v37  ;;  %v5584_v49 = vcombine.low %v285_v38, %v293_v40  ;;  %v5680_v36 = vcombine.low %v381_v22, %v389_v24  ;;  %v420_v40 = vld [vmem:[#allocation5 + $0xa50] sm:$0xff] }
  0xf1   :  { %3448 = vmatprep.subr.bf16.mxu0 %v5471_v50  ;;  %3534 = vmatprep.subr.bf16.mxu1 %v5473_v54  ;;  %v5599_v50 = vcombine.high %v300_v44, %v308_v56  ;;  %v5601_v54 = vcombine.high %v301_v45, %v309_v47  ;;  %v516_v24 = vld [vmem:[#allocation5 + $0xd50] sm:$0xff] }
  0xf4   :  { %3449 = vmatpush1.bf16.msra.mxu0 %v5470_v57  ;;  %3535 = vmatpush1.bf16.msra.mxu1 %v5472_v58  ;;  %v5598_v57 = vcombine.low %v300_v44, %v308_v56  ;;  %v5600_v58 = vcombine.low %v301_v45, %v309_v47  ;;  %v436_v47 = vld [vmem:[#allocation5 + $0xad0] sm:$0xff] }
  0xf5   :  { %3450 = vmatprep.subr.bf16.mxu0 %v5487_v59  ;;  %3536 = vmatprep.subr.bf16.mxu1 %v5489_v63  ;;  %v5615_v59 = vcombine.high %v316_v51, %v324_v52  ;;  %v5617_v63 = vcombine.high %v317_v53, %v325_v55 }
  0xf8   :  { %3451 = vmatpush1.bf16.msra.mxu0 %v5486_v1  ;;  %3537 = vmatpush1.bf16.msra.mxu1 %v5488_v2  ;;  %v5614_v1 = vcombine.low %v316_v51, %v324_v52  ;;  %v5616_v2 = vcombine.low %v317_v53, %v325_v55  ;;  %v452_v55 = vld [vmem:[#allocation5 + $0xb50] sm:$0xff] }
  0xf9   :  { %3452 = vmatprep.subr.bf16.mxu0 %v5503_v3  ;;  %3538 = vmatprep.subr.bf16.mxu1 %v5505_v7  ;;  %v5631_v3 = vcombine.high %v332_v60, %v340_v61  ;;  %v5633_v7 = vcombine.high %v333_v62, %v341_v0 }
  0xfc   :  { %3453 = vmatpush1.bf16.msra.mxu0 %v5502_v9  ;;  %3539 = vmatpush1.bf16.msra.mxu1 %v5504_v10  ;;  %v5630_v9 = vcombine.low %v332_v60, %v340_v61  ;;  %v5632_v10 = vcombine.low %v333_v62, %v341_v0  ;;  %v468_v0 = vld [vmem:[#allocation5 + $0xbd0] sm:$0xff] }
  0xfd   :  { %3454 = vmatprep.subr.bf16.mxu0 %v5519_v11  ;;  %3540 = vmatprep.subr.bf16.mxu1 %v5521_v15  ;;  %v5647_v11 = vcombine.high %v348_v4, %v356_v5  ;;  %v5649_v15 = vcombine.high %v349_v6, %v357_v8 }
 0x100   :  { %3455 = vmatpush1.bf16.msra.mxu0 %v5518_v17  ;;  %3541 = vmatpush1.bf16.msra.mxu1 %v5520_v18  ;;  %v5646_v17 = vcombine.low %v348_v4, %v356_v5  ;;  %v5648_v18 = vcombine.low %v349_v6, %v357_v8  ;;  %v484_v8 = vld [vmem:[#allocation5 + $0xc50] sm:$0xff] }
 0x101   :  { %3456 = vmatprep.subr.bf16.mxu0 %v5535_v19  ;;  %3542 = vmatprep.subr.bf16.mxu1 %v5537_v23  ;;  %v5663_v19 = vcombine.high %v364_v12, %v372_v13  ;;  %v5665_v23 = vcombine.high %v365_v14, %v373_v16 }
 0x104   :  { %3457 = vmatpush1.bf16.msra.mxu0 %v5534_v25  ;;  %3543 = vmatpush1.bf16.msra.mxu1 %v5536_v26  ;;  %v6670_v25 = vld [vmem:[#allocation2] ss:$16 sps:$4 sm:$0xff]   ;;  %v5662_v26 = vcombine.low %v364_v12, %v372_v13 }
 0x105   :  { %3458 = vmatprep.subr.bf16.mxu0 %v5551_v27  ;;  %3544 = vmatprep.subr.bf16.mxu1 %v5553_v31  ;;  %v5664_v27 = vcombine.low %v365_v14, %v373_v16  ;;  %v404_v31 = vld [vmem:[#allocation5 + $0x9d0] sm:$0xff] }
 0x106   :  { %v5695_v37 = vcombine.high %v396_v30, %v404_v31  ;;  %v500_v16 = vld [vmem:[#allocation5 + $0xcd0] sm:$0xff] }
 0x108   :  { %3459 = vmatpush1.bf16.msra.mxu0 %v5550_v33  ;;  %3545 = vmatpush1.bf16.msra.mxu1 %v5552_v34  ;;  %v397_v33 = vld [vmem:[#allocation5 + $0x998] sm:$0xff] }
 0x109   :  { %3460 = vmatprep.subr.bf16.mxu0 %v5567_v35  ;;  %3546 = vmatprep.subr.bf16.mxu1 %v5569_v39  ;;  %v405_v34 = vld [vmem:[#allocation5 + $0x9d8] sm:$0xff]  ;;  %v5678_v35 = vcombine.low %v380_v20, %v388_v21  ;;  %v412_v39 = vld [vmem:[#allocation5 + $0xa10] sm:$0xff] }
 0x10a   :  { %v5697_v38 = vcombine.high %v397_v33, %v405_v34  ;;  %v5696_v44 = vcombine.low %v397_v33, %v405_v34  ;;  %v5711_v56 = vcombine.high %v412_v39, %v420_v40  ;;  %v524_v33 = vld [vmem:[#allocation5 + $0xd90] sm:$0xff] }
 0x10b   :  { %v532_v34 = vld [vmem:[#allocation5 + $0xdd0] sm:$0xff] }
 0x10c   :  { %3461 = vmatpush1.bf16.msra.mxu0 %v5566_v41  ;;  %3547 = vmatpush1.bf16.msra.mxu1 %v5568_v42  ;;  %v413_v41 = vld [vmem:[#allocation5 + $0xa18] sm:$0xff] }
 0x10d   :  { %3462 = vmatprep.subr.bf16.mxu0 %v5583_v43  ;;  %3548 = vmatprep.subr.bf16.mxu1 %v5585_v46  ;;  %v421_v42 = vld [vmem:[#allocation5 + $0xa58] sm:$0xff]  ;;  %v5694_v43 = vcombine.low %v396_v30, %v404_v31  ;;  %v428_v46 = vld [vmem:[#allocation5 + $0xa90] sm:$0xff] }
 0x10e   :  { %v5713_v45 = vcombine.high %v413_v41, %v421_v42  ;;  %v5712_v51 = vcombine.low %v413_v41, %v421_v42  ;;  %v5727_v52 = vcombine.high %v428_v46, %v436_v47  ;;  %v540_v41 = vld [vmem:[#allocation5 + $0xe10] sm:$0xff] }
 0x10f   :  { %v548_v42 = vld [vmem:[#allocation5 + $0xe50] sm:$0xff] }
 0x110   :  { %3463 = vmatpush1.bf16.msra.mxu0 %v5582_v48  ;;  %3549 = vmatpush1.bf16.msra.mxu1 %v5584_v49  ;;  %v429_v48 = vld [vmem:[#allocation5 + $0xa98] sm:$0xff] }
 0x111   :  { %3464 = vmatprep.subr.bf16.mxu0 %v5599_v50  ;;  %3550 = vmatprep.subr.bf16.mxu1 %v5601_v54  ;;  %v437_v49 = vld [vmem:[#allocation5 + $0xad8] sm:$0xff]  ;;  %v5710_v50 = vcombine.low %v412_v39, %v420_v40  ;;  %v444_v54 = vld [vmem:[#allocation5 + $0xb10] sm:$0xff]  ;;  %v5823_v39 = vcombine.high %v524_v33, %v532_v34 }
 0x112   :  { %v5729_v53 = vcombine.high %v429_v48, %v437_v49  ;;  %v5728_v60 = vcombine.low %v429_v48, %v437_v49  ;;  %v5743_v61 = vcombine.high %v444_v54, %v452_v55  ;;  %v556_v48 = vld [vmem:[#allocation5 + $0xe90] sm:$0xff] }
 0x113   :  { %v564_v49 = vld [vmem:[#allocation5 + $0xed0] sm:$0xff] }
 0x114   :  { %3465 = vmatpush1.bf16.msra.mxu0 %v5598_v57  ;;  %3551 = vmatpush1.bf16.msra.mxu1 %v5600_v58  ;;  %v445_v57 = vld [vmem:[#allocation5 + $0xb18] sm:$0xff] }
 0x115   :  { %3466 = vmatprep.subr.bf16.mxu0 %v5615_v59  ;;  %3552 = vmatprep.subr.bf16.mxu1 %v5617_v63  ;;  %v453_v58 = vld [vmem:[#allocation5 + $0xb58] sm:$0xff]  ;;  %v5726_v59 = vcombine.low %v428_v46, %v436_v47  ;;  %v460_v63 = vld [vmem:[#allocation5 + $0xb90] sm:$0xff]  ;;  %v5839_v46 = vcombine.high %v540_v41, %v548_v42 }
 0x116   :  { %v5745_v62 = vcombine.high %v445_v57, %v453_v58  ;;  %v5744_v4 = vcombine.low %v445_v57, %v453_v58  ;;  %v5759_v5 = vcombine.high %v460_v63, %v468_v0  ;;  %v572_v57 = vld [vmem:[#allocation5 + $0xf10] sm:$0xff] }
 0x117   :  { %v580_v58 = vld [vmem:[#allocation5 + $0xf50] sm:$0xff] }
 0x118   :  { %3467 = vmatpush1.bf16.msra.mxu0 %v5614_v1  ;;  %3553 = vmatpush1.bf16.msra.mxu1 %v5616_v2  ;;  %v461_v1 = vld [vmem:[#allocation5 + $0xb98] sm:$0xff] }
 0x119   :  { %3468 = vmatprep.subr.bf16.mxu0 %v5631_v3  ;;  %3554 = vmatprep.subr.bf16.mxu1 %v5633_v7  ;;  %v469_v2 = vld [vmem:[#allocation5 + $0xbd8] sm:$0xff]  ;;  %v5742_v3 = vcombine.low %v444_v54, %v452_v55  ;;  %v476_v7 = vld [vmem:[#allocation5 + $0xc10] sm:$0xff]  ;;  %v5855_v54 = vcombine.high %v556_v48, %v564_v49 }
 0x11a   :  { %v5761_v6 = vcombine.high %v461_v1, %v469_v2  ;;  %v5760_v12 = vcombine.low %v461_v1, %v469_v2  ;;  %v5775_v13 = vcombine.high %v476_v7, %v484_v8  ;;  %v588_v1 = vld [vmem:[#allocation5 + $0xf90] sm:$0xff] }
 0x11b   :  { %v596_v2 = vld [vmem:[#allocation5 + $0xfd0] sm:$0xff] }
 0x11c   :  { %3469 = vmatpush1.bf16.msra.mxu0 %v5630_v9  ;;  %3555 = vmatpush1.bf16.msra.mxu1 %v5632_v10  ;;  %v477_v9 = vld [vmem:[#allocation5 + $0xc18] sm:$0xff] }
 0x11d   :  { %3481 = vmatprep.subr.bf16.mxu0 %v5647_v11  ;;  %3567 = vmatprep.subr.bf16.mxu1 %v5649_v15  ;;  %v485_v10 = vld [vmem:[#allocation5 + $0xc58] sm:$0xff]  ;;  %v5758_v11 = vcombine.low %v460_v63, %v468_v0  ;;  %v492_v15 = vld [vmem:[#allocation5 + $0xc90] sm:$0xff]  ;;  %v5871_v63 = vcombine.high %v572_v57, %v580_v58 }
 0x11e   :  { %v5777_v14 = vcombine.high %v477_v9, %v485_v10  ;;  %v5776_v20 = vcombine.low %v477_v9, %v485_v10  ;;  %v5791_v21 = vcombine.high %v492_v15, %v500_v16  ;;  %v94_v9 = vld [vmem:[#allocation5 + $0x20] sm:$0xff] }
 0x11f   :  { %3471 = vmatmul.mubr.bf16.vlgmr.msra.gmra.mrb[4].mxu0 %v6670_v25  ;;  %3557 = vmatmul.mubr.bf16.vlgmr.msra.gmra.mrb[4].mxu1 %v6670_v25  ;;  %v102_v10 = vld [vmem:[#allocation5 + $0x60] sm:$0xff] }
 0x120   :  { %3482 = vmatpush1.bf16.msra.mxu0 %v5646_v17  ;;  %3568 = vmatpush1.bf16.msra.mxu1 %v5648_v18  ;;  %v493_v17 = vld [vmem:[#allocation5 + $0xc98] sm:$0xff] }
 0x121   :  { %3483 = vmatprep.subr.bf16.mxu0 %v5663_v19  ;;  %3569 = vmatprep.subr.bf16.mxu1 %v5665_v23  ;;  %v501_v18 = vld [vmem:[#allocation5 + $0xcd8] sm:$0xff]  ;;  %v5774_v19 = vcombine.low %v476_v7, %v484_v8  ;;  %v508_v23 = vld [vmem:[#allocation5 + $0xd10] sm:$0xff]  ;;  %v5887_v7 = vcombine.high %v588_v1, %v596_v2 }
 0x122   :  { %3513 = vmatprep.mubr.bf16.mxu0 %v6674_v32  ;;  %3599 = vmatprep.mubr.bf16.mxu1 %v6674_v32  ;;  %v5793_v22 = vcombine.high %v493_v17, %v501_v18  ;;  %v5807_v30 = vcombine.high %v508_v23, %v516_v24 }
 0x124   :  { %3484 = vmatpush1.bf16.msra.mxu0 %v5662_v26  ;;  %3570 = vmatpush1.bf16.msra.mxu1 %v5664_v27  ;;  %v509_v26 = vld [vmem:[#allocation5 + $0xd18] sm:$0xff] }
 0x125   :  { %3485 = vmatprep.subr.bf16.mxu0 %v5679_v28  ;;  %3571 = vmatprep.subr.bf16.mxu1 %v5681_v29  ;;  %v517_v27 = vld [vmem:[#allocation5 + $0xd58] sm:$0xff]  ;;  %v5790_v28 = vcombine.low %v492_v15, %v500_v16  ;;  %v5792_v29 = vcombine.low %v493_v17, %v501_v18  ;;  %v5395_v15 = vcombine.high %v94_v9, %v102_v10  ;;  %v110_v17 = vld [vmem:[#allocation5 + $0xa0] sm:$0xff] }
 0x126   :  { %v5809_v31 = vcombine.high %v509_v26, %v517_v27  ;;  %v118_v18 = vld [vmem:[#allocation5 + $0xe0] sm:$0xff] }
 0x128   :  { %3486 = vmatpush1.bf16.msra.mxu0 %v5678_v35  ;;  %3572 = vmatpush1.bf16.msra.mxu1 %v5680_v36  ;;  %v525_v35 = vld [vmem:[#allocation5 + $0xd98] sm:$0xff] }
 0x129   :  { %3487 = vmatprep.subr.bf16.mxu0 %v5695_v37  ;;  %3573 = vmatprep.subr.bf16.mxu1 %v5697_v38  ;;  %v533_v36 = vld [vmem:[#allocation5 + $0xdd8] sm:$0xff]  ;;  %v5806_v37 = vcombine.low %v508_v23, %v516_v24  ;;  %v5808_v38 = vcombine.low %v509_v26, %v517_v27  ;;  %v5411_v23 = vcombine.high %v110_v17, %v118_v18  ;;  %v126_v26 = vld [vmem:[#allocation5 + $0x120] sm:$0xff] }
 0x12a   :  { %v5825_v40 = vcombine.high %v525_v35, %v533_v36  ;;  %v134_v27 = vld [vmem:[#allocation5 + $0x160] sm:$0xff] }
 0x12c   :  { %3488 = vmatpush1.bf16.msra.mxu0 %v5694_v43  ;;  %3574 = vmatpush1.bf16.msra.mxu1 %v5696_v44  ;;  %v541_v43 = vld [vmem:[#allocation5 + $0xe18] sm:$0xff] }
 0x12d   :  { %3489 = vmatprep.subr.bf16.mxu0 %v5711_v56  ;;  %3575 = vmatprep.subr.bf16.mxu1 %v5713_v45  ;;  %v549_v44 = vld [vmem:[#allocation5 + $0xe58] sm:$0xff]  ;;  %v5822_v56 = vcombine.low %v524_v33, %v532_v34  ;;  %v5824_v45 = vcombine.low %v525_v35, %v533_v36  ;;  %v5427_v34 = vcombine.high %v126_v26, %v134_v27  ;;  %v142_v36 = vld [vmem:[#allocation5 + $0x1a0] sm:$0xff] }
 0x12e   :  { %v5841_v47 = vcombine.high %v541_v43, %v549_v44 }
 0x130   :  { %3490 = vmatpush1.bf16.msra.mxu0 %v5710_v50  ;;  %3576 = vmatpush1.bf16.msra.mxu1 %v5712_v51  ;;  %v557_v50 = vld [vmem:[#allocation5 + $0xe98] sm:$0xff] }
 0x131   :  { %3491 = vmatprep.subr.bf16.mxu0 %v5727_v52  ;;  %3577 = vmatprep.subr.bf16.mxu1 %v5729_v53  ;;  %v565_v51 = vld [vmem:[#allocation5 + $0xed8] sm:$0xff]  ;;  %v5838_v52 = vcombine.low %v540_v41, %v548_v42  ;;  %v5840_v53 = vcombine.low %v541_v43, %v549_v44  ;;  %v5426_v41 = vcombine.low %v126_v26, %v134_v27 }
 0x132   :  { %v5857_v55 = vcombine.high %v557_v50, %v565_v51 }
 0x134   :  { %3492 = vmatpush1.bf16.msra.mxu0 %v5726_v59  ;;  %3578 = vmatpush1.bf16.msra.mxu1 %v5728_v60  ;;  %v573_v59 = vld [vmem:[#allocation5 + $0xf18] sm:$0xff] }
 0x135   :  { %3493 = vmatprep.subr.bf16.mxu0 %v5743_v61  ;;  %3579 = vmatprep.subr.bf16.mxu1 %v5745_v62  ;;  %v581_v60 = vld [vmem:[#allocation5 + $0xf58] sm:$0xff]  ;;  %v5854_v61 = vcombine.low %v556_v48, %v564_v49  ;;  %v5856_v62 = vcombine.low %v557_v50, %v565_v51 }
 0x136   :  { %v5873_v0 = vcombine.high %v573_v59, %v581_v60 }
 0x138   :  { %3494 = vmatpush1.bf16.msra.mxu0 %v5742_v3  ;;  %3580 = vmatpush1.bf16.msra.mxu1 %v5744_v4  ;;  %v589_v3 = vld [vmem:[#allocation5 + $0xf98] sm:$0xff] }
 0x139   :  { %3495 = vmatprep.subr.bf16.mxu0 %v5759_v5  ;;  %3581 = vmatprep.subr.bf16.mxu1 %v5761_v6  ;;  %v597_v4 = vld [vmem:[#allocation5 + $0xfd8] sm:$0xff]  ;;  %v5870_v5 = vcombine.low %v572_v57, %v580_v58  ;;  %v5872_v6 = vcombine.low %v573_v59, %v581_v60 }
 0x13a   :  { %v5889_v8 = vcombine.high %v589_v3, %v597_v4 }
 0x13c   :  { %3496 = vmatpush1.bf16.msra.mxu0 %v5758_v11  ;;  %3582 = vmatpush1.bf16.msra.mxu1 %v5760_v12  ;;  %v95_v11 = vld [vmem:[#allocation5 + $0x28] sm:$0xff] }
 0x13d   :  { %3497 = vmatprep.subr.bf16.mxu0 %v5775_v13  ;;  %3583 = vmatprep.subr.bf16.mxu1 %v5777_v14  ;;  %v103_v12 = vld [vmem:[#allocation5 + $0x68] sm:$0xff]  ;;  %v5886_v13 = vcombine.low %v588_v1, %v596_v2  ;;  %v5888_v14 = vcombine.low %v589_v3, %v597_v4 }
 0x13e   :  { %v5397_v16 = vcombine.high %v95_v11, %v103_v12 }
 0x140   :  { %3498 = vmatpush1.bf16.msra.mxu0 %v5774_v19  ;;  %3584 = vmatpush1.bf16.msra.mxu1 %v5776_v20  ;;  %v111_v19 = vld [vmem:[#allocation5 + $0xa8] sm:$0xff] }
 0x141   :  { %3499 = vmatprep.subr.bf16.mxu0 %v5791_v21  ;;  %3585 = vmatprep.subr.bf16.mxu1 %v5793_v22  ;;  %v119_v20 = vld [vmem:[#allocation5 + $0xe8] sm:$0xff]  ;;  %v5394_v21 = vcombine.low %v94_v9, %v102_v10  ;;  %v5396_v22 = vcombine.low %v95_v11, %v103_v12 }
 0x142   :  { %v5413_v24 = vcombine.high %v111_v19, %v119_v20  ;;  %v5412_v33 = vcombine.low %v111_v19, %v119_v20 }
 0x144   :  { %3500 = vmatpush1.bf16.msra.mxu0 %v5790_v28  ;;  %3586 = vmatpush1.bf16.msra.mxu1 %v5792_v29  ;;  %v6678_v28 = vld [vmem:[#allocation2 + $0x8] ss:$16 sps:$4 sm:$0xff]  }
 0x145   :  { %3501 = vmatprep.subr.bf16.mxu0 %v5807_v30  ;;  %3587 = vmatprep.subr.bf16.mxu1 %v5809_v31  ;;  %v127_v29 = vld [vmem:[#allocation5 + $0x128] sm:$0xff]  ;;  %v5410_v31 = vcombine.low %v110_v17, %v118_v18 }
 0x146   :  { %v135_v30 = vld [vmem:[#allocation5 + $0x168] sm:$0xff] }
 0x147   :  { %v5429_v35 = vcombine.high %v127_v29, %v135_v30  ;;  %v5428_v42 = vcombine.low %v127_v29, %v135_v30 }
 0x148   :  { %3502 = vmatpush1.bf16.msra.mxu0 %v5806_v37  ;;  %3588 = vmatpush1.bf16.msra.mxu1 %v5808_v38  ;;  %v150_v37 = vld [vmem:[#allocation5 + $0x1e0] sm:$0xff] }
 0x149   :  { %3503 = vmatprep.subr.bf16.mxu0 %v5823_v39  ;;  %3589 = vmatprep.subr.bf16.mxu1 %v5825_v40  ;;  %v6682_v38 = vld [vmem:[#allocation2 + $0x4] ss:$16 sps:$4 sm:$0xff]   ;;  %v143_v39 = vld [vmem:[#allocation5 + $0x1a8] sm:$0xff]  ;;  %v5443_v43 = vcombine.high %v142_v36, %v150_v37  ;;  %v5442_v48 = vcombine.low %v142_v36, %v150_v37 }
 0x14a   :  { %v151_v40 = vld [vmem:[#allocation5 + $0x1e8] sm:$0xff] }
 0x14b   :  { %v5445_v44 = vcombine.high %v143_v39, %v151_v40  ;;  %v5444_v49 = vcombine.low %v143_v39, %v151_v40 }
 0x14c   :  { %3504 = vmatpush1.bf16.msra.mxu0 %v5822_v56  ;;  %3590 = vmatpush1.bf16.msra.mxu1 %v5824_v45  ;;  %v158_v56 = vld [vmem:[#allocation5 + $0x220] sm:$0xff] }
 0x14d   :  { %3505 = vmatprep.subr.bf16.mxu0 %v5839_v46  ;;  %3591 = vmatprep.subr.bf16.mxu1 %v5841_v47  ;;  %v166_v45 = vld [vmem:[#allocation5 + $0x260] sm:$0xff]  ;;  %v159_v46 = vld [vmem:[#allocation5 + $0x228] sm:$0xff] }
 0x14e   :  { %v167_v47 = vld [vmem:[#allocation5 + $0x268] sm:$0xff]  ;;  %v5459_v50 = vcombine.high %v158_v56, %v166_v45  ;;  %v5458_v57 = vcombine.low %v158_v56, %v166_v45 }
 0x14f   :  { %v5461_v51 = vcombine.high %v159_v46, %v167_v47  ;;  %v5460_v58 = vcombine.low %v159_v46, %v167_v47 }
 0x150   :  { %3506 = vmatpush1.bf16.msra.mxu0 %v5838_v52  ;;  %3592 = vmatpush1.bf16.msra.mxu1 %v5840_v53  ;;  %v174_v52 = vld [vmem:[#allocation5 + $0x2a0] sm:$0xff] }
 0x151   :  { %3507 = vmatprep.subr.bf16.mxu0 %v5855_v54  ;;  %3593 = vmatprep.subr.bf16.mxu1 %v5857_v55  ;;  %v182_v53 = vld [vmem:[#allocation5 + $0x2e0] sm:$0xff]  ;;  %v175_v54 = vld [vmem:[#allocation5 + $0x2a8] sm:$0xff] }
 0x152   :  { %v183_v55 = vld [vmem:[#allocation5 + $0x2e8] sm:$0xff]  ;;  %v5475_v59 = vcombine.high %v174_v52, %v182_v53  ;;  %v5474_v1 = vcombine.low %v174_v52, %v182_v53 }
 0x153   :  { %v5477_v60 = vcombine.high %v175_v54, %v183_v55  ;;  %v5476_v2 = vcombine.low %v175_v54, %v183_v55 }
 0x154   :  { %3508 = vmatpush1.bf16.msra.mxu0 %v5854_v61  ;;  %3594 = vmatpush1.bf16.msra.mxu1 %v5856_v62  ;;  %v190_v61 = vld [vmem:[#allocation5 + $0x320] sm:$0xff] }
 0x155   :  { %3509 = vmatprep.subr.bf16.mxu0 %v5871_v63  ;;  %3595 = vmatprep.subr.bf16.mxu1 %v5873_v0  ;;  %v198_v62 = vld [vmem:[#allocation5 + $0x360] sm:$0xff]  ;;  %v191_v63 = vld [vmem:[#allocation5 + $0x328] sm:$0xff] }
 0x156   :  { %v199_v0 = vld [vmem:[#allocation5 + $0x368] sm:$0xff]  ;;  %v5491_v3 = vcombine.high %v190_v61, %v198_v62  ;;  %v5490_v9 = vcombine.low %v190_v61, %v198_v62 }
 0x157   :  { %v5493_v4 = vcombine.high %v191_v63, %v199_v0  ;;  %v5492_v10 = vcombine.low %v191_v63, %v199_v0 }
 0x158   :  { %3510 = vmatpush1.bf16.msra.mxu0 %v5870_v5  ;;  %3596 = vmatpush1.bf16.msra.mxu1 %v5872_v6  ;;  %v206_v5 = vld [vmem:[#allocation5 + $0x3a0] sm:$0xff] }
 0x159   :  { %3511 = vmatprep.subr.bf16.mxu0 %v5887_v7  ;;  %3597 = vmatprep.subr.bf16.mxu1 %v5889_v8  ;;  %v214_v6 = vld [vmem:[#allocation5 + $0x3e0] sm:$0xff]  ;;  %v207_v7 = vld [vmem:[#allocation5 + $0x3a8] sm:$0xff] }
 0x15a   :  { %v215_v8 = vld [vmem:[#allocation5 + $0x3e8] sm:$0xff]  ;;  %v5507_v11 = vcombine.high %v206_v5, %v214_v6  ;;  %v5506_v17 = vcombine.low %v206_v5, %v214_v6 }
 0x15b   :  { %v5509_v12 = vcombine.high %v207_v7, %v215_v8  ;;  %v5508_v18 = vcombine.low %v207_v7, %v215_v8 }
 0x15c   :  { %3512 = vmatpush1.bf16.msra.mxu0 %v5886_v13  ;;  %3598 = vmatpush1.bf16.msra.mxu1 %v5888_v14  ;;  %v222_v13 = vld [vmem:[#allocation5 + $0x420] sm:$0xff] }
 0x15d   :  { %3610 = vmatprep.subr.bf16.mxu0 %v5395_v15  ;;  %3696 = vmatprep.subr.bf16.mxu1 %v5397_v16  ;;  %v230_v14 = vld [vmem:[#allocation5 + $0x460] sm:$0xff]  ;;  %v223_v15 = vld [vmem:[#allocation5 + $0x428] sm:$0xff] }
 0x15e   :  { %v231_v16 = vld [vmem:[#allocation5 + $0x468] sm:$0xff]  ;;  %v5523_v19 = vcombine.high %v222_v13, %v230_v14  ;;  %v5522_v26 = vcombine.low %v222_v13, %v230_v14 }
 0x15f   :  { %3514 = vmatmul.mubr.bf16.vlgmr.msra.gmra.mrb[4].mxu0 %v6678_v28  ;;  %3600 = vmatmul.mubr.bf16.vlgmr.msra.gmra.mrb[4].mxu1 %v6678_v28  ;;  %v5525_v20 = vcombine.high %v223_v15, %v231_v16  ;;  %v5524_v27 = vcombine.low %v223_v15, %v231_v16 }
 0x160   :  { %3611 = vmatpush1.bf16.msra.mxu0 %v5394_v21  ;;  %3697 = vmatpush1.bf16.msra.mxu1 %v5396_v22  ;;  %v238_v21 = vld [vmem:[#allocation5 + $0x4a0] sm:$0xff] }
 0x161   :  { %3612 = vmatprep.subr.bf16.mxu0 %v5411_v23  ;;  %3698 = vmatprep.subr.bf16.mxu1 %v5413_v24  ;;  %v246_v22 = vld [vmem:[#allocation5 + $0x4e0] sm:$0xff]  ;;  %v239_v23 = vld [vmem:[#allocation5 + $0x4a8] sm:$0xff] }
 0x162   :  { %3642 = vmatprep.mubr.bf16.mxu0 %v6682_v38  ;;  %3728 = vmatprep.mubr.bf16.mxu1 %v6682_v38  ;;  %v247_v24 = vld [vmem:[#allocation5 + $0x4e8] sm:$0xff]  ;;  %v5539_v29 = vcombine.high %v238_v21, %v246_v22  ;;  %v5538_v36 = vcombine.low %v238_v21, %v246_v22 }
 0x163   :  { %v5541_v30 = vcombine.high %v239_v23, %v247_v24  ;;  %v5540_v37 = vcombine.low %v239_v23, %v247_v24 }
 0x164   :  { %3613 = vmatpush1.bf16.msra.mxu0 %v5410_v31  ;;  %3699 = vmatpush1.bf16.msra.mxu1 %v5412_v33  ;;  %v254_v31 = vld [vmem:[#allocation5 + $0x520] sm:$0xff] }
 0x165   :  { %3614 = vmatprep.subr.bf16.mxu0 %v5427_v34  ;;  %3700 = vmatprep.subr.bf16.mxu1 %v5429_v35  ;;  %v262_v33 = vld [vmem:[#allocation5 + $0x560] sm:$0xff]  ;;  %v255_v34 = vld [vmem:[#allocation5 + $0x528] sm:$0xff] }
 0x166   :  { %v263_v35 = vld [vmem:[#allocation5 + $0x568] sm:$0xff]  ;;  %v5555_v39 = vcombine.high %v254_v31, %v262_v33  ;;  %v5554_v56 = vcombine.low %v254_v31, %v262_v33 }
 0x167   :  { %v5557_v40 = vcombine.high %v255_v34, %v263_v35  ;;  %v5556_v45 = vcombine.low %v255_v34, %v263_v35 }
 0x168   :  { %3615 = vmatpush1.bf16.msra.mxu0 %v5426_v41  ;;  %3701 = vmatpush1.bf16.msra.mxu1 %v5428_v42  ;;  %v270_v41 = vld [vmem:[#allocation5 + $0x5a0] sm:$0xff] }
 0x169   :  { %3616 = vmatprep.subr.bf16.mxu0 %v5443_v43  ;;  %3702 = vmatprep.subr.bf16.mxu1 %v5445_v44  ;;  %v278_v42 = vld [vmem:[#allocation5 + $0x5e0] sm:$0xff]  ;;  %v271_v43 = vld [vmem:[#allocation5 + $0x5a8] sm:$0xff] }
 0x16a   :  { %v279_v44 = vld [vmem:[#allocation5 + $0x5e8] sm:$0xff]  ;;  %v5571_v46 = vcombine.high %v270_v41, %v278_v42  ;;  %v5570_v52 = vcombine.low %v270_v41, %v278_v42 }
 0x16b   :  { %v5573_v47 = vcombine.high %v271_v43, %v279_v44  ;;  %v5572_v53 = vcombine.low %v271_v43, %v279_v44 }
 0x16c   :  { %3617 = vmatpush1.bf16.msra.mxu0 %v5442_v48  ;;  %3703 = vmatpush1.bf16.msra.mxu1 %v5444_v49  ;;  %v286_v48 = vld [vmem:[#allocation5 + $0x620] sm:$0xff] }
 0x16d   :  { %3618 = vmatprep.subr.bf16.mxu0 %v5459_v50  ;;  %3704 = vmatprep.subr.bf16.mxu1 %v5461_v51  ;;  %v294_v49 = vld [vmem:[#allocation5 + $0x660] sm:$0xff]  ;;  %v287_v50 = vld [vmem:[#allocation5 + $0x628] sm:$0xff] }
 0x16e   :  { %v295_v51 = vld [vmem:[#allocation5 + $0x668] sm:$0xff]  ;;  %v5587_v54 = vcombine.high %v286_v48, %v294_v49  ;;  %v5586_v61 = vcombine.low %v286_v48, %v294_v49  ;;  %v606_v48 = vlaneseq }
 0x16f   :  { %v5589_v55 = vcombine.high %v287_v50, %v295_v51  ;;  %v5588_v62 = vcombine.low %v287_v50, %v295_v51 }
 0x170   :  { %3619 = vmatpush1.bf16.msra.mxu0 %v5458_v57  ;;  %3705 = vmatpush1.bf16.msra.mxu1 %v5460_v58  ;;  %v302_v57 = vld [vmem:[#allocation5 + $0x6a0] sm:$0xff] }
 0x171   :  { %3620 = vmatprep.subr.bf16.mxu0 %v5475_v59  ;;  %3706 = vmatprep.subr.bf16.mxu1 %v5477_v60  ;;  %v310_v58 = vld [vmem:[#allocation5 + $0x6e0] sm:$0xff]  ;;  %v303_v59 = vld [vmem:[#allocation5 + $0x6a8] sm:$0xff] }
 0x172   :  { %v311_v60 = vld [vmem:[#allocation5 + $0x6e8] sm:$0xff]  ;;  %v5603_v63 = vcombine.high %v302_v57, %v310_v58  ;;  %v5602_v5 = vcombine.low %v302_v57, %v310_v58  ;;  %v6690_v57 = vshrl.u32 %v606_v48, 7 }
 0x173   :  { %v5605_v0 = vcombine.high %v303_v59, %v311_v60  ;;  %v5604_v6 = vcombine.low %v303_v59, %v311_v60 }
 0x174   :  { %3621 = vmatpush1.bf16.msra.mxu0 %v5474_v1  ;;  %3707 = vmatpush1.bf16.msra.mxu1 %v5476_v2  ;;  %v318_v1 = vld [vmem:[#allocation5 + $0x720] sm:$0xff] }
 0x175   :  { %3622 = vmatprep.subr.bf16.mxu0 %v5491_v3  ;;  %3708 = vmatprep.subr.bf16.mxu1 %v5493_v4  ;;  %v326_v2 = vld [vmem:[#allocation5 + $0x760] sm:$0xff]  ;;  %v319_v3 = vld [vmem:[#allocation5 + $0x728] sm:$0xff] }
 0x176   :  { %v327_v4 = vld [vmem:[#allocation5 + $0x768] sm:$0xff]  ;;  %v5619_v7 = vcombine.high %v318_v1, %v326_v2  ;;  %v5618_v13 = vcombine.low %v318_v1, %v326_v2 }
 0x177   :  { %v5621_v8 = vcombine.high %v319_v3, %v327_v4  ;;  %v5620_v14 = vcombine.low %v319_v3, %v327_v4  ;;  %v439_v1 = vld [vmem:[#allocation5 + $0xae8] sm:$0xff]  ;;  %v6693_v3 = vld [vmem:[#allocation7] sm:$0xff]  ;;  %v616_v4 = vsub.s32 2, %v6690_v57 }
 0x178   :  { %3623 = vmatpush1.bf16.msra.mxu0 %v5490_v9  ;;  %3709 = vmatpush1.bf16.msra.mxu1 %v5492_v10  ;;  %v334_v9 = vld [vmem:[#allocation5 + $0x7a0] sm:$0xff] }
 0x179   :  { %3624 = vmatprep.subr.bf16.mxu0 %v5507_v11  ;;  %3710 = vmatprep.subr.bf16.mxu1 %v5509_v12  ;;  %v342_v10 = vld [vmem:[#allocation5 + $0x7e0] sm:$0xff]  ;;  %v335_v11 = vld [vmem:[#allocation5 + $0x7a8] sm:$0xff] }
 0x17a   :  { %v343_v12 = vld [vmem:[#allocation5 + $0x7e8] sm:$0xff]  ;;  %v5635_v15 = vcombine.high %v334_v9, %v342_v10  ;;  %v5634_v21 = vcombine.low %v334_v9, %v342_v10  ;;  %v446_v10 = vld [vmem:[#allocation5 + $0xb20] sm:$0xff] }
 0x17b   :  { %v5637_v16 = vcombine.high %v335_v11, %v343_v12  ;;  %v5636_v22 = vcombine.low %v335_v11, %v343_v12  ;;  %v454_v11 = vld [vmem:[#allocation5 + $0xb60] sm:$0xff] }
 0x17c   :  { %3625 = vmatpush1.bf16.msra.mxu0 %v5506_v17  ;;  %3711 = vmatpush1.bf16.msra.mxu1 %v5508_v18  ;;  %v350_v17 = vld [vmem:[#allocation5 + $0x820] sm:$0xff] }
 0x17d   :  { %3626 = vmatprep.subr.bf16.mxu0 %v5523_v19  ;;  %3712 = vmatprep.subr.bf16.mxu1 %v5525_v20  ;;  %v358_v18 = vld [vmem:[#allocation5 + $0x860] sm:$0xff]  ;;  %v351_v19 = vld [vmem:[#allocation5 + $0x828] sm:$0xff] }
 0x17e   :  { %v359_v20 = vld [vmem:[#allocation5 + $0x868] sm:$0xff]  ;;  %v5651_v23 = vcombine.high %v350_v17, %v358_v18  ;;  %v5650_v31 = vcombine.low %v350_v17, %v358_v18 }
 0x17f   :  { %v5653_v24 = vcombine.high %v351_v19, %v359_v20  ;;  %v5652_v33 = vcombine.low %v351_v19, %v359_v20  ;;  %v5747_v20 = vcombine.high %v446_v10, %v454_v11 }
 0x180   :  { %3627 = vmatpush1.bf16.msra.mxu0 %v5522_v26  ;;  %3713 = vmatpush1.bf16.msra.mxu1 %v5524_v27  ;;  %v366_v26 = vld [vmem:[#allocation5 + $0x8a0] sm:$0xff] }
 0x181   :  { %3628 = vmatprep.subr.bf16.mxu0 %v5539_v29  ;;  %3714 = vmatprep.subr.bf16.mxu1 %v5541_v30  ;;  %v374_v27 = vld [vmem:[#allocation5 + $0x8e0] sm:$0xff]  ;;  %v367_v29 = vld [vmem:[#allocation5 + $0x8a8] sm:$0xff] }
 0x182   :  { %v375_v30 = vld [vmem:[#allocation5 + $0x8e8] sm:$0xff]  ;;  %v5667_v34 = vcombine.high %v366_v26, %v374_v27  ;;  %v5666_v41 = vcombine.low %v366_v26, %v374_v27 }
 0x183   :  { %v5669_v35 = vcombine.high %v367_v29, %v375_v30  ;;  %v5668_v42 = vcombine.low %v367_v29, %v375_v30  ;;  %v463_v30 = vld [vmem:[#allocation5 + $0xba8] sm:$0xff] }
 0x184   :  { %3629 = vmatpush1.bf16.msra.mxu0 %v5538_v36  ;;  %3715 = vmatpush1.bf16.msra.mxu1 %v5540_v37  ;;  %v382_v36 = vld [vmem:[#allocation5 + $0x920] sm:$0xff] }
 0x185   :  { %3630 = vmatprep.subr.bf16.mxu0 %v5555_v39  ;;  %3716 = vmatprep.subr.bf16.mxu1 %v5557_v40  ;;  %v390_v37 = vld [vmem:[#allocation5 + $0x960] sm:$0xff]  ;;  %v383_v39 = vld [vmem:[#allocation5 + $0x928] sm:$0xff] }
 0x186   :  { %v391_v40 = vld [vmem:[#allocation5 + $0x968] sm:$0xff]  ;;  %v5683_v43 = vcombine.high %v382_v36, %v390_v37  ;;  %v5682_v49 = vcombine.low %v382_v36, %v390_v37  ;;  %v5746_v37 = vcombine.low %v446_v10, %v454_v11  ;;  %v502_v10 = vld [vmem:[#allocation5 + $0xce0] sm:$0xff] }
 0x187   :  { %v5685_v44 = vcombine.high %v383_v39, %v391_v40 }
 0x188   :  { %3631 = vmatpush1.bf16.msra.mxu0 %v5554_v56  ;;  %3717 = vmatpush1.bf16.msra.mxu1 %v5556_v45  ;;  %v398_v56 = vld [vmem:[#allocation5 + $0x9a0] sm:$0xff] }
 0x189   :  { %3632 = vmatprep.subr.bf16.mxu0 %v5571_v46  ;;  %3718 = vmatprep.subr.bf16.mxu1 %v5573_v47  ;;  %v406_v45 = vld [vmem:[#allocation5 + $0x9e0] sm:$0xff]  ;;  %v399_v46 = vld [vmem:[#allocation5 + $0x9a8] sm:$0xff] }
 0x18a   :  { %v407_v47 = vld [vmem:[#allocation5 + $0x9e8] sm:$0xff]  ;;  %v5699_v50 = vcombine.high %v398_v56, %v406_v45  ;;  %v5698_v58 = vcombine.low %v398_v56, %v406_v45 }
 0x18b   :  { %v5701_v51 = vcombine.high %v399_v46, %v407_v47  ;;  %v5700_v59 = vcombine.low %v399_v46, %v407_v47 }
 0x18c   :  { %3633 = vmatpush1.bf16.msra.mxu0 %v5570_v52  ;;  %3719 = vmatpush1.bf16.msra.mxu1 %v5572_v53  ;;  %v414_v52 = vld [vmem:[#allocation5 + $0xa20] sm:$0xff] }
 0x18d   :  { %3634 = vmatprep.subr.bf16.mxu0 %v5587_v54  ;;  %3720 = vmatprep.subr.bf16.mxu1 %v5589_v55  ;;  %v422_v53 = vld [vmem:[#allocation5 + $0xa60] sm:$0xff]  ;;  %v415_v54 = vld [vmem:[#allocation5 + $0xa28] sm:$0xff] }
 0x18e   :  { %v423_v55 = vld [vmem:[#allocation5 + $0xa68] sm:$0xff]  ;;  %v5714_v2 = vcombine.low %v414_v52, %v422_v53 }
 0x18f   :  { %v5717_v60 = vcombine.high %v415_v54, %v423_v55 }
 0x190   :  { %3635 = vmatpush1.bf16.msra.mxu0 %v5586_v61  ;;  %3721 = vmatpush1.bf16.msra.mxu1 %v5588_v62  ;;  %v430_v61 = vld [vmem:[#allocation5 + $0xaa0] sm:$0xff] }
 0x191   :  { %3636 = vmatprep.subr.bf16.mxu0 %v5603_v63  ;;  %3722 = vmatprep.subr.bf16.mxu1 %v5605_v0  ;;  %v438_v62 = vld [vmem:[#allocation5 + $0xae0] sm:$0xff]  ;;  %v608_v63 = vsub.s32 0, %v6690_v57  ;;  %v431_v0 = vld [vmem:[#allocation5 + $0xaa8] sm:$0xff] }
 0x192   :  { %v5733_v9 = vcombine.high %v431_v0, %v439_v1  ;;  %v5730_v17 = vcombine.low %v430_v61, %v438_v62  ;;  %v5732_v19 = vcombine.low %v431_v0, %v439_v1 }
 0x193   :  { %v609_v12 = vrot.slane %v6693_v3, %v608_v63 }
 0x194   :  { %3637 = vmatpush1.bf16.msra.mxu0 %v5602_v5  ;;  %3723 = vmatpush1.bf16.msra.mxu1 %v5604_v6  ;;  %v612_v5 = vsub.s32 1, %v6690_v57  ;;  %v5716_v6 = vcombine.low %v415_v54, %v423_v55  ;;  %v479_v54 = vld [vmem:[#allocation5 + $0xc28] sm:$0xff] }
 0x195   :  { %3638 = vmatprep.subr.bf16.mxu0 %v5619_v7  ;;  %3724 = vmatprep.subr.bf16.mxu1 %v5621_v8  ;;  %v620_v7 = vsub.s32 3, %v6690_v57  ;;  %v5731_v8 = vcombine.high %v430_v61, %v438_v62  ;;  %v487_v55 = vld [vmem:[#allocation5 + $0xc68] sm:$0xff] }
 0x197   :  { %v621_v18 = vrot.slane %v6693_v3, %v620_v7 }
 0x198   :  { %3639 = vmatpush1.bf16.msra.mxu0 %v5618_v13  ;;  %3725 = vmatpush1.bf16.msra.mxu1 %v5620_v14  ;;  %v447_v13 = vld [vmem:[#allocation5 + $0xb28] sm:$0xff] }
 0x199   :  { %3640 = vmatprep.subr.bf16.mxu0 %v5635_v15  ;;  %3726 = vmatprep.subr.bf16.mxu1 %v5637_v16  ;;  %v455_v14 = vld [vmem:[#allocation5 + $0xb68] sm:$0xff]  ;;  %v617_v15 = vrot.slane %v6693_v3, %v616_v4  ;;  %v613_v16 = vrot.slane %v6693_v3, %v612_v5 }
 0x19c   :  { %3641 = vmatpush1.bf16.msra.mxu0 %v5634_v21  ;;  %3727 = vmatpush1.bf16.msra.mxu1 %v5636_v22  ;;  %v5749_v22 = vcombine.high %v447_v13, %v455_v14 }
 0x19d   :  { %3653 = vmatprep.subr.bf16.mxu0 %v5651_v23  ;;  %3739 = vmatprep.subr.bf16.mxu1 %v5653_v24  ;;  %v462_v23 = vld [vmem:[#allocation5 + $0xba0] sm:$0xff] }
 0x19e   :  { %v470_v24 = vld [vmem:[#allocation5 + $0xbe0] sm:$0xff] }
 0x19f   :  { %3643 = vmatmul.mubr.bf16.vlgmr.msra.gmra.mrb[8].mxu0 %v6670_v25  ;;  %3729 = vmatmul.mubr.bf16.vlgmr.msra.gmra.mrb[8].mxu1 %v6670_v25  ;;  %v5684_v25 = vcombine.low %v383_v39, %v391_v40  ;;  %v5748_v39 = vcombine.low %v447_v13, %v455_v14  ;;  %v5762_v47 = vcombine.low %v462_v23, %v470_v24  ;;  %v503_v13 = vld [vmem:[#allocation5 + $0xce8] sm:$0xff] }
 0x1a0   :  { %3654 = vmatpush1.bf16.msra.mxu0 %v5650_v31  ;;  %3740 = vmatpush1.bf16.msra.mxu1 %v5652_v33  ;;  %v471_v31 = vld [vmem:[#allocation5 + $0xbe8] sm:$0xff] }
 0x1a1   :  { %3655 = vmatprep.subr.bf16.mxu0 %v5667_v34  ;;  %3741 = vmatprep.subr.bf16.mxu1 %v5669_v35  ;;  %v5765_v48 = vcombine.high %v463_v30, %v471_v31 }
 0x1a2   :  { %3685 = vmatprep.mubr.bf16.mxu0 %v6674_v32  ;;  %3771 = vmatprep.mubr.bf16.mxu1 %v6674_v32  ;;  %v5715_v32 = vcombine.high %v414_v52, %v422_v53  ;;  %v5764_v53 = vcombine.low %v463_v30, %v471_v31  ;;  %v527_v30 = vld [vmem:[#allocation5 + $0xda8] sm:$0xff] }
 0x1a3   :  { %v535_v31 = vld [vmem:[#allocation5 + $0xde8] sm:$0xff] }
 0x1a4   :  { %3656 = vmatpush1.bf16.msra.mxu0 %v5666_v41  ;;  %3742 = vmatpush1.bf16.msra.mxu1 %v5668_v42 }
 0x1a5   :  { %3657 = vmatprep.subr.bf16.mxu0 %v5683_v43  ;;  %3743 = vmatprep.subr.bf16.mxu1 %v5685_v44  ;;  %v5763_v44 = vcombine.high %v462_v23, %v470_v24 }
 0x1a8   :  { %3658 = vmatpush1.bf16.msra.mxu0 %v5682_v49  ;;  %3744 = vmatpush1.bf16.msra.mxu1 %v5684_v25  ;;  %v478_v49 = vld [vmem:[#allocation5 + $0xc20] sm:$0xff] }
 0x1a9   :  { %3659 = vmatprep.subr.bf16.mxu0 %v5699_v50  ;;  %3745 = vmatprep.subr.bf16.mxu1 %v5701_v51  ;;  %v486_v25 = vld [vmem:[#allocation5 + $0xc60] sm:$0xff] }
 0x1aa   :  { %v5779_v1 = vcombine.high %v478_v49, %v486_v25  ;;  %v5778_v14 = vcombine.low %v478_v49, %v486_v25 }
 0x1ac   :  { %3660 = vmatpush1.bf16.msra.mxu0 %v5698_v58  ;;  %3746 = vmatpush1.bf16.msra.mxu1 %v5700_v59 }
 0x1ad   :  { %3661 = vmatprep.subr.bf16.mxu0 %v5715_v32  ;;  %3747 = vmatprep.subr.bf16.mxu1 %v5717_v60 }
 0x1b0   :  { %3662 = vmatpush1.bf16.msra.mxu0 %v5714_v2  ;;  %3748 = vmatpush1.bf16.msra.mxu1 %v5716_v6 }
 0x1b1   :  { %3663 = vmatprep.subr.bf16.mxu0 %v5731_v8  ;;  %3749 = vmatprep.subr.bf16.mxu1 %v5733_v9  ;;  %v5781_v8 = vcombine.high %v479_v54, %v487_v55  ;;  %v494_v9 = vld [vmem:[#allocation5 + $0xca0] sm:$0xff] }
 0x1b2   :  { %v3343_v21 = vpop.f32.mrb[0].mxu0  ;;  %v3429_v27 = vpop.f32.mrb[0].mxu1 }
 0x1b3   :  { %v6203_v26 = vadd.f32 %v3343_v21, %v609_v12  ;;  %v3345_v29 = vpop.f32.mrb[1].mxu0  ;;  %v6207_v33 = vadd.f32 %v3429_v27, %v617_v15  ;;  %v3431_v35 = vpop.f32.mrb[1].mxu1  ;;  %v519_v21 = vld [vmem:[#allocation5 + $0xd68] sm:$0xff]  ;;  %v526_v27 = vld [vmem:[#allocation5 + $0xda0] sm:$0xff] }
 0x1b4   :  { %v6204_v34 = vadd.f32 %v3345_v29, %v613_v16  ;;  %v3347_v36 = vpop.f32.mrb[2].mxu0  ;;  %3664 = vmatpush1.bf16.msra.mxu0 %v5730_v17  ;;  %v6208_v40 = vadd.f32 %v3431_v35, %v621_v18  ;;  %v3433_v42 = vpop.f32.mrb[2].mxu1  ;;  %3750 = vmatpush1.bf16.msra.mxu1 %v5732_v19  ;;  %v518_v19 = vld [vmem:[#allocation5 + $0xd60] sm:$0xff] }
 0x1b5   :  { %v6205_v41 = vadd.f32 %v3347_v36, %v609_v12  ;;  %v3349_v43 = vpop.f32.mrb[3].mxu0  ;;  %3665 = vmatprep.subr.bf16.mxu0 %v5747_v20  ;;  %v6209_v56 = vadd.f32 %v3433_v42, %v617_v15  ;;  %v3435_v46 = vpop.f32.mrb[3].mxu1  ;;  %3751 = vmatprep.subr.bf16.mxu1 %v5749_v22  ;;  %v3954_v50 = vmax.f32 %v6203_v26, 0.0  ;;  %v3956_v58 = vmax.f32 %v6207_v33, 0.0  ;;  %v495_v12 = vld [vmem:[#allocation5 + $0xca8] sm:$0xff]  ;;  %v534_v29 = vld [vmem:[#allocation5 + $0xde0] sm:$0xff] }
 0x1b6   :  { %v6206_v45 = vadd.f32 %v3349_v43, %v613_v16  ;;  %v6210_v52 = vadd.f32 %v3435_v46, %v621_v18  ;;  %v3955_v59 = vmax.f32 %v6204_v34, 0.0  ;;  %v3957_v61 = vmax.f32 %v6208_v40, 0.0  ;;  %v510_v18 = vld [vmem:[#allocation5 + $0xd20] sm:$0xff]  ;;  %v511_v20 = vld [vmem:[#allocation5 + $0xd28] sm:$0xff] }
 0x1b7   :  { %v3970_v51 = vmax.f32 %v6205_v41, 0.0  ;;  %v3972_v32 = vmax.f32 %v6209_v56, 0.0  ;;  %v5780_v15 = vcombine.low %v479_v54, %v487_v55  ;;  %v5795_v16 = vcombine.high %v494_v9, %v502_v10  ;;  %v543_v40 = vld [vmem:[#allocation5 + $0xe28] sm:$0xff]  ;;  %v566_v46 = vld [vmem:[#allocation5 + $0xee0] sm:$0xff] }
 0x1b8   :  { %v3971_v60 = vmax.f32 %v6206_v45, 0.0  ;;  %3666 = vmatpush1.bf16.msra.mxu0 %v5746_v37  ;;  %v3973_v0 = vmax.f32 %v6210_v52, 0.0  ;;  %3752 = vmatpush1.bf16.msra.mxu1 %v5748_v39  ;;  %v5797_v17 = vcombine.high %v495_v12, %v503_v13  ;;  %v5794_v22 = vcombine.low %v494_v9, %v502_v10  ;;  %v542_v37 = vld [vmem:[#allocation5 + $0xe20] sm:$0xff]  ;;  %v551_v41 = vld [vmem:[#allocation5 + $0xe68] sm:$0xff] }
 0x1b9   :  { %v6710_v62 = vpack.c.bf16 %v3970_v51, %v3954_v50  ;;  %3667 = vmatprep.subr.bf16.mxu0 %v5763_v44  ;;  %v6712_v2 = vpack.c.bf16 %v3972_v32, %v3956_v58  ;;  %3753 = vmatprep.subr.bf16.mxu1 %v5765_v48  ;;  %v5796_v23 = vcombine.low %v495_v12, %v503_v13  ;;  %v550_v39 = vld [vmem:[#allocation5 + $0xe60] sm:$0xff]  ;;  %v567_v48 = vld [vmem:[#allocation5 + $0xee8] sm:$0xff] }
 0x1ba   :  { %v6714_v6 = vpack.c.bf16 %v3971_v60, %v3955_v59  ;;  %v6716_v11 = vpack.c.bf16 %v3973_v0, %v3957_v61  ;;  %v5811_v24 = vcombine.high %v510_v18, %v518_v19  ;;  %v5813_v26 = vcombine.high %v511_v20, %v519_v21  ;;  %v558_v45 = vld [vmem:[#allocation5 + $0xea0] sm:$0xff]  ;;  %v575_v54 = vld [vmem:[#allocation5 + $0xf28] sm:$0xff] }
 0x1bb   :  { %v5810_v33 = vcombine.low %v510_v18, %v518_v19  ;;  %v5812_v34 = vcombine.low %v511_v20, %v519_v21  ;;  %v5827_v35 = vcombine.high %v526_v27, %v534_v29  ;;  %v5829_v36 = vcombine.high %v527_v30, %v535_v31  ;;  %v574_v52 = vld [vmem:[#allocation5 + $0xf20] sm:$0xff]  ;;  %v583_v55 = vld [vmem:[#allocation5 + $0xf68] sm:$0xff] }
 0x1bc   :  { %3668 = vmatpush1.bf16.msra.mxu0 %v5762_v47  ;;  %3754 = vmatpush1.bf16.msra.mxu1 %v5764_v53  ;;  %v5826_v42 = vcombine.low %v526_v27, %v534_v29  ;;  %v5828_v43 = vcombine.low %v527_v30, %v535_v31  ;;  %v5843_v44 = vcombine.high %v542_v37, %v550_v39  ;;  %v559_v47 = vld [vmem:[#allocation5 + $0xea8] sm:$0xff]  ;;  %v582_v53 = vld [vmem:[#allocation5 + $0xf60] sm:$0xff] }
 0x1bd   :  { %3669 = vmatprep.subr.bf16.mxu0 %v5779_v1  ;;  %3755 = vmatprep.subr.bf16.mxu1 %v5781_v8  ;;  %v5845_v56 = vcombine.high %v543_v40, %v551_v41  ;;  %v5842_v49 = vcombine.low %v542_v37, %v550_v39  ;;  %v5844_v25 = vcombine.low %v543_v40, %v551_v41  ;;  %v590_v61 = vld [vmem:[#allocation5 + $0xfa0] sm:$0xff]  ;;  %v591_v1 = vld [vmem:[#allocation5 + $0xfa8] sm:$0xff] }
 0x1be   :  { %v5859_v50 = vcombine.high %v558_v45, %v566_v46  ;;  %v5861_v51 = vcombine.high %v559_v47, %v567_v48  ;;  %v5858_v58 = vcombine.low %v558_v45, %v566_v46  ;;  %v5860_v59 = vcombine.low %v559_v47, %v567_v48  ;;  %v598_v0 = vld [vmem:[#allocation5 + $0xfe0] sm:$0xff]  ;;  %v599_v8 = vld [vmem:[#allocation5 + $0xfe8] sm:$0xff]  ;;  %v160_v48 = vld [vmem:[#allocation5 + $0x230] sm:$0xff] }
 0x1bf   :  { %v5875_v32 = vcombine.high %v574_v52, %v582_v53  ;;  %v5877_v60 = vcombine.high %v575_v54, %v583_v55  ;;  %v5874_v9 = vcombine.low %v574_v52, %v582_v53  ;;  %v5876_v10 = vcombine.low %v575_v54, %v583_v55  ;;  %v176_v54 = vld [vmem:[#allocation5 + $0x2b0] sm:$0xff] }
 0x1c0   :  { %3670 = vmatpush1.bf16.msra.mxu0 %v5778_v14  ;;  %3756 = vmatpush1.bf16.msra.mxu1 %v5780_v15  ;;  %v5891_v12 = vcombine.high %v590_v61, %v598_v0  ;;  %v5893_v13 = vcombine.high %v591_v1, %v599_v8  ;;  %v96_v14 = vld [vmem:[#allocation5 + $0x30] sm:$0xff]  ;;  %v5890_v18 = vcombine.low %v590_v61, %v598_v0 }
 0x1c1   :  { %3671 = vmatprep.subr.bf16.mxu0 %v5795_v16  ;;  %3757 = vmatprep.subr.bf16.mxu1 %v5797_v17  ;;  %v104_v15 = vld [vmem:[#allocation5 + $0x70] sm:$0xff]  ;;  %v97_v16 = vld [vmem:[#allocation5 + $0x38] sm:$0xff]  ;;  %v5892_v19 = vcombine.low %v591_v1, %v599_v8 }
 0x1c2   :  { %v105_v17 = vld [vmem:[#allocation5 + $0x78] sm:$0xff]  ;;  %v5399_v20 = vcombine.high %v96_v14, %v104_v15  ;;  %v5398_v27 = vcombine.low %v96_v14, %v104_v15  ;;  %v184_v55 = vld [vmem:[#allocation5 + $0x2f0] sm:$0xff] }
 0x1c3   :  { %v5401_v21 = vcombine.high %v97_v16, %v105_v17  ;;  %v5400_v29 = vcombine.low %v97_v16, %v105_v17  ;;  %v5479_v61 = vcombine.high %v176_v54, %v184_v55  ;;  %v192_v1 = vld [vmem:[#allocation5 + $0x330] sm:$0xff] }
 0x1c4   :  { %3672 = vmatpush1.bf16.msra.mxu0 %v5794_v22  ;;  %3758 = vmatpush1.bf16.msra.mxu1 %v5796_v23  ;;  %v112_v22 = vld [vmem:[#allocation5 + $0xb0] sm:$0xff] }
 0x1c5   :  { %3673 = vmatprep.subr.bf16.mxu0 %v5811_v24  ;;  %3759 = vmatprep.subr.bf16.mxu1 %v5813_v26  ;;  %v120_v23 = vld [vmem:[#allocation5 + $0xf0] sm:$0xff]  ;;  %v113_v24 = vld [vmem:[#allocation5 + $0xb8] sm:$0xff] }
 0x1c6   :  { %v121_v26 = vld [vmem:[#allocation5 + $0xf8] sm:$0xff]  ;;  %v5415_v30 = vcombine.high %v112_v22, %v120_v23  ;;  %v5414_v37 = vcombine.low %v112_v22, %v120_v23  ;;  %v200_v8 = vld [vmem:[#allocation5 + $0x370] sm:$0xff] }
 0x1c7   :  { %v5417_v31 = vcombine.high %v113_v24, %v121_v26  ;;  %v5416_v39 = vcombine.low %v113_v24, %v121_v26  ;;  %v5495_v14 = vcombine.high %v192_v1, %v200_v8  ;;  %v208_v16 = vld [vmem:[#allocation5 + $0x3b0] sm:$0xff] }
 0x1c8   :  { %3674 = vmatpush1.bf16.msra.mxu0 %v5810_v33  ;;  %3760 = vmatpush1.bf16.msra.mxu1 %v5812_v34  ;;  %v128_v33 = vld [vmem:[#allocation5 + $0x130] sm:$0xff] }
 0x1c9   :  { %3675 = vmatprep.subr.bf16.mxu0 %v5827_v35  ;;  %3761 = vmatprep.subr.bf16.mxu1 %v5829_v36  ;;  %v136_v34 = vld [vmem:[#allocation5 + $0x170] sm:$0xff]  ;;  %v129_v35 = vld [vmem:[#allocation5 + $0x138] sm:$0xff] }
 0x1ca   :  { %v137_v36 = vld [vmem:[#allocation5 + $0x178] sm:$0xff]  ;;  %v5431_v40 = vcombine.high %v128_v33, %v136_v34  ;;  %v5430_v45 = vcombine.low %v128_v33, %v136_v34  ;;  %v216_v17 = vld [vmem:[#allocation5 + $0x3f0] sm:$0xff] }
 0x1cb   :  { %v5433_v41 = vcombine.high %v129_v35, %v137_v36  ;;  %v5511_v22 = vcombine.high %v208_v16, %v216_v17  ;;  %v224_v24 = vld [vmem:[#allocation5 + $0x430] sm:$0xff] }
 0x1cc   :  { %3676 = vmatpush1.bf16.msra.mxu0 %v5826_v42  ;;  %3762 = vmatpush1.bf16.msra.mxu1 %v5828_v43  ;;  %v144_v42 = vld [vmem:[#allocation5 + $0x1b0] sm:$0xff] }
 0x1cd   :  { %3677 = vmatprep.subr.bf16.mxu0 %v5843_v44  ;;  %3763 = vmatprep.subr.bf16.mxu1 %v5845_v56  ;;  %v152_v43 = vld [vmem:[#allocation5 + $0x1f0] sm:$0xff]  ;;  %v145_v44 = vld [vmem:[#allocation5 + $0x1b8] sm:$0xff] }
 0x1ce   :  { %v153_v56 = vld [vmem:[#allocation5 + $0x1f8] sm:$0xff]  ;;  %v5447_v46 = vcombine.high %v144_v42, %v152_v43  ;;  %v232_v26 = vld [vmem:[#allocation5 + $0x470] sm:$0xff] }
 0x1cf   :  { %v5449_v47 = vcombine.high %v145_v44, %v153_v56  ;;  %v5448_v52 = vcombine.low %v145_v44, %v153_v56  ;;  %v5527_v33 = vcombine.high %v224_v24, %v232_v26  ;;  %v256_v44 = vld [vmem:[#allocation5 + $0x530] sm:$0xff] }
 0x1d0   :  { %3678 = vmatpush1.bf16.msra.mxu0 %v5842_v49  ;;  %3764 = vmatpush1.bf16.msra.mxu1 %v5844_v25  ;;  %v168_v49 = vld [vmem:[#allocation5 + $0x270] sm:$0xff]  ;;  %v161_v25 = vld [vmem:[#allocation5 + $0x238] sm:$0xff] }
 0x1d1   :  { %3679 = vmatprep.subr.bf16.mxu0 %v5859_v50  ;;  %3765 = vmatprep.subr.bf16.mxu1 %v5861_v51  ;;  %v169_v50 = vld [vmem:[#allocation5 + $0x278] sm:$0xff]  ;;  %v5446_v51 = vcombine.low %v144_v42, %v152_v43  ;;  %v5463_v53 = vcombine.high %v160_v48, %v168_v49  ;;  %v264_v56 = vld [vmem:[#allocation5 + $0x570] sm:$0xff] }
 0x1d4   :  { %3680 = vmatpush1.bf16.msra.mxu0 %v5858_v58  ;;  %3766 = vmatpush1.bf16.msra.mxu1 %v5860_v59  ;;  %v177_v58 = vld [vmem:[#allocation5 + $0x2b8] sm:$0xff] }
 0x1d5   :  { %3681 = vmatprep.subr.bf16.mxu0 %v5875_v32  ;;  %3767 = vmatprep.subr.bf16.mxu1 %v5877_v60  ;;  %v185_v59 = vld [vmem:[#allocation5 + $0x2f8] sm:$0xff]  ;;  %v5462_v32 = vcombine.low %v160_v48, %v168_v49  ;;  %v5464_v60 = vcombine.low %v161_v25, %v169_v50  ;;  %v5559_v48 = vcombine.high %v256_v44, %v264_v56 }
 0x1d6   :  { %v5481_v0 = vcombine.high %v177_v58, %v185_v59 }
 0x1d8   :  { %3682 = vmatpush1.bf16.msra.mxu0 %v5874_v9  ;;  %3768 = vmatpush1.bf16.msra.mxu1 %v5876_v10  ;;  %v193_v9 = vld [vmem:[#allocation5 + $0x338] sm:$0xff] }
 0x1d9   :  { %3683 = vmatprep.subr.bf16.mxu0 %v5891_v12  ;;  %3769 = vmatprep.subr.bf16.mxu1 %v5893_v13  ;;  %v201_v10 = vld [vmem:[#allocation5 + $0x378] sm:$0xff]  ;;  %v5478_v12 = vcombine.low %v176_v54, %v184_v55  ;;  %v5480_v13 = vcombine.low %v177_v58, %v185_v59  ;;  %v288_v58 = vld [vmem:[#allocation5 + $0x630] sm:$0xff] }
 0x1da   :  { %v5497_v15 = vcombine.high %v193_v9, %v201_v10  ;;  %v296_v59 = vld [vmem:[#allocation5 + $0x670] sm:$0xff] }
 0x1dc   :  { %3684 = vmatpush1.bf16.msra.mxu0 %v5890_v18  ;;  %3770 = vmatpush1.bf16.msra.mxu1 %v5892_v19  ;;  %v209_v18 = vld [vmem:[#allocation5 + $0x3b8] sm:$0xff] }
 0x1dd   :  { %3782 = vmatprep.subr.bf16.mxu0 %v5399_v20  ;;  %3868 = vmatprep.subr.bf16.mxu1 %v5401_v21  ;;  %v217_v19 = vld [vmem:[#allocation5 + $0x3f8] sm:$0xff]  ;;  %v5494_v20 = vcombine.low %v192_v1, %v200_v8  ;;  %v5496_v21 = vcombine.low %v193_v9, %v201_v10  ;;  %v5591_v1 = vcombine.high %v288_v58, %v296_v59  ;;  %v304_v9 = vld [vmem:[#allocation5 + $0x6b0] sm:$0xff] }
 0x1de   :  { %v5513_v23 = vcombine.high %v209_v18, %v217_v19  ;;  %v312_v10 = vld [vmem:[#allocation5 + $0x6f0] sm:$0xff] }
 0x1df   :  { %3686 = vmatmul.mubr.bf16.vlgmr.msra.gmra.mrb[8].mxu0 %v6678_v28  ;;  %3772 = vmatmul.mubr.bf16.vlgmr.msra.gmra.mrb[8].mxu1 %v6678_v28  ;;  %v5432_v28 = vcombine.low %v129_v35, %v137_v36  ;;  %v240_v35 = vld [vmem:[#allocation5 + $0x4b0] sm:$0xff] }
 0x1e0   :  { %3783 = vmatpush1.bf16.msra.mxu0 %v5398_v27  ;;  %3869 = vmatpush1.bf16.msra.mxu1 %v5400_v29  ;;  %v225_v27 = vld [vmem:[#allocation5 + $0x438] sm:$0xff]  ;;  %v248_v36 = vld [vmem:[#allocation5 + $0x4f0] sm:$0xff] }
 0x1e1   :  { %3784 = vmatprep.subr.bf16.mxu0 %v5415_v30  ;;  %3870 = vmatprep.subr.bf16.mxu1 %v5417_v31  ;;  %v233_v29 = vld [vmem:[#allocation5 + $0x478] sm:$0xff]  ;;  %v5510_v30 = vcombine.low %v208_v16, %v216_v17  ;;  %v5512_v31 = vcombine.low %v209_v18, %v217_v19  ;;  %v5543_v42 = vcombine.high %v240_v35, %v248_v36  ;;  %v320_v18 = vld [vmem:[#allocation5 + $0x730] sm:$0xff] }
 0x1e2   :  { %3814 = vmatprep.mubr.bf16.mxu0 %v6682_v38  ;;  %3900 = vmatprep.mubr.bf16.mxu1 %v6682_v38  ;;  %v5465_v38 = vcombine.high %v161_v25, %v169_v50  ;;  %v5529_v34 = vcombine.high %v225_v27, %v233_v29  ;;  %v272_v25 = vld [vmem:[#allocation5 + $0x5b0] sm:$0xff]  ;;  %v5607_v16 = vcombine.high %v304_v9, %v312_v10 }
 0x1e3   :  { %v280_v50 = vld [vmem:[#allocation5 + $0x5f0] sm:$0xff] }
 0x1e4   :  { %3785 = vmatpush1.bf16.msra.mxu0 %v5414_v37  ;;  %3871 = vmatpush1.bf16.msra.mxu1 %v5416_v39  ;;  %v241_v37 = vld [vmem:[#allocation5 + $0x4b8] sm:$0xff]  ;;  %v5575_v54 = vcombine.high %v272_v25, %v280_v50  ;;  %v328_v19 = vld [vmem:[#allocation5 + $0x770] sm:$0xff] }
 0x1e5   :  { %3786 = vmatprep.subr.bf16.mxu0 %v5431_v40  ;;  %3872 = vmatprep.subr.bf16.mxu1 %v5433_v41  ;;  %v249_v39 = vld [vmem:[#allocation5 + $0x4f8] sm:$0xff]  ;;  %v5526_v40 = vcombine.low %v224_v24, %v232_v26  ;;  %v5528_v41 = vcombine.low %v225_v27, %v233_v29  ;;  %v5623_v24 = vcombine.high %v320_v18, %v328_v19  ;;  %v336_v27 = vld [vmem:[#allocation5 + $0x7b0] sm:$0xff] }
 0x1e6   :  { %v5545_v43 = vcombine.high %v241_v37, %v249_v39  ;;  %v344_v29 = vld [vmem:[#allocation5 + $0x7f0] sm:$0xff] }
 0x1e8   :  { %3787 = vmatpush1.bf16.msra.mxu0 %v5430_v45  ;;  %3873 = vmatpush1.bf16.msra.mxu1 %v5432_v28  ;;  %v257_v45 = vld [vmem:[#allocation5 + $0x538] sm:$0xff] }
 0x1e9   :  { %3788 = vmatprep.subr.bf16.mxu0 %v5447_v46  ;;  %3874 = vmatprep.subr.bf16.mxu1 %v5449_v47  ;;  %v265_v28 = vld [vmem:[#allocation5 + $0x578] sm:$0xff]  ;;  %v5542_v46 = vcombine.low %v240_v35, %v248_v36  ;;  %v5544_v47 = vcombine.low %v241_v37, %v249_v39  ;;  %v5639_v35 = vcombine.high %v336_v27, %v344_v29  ;;  %v352_v37 = vld [vmem:[#allocation5 + $0x830] sm:$0xff] }
 0x1ea   :  { %v5561_v49 = vcombine.high %v257_v45, %v265_v28  ;;  %v360_v39 = vld [vmem:[#allocation5 + $0x870] sm:$0xff] }
 0x1ec   :  { %3789 = vmatpush1.bf16.msra.mxu0 %v5446_v51  ;;  %3875 = vmatpush1.bf16.msra.mxu1 %v5448_v52  ;;  %v273_v51 = vld [vmem:[#allocation5 + $0x5b8] sm:$0xff] }
 0x1ed   :  { %3790 = vmatprep.subr.bf16.mxu0 %v5463_v53  ;;  %3876 = vmatprep.subr.bf16.mxu1 %v5465_v38  ;;  %v281_v52 = vld [vmem:[#allocation5 + $0x5f8] sm:$0xff]  ;;  %v5558_v53 = vcombine.low %v256_v44, %v264_v56  ;;  %v5560_v38 = vcombine.low %v257_v45, %v265_v28  ;;  %v5655_v44 = vcombine.high %v352_v37, %v360_v39  ;;  %v368_v45 = vld [vmem:[#allocation5 + $0x8b0] sm:$0xff] }
 0x1ee   :  { %v5577_v55 = vcombine.high %v273_v51, %v281_v52  ;;  %v376_v28 = vld [vmem:[#allocation5 + $0x8f0] sm:$0xff] }
 0x1f0   :  { %3791 = vmatpush1.bf16.msra.mxu0 %v5462_v32  ;;  %3877 = vmatpush1.bf16.msra.mxu1 %v5464_v60  ;;  %v289_v32 = vld [vmem:[#allocation5 + $0x638] sm:$0xff] }
 0x1f1   :  { %3792 = vmatprep.subr.bf16.mxu0 %v5479_v61  ;;  %3878 = vmatprep.subr.bf16.mxu1 %v5481_v0  ;;  %v297_v60 = vld [vmem:[#allocation5 + $0x678] sm:$0xff]  ;;  %v5574_v61 = vcombine.low %v272_v25, %v280_v50  ;;  %v5576_v0 = vcombine.low %v273_v51, %v281_v52  ;;  %v5671_v25 = vcombine.high %v368_v45, %v376_v28  ;;  %v384_v51 = vld [vmem:[#allocation5 + $0x930] sm:$0xff] }
 0x1f2   :  { %v5593_v8 = vcombine.high %v289_v32, %v297_v60  ;;  %v392_v52 = vld [vmem:[#allocation5 + $0x970] sm:$0xff] }
 0x1f4   :  { %3793 = vmatpush1.bf16.msra.mxu0 %v5478_v12  ;;  %3879 = vmatpush1.bf16.msra.mxu1 %v5480_v13  ;;  %v305_v12 = vld [vmem:[#allocation5 + $0x6b8] sm:$0xff] }
 0x1f5   :  { %3794 = vmatprep.subr.bf16.mxu0 %v5495_v14  ;;  %3880 = vmatprep.subr.bf16.mxu1 %v5497_v15  ;;  %v313_v13 = vld [vmem:[#allocation5 + $0x6f8] sm:$0xff]  ;;  %v5590_v14 = vcombine.low %v288_v58, %v296_v59  ;;  %v5592_v15 = vcombine.low %v289_v32, %v297_v60  ;;  %v5687_v59 = vcombine.high %v384_v51, %v392_v52  ;;  %v400_v60 = vld [vmem:[#allocation5 + $0x9b0] sm:$0xff] }
 0x1f6   :  { %v5609_v17 = vcombine.high %v305_v12, %v313_v13 }
 0x1f8   :  { %3795 = vmatpush1.bf16.msra.mxu0 %v5494_v20  ;;  %3881 = vmatpush1.bf16.msra.mxu1 %v5496_v21  ;;  %v321_v20 = vld [vmem:[#allocation5 + $0x738] sm:$0xff] }
 0x1f9   :  { %3796 = vmatprep.subr.bf16.mxu0 %v5511_v22  ;;  %3882 = vmatprep.subr.bf16.mxu1 %v5513_v23  ;;  %v329_v21 = vld [vmem:[#allocation5 + $0x778] sm:$0xff]  ;;  %v5606_v22 = vcombine.low %v304_v9, %v312_v10  ;;  %v5608_v23 = vcombine.low %v305_v12, %v313_v13  ;;  %v5686_v9 = vcombine.low %v384_v51, %v392_v52 }
 0x1fa   :  { %v5625_v26 = vcombine.high %v321_v20, %v329_v21 }
 0x1fc   :  { %3797 = vmatpush1.bf16.msra.mxu0 %v5510_v30  ;;  %3883 = vmatpush1.bf16.msra.mxu1 %v5512_v31  ;;  %v337_v30 = vld [vmem:[#allocation5 + $0x7b8] sm:$0xff] }
 0x1fd   :  { %3798 = vmatprep.subr.bf16.mxu0 %v5527_v33  ;;  %3884 = vmatprep.subr.bf16.mxu1 %v5529_v34  ;;  %v345_v31 = vld [vmem:[#allocation5 + $0x7f8] sm:$0xff]  ;;  %v5622_v33 = vcombine.low %v320_v18, %v328_v19  ;;  %v5624_v34 = vcombine.low %v321_v20, %v329_v21 }
 0x1fe   :  { %v5641_v36 = vcombine.high %v337_v30, %v345_v31 }
 0x200   :  { %3799 = vmatpush1.bf16.msra.mxu0 %v5526_v40  ;;  %3885 = vmatpush1.bf16.msra.mxu1 %v5528_v41  ;;  %v353_v40 = vld [vmem:[#allocation5 + $0x838] sm:$0xff] }
 0x201   :  { %3800 = vmatprep.subr.bf16.mxu0 %v5543_v42  ;;  %3886 = vmatprep.subr.bf16.mxu1 %v5545_v43  ;;  %v361_v41 = vld [vmem:[#allocation5 + $0x878] sm:$0xff]  ;;  %v5638_v42 = vcombine.low %v336_v27, %v344_v29  ;;  %v5640_v43 = vcombine.low %v337_v30, %v345_v31  ;;  %v632_v30 = vsub.s32 6, %v6690_v57  ;;  %v628_v31 = vsub.s32 5, %v6690_v57 }
 0x202   :  { %v5657_v56 = vcombine.high %v353_v40, %v361_v41  ;;  %v441_v27 = vld [vmem:[#allocation5 + $0xaf8] sm:$0xff] }
 0x204   :  { %3801 = vmatpush1.bf16.msra.mxu0 %v5542_v46  ;;  %3887 = vmatpush1.bf16.msra.mxu1 %v5544_v47  ;;  %v369_v46 = vld [vmem:[#allocation5 + $0x8b8] sm:$0xff] }
 0x205   :  { %3802 = vmatprep.subr.bf16.mxu0 %v5559_v48  ;;  %3888 = vmatprep.subr.bf16.mxu1 %v5561_v49  ;;  %v377_v47 = vld [vmem:[#allocation5 + $0x8f8] sm:$0xff]  ;;  %v5654_v48 = vcombine.low %v352_v37, %v360_v39  ;;  %v5656_v49 = vcombine.low %v353_v40, %v361_v41  ;;  %v448_v37 = vld [vmem:[#allocation5 + $0xb30] sm:$0xff] }
 0x206   :  { %v5673_v50 = vcombine.high %v369_v46, %v377_v47  ;;  %v5672_v58 = vcombine.low %v369_v46, %v377_v47  ;;  %v456_v39 = vld [vmem:[#allocation5 + $0xb70] sm:$0xff]  ;;  %v449_v41 = vld [vmem:[#allocation5 + $0xb38] sm:$0xff] }
 0x207   :  { %v5751_v46 = vcombine.high %v448_v37, %v456_v39 }
 0x208   :  { %3803 = vmatpush1.bf16.msra.mxu0 %v5558_v53  ;;  %3889 = vmatpush1.bf16.msra.mxu1 %v5560_v38  ;;  %v6418_v53 = vld [vmem:[#allocation2] ss:$16 sps:$4 sm:$0xff]   ;;  %v385_v38 = vld [vmem:[#allocation5 + $0x938] sm:$0xff] }
 0x209   :  { %3804 = vmatprep.subr.bf16.mxu0 %v5575_v54  ;;  %3890 = vmatprep.subr.bf16.mxu1 %v5577_v55  ;;  %v393_v54 = vld [vmem:[#allocation5 + $0x978] sm:$0xff]  ;;  %v5670_v55 = vcombine.low %v368_v45, %v376_v28 }
 0x20a   :  { %v5689_v32 = vcombine.high %v385_v38, %v393_v54  ;;  %v5688_v10 = vcombine.low %v385_v38, %v393_v54  ;;  %v473_v38 = vld [vmem:[#allocation5 + $0xbf8] sm:$0xff] }
 0x20c   :  { %3805 = vmatpush1.bf16.msra.mxu0 %v5574_v61  ;;  %3891 = vmatpush1.bf16.msra.mxu1 %v5576_v0  ;;  %v408_v61 = vld [vmem:[#allocation5 + $0x9f0] sm:$0xff]  ;;  %v6419_v0 = vld [vmem:[#allocation2 + $0xc] ss:$16 sps:$4 sm:$0xff]  }
 0x20d   :  { %3806 = vmatprep.subr.bf16.mxu0 %v5591_v1  ;;  %3892 = vmatprep.subr.bf16.mxu1 %v5593_v8  ;;  %v401_v1 = vld [vmem:[#allocation5 + $0x9b8] sm:$0xff]  ;;  %v5703_v12 = vcombine.high %v400_v60, %v408_v61  ;;  %v5702_v18 = vcombine.low %v400_v60, %v408_v61 }
 0x20e   :  { %v409_v8 = vld [vmem:[#allocation5 + $0x9f8] sm:$0xff] }
 0x20f   :  { %v5705_v13 = vcombine.high %v401_v1, %v409_v8  ;;  %v5704_v19 = vcombine.low %v401_v1, %v409_v8 }
 0x210   :  { %3807 = vmatpush1.bf16.msra.mxu0 %v5590_v14  ;;  %3893 = vmatpush1.bf16.msra.mxu1 %v5592_v15  ;;  %v416_v14 = vld [vmem:[#allocation5 + $0xa30] sm:$0xff] }
 0x211   :  { %3808 = vmatprep.subr.bf16.mxu0 %v5607_v16  ;;  %3894 = vmatprep.subr.bf16.mxu1 %v5609_v17  ;;  %v424_v15 = vld [vmem:[#allocation5 + $0xa70] sm:$0xff]  ;;  %v417_v16 = vld [vmem:[#allocation5 + $0xa38] sm:$0xff] }
 0x212   :  { %v425_v17 = vld [vmem:[#allocation5 + $0xa78] sm:$0xff]  ;;  %v5719_v20 = vcombine.high %v416_v14, %v424_v15  ;;  %v5718_v29 = vcombine.low %v416_v14, %v424_v15  ;;  %v480_v15 = vld [vmem:[#allocation5 + $0xc30] sm:$0xff] }
 0x213   :  { %v5721_v21 = vcombine.high %v417_v16, %v425_v17 }
 0x214   :  { %3809 = vmatpush1.bf16.msra.mxu0 %v5606_v22  ;;  %3895 = vmatpush1.bf16.msra.mxu1 %v5608_v23  ;;  %v432_v22 = vld [vmem:[#allocation5 + $0xab0] sm:$0xff] }
 0x215   :  { %3810 = vmatprep.subr.bf16.mxu0 %v5623_v24  ;;  %3896 = vmatprep.subr.bf16.mxu1 %v5625_v26  ;;  %v440_v23 = vld [vmem:[#allocation5 + $0xaf0] sm:$0xff]  ;;  %v624_v24 = vsub.s32 4, %v6690_v57  ;;  %v433_v26 = vld [vmem:[#allocation5 + $0xab8] sm:$0xff] }
 0x216   :  { %v5736_v28 = vcombine.low %v433_v26, %v441_v27 }
 0x217   :  { %v625_v40 = vrot.slane %v6693_v3, %v624_v24 }
 0x218   :  { %3811 = vmatpush1.bf16.msra.mxu0 %v5622_v33  ;;  %3897 = vmatpush1.bf16.msra.mxu1 %v5624_v34  ;;  %v5720_v33 = vcombine.low %v417_v16, %v425_v17  ;;  %v636_v34 = vsub.s32 7, %v6690_v57  ;;  %v488_v16 = vld [vmem:[#allocation5 + $0xc70] sm:$0xff] }
 0x219   :  { %3812 = vmatprep.subr.bf16.mxu0 %v5639_v35  ;;  %3898 = vmatprep.subr.bf16.mxu1 %v5641_v36  ;;  %v5735_v35 = vcombine.high %v432_v22, %v440_v23  ;;  %v5737_v36 = vcombine.high %v433_v26, %v441_v27 }
 0x21a   :  { %v637_v45 = vrot.slane %v6693_v3, %v636_v34 }
 0x21c   :  { %3813 = vmatpush1.bf16.msra.mxu0 %v5638_v42  ;;  %3899 = vmatpush1.bf16.msra.mxu1 %v5640_v43  ;;  %v457_v42 = vld [vmem:[#allocation5 + $0xb78] sm:$0xff]  ;;  %v633_v43 = vrot.slane %v6693_v3, %v632_v30 }
 0x21d   :  { %3825 = vmatprep.subr.bf16.mxu0 %v5655_v44  ;;  %3911 = vmatprep.subr.bf16.mxu1 %v5657_v56  ;;  %v629_v44 = vrot.slane %v6693_v3, %v628_v31  ;;  %v5734_v56 = vcombine.low %v432_v22, %v440_v23  ;;  %v5752_v3 = vcombine.low %v449_v41, %v457_v42  ;;  %v489_v22 = vld [vmem:[#allocation5 + $0xc78] sm:$0xff] }
 0x21f   :  { %3815 = vmatmul.mubr.bf16.vlgmr.msra.gmra.mrb[12].mxu0 %v6418_v53  ;;  %3901 = vmatmul.mubr.bf16.vlgmr.msra.gmra.mrb[12].mxu1 %v6418_v53  ;;  %v465_v53 = vld [vmem:[#allocation5 + $0xbb8] sm:$0xff] }
 0x220   :  { %3826 = vmatpush1.bf16.msra.mxu0 %v5654_v48  ;;  %3912 = vmatpush1.bf16.msra.mxu1 %v5656_v49  ;;  %v5753_v48 = vcombine.high %v449_v41, %v457_v42  ;;  %v464_v49 = vld [vmem:[#allocation5 + $0xbb0] sm:$0xff]  ;;  %v5769_v14 = vcombine.high %v465_v53, %v473_v38 }
 0x221   :  { %3827 = vmatprep.subr.bf16.mxu0 %v5671_v25  ;;  %3913 = vmatprep.subr.bf16.mxu1 %v5673_v50  ;;  %v472_v25 = vld [vmem:[#allocation5 + $0xbf0] sm:$0xff] }
 0x222   :  { %3857 = vmatprep.mubr.bf16.mxu0 %v6419_v0  ;;  %3943 = vmatprep.mubr.bf16.mxu1 %v6419_v0  ;;  %v5767_v8 = vcombine.high %v464_v49, %v472_v25  ;;  %v496_v42 = vld [vmem:[#allocation5 + $0xcb0] sm:$0xff] }
 0x224   :  { %3828 = vmatpush1.bf16.msra.mxu0 %v5670_v55  ;;  %3914 = vmatpush1.bf16.msra.mxu1 %v5672_v58 }
 0x225   :  { %3829 = vmatprep.subr.bf16.mxu0 %v5687_v59  ;;  %3915 = vmatprep.subr.bf16.mxu1 %v5689_v32  ;;  %v5750_v32 = vcombine.low %v448_v37, %v456_v39  ;;  %v5783_v37 = vcombine.high %v480_v15, %v488_v16 }
 0x228   :  { %3830 = vmatpush1.bf16.msra.mxu0 %v5686_v9  ;;  %3916 = vmatpush1.bf16.msra.mxu1 %v5688_v10 }
 0x229   :  { %3831 = vmatprep.subr.bf16.mxu0 %v5703_v12  ;;  %3917 = vmatprep.subr.bf16.mxu1 %v5705_v13  ;;  %v5766_v13 = vcombine.low %v464_v49, %v472_v25  ;;  %v512_v49 = vld [vmem:[#allocation5 + $0xd30] sm:$0xff] }
 0x22a   :  { %v520_v25 = vld [vmem:[#allocation5 + $0xd70] sm:$0xff] }
 0x22c   :  { %3832 = vmatpush1.bf16.msra.mxu0 %v5702_v18  ;;  %3918 = vmatpush1.bf16.msra.mxu1 %v5704_v19 }
 0x22d   :  { %3833 = vmatprep.subr.bf16.mxu0 %v5719_v20  ;;  %3919 = vmatprep.subr.bf16.mxu1 %v5721_v21  ;;  %v5768_v20 = vcombine.low %v465_v53, %v473_v38  ;;  %v481_v21 = vld [vmem:[#allocation5 + $0xc38] sm:$0xff]  ;;  %v5815_v38 = vcombine.high %v512_v49, %v520_v25 }
 0x22e   :  { %v5785_v41 = vcombine.high %v481_v21, %v489_v22 }
 0x230   :  { %3834 = vmatpush1.bf16.msra.mxu0 %v5718_v29  ;;  %3920 = vmatpush1.bf16.msra.mxu1 %v5720_v33 }
 0x231   :  { %3835 = vmatprep.subr.bf16.mxu0 %v5735_v35  ;;  %3921 = vmatprep.subr.bf16.mxu1 %v5737_v36 }
 0x232   :  { %v3515_v47 = vpop.f32.mrb[4].mxu0  ;;  %v3601_v51 = vpop.f32.mrb[4].mxu1 }
 0x233   :  { %v6211_v50 = vadd.f32 %v3515_v47, %v625_v40  ;;  %v3517_v52 = vpop.f32.mrb[5].mxu0  ;;  %v6215_v54 = vadd.f32 %v3601_v51, %v633_v43  ;;  %v3603_v58 = vpop.f32.mrb[5].mxu1  ;;  %v521_v51 = vld [vmem:[#allocation5 + $0xd78] sm:$0xff] }
 0x234   :  { %v6212_v55 = vadd.f32 %v3517_v52, %v629_v44  ;;  %v3519_v59 = vpop.f32.mrb[6].mxu0  ;;  %3836 = vmatpush1.bf16.msra.mxu0 %v5734_v56  ;;  %v6216_v60 = vadd.f32 %v3603_v58, %v637_v45  ;;  %v3605_v0 = vpop.f32.mrb[6].mxu1  ;;  %3922 = vmatpush1.bf16.msra.mxu1 %v5736_v28  ;;  %v497_v56 = vld [vmem:[#allocation5 + $0xcb8] sm:$0xff]  ;;  %v5782_v28 = vcombine.low %v480_v15, %v488_v16  ;;  %v536_v58 = vld [vmem:[#allocation5 + $0xdf0] sm:$0xff] }
 0x235   :  { %v6213_v61 = vadd.f32 %v3519_v59, %v625_v40  ;;  %v3521_v1 = vpop.f32.mrb[7].mxu0  ;;  %3837 = vmatprep.subr.bf16.mxu0 %v5751_v46  ;;  %v6217_v9 = vadd.f32 %v3605_v0, %v633_v43  ;;  %v3607_v12 = vpop.f32.mrb[7].mxu1  ;;  %3923 = vmatprep.subr.bf16.mxu1 %v5753_v48  ;;  %v3958_v17 = vmax.f32 %v6211_v50, 0.0  ;;  %v3960_v23 = vmax.f32 %v6215_v54, 0.0  ;;  %v504_v43 = vld [vmem:[#allocation5 + $0xcf0] sm:$0xff]  ;;  %v513_v50 = vld [vmem:[#allocation5 + $0xd38] sm:$0xff] }
 0x236   :  { %v6214_v10 = vadd.f32 %v3521_v1, %v629_v44  ;;  %v6218_v19 = vadd.f32 %v3607_v12, %v637_v45  ;;  %v3959_v26 = vmax.f32 %v6212_v55, 0.0  ;;  %v3961_v33 = vmax.f32 %v6216_v60, 0.0  ;;  %v505_v45 = vld [vmem:[#allocation5 + $0xcf8] sm:$0xff]  ;;  %v528_v55 = vld [vmem:[#allocation5 + $0xdb0] sm:$0xff] }
 0x237   :  { %v3974_v18 = vmax.f32 %v6213_v61, 0.0  ;;  %v3976_v27 = vmax.f32 %v6217_v9, 0.0  ;;  %v5784_v46 = vcombine.low %v481_v21, %v489_v22  ;;  %v5799_v47 = vcombine.high %v496_v42, %v504_v43  ;;  %v529_v59 = vld [vmem:[#allocation5 + $0xdb8] sm:$0xff]  ;;  %v544_v1 = vld [vmem:[#allocation5 + $0xe30] sm:$0xff] }
 0x238   :  { %v3975_v29 = vmax.f32 %v6214_v10, 0.0  ;;  %3838 = vmatpush1.bf16.msra.mxu0 %v5750_v32  ;;  %v3977_v36 = vmax.f32 %v6218_v19, 0.0  ;;  %3924 = vmatpush1.bf16.msra.mxu1 %v5752_v3  ;;  %v5801_v48 = vcombine.high %v497_v56, %v505_v45  ;;  %v5798_v52 = vcombine.low %v496_v42, %v504_v43  ;;  %v537_v32 = vld [vmem:[#allocation5 + $0xdf8] sm:$0xff]  ;;  %v560_v16 = vld [vmem:[#allocation5 + $0xeb0] sm:$0xff] }
 0x239   :  { %v6738_v35 = vpack.c.bf16 %v3974_v18, %v3958_v17  ;;  %3839 = vmatprep.subr.bf16.mxu0 %v5767_v8  ;;  %v6740_v39 = vpack.c.bf16 %v3976_v27, %v3960_v23  ;;  %3925 = vmatprep.subr.bf16.mxu1 %v5769_v14  ;;  %v5800_v53 = vcombine.low %v497_v56, %v505_v45  ;;  %v552_v8 = vld [vmem:[#allocation5 + $0xe70] sm:$0xff]  ;;  %v545_v9 = vld [vmem:[#allocation5 + $0xe38] sm:$0xff] }
 0x23a   :  { %v6742_v40 = vpack.c.bf16 %v3975_v29, %v3959_v26  ;;  %v6744_v44 = vpack.c.bf16 %v3977_v36, %v3961_v33  ;;  %v5817_v54 = vcombine.high %v513_v50, %v521_v51  ;;  %v5814_v3 = vcombine.low %v512_v49, %v520_v25  ;;  %v553_v10 = vld [vmem:[#allocation5 + $0xe78] sm:$0xff]  ;;  %v568_v17 = vld [vmem:[#allocation5 + $0xef0] sm:$0xff] }
 0x23b   :  { %v5816_v60 = vcombine.low %v513_v50, %v521_v51  ;;  %v5831_v61 = vcombine.high %v528_v55, %v536_v58  ;;  %v5833_v0 = vcombine.high %v529_v59, %v537_v32  ;;  %v5830_v12 = vcombine.low %v528_v55, %v536_v58  ;;  %v561_v18 = vld [vmem:[#allocation5 + $0xeb8] sm:$0xff]  ;;  %v576_v26 = vld [vmem:[#allocation5 + $0xf30] sm:$0xff] }
 0x23c   :  { %3840 = vmatpush1.bf16.msra.mxu0 %v5766_v13  ;;  %3926 = vmatpush1.bf16.msra.mxu1 %v5768_v20  ;;  %v5832_v13 = vcombine.low %v529_v59, %v537_v32  ;;  %v5847_v14 = vcombine.high %v544_v1, %v552_v8  ;;  %v5849_v15 = vcombine.high %v545_v9, %v553_v10  ;;  %v569_v19 = vld [vmem:[#allocation5 + $0xef8] sm:$0xff]  ;;  %v584_v27 = vld [vmem:[#allocation5 + $0xf70] sm:$0xff] }
 0x23d   :  { %3841 = vmatprep.subr.bf16.mxu0 %v5783_v37  ;;  %3927 = vmatprep.subr.bf16.mxu1 %v5785_v41  ;;  %v5846_v20 = vcombine.low %v544_v1, %v552_v8  ;;  %v5848_v21 = vcombine.low %v545_v9, %v553_v10  ;;  %v5863_v22 = vcombine.high %v560_v16, %v568_v17  ;;  %v577_v29 = vld [vmem:[#allocation5 + $0xf38] sm:$0xff]  ;;  %v592_v43 = vld [vmem:[#allocation5 + $0xfb0] sm:$0xff]  ;;  %v6298_v1 = vld [vmem:[#allocation8 + $0x58] sm:$0xff]  }
 0x23e   :  { %v5865_v23 = vcombine.high %v561_v18, %v569_v19  ;;  %v585_v33 = vld [vmem:[#allocation5 + $0xf78] sm:$0xff]  ;;  %v5862_v36 = vcombine.low %v560_v16, %v568_v17  ;;  %v5864_v37 = vcombine.low %v561_v18, %v569_v19  ;;  %v5879_v41 = vcombine.high %v576_v26, %v584_v27  ;;  %v600_v56 = vld [vmem:[#allocation5 + $0xff0] sm:$0xff]  ;;  %v6299_v8 = vld [vmem:[#allocation8 + $0xd8] sm:$0xff]  }
 0x23f   :  { %v5881_v42 = vcombine.high %v577_v29, %v585_v33  ;;  %v593_v45 = vld [vmem:[#allocation5 + $0xfb8] sm:$0xff]  ;;  %v5894_v25 = vcombine.low %v592_v43, %v600_v56  ;;  %v6286_v51 = vld [vmem:[#allocation8 + $0x40] sm:$0xff]   ;;  %v6300_v9 = vld [vmem:[#allocation8 + $0x18] sm:$0xff]  }
 0x240   :  { %3842 = vmatpush1.bf16.msra.mxu0 %v5782_v28  ;;  %3928 = vmatpush1.bf16.msra.mxu1 %v5784_v46  ;;  %v601_v28 = vld [vmem:[#allocation5 + $0xff8] sm:$0xff]  ;;  %v5878_v46 = vcombine.low %v576_v26, %v584_v27  ;;  %v6302_v10 = vld [vmem:[#allocation8 + $0x60] sm:$0xff]   ;;  %v6310_v18 = vld [vmem:[#allocation8 + $0x70] sm:$0xff]  }
 0x241   :  { %3843 = vmatprep.subr.bf16.mxu0 %v5799_v47  ;;  %3929 = vmatprep.subr.bf16.mxu1 %v5801_v48  ;;  %v5880_v47 = vcombine.low %v577_v29, %v585_v33  ;;  %v5895_v48 = vcombine.high %v592_v43, %v600_v56  ;;  %v5897_v49 = vcombine.high %v593_v45, %v601_v28  ;;  %v6420_v55 = vld [vmem:[#allocation2 + $0x8] ss:$16 sps:$4 sm:$0xff]   ;;  %v6311_v19 = vld [vmem:[#allocation8 + $0xf0] sm:$0xff]   ;;  %v6318_v29 = vld [vmem:[#allocation8 + $0x140] sm:$0xff]  }
 0x242   :  { %v5896_v50 = vcombine.low %v593_v45, %v601_v28  ;;  %v6291_v58 = vld [vmem:[#allocation8 + $0xc8] sm:$0xff]   ;;  %v6316_v26 = vld [vmem:[#allocation8 + $0x38] sm:$0xff]   ;;  %v6319_v33 = vld [vmem:[#allocation8 + $0x1c0] sm:$0xff]  }
 0x243   :  { %v6292_v59 = vld [vmem:[#allocation8 + $0x8] sm:$0xff]   ;;  %v6317_v27 = vld [vmem:[#allocation8 + $0xb8] sm:$0xff]   ;;  %v6326_v45 = vld [vmem:[#allocation8 + $0x150] sm:$0xff]  }
 0x244   :  { %3844 = vmatpush1.bf16.msra.mxu0 %v5798_v52  ;;  %3930 = vmatpush1.bf16.msra.mxu1 %v5800_v53  ;;  %v6287_v52 = vld [vmem:[#allocation8 + $0xc0] sm:$0xff]   ;;  %v6293_v32 = vld [vmem:[#allocation8 + $0x88] sm:$0xff]   ;;  %v6327_v28 = vld [vmem:[#allocation8 + $0x1d0] sm:$0xff]  }
 0x245   :  { %3845 = vmatprep.subr.bf16.mxu0 %v5815_v38  ;;  %3931 = vmatprep.subr.bf16.mxu1 %v5817_v54  ;;  %v6288_v53 = vld [vmem:[#allocation8] sm:$0xff]   ;;  %v6290_v54 = vld [vmem:[#allocation8 + $0x48] sm:$0xff]  }
 0x246   :  { %v6289_v38 = vld [vmem:[#allocation8 + $0x80] sm:$0xff]   ;;  %v6308_v16 = vld [vmem:[#allocation8 + $0x28] sm:$0xff]  }
 0x247   :  { %v6309_v17 = vld [vmem:[#allocation8 + $0xa8] sm:$0xff]  }
 0x248   :  { %3846 = vmatpush1.bf16.msra.mxu0 %v5814_v3  ;;  %3932 = vmatpush1.bf16.msra.mxu1 %v5816_v60  ;;  %v6294_v3 = vld [vmem:[#allocation8 + $0x50] sm:$0xff]   ;;  %v6324_v43 = vld [vmem:[#allocation8 + $0x108] sm:$0xff]  }
 0x249   :  { %3847 = vmatprep.subr.bf16.mxu0 %v5831_v61  ;;  %3933 = vmatprep.subr.bf16.mxu1 %v5833_v0  ;;  %v6295_v60 = vld [vmem:[#allocation8 + $0xd0] sm:$0xff]   ;;  %v6325_v56 = vld [vmem:[#allocation8 + $0x188] sm:$0xff]  }
 0x24a   :  { %v6296_v61 = vld [vmem:[#allocation8 + $0x10] sm:$0xff]  }
 0x24b   :  { %v6297_v0 = vld [vmem:[#allocation8 + $0x90] sm:$0xff]  }
 0x24c   :  { %3848 = vmatpush1.bf16.msra.mxu0 %v5830_v12  ;;  %3934 = vmatpush1.bf16.msra.mxu1 %v5832_v13  ;;  %v6303_v12 = vld [vmem:[#allocation8 + $0xe0] sm:$0xff]  }
 0x24d   :  { %3849 = vmatprep.subr.bf16.mxu0 %v5847_v14  ;;  %3935 = vmatprep.subr.bf16.mxu1 %v5849_v15  ;;  %v6305_v13 = vld [vmem:[#allocation8 + $0xa0] sm:$0xff]   ;;  %v6306_v14 = vld [vmem:[#allocation8 + $0x68] sm:$0xff]  }
 0x24e   :  { %v6307_v15 = vld [vmem:[#allocation8 + $0xe8] sm:$0xff]  }
 0x250   :  { %3850 = vmatpush1.bf16.msra.mxu0 %v5846_v20  ;;  %3936 = vmatpush1.bf16.msra.mxu1 %v5848_v21  ;;  %v6312_v20 = vld [vmem:[#allocation8 + $0x30] sm:$0xff]  }
 0x251   :  { %3851 = vmatprep.subr.bf16.mxu0 %v5863_v22  ;;  %3937 = vmatprep.subr.bf16.mxu1 %v5865_v23  ;;  %v6313_v21 = vld [vmem:[#allocation8 + $0xb0] sm:$0xff]   ;;  %v6314_v22 = vld [vmem:[#allocation8 + $0x78] sm:$0xff]  }
 0x252   :  { %v6315_v23 = vld [vmem:[#allocation8 + $0xf8] sm:$0xff]  }
 0x254   :  { %3852 = vmatpush1.bf16.msra.mxu0 %v5862_v36  ;;  %3938 = vmatpush1.bf16.msra.mxu1 %v5864_v37  ;;  %v6320_v36 = vld [vmem:[#allocation8 + $0x100] sm:$0xff]  }
 0x255   :  { %3853 = vmatprep.subr.bf16.mxu0 %v5879_v41  ;;  %3939 = vmatprep.subr.bf16.mxu1 %v5881_v42  ;;  %v6321_v37 = vld [vmem:[#allocation8 + $0x180] sm:$0xff]   ;;  %v6322_v41 = vld [vmem:[#allocation8 + $0x148] sm:$0xff]  }
 0x256   :  { %v6323_v42 = vld [vmem:[#allocation8 + $0x1c8] sm:$0xff]  }
 0x258   :  { %3854 = vmatpush1.bf16.msra.mxu0 %v5878_v46  ;;  %3940 = vmatpush1.bf16.msra.mxu1 %v5880_v47  ;;  %v6328_v46 = vld [vmem:[#allocation8 + $0x110] sm:$0xff]   ;;  %v6330_v47 = vld [vmem:[#allocation8 + $0x158] sm:$0xff]  }
 0x259   :  { %3855 = vmatprep.subr.bf16.mxu0 %v5895_v48  ;;  %3941 = vmatprep.subr.bf16.mxu1 %v5897_v49  ;;  %v6332_v48 = vld [vmem:[#allocation8 + $0x118] sm:$0xff]   ;;  %v6334_v49 = vld [vmem:[#allocation8 + $0x160] sm:$0xff]  }
 0x25c   :  { %3856 = vmatpush1.bf16.msra.mxu0 %v5894_v25  ;;  %3942 = vmatpush1.bf16.msra.mxu1 %v5896_v50  ;;  %v6335_v25 = vld [vmem:[#allocation8 + $0x1e0] sm:$0xff]  }
 0x25d   :  { %6027 = vmatprep.subr.bf16.mxu0 %v6286_v51  ;;  %6049 = vmatprep.subr.bf16.mxu1 %v6287_v52  ;;  %v6337_v50 = vld [vmem:[#allocation8 + $0x1a0] sm:$0xff]   ;;  %v6338_v51 = vld [vmem:[#allocation8 + $0x168] sm:$0xff]  }
 0x25e   :  { %v6339_v52 = vld [vmem:[#allocation8 + $0x1e8] sm:$0xff]  }
 0x25f   :  { %3858 = vmatmul.mubr.bf16.vlgmr.msra.gmra.mrb[12].mxu0 %v6420_v55  ;;  %3944 = vmatmul.mubr.bf16.vlgmr.msra.gmra.mrb[12].mxu1 %v6420_v55  ;;  %v6343_v55 = vld [vmem:[#allocation8 + $0x1f0] sm:$0xff]  }
 0x260   :  { %6028 = vmatpush3.bf16.msra.mxu0 %v6288_v53  ;;  %5065 = vmatprep.mubr.bf16.mxu0 %v6714_v6  ;;  %v6301_v6 = vld [vmem:[#allocation8 + $0x98] sm:$0xff]   ;;  %v6340_v53 = vld [vmem:[#allocation8 + $0x128] sm:$0xff]  }
 0x261   :  { %6050 = vmatpush3.bf16.msra.mxu1 %v6289_v38  ;;  %5106 = vmatprep.mubr.bf16.mxu1 %v6716_v11  ;;  %v6304_v11 = vld [vmem:[#allocation8 + $0x20] sm:$0xff]   ;;  %v6341_v38 = vld [vmem:[#allocation8 + $0x1a8] sm:$0xff]  }
 0x262   :  { %6029 = vmatprep.subr.bf16.mxu0 %v6290_v54  ;;  %6051 = vmatprep.subr.bf16.mxu1 %v6291_v58  ;;  %v6342_v54 = vld [vmem:[#allocation8 + $0x170] sm:$0xff]  }
 0x263   :  { %v6344_v58 = vld [vmem:[#allocation8 + $0x130] sm:$0xff]  }
 0x264   :  { %6030 = vmatpush3.bf16.msra.mxu0 %v6292_v59  ;;  %v6345_v59 = vld [vmem:[#allocation8 + $0x1b0] sm:$0xff]  }
 0x265   :  { %6052 = vmatpush3.bf16.msra.mxu1 %v6293_v32  ;;  %6031 = vmatprep.subr.bf16.mxu0 %v6294_v3  ;;  %v6346_v32 = vld [vmem:[#allocation8 + $0x178] sm:$0xff]  }
 0x266   :  { %6053 = vmatprep.subr.bf16.mxu1 %v6295_v60  ;;  %v6347_v3 = vld [vmem:[#allocation8 + $0x1f8] sm:$0xff]  }
 0x267   :  { %v6348_v60 = vld [vmem:[#allocation8 + $0x138] sm:$0xff]  }
 0x268   :  { %6032 = vmatpush3.bf16.msra.mxu0 %v6296_v61  ;;  %v6349_v61 = vld [vmem:[#allocation8 + $0x1b8] sm:$0xff]  }
 0x269   :  { %6054 = vmatpush3.bf16.msra.mxu1 %v6297_v0  ;;  %6033 = vmatprep.subr.bf16.mxu0 %v6298_v1  ;;  %v6350_v0 = vld [vmem:[#allocation8 + $0x240] sm:$0xff]  }
 0x26a   :  { %6055 = vmatprep.subr.bf16.mxu1 %v6299_v8  ;;  %v6351_v1 = vld [vmem:[#allocation8 + $0x2c0] sm:$0xff]  }
 0x26b   :  { %v6352_v8 = vld [vmem:[#allocation8 + $0x200] sm:$0xff]  }
 0x26c   :  { %6034 = vmatpush3.bf16.msra.mxu0 %v6300_v9  ;;  %v6353_v9 = vld [vmem:[#allocation8 + $0x280] sm:$0xff]  }
 0x26d   :  { %6056 = vmatpush3.bf16.msra.mxu1 %v6301_v6  ;;  %6035 = vmatprep.subr.bf16.mxu0 %v6302_v10  ;;  %v6354_v6 = vld [vmem:[#allocation8 + $0x248] sm:$0xff]  }
 0x26e   :  { %6057 = vmatprep.subr.bf16.mxu1 %v6303_v12  ;;  %v6355_v10 = vld [vmem:[#allocation8 + $0x2c8] sm:$0xff]  }
 0x26f   :  { %v6356_v12 = vld [vmem:[#allocation8 + $0x208] sm:$0xff]  }
 0x270   :  { %6036 = vmatpush3.bf16.msra.mxu0 %v6304_v11  ;;  %v6357_v11 = vld [vmem:[#allocation8 + $0x288] sm:$0xff]  }
 0x271   :  { %6058 = vmatpush3.bf16.msra.mxu1 %v6305_v13  ;;  %6037 = vmatprep.subr.bf16.mxu0 %v6306_v14  ;;  %v6358_v13 = vld [vmem:[#allocation8 + $0x250] sm:$0xff]  }
 0x272   :  { %6059 = vmatprep.subr.bf16.mxu1 %v6307_v15  ;;  %v6359_v14 = vld [vmem:[#allocation8 + $0x2d0] sm:$0xff]  }
 0x273   :  { %v6360_v15 = vld [vmem:[#allocation8 + $0x210] sm:$0xff]  }
 0x274   :  { %6038 = vmatpush3.bf16.msra.mxu0 %v6308_v16  ;;  %v6361_v16 = vld [vmem:[#allocation8 + $0x290] sm:$0xff]  }
 0x275   :  { %6060 = vmatpush3.bf16.msra.mxu1 %v6309_v17  ;;  %6039 = vmatprep.subr.bf16.mxu0 %v6310_v18  ;;  %v6362_v17 = vld [vmem:[#allocation8 + $0x258] sm:$0xff]  }
 0x276   :  { %6061 = vmatprep.subr.bf16.mxu1 %v6311_v19  ;;  %v6363_v18 = vld [vmem:[#allocation8 + $0x2d8] sm:$0xff]   ;;  %v6366_v19 = vld [vmem:[#allocation8 + $0x260] sm:$0xff]  }
 0x278   :  { %6040 = vmatpush3.bf16.msra.mxu0 %v6312_v20  ;;  %v6367_v20 = vld [vmem:[#allocation8 + $0x2e0] sm:$0xff]  }
 0x279   :  { %6062 = vmatpush3.bf16.msra.mxu1 %v6313_v21  ;;  %6041 = vmatprep.subr.bf16.mxu0 %v6314_v22  ;;  %v6368_v21 = vld [vmem:[#allocation8 + $0x220] sm:$0xff]   ;;  %v6754_v22 = vld [vmem:[#allocation7 + $0x8] sm:$0xff] }
 0x27a   :  { %6063 = vmatprep.subr.bf16.mxu1 %v6315_v23  ;;  %v6369_v23 = vld [vmem:[#allocation8 + $0x2a0] sm:$0xff]  }
 0x27c   :  { %6042 = vmatpush3.bf16.msra.mxu0 %v6316_v26  ;;  %v6370_v26 = vld [vmem:[#allocation8 + $0x268] sm:$0xff]  }
 0x27d   :  { %6064 = vmatpush3.bf16.msra.mxu1 %v6317_v27  ;;  %6071 = vmatprep.subr.bf16.mxu0 %v6318_v29  ;;  %v6371_v27 = vld [vmem:[#allocation8 + $0x2e8] sm:$0xff]   ;;  %v641_v29 = vrot.slane %v6754_v22, %v608_v63  ;;  %v6375_v63 = vld [vmem:[#allocation8 + $0x2f0] sm:$0xff]  }
 0x27e   :  { %6093 = vmatprep.subr.bf16.mxu1 %v6319_v33  ;;  %v649_v33 = vrot.slane %v6754_v22, %v616_v4 }
 0x27f   :  { %5066 = vmatmul.mubr.bf16.vlgmr.msra.gmra.mrb[16].mxu0 %v6710_v62  ;;  %v6329_v62 = vld [vmem:[#allocation8 + $0x190] sm:$0xff]  }
 0x280   :  { %5107 = vmatmul.mubr.bf16.vlgmr.msra.gmra.mrb[16].mxu1 %v6712_v2  ;;  %6072 = vmatpush3.bf16.msra.mxu0 %v6320_v36  ;;  %v6331_v2 = vld [vmem:[#allocation8 + $0x1d8] sm:$0xff]   ;;  %v645_v36 = vrot.slane %v6754_v22, %v612_v5  ;;  %v6376_v5 = vld [vmem:[#allocation8 + $0x230] sm:$0xff]  }
 0x281   :  { %5147 = vmatprep.mubr.bf16.mxu0 %v6742_v40  ;;  %6094 = vmatpush3.bf16.msra.mxu1 %v6321_v37  ;;  %v6333_v40 = vld [vmem:[#allocation8 + $0x198] sm:$0xff]   ;;  %v6372_v37 = vld [vmem:[#allocation8 + $0x228] sm:$0xff]  }
 0x282   :  { %5188 = vmatprep.mubr.bf16.mxu1 %v6744_v44  ;;  %6073 = vmatprep.subr.bf16.mxu0 %v6322_v41  ;;  %v6336_v44 = vld [vmem:[#allocation8 + $0x120] sm:$0xff]   ;;  %v653_v41 = vrot.slane %v6754_v22, %v620_v7 }
 0x283   :  { %6095 = vmatprep.subr.bf16.mxu1 %v6323_v42  ;;  %v6373_v42 = vld [vmem:[#allocation8 + $0x2a8] sm:$0xff]  }
 0x284   :  { %6074 = vmatpush3.bf16.msra.mxu0 %v6324_v43  ;;  %v6374_v43 = vld [vmem:[#allocation8 + $0x270] sm:$0xff]  }
 0x285   :  { %6096 = vmatpush3.bf16.msra.mxu1 %v6325_v56  ;;  %6075 = vmatprep.subr.bf16.mxu0 %v6326_v45 }
 0x286   :  { %6097 = vmatprep.subr.bf16.mxu1 %v6327_v28 }
 0x288   :  { %6076 = vmatpush3.bf16.msra.mxu0 %v6328_v46 }
 0x289   :  { %6098 = vmatpush3.bf16.msra.mxu1 %v6329_v62  ;;  %6077 = vmatprep.subr.bf16.mxu0 %v6330_v47 }
 0x28a   :  { %6099 = vmatprep.subr.bf16.mxu1 %v6331_v2 }
 0x28c   :  { %6078 = vmatpush3.bf16.msra.mxu0 %v6332_v48 }
 0x28d   :  { %6100 = vmatpush3.bf16.msra.mxu1 %v6333_v40  ;;  %6079 = vmatprep.subr.bf16.mxu0 %v6334_v49 }
 0x28e   :  { %6101 = vmatprep.subr.bf16.mxu1 %v6335_v25  ;;  %v6377_v25 = vld [vmem:[#allocation8 + $0x2b0] sm:$0xff]  }
 0x290   :  { %6080 = vmatpush3.bf16.msra.mxu0 %v6336_v44  ;;  %v6378_v44 = vld [vmem:[#allocation8 + $0x278] sm:$0xff]  }
 0x291   :  { %6102 = vmatpush3.bf16.msra.mxu1 %v6337_v50  ;;  %6081 = vmatprep.subr.bf16.mxu0 %v6338_v51 }
 0x292   :  { %6103 = vmatprep.subr.bf16.mxu1 %v6339_v52 }
 0x294   :  { %6082 = vmatpush3.bf16.msra.mxu0 %v6340_v53  ;;  %v6379_v53 = vld [vmem:[#allocation8 + $0x2f8] sm:$0xff]  }
 0x295   :  { %6104 = vmatpush3.bf16.msra.mxu1 %v6341_v38  ;;  %6083 = vmatprep.subr.bf16.mxu0 %v6342_v54 }
 0x296   :  { %6105 = vmatprep.subr.bf16.mxu1 %v6343_v55 }
 0x298   :  { %6084 = vmatpush3.bf16.msra.mxu0 %v6344_v58 }
 0x299   :  { %6106 = vmatpush3.bf16.msra.mxu1 %v6345_v59  ;;  %6085 = vmatprep.subr.bf16.mxu0 %v6346_v32 }
 0x29a   :  { %6107 = vmatprep.subr.bf16.mxu1 %v6347_v3 }
 0x29c   :  { %6086 = vmatpush3.bf16.msra.mxu0 %v6348_v60  ;;  %v6380_v60 = vld [vmem:[#allocation8 + $0x238] sm:$0xff]  }
 0x29d   :  { %6108 = vmatpush3.bf16.msra.mxu1 %v6349_v61  ;;  %6115 = vmatprep.subr.bf16.mxu0 %v6350_v0 }
 0x29e   :  { %6137 = vmatprep.subr.bf16.mxu1 %v6351_v1 }
 0x29f   :  { %5148 = vmatmul.mubr.bf16.vlgmr.msra.gmra.mrb[20].mxu0 %v6738_v35  ;;  %v6364_v35 = vld [vmem:[#allocation8 + $0x218] sm:$0xff]  }
 0x2a0   :  { %5189 = vmatmul.mubr.bf16.vlgmr.msra.gmra.mrb[20].mxu1 %v6740_v39  ;;  %6116 = vmatpush3.bf16.msra.mxu0 %v6352_v8  ;;  %v6365_v39 = vld [vmem:[#allocation8 + $0x298] sm:$0xff]  }
 0x2a1   :  { %6138 = vmatpush3.bf16.msra.mxu1 %v6353_v9  ;;  %6117 = vmatprep.subr.bf16.mxu0 %v6354_v6  ;;  %v6381_v8 = vld [vmem:[#allocation8 + $0x2b8] sm:$0xff]  }
 0x2a2   :  { %6139 = vmatprep.subr.bf16.mxu1 %v6355_v10  ;;  %v6382_v10 = vld [vmem:[#allocation8 + $0x340] sm:$0xff]  }
 0x2a4   :  { %6118 = vmatpush3.bf16.msra.mxu0 %v6356_v12  ;;  %v6383_v12 = vld [vmem:[#allocation8 + $0x3c0] sm:$0xff]  }
 0x2a5   :  { %6140 = vmatpush3.bf16.msra.mxu1 %v6357_v11  ;;  %6119 = vmatprep.subr.bf16.mxu0 %v6358_v13  ;;  %v6384_v13 = vld [vmem:[#allocation8 + $0x300] sm:$0xff]  }
 0x2a6   :  { %6141 = vmatprep.subr.bf16.mxu1 %v6359_v14  ;;  %v6385_v14 = vld [vmem:[#allocation8 + $0x380] sm:$0xff]  }
 0x2a8   :  { %6120 = vmatpush3.bf16.msra.mxu0 %v6360_v15  ;;  %v6386_v15 = vld [vmem:[#allocation8 + $0x348] sm:$0xff]  }
 0x2a9   :  { %6142 = vmatpush3.bf16.msra.mxu1 %v6361_v16  ;;  %6121 = vmatprep.subr.bf16.mxu0 %v6362_v17  ;;  %v6387_v16 = vld [vmem:[#allocation8 + $0x3c8] sm:$0xff]  }
 0x2aa   :  { %6143 = vmatprep.subr.bf16.mxu1 %v6363_v18  ;;  %v6388_v17 = vld [vmem:[#allocation8 + $0x308] sm:$0xff]  }
 0x2ab   :  { %v6389_v18 = vld [vmem:[#allocation8 + $0x388] sm:$0xff]  }
 0x2ac   :  { %6122 = vmatpush3.bf16.msra.mxu0 %v6364_v35  ;;  %v6390_v35 = vld [vmem:[#allocation8 + $0x350] sm:$0xff]  }
 0x2ad   :  { %6144 = vmatpush3.bf16.msra.mxu1 %v6365_v39  ;;  %6123 = vmatprep.subr.bf16.mxu0 %v6366_v19  ;;  %v6391_v39 = vld [vmem:[#allocation8 + $0x3d0] sm:$0xff]  }
 0x2ae   :  { %6145 = vmatprep.subr.bf16.mxu1 %v6367_v20  ;;  %v6392_v19 = vld [vmem:[#allocation8 + $0x310] sm:$0xff]  }
 0x2af   :  { %v6393_v20 = vld [vmem:[#allocation8 + $0x390] sm:$0xff]  }
 0x2b0   :  { %6124 = vmatpush3.bf16.msra.mxu0 %v6368_v21  ;;  %v6394_v21 = vld [vmem:[#allocation8 + $0x358] sm:$0xff]  }
 0x2b1   :  { %6146 = vmatpush3.bf16.msra.mxu1 %v6369_v23  ;;  %6125 = vmatprep.subr.bf16.mxu0 %v6370_v26  ;;  %v6395_v23 = vld [vmem:[#allocation8 + $0x3d8] sm:$0xff]  }
 0x2b2   :  { %v3687_v56 = vpop.f32.mrb[8].mxu0  ;;  %6147 = vmatprep.subr.bf16.mxu1 %v6371_v27  ;;  %v3773_v28 = vpop.f32.mrb[8].mxu1  ;;  %v6396_v26 = vld [vmem:[#allocation8 + $0x318] sm:$0xff]  }
 0x2b3   :  { %v6219_v45 = vadd.f32 %v3687_v56, %v641_v29  ;;  %v3689_v46 = vpop.f32.mrb[9].mxu0  ;;  %v6223_v4 = vadd.f32 %v3773_v28, %v649_v33  ;;  %v3775_v47 = vpop.f32.mrb[9].mxu1  ;;  %v6397_v27 = vld [vmem:[#allocation8 + $0x398] sm:$0xff]   ;;  %v6405_v56 = vld [vmem:[#allocation8 + $0x3a8] sm:$0xff]   ;;  %v6408_v28 = vld [vmem:[#allocation8 + $0x330] sm:$0xff]  }
 0x2b4   :  { %v6220_v62 = vadd.f32 %v3689_v46, %v645_v36  ;;  %v3691_v2 = vpop.f32.mrb[10].mxu0  ;;  %6126 = vmatpush3.bf16.msra.mxu0 %v6372_v37  ;;  %v6224_v48 = vadd.f32 %v3775_v47, %v653_v41  ;;  %v3777_v49 = vpop.f32.mrb[10].mxu1  ;;  %v6401_v37 = vld [vmem:[#allocation8 + $0x3a0] sm:$0xff]   ;;  %v6409_v46 = vld [vmem:[#allocation8 + $0x3b0] sm:$0xff]   ;;  %v6412_v47 = vld [vmem:[#allocation8 + $0x338] sm:$0xff]  }
 0x2b5   :  { %v6221_v40 = vadd.f32 %v3691_v2, %v641_v29  ;;  %6148 = vmatpush3.bf16.msra.mxu1 %v6373_v42  ;;  %v3693_v7 = vpop.f32.mrb[11].mxu0  ;;  %6127 = vmatprep.subr.bf16.mxu0 %v6374_v43  ;;  %v6225_v50 = vadd.f32 %v3777_v49, %v649_v33  ;;  %v3779_v52 = vpop.f32.mrb[11].mxu1  ;;  %v3962_v38 = vmax.f32 %v6219_v45, 0.0  ;;  %v3964_v58 = vmax.f32 %v6223_v4, 0.0  ;;  %v6398_v29 = vld [vmem:[#allocation8 + $0x360] sm:$0xff]   ;;  %v6403_v42 = vld [vmem:[#allocation8 + $0x3e8] sm:$0xff]  }
 0x2b6   :  { %v6222_v51 = vadd.f32 %v3693_v7, %v645_v36  ;;  %6149 = vmatprep.subr.bf16.mxu1 %v6375_v63  ;;  %v6226_v55 = vadd.f32 %v3779_v52, %v653_v41  ;;  %v3963_v59 = vmax.f32 %v6220_v62, 0.0  ;;  %v3965_v61 = vmax.f32 %v6224_v48, 0.0  ;;  %v6399_v33 = vld [vmem:[#allocation8 + $0x3e0] sm:$0xff]   ;;  %v6402_v41 = vld [vmem:[#allocation8 + $0x368] sm:$0xff]   ;;  %v6406_v63 = vld [vmem:[#allocation8 + $0x370] sm:$0xff]  }
 0x2b7   :  { %v3978_v54 = vmax.f32 %v6221_v40, 0.0  ;;  %v3980_v32 = vmax.f32 %v6225_v50, 0.0  ;;  %v6400_v36 = vld [vmem:[#allocation8 + $0x320] sm:$0xff]   ;;  %v6404_v43 = vld [vmem:[#allocation8 + $0x328] sm:$0xff]   ;;  %v6407_v45 = vld [vmem:[#allocation8 + $0x3f0] sm:$0xff]   ;;  %v665_v48 = vrot.slane %v6754_v22, %v632_v30  ;;  %v661_v40 = vrot.slane %v6754_v22, %v628_v31 }
 0x2b8   :  { %v3979_v3 = vmax.f32 %v6222_v51, 0.0  ;;  %6128 = vmatpush3.bf16.msra.mxu0 %v6376_v5  ;;  %v3981_v1 = vmax.f32 %v6226_v55, 0.0  ;;  %v6410_v4 = vld [vmem:[#allocation8 + $0x378] sm:$0xff]   ;;  %v657_v5 = vrot.slane %v6754_v22, %v624_v24  ;;  %v669_v49 = vrot.slane %v6754_v22, %v636_v34 }
 0x2b9   :  { %v3994_v0 = vpack.c.bf16 %v3978_v54, %v3962_v38  ;;  %6150 = vmatpush3.bf16.msra.mxu1 %v6377_v25  ;;  %6129 = vmatprep.subr.bf16.mxu0 %v6378_v44  ;;  %v3996_v9 = vpack.c.bf16 %v3980_v32, %v3964_v58  ;;  %v6411_v62 = vld [vmem:[#allocation8 + $0x3f8] sm:$0xff]  }
 0x2ba   :  { %v3995_v6 = vpack.c.bf16 %v3979_v3, %v3963_v59  ;;  %6151 = vmatprep.subr.bf16.mxu1 %v6379_v53  ;;  %v3997_v11 = vpack.c.bf16 %v3981_v1, %v3965_v61  ;;  %v6413_v2 = vld [vmem:[#allocation8 + $0x3b8] sm:$0xff]  }
 0x2bc   :  { %6130 = vmatpush3.bf16.msra.mxu0 %v6380_v60  ;;  %5229 = vmatprep.mubr.bf16.mxu0 %v3995_v6 }
 0x2bd   :  { %6152 = vmatpush3.bf16.msra.mxu1 %v6381_v8  ;;  %5270 = vmatprep.mubr.bf16.mxu1 %v3997_v11 }
 0x2be   :  { %6159 = vmatprep.subr.bf16.mxu0 %v6382_v10  ;;  %6181 = vmatprep.subr.bf16.mxu1 %v6383_v12 }
 0x2bf   :  { %5230 = vmatmul.mubr.bf16.vlgmr.msra.gmra.mrb[24].mxu0 %v3994_v0 }
 0x2c0   :  { %5271 = vmatmul.mubr.bf16.vlgmr.msra.gmra.mrb[24].mxu1 %v3996_v9  ;;  %6160 = vmatpush3.bf16.msra.mxu0 %v6384_v13  ;;  %v5898_v13 = vld [vmem:[#allocation10] ss:$0 sm:$0xff] }
 0x2c1   :  { %6182 = vmatpush3.bf16.msra.mxu1 %v6385_v14  ;;  %6161 = vmatprep.subr.bf16.mxu0 %v6386_v15 }
 0x2c2   :  { %6183 = vmatprep.subr.bf16.mxu1 %v6387_v16 }
 0x2c4   :  { %6162 = vmatpush3.bf16.msra.mxu0 %v6388_v17 }
 0x2c5   :  { %6184 = vmatpush3.bf16.msra.mxu1 %v6389_v18  ;;  %6163 = vmatprep.subr.bf16.mxu0 %v6390_v35 }
 0x2c6   :  { %6185 = vmatprep.subr.bf16.mxu1 %v6391_v39 }
 0x2c8   :  { %6164 = vmatpush3.bf16.msra.mxu0 %v6392_v19 }
 0x2c9   :  { %6186 = vmatpush3.bf16.msra.mxu1 %v6393_v20  ;;  %6165 = vmatprep.subr.bf16.mxu0 %v6394_v21 }
 0x2ca   :  { %6187 = vmatprep.subr.bf16.mxu1 %v6395_v23 }
 0x2cc   :  { %6166 = vmatpush3.bf16.msra.mxu0 %v6396_v26 }
 0x2cd   :  { %6188 = vmatpush3.bf16.msra.mxu1 %v6397_v27  ;;  %6167 = vmatprep.subr.bf16.mxu0 %v6398_v29 }
 0x2ce   :  { %6189 = vmatprep.subr.bf16.mxu1 %v6399_v33 }
 0x2d0   :  { %6168 = vmatpush3.bf16.msra.mxu0 %v6400_v36 }
 0x2d1   :  { %6190 = vmatpush3.bf16.msra.mxu1 %v6401_v37  ;;  %6169 = vmatprep.subr.bf16.mxu0 %v6402_v41 }
 0x2d2   :  { %6191 = vmatprep.subr.bf16.mxu1 %v6403_v42 }
 0x2d4   :  { %6170 = vmatpush3.bf16.msra.mxu0 %v6404_v43 }
 0x2d5   :  { %6192 = vmatpush3.bf16.msra.mxu1 %v6405_v56  ;;  %6171 = vmatprep.subr.bf16.mxu0 %v6406_v63 }
 0x2d6   :  { %6193 = vmatprep.subr.bf16.mxu1 %v6407_v45 }
 0x2d8   :  { %6172 = vmatpush3.bf16.msra.mxu0 %v6408_v28 }
 0x2d9   :  { %6194 = vmatpush3.bf16.msra.mxu1 %v6409_v46  ;;  %6173 = vmatprep.subr.bf16.mxu0 %v6410_v4 }
 0x2da   :  { %6195 = vmatprep.subr.bf16.mxu1 %v6411_v62 }
 0x2dc   :  { %6174 = vmatpush3.bf16.msra.mxu0 %v6412_v47 }
 0x2dd   :  { %6196 = vmatpush3.bf16.msra.mxu1 %v6413_v2 }
 0x332   :  { %v3859_v7 = vpop.f32.mrb[12].mxu0  ;;  %v3945_v44 = vpop.f32.mrb[12].mxu1 }
 0x333   :  { %v6227_v25 = vadd.f32 %v3859_v7, %v657_v5  ;;  %v3861_v50 = vpop.f32.mrb[13].mxu0  ;;  %v6231_v51 = vadd.f32 %v3945_v44, %v665_v48  ;;  %v3947_v53 = vpop.f32.mrb[13].mxu1 }
 0x334   :  { %v6228_v52 = vadd.f32 %v3861_v50, %v661_v40  ;;  %v3863_v24 = vpop.f32.mrb[14].mxu0  ;;  %v6232_v38 = vadd.f32 %v3947_v53, %v669_v49  ;;  %v3949_v55 = vpop.f32.mrb[14].mxu1 }
 0x335   :  { %v6229_v54 = vadd.f32 %v3863_v24, %v657_v5  ;;  %v3865_v30 = vpop.f32.mrb[15].mxu0  ;;  %v6233_v58 = vadd.f32 %v3949_v55, %v665_v48  ;;  %v3951_v32 = vpop.f32.mrb[15].mxu1  ;;  %v3966_v31 = vmax.f32 %v6227_v25, 0.0  ;;  %v3968_v60 = vmax.f32 %v6231_v51, 0.0 }
 0x336   :  { %v6230_v59 = vadd.f32 %v3865_v30, %v661_v40  ;;  %v6234_v57 = vadd.f32 %v3951_v32, %v669_v49  ;;  %v3967_v34 = vmax.f32 %v6228_v52, 0.0  ;;  %v3969_v0 = vmax.f32 %v6232_v38, 0.0 }
 0x337   :  { %v3982_v3 = vmax.f32 %v6229_v54, 0.0  ;;  %v3984_v22 = vmax.f32 %v6233_v58, 0.0 }
 0x338   :  { %v3983_v61 = vmax.f32 %v6230_v59, 0.0  ;;  %v3985_v8 = vmax.f32 %v6234_v57, 0.0 }
 0x339   :  { %v3998_v1 = vpack.c.bf16 %v3982_v3, %v3966_v31  ;;  %v4000_v9 = vpack.c.bf16 %v3984_v22, %v3968_v60 }
 0x33a   :  { %v3999_v6 = vpack.c.bf16 %v3983_v61, %v3967_v34  ;;  %v4001_v10 = vpack.c.bf16 %v3985_v8, %v3969_v0 }
 0x33c   :  { %5311 = vmatprep.mubr.bf16.mxu0 %v3999_v6  ;;  %5352 = vmatprep.mubr.bf16.mxu1 %v4001_v10 }
 0x33d   :  { %5312 = vmatmul.mubr.bf16.vlgmr.msra.gmra.mrb[28].mxu0 %v3998_v1  ;;  %5353 = vmatmul.mubr.bf16.vlgmr.msra.gmra.mrb[28].mxu1 %v4000_v9 }
 0x352   :  { %v6043_v12 = vpop.f32.mrb[16].mxu0 }
 0x353   :  { %v6065_v11 = vpop.f32.mrb[16].mxu1  ;;  %v6044_v14 = vpop.f32.mrb[17].mxu0 }
 0x354   :  { %v6045_v15 = vadd.f32 %v6044_v14, %v6043_v12  ;;  %v6066_v16 = vpop.f32.mrb[17].mxu1  ;;  %v6046_v17 = vpop.f32.mrb[18].mxu0 }
 0x355   :  { %v6067_v18 = vadd.f32 %v6066_v16, %v6065_v11  ;;  %v6068_v35 = vpop.f32.mrb[18].mxu1  ;;  %v6047_v39 = vpop.f32.mrb[19].mxu0 }
 0x356   :  { %v5068_v19 = vadd.f32 %v6045_v15, %v5898_v13  ;;  %v6048_v20 = vadd.f32 %v6047_v39, %v6046_v17  ;;  %v6069_v21 = vpop.f32.mrb[19].mxu1 }
 0x357   :  { %v6070_v23 = vadd.f32 %v6069_v21, %v6068_v35 }
 0x358   :  { %v5109_v26 = vadd.f32 %v6067_v18, %v5068_v19  ;;  %v5071_v27 = vadd.f32 %v6048_v20, %v5898_v13 }
 0x35a   :  { %v5112_v29 = vadd.f32 %v6070_v23, %v5071_v27 }
 0x372   :  { %v6087_v33 = vpop.f32.mrb[20].mxu0 }
 0x373   :  { %v6109_v36 = vpop.f32.mrb[20].mxu1  ;;  %v6088_v37 = vpop.f32.mrb[21].mxu0 }
 0x374   :  { %v6089_v41 = vadd.f32 %v6088_v37, %v6087_v33  ;;  %v6110_v42 = vpop.f32.mrb[21].mxu1  ;;  %v6090_v43 = vpop.f32.mrb[22].mxu0 }
 0x375   :  { %v6111_v56 = vadd.f32 %v6110_v42, %v6109_v36  ;;  %v6112_v63 = vpop.f32.mrb[22].mxu1  ;;  %v6091_v45 = vpop.f32.mrb[23].mxu0 }
 0x376   :  { %v5150_v28 = vadd.f32 %v6089_v41, %v5109_v26  ;;  %v6092_v46 = vadd.f32 %v6091_v45, %v6090_v43  ;;  %v6113_v4 = vpop.f32.mrb[23].mxu1 }
 0x377   :  { %v6114_v62 = vadd.f32 %v6113_v4, %v6112_v63 }
 0x378   :  { %v5191_v47 = vadd.f32 %v6111_v56, %v5150_v28  ;;  %v5153_v2 = vadd.f32 %v6092_v46, %v5112_v29 }
 0x37a   :  { %v5194_v5 = vadd.f32 %v6114_v62, %v5153_v2 }
 0x392   :  { %v6131_v48 = vpop.f32.mrb[24].mxu0 }
 0x393   :  { %v6153_v40 = vpop.f32.mrb[24].mxu1  ;;  %v6132_v49 = vpop.f32.mrb[25].mxu0 }
 0x394   :  { %v6133_v7 = vadd.f32 %v6132_v49, %v6131_v48  ;;  %v6154_v25 = vpop.f32.mrb[25].mxu1  ;;  %v6134_v44 = vpop.f32.mrb[26].mxu0 }
 0x395   :  { %v6155_v50 = vadd.f32 %v6154_v25, %v6153_v40  ;;  %v6156_v51 = vpop.f32.mrb[26].mxu1  ;;  %v6135_v52 = vpop.f32.mrb[27].mxu0 }
 0x396   :  { %v5232_v53 = vadd.f32 %v6133_v7, %v5191_v47  ;;  %v6136_v24 = vadd.f32 %v6135_v52, %v6134_v44  ;;  %v6157_v38 = vpop.f32.mrb[27].mxu1 }
 0x397   :  { %v6158_v54 = vadd.f32 %v6157_v38, %v6156_v51 }
 0x398   :  { %v5273_v55 = vadd.f32 %v6155_v50, %v5232_v53  ;;  %v5235_v30 = vadd.f32 %v6136_v24, %v5194_v5 }
 0x39a   :  { %v5276_v58 = vadd.f32 %v6158_v54, %v5235_v30 }
 0x410   :  { %v6175_v59 = vpop.f32.mrb[28].mxu0  ;;  %v6197_v32 = vpop.f32.mrb[28].mxu1 }
 0x411   :  { %v6176_v31 = vpop.f32.mrb[29].mxu0  ;;  %v6198_v57 = vpop.f32.mrb[29].mxu1 }
 0x412   :  { %v6177_v3 = vadd.f32 %v6176_v31, %v6175_v59  ;;  %v6178_v60 = vpop.f32.mrb[30].mxu0  ;;  %v6199_v34 = vadd.f32 %v6198_v57, %v6197_v32  ;;  %v6200_v22 = vpop.f32.mrb[30].mxu1 }
 0x413   :  { %v6179_v61 = vpop.f32.mrb[31].mxu0  ;;  %v6201_v8 = vpop.f32.mrb[31].mxu1 }
 0x414   :  { %v5314_v0 = vadd.f32 %v6177_v3, %v5273_v55  ;;  %v6180_v1 = vadd.f32 %v6179_v61, %v6178_v60  ;;  %v6202_v9 = vadd.f32 %v6201_v8, %v6200_v22 }
 0x416   :  { %v5355_v6 = vadd.f32 %v6199_v34, %v5314_v0  ;;  %v5317_v10 = vadd.f32 %v6180_v1, %v5276_v58 }
 0x418   :  { %5361 = vst [vmem:[#allocation11] sm:$0xff] %v5355_v6  ;;  %v5358_v12 = vadd.f32 %v6202_v9, %v5317_v10 }
 0x41a   :  { %5362 = vst [vmem:[#allocation11 + $0x8] sm:$0xff] %v5358_v12 }
 0x41b   :  { %6542 = shalt.err (!%p6539_p2)
}
 0x41c   :  { %s6543_s7 = scalar_lea.hbm %s6797_s5, 256 }
 0x41d   :  { %p6544_p3 = scmp.ne.s32.totalorder %s6797_s5, %s6543_s7  ;;  %p6547_p4 = scmp.lt.u32.totalorder %s6543_s7, %s6797_s5 }
 0x41f   :  { %p6549_p5 = pnand %p6547_p4, %p6544_p3 }
 0x421   :  { %6552 = shalt.err (!%p6549_p5)
}
 0x422   :  { %s6572_s12 = smov 128   ;;  %s6573_s13 = smov 8  }
 0x423   :  { %5374 = dma.vmem_to_hbm [thread:$0]  %s5369_s3, 256, %s6797_s5, [#allocation4], %s6572_s12, %s6572_s12, %s6573_s13  }
 0x424   :  { %6559 = dma.done.wait [#allocation4], 256  }
 0x425   :  { %6560 = vsyncadd [#allocation4], 4294967040 }
 0x426   :  { %5378 = vsyncpa [#allocation3], 1 }
 0x427   :  { %5379 = vsyncpa [#allocation6], 1 }
 0x428   :  { %5380 = vsyncpa [#allocation9], 1 }
 0x429   :  { %5381 = vsyncpa [#allocation4], 1 }

</bundles_post_ra>
